<compile_context>
chip_gen: v7x
topology: tpu7x:2x2x1
jax: 0.10.0
libtpu: 0.0.40
codegen_flags: <defaults>
</compile_context>

<pallas_src>
import functools

import jax
import jax.numpy as jnp
from jax.experimental import pallas as pl
from jax.experimental.pallas import tpu as pltpu


# Contract dim 0 of both operands (lhs^T @ rhs without building a transpose).
_TN_DIMS = (((0,), (0,)), ((), ()))


def _fused_kernel(x_ref, src_ref,
                  wq_ref, bq_ref, wk_ref, bk_ref, wv_ref, bv_ref,
                  wmt_ref, bm_ref, w1x_ref, w1m_ref, b1_ref, w2_ref, b2_ref,
                  o_ref,
                  k_sc, v_sc, q_sc, attn_sc, h1_sc, sum_sc, ssq_sc,
                  *, num_heads, head_dim, q_tile, n_total):
    phase = pl.program_id(1)     # 0: attention + h1 + stats; 1: norm + ReLU + w2
    nt = pl.program_id(2)        # query-tile index
    bf16, f32 = jnp.bfloat16, jnp.float32

    # ---- per-batch init: K/V projections of the full source + zeroed stats ----
    # Valid because the phase/tile axes are "arbitrary" (sequential per batch on
    # one core) and the init runs again for every batch / core.
    @pl.when(jnp.logical_and(phase == 0, nt == 0))
    def _():
        src = src_ref[0]                                                   # (D, M) bf16
        k = jnp.dot(wk_ref[...], src, preferred_element_type=f32) + bk_ref[...]
        v = jnp.dot(wv_ref[...], src, preferred_element_type=f32) + bv_ref[...]
        k_sc[...] = k.astype(bf16)
        v_sc[...] = v.astype(bf16)
        sum_sc[...] = jnp.zeros_like(sum_sc)
        ssq_sc[...] = jnp.zeros_like(ssq_sc)

    # ---- phase 0: attention + merge + first MLP conv + InstanceNorm stats -----
    @pl.when(phase == 0)
    def _():
        x = x_ref[0]                                                       # (D, TN) bf16
        # Q projection; 1/sqrt(head_dim) is folded into wq/bq by the wrapper.
        q = jnp.dot(wq_ref[...], x, preferred_element_type=f32) + bq_ref[...]
        q_sc[...] = q.astype(bf16)

        # Per-head attention.  Scores are (M, TN) so per-query stats are (1, TN)
        # lane-broadcasts (no transposes); normalization happens after PV.
        def head_body(h, carry):
            off = pl.multiple_of(h * head_dim, head_dim)
            qh = q_sc[pl.ds(off, head_dim), :]                             # (hd, TN)
            kh = k_sc[pl.ds(off, head_dim), :]                             # (hd, M)
            vh = v_sc[pl.ds(off, head_dim), :]                             # (hd, M)
            s = jax.lax.dot_general(kh, qh, _TN_DIMS,
                                    preferred_element_type=f32)            # (M, TN)
            s = s - jnp.max(s, axis=0, keepdims=True)
            e = jnp.exp(s)
            inv = pl.reciprocal(jnp.sum(e, axis=0, keepdims=True), approx=True)
            oh = jnp.dot(vh, e.astype(bf16), preferred_element_type=f32)   # (hd, TN)
            attn_sc[pl.ds(off, head_dim), :] = (oh * inv).astype(bf16)
            return carry

        jax.lax.fori_loop(0, num_heads, head_body, 0, unroll=True)

        # Single merge conv with a full K=D contraction (heads are contiguous
        # sublane slices of attn_sc; output channels back in original order).
        message = (jax.lax.dot_general(wmt_ref[...], attn_sc[...], _TN_DIMS,
                                       preferred_element_type=f32)
                   + bm_ref[...])                                          # (D, TN) f32

        # First MLP conv on concat([x, message]) without materializing the concat.
        h1 = (jnp.dot(w1x_ref[...], x, preferred_element_type=f32)
              + jnp.dot(w1m_ref[...], message.astype(bf16),
                        preferred_element_type=f32)
              + b1_ref[...])                                               # (2D, TN) f32

        # InstanceNorm statistics over the FULL sequence, accumulated in f32
        # from the pre-cast values.
        sum_sc[...] += jnp.sum(h1, axis=-1, keepdims=True)
        ssq_sc[...] += jnp.sum(h1 * h1, axis=-1, keepdims=True)

        # Stash h1 as bf16 in VMEM; it never round-trips through HBM.
        col = pl.multiple_of(nt * q_tile, q_tile)
        h1_sc[:, pl.ds(col, q_tile)] = h1.astype(bf16)

    # ---- phase 1: InstanceNorm (full-sequence stats) + ReLU + final conv ------
    @pl.when(phase == 1)
    def _():
        col = pl.multiple_of(nt * q_tile, q_tile)
        h1 = h1_sc[:, pl.ds(col, q_tile)].astype(f32)                      # (2D, TN)
        inv_n = 1.0 / n_total
        mean = sum_sc[...] * inv_n                                         # (2D, 1)
        var = jnp.maximum(ssq_sc[...] * inv_n - mean * mean, 0.0)          # clamp >= 0
        hn = (h1 - mean) * jax.lax.rsqrt(var + 1e-5)
        hr = jnp.maximum(hn, 0.0).astype(bf16)
        o_ref[0] = (jnp.dot(w2_ref[...], hr, preferred_element_type=f32)
                    + b2_ref[...])


def attentional_propagation(x_ncl, source_ncl, params, num_heads):
    """x_ncl: (B, D, N), source_ncl: (B, D, M) -- PyTorch NCL layout in & out."""
    B, D, N = x_ncl.shape
    M = source_ncl.shape[2]
    H = num_heads
    hd = D // H
    assert D % H == 0

    # Query tile capped at 256 (keeps per-head (M, TN) f32 softmax temporaries
    # small); falls back to the full N if nothing divides evenly.
    q_tile = N
    for cand in (256, 128):
        if N > cand and N % cand == 0:
            q_tile = cand
            break
    assert N % q_tile == 0
    n_tiles = N // q_tile

    f32, bf16 = jnp.float32, jnp.bfloat16
    x = x_ncl.astype(bf16)
    src = source_ncl.astype(bf16)

    # PyTorch .view(B, hd, H, L) maps channel c -> (d=c//H, h=c%H).  Permute so
    # that head h occupies contiguous channels [h*hd, (h+1)*hd).
    perm = jnp.arange(D).reshape(hd, H).T.reshape(-1)   # perm[h*hd+d] = d*H + h
    scale = 1.0 / (hd ** 0.5)

    wq_t = (params["wq"][perm, :] * scale).astype(bf16)            # (D, D)
    bq_t = (params["bq"][perm] * scale).astype(f32).reshape(D, 1)
    wk_t = params["wk"][perm, :].astype(bf16)
    bk_t = params["bk"][perm].astype(f32).reshape(D, 1)
    wv_t = params["wv"][perm, :].astype(bf16)
    bv_t = params["bv"][perm].astype(f32).reshape(D, 1)
    wm_tt = params["wm"][:, perm].T.astype(bf16)                   # (D_in_perm, D_out)
    bm_t = params["bm"].astype(f32).reshape(D, 1)
    w1x_t = params["w1"][:, :D].astype(bf16)                       # (2D, D) -- x part
    w1m_t = params["w1"][:, D:].astype(bf16)                       # (2D, D) -- message part
    b1_t = params["b1"].astype(f32).reshape(2 * D, 1)
    w2_t = params["w2"].astype(bf16)                               # (D, 2D)
    b2_t = params["b2"].astype(f32).reshape(D, 1)

    idx_w = lambda b, p, t: (0, 0)
    kernel = functools.partial(_fused_kernel, num_heads=H, head_dim=hd,
                               q_tile=q_tile, n_total=N)

    out = pl.pallas_call(
        kernel,
        grid=(B, 2, n_tiles),
        in_specs=[
            # x tile; parked on tile 0 during phase 1 (it is not read there).
            pl.BlockSpec((1, D, q_tile), lambda b, p, t: (b, 0, t * (1 - p))),
            pl.BlockSpec((1, D, M), lambda b, p, t: (b, 0, 0)),             # full source
            pl.BlockSpec((D, D), idx_w), pl.BlockSpec((D, 1), idx_w),       # wq, bq
            pl.BlockSpec((D, D), idx_w), pl.BlockSpec((D, 1), idx_w),       # wk, bk
            pl.BlockSpec((D, D), idx_w), pl.BlockSpec((D, 1), idx_w),       # wv, bv
            pl.BlockSpec((D, D), idx_w), pl.BlockSpec((D, 1), idx_w),       # wm^T, bm
            pl.BlockSpec((2 * D, D), idx_w), pl.BlockSpec((2 * D, D), idx_w),  # w1x, w1m
            pl.BlockSpec((2 * D, 1), idx_w),                                 # b1
            pl.BlockSpec((D, 2 * D), idx_w), pl.BlockSpec((D, 1), idx_w),    # w2, b2
        ],
        # Output only written in phase 1; during phase 0 the block index is
        # parked on tile 0 so no intermediate write-back ever happens and every
        # copied-out block was written by the kernel.
        out_specs=pl.BlockSpec((1, D, q_tile), lambda b, p, t: (b, 0, t * p)),
        out_shape=jax.ShapeDtypeStruct((B, D, N), jnp.float32),
        scratch_shapes=[
            pltpu.VMEM((D, M), bf16),            # K cache (per batch)
            pltpu.VMEM((D, M), bf16),            # V cache (per batch)
            pltpu.VMEM((D, q_tile), bf16),       # Q tile (head-sliced in the loop)
            pltpu.VMEM((D, q_tile), bf16),       # per-tile attention output (all heads)
            pltpu.VMEM((2 * D, N), bf16),        # h1 for the whole sequence (no HBM trip)
            pltpu.VMEM((2 * D, 1), f32),         # InstanceNorm sum
            pltpu.VMEM((2 * D, 1), f32),         # InstanceNorm sum of squares
        ],
        compiler_params=pltpu.CompilerParams(
            dimension_semantics=("parallel", "arbitrary", "arbitrary"),
            vmem_limit_bytes=48 * 1024 * 1024),
    )(x, src, wq_t, bq_t, wk_t, bk_t, wv_t, bv_t, wm_tt, bm_t,
      w1x_t, w1m_t, b1_t, w2_t, b2_t)

    return out  # (B, D, N) -- PyTorch layout


def _reference(x_ncl, source_ncl, params, num_heads):
    """Pure-JAX f32 reference replicating the PyTorch forward exactly."""
    B, D, N = x_ncl.shape
    hd = D // num_heads

    def conv1x1(x, w, b):  # x: (B, C_in, L), w: (C_out, C_in)
        return jnp.einsum("oc,bcl->bol", w, x) + b[None, :, None]

    q = conv1x1(x_ncl, params["wq"], params["bq"]).reshape(B, hd, num_heads, N)
    k = conv1x1(source_ncl, params["wk"], params["bk"]).reshape(B, hd, num_heads, -1)
    v = conv1x1(source_ncl, params["wv"], params["bv"]).reshape(B, hd, num_heads, -1)

    scores = jnp.einsum("bdhn,bdhm->bhnm", q, k) / (hd ** 0.5)
    scores = scores - jnp.max(scores, axis=-1, keepdims=True)
    e = jnp.exp(scores)
    prob = e / jnp.sum(e, axis=-1, keepdims=True)
    attn = jnp.einsum("bhnm,bdhm->bdhn", prob, v).reshape(B, D, N)
    message = conv1x1(attn, params["wm"], params["bm"])

    cat = jnp.concatenate([x_ncl, message], axis=1)
    h1 = conv1x1(cat, params["w1"], params["b1"])
    mean = jnp.mean(h1, axis=2, keepdims=True)
    var = jnp.mean((h1 - mean) ** 2, axis=2, keepdims=True)
    hn = (h1 - mean) * jax.lax.rsqrt(var + 1e-5)
    hr = jnp.maximum(hn, 0.0)
    return conv1x1(hr, params["w2"], params["b2"])


def init_params(key, feature_dim):
    D = feature_dim
    ks = jax.random.split(key, 12)
    n = lambda k, s: (0.1 * jax.random.normal(k, s)).astype(jnp.float32)
    return {
        "wq": n(ks[0], (D, D)), "bq": n(ks[1], (D,)),
        "wk": n(ks[2], (D, D)), "bk": n(ks[3], (D,)),
        "wv": n(ks[4], (D, D)), "bv": n(ks[5], (D,)),
        "wm": n(ks[6], (D, D)), "bm": n(ks[7], (D,)),
        "w1": n(ks[8], (2 * D, 2 * D)), "b1": n(ks[9], (2 * D,)),
        "w2": n(ks[10], (D, 2 * D)),
        "b2": jnp.zeros((D,), jnp.float32),  # nn.init.constant_(mlp[-1].bias, 0.0)
    }


if __name__ == "__main__":
    # Small lane-friendly test: D multiple of 128, N split into two 128-tiles so
    # the multi-tile stat accumulation and phase structure are exercised.
    feature_dim, num_heads = 128, 4
    B, N, M = 2, 256, 256

    key = jax.random.PRNGKey(0)
    kx, ks, kp = jax.random.split(key, 3)
    x = jax.random.normal(kx, (B, feature_dim, N), dtype=jnp.float32)       # (B, D, N)
    source = jax.random.normal(ks, (B, feature_dim, M), dtype=jnp.float32)  # (B, D, M)
    params = init_params(kp, feature_dim)

    out = attentional_propagation(x, source, params, num_heads)
    out = jax.block_until_ready(out)

    ref = jax.block_until_ready(_reference(x, source, params, num_heads))
    assert out.shape == (B, feature_dim, N)
    # bf16 MXU operands + bf16 VMEM-resident h1 vs. the all-f32 reference.
    max_err = float(jnp.max(jnp.abs(out - ref)))
    assert jnp.allclose(out, ref, rtol=6e-2, atol=6e-2), max_err

    print("KERNEL_OK")
</pallas_src>

<mosaic_0001>
module attributes {stable_mosaic.version = 11 : i64} {
  func.func @_fused_kernel(%arg0: i32, %arg1: i32, %arg2: i32, %arg3: memref<1x128x128xbf16, #tpu.memory_space<vmem>>, %arg4: memref<1x128x256xbf16, #tpu.memory_space<vmem>>, %arg5: memref<128x128xbf16, #tpu.memory_space<vmem>>, %arg6: memref<128x1xf32, #tpu.memory_space<vmem>>, %arg7: memref<128x128xbf16, #tpu.memory_space<vmem>>, %arg8: memref<128x1xf32, #tpu.memory_space<vmem>>, %arg9: memref<128x128xbf16, #tpu.memory_space<vmem>>, %arg10: memref<128x1xf32, #tpu.memory_space<vmem>>, %arg11: memref<128x128xbf16, #tpu.memory_space<vmem>>, %arg12: memref<128x1xf32, #tpu.memory_space<vmem>>, %arg13: memref<256x128xbf16, #tpu.memory_space<vmem>>, %arg14: memref<256x128xbf16, #tpu.memory_space<vmem>>, %arg15: memref<256x1xf32, #tpu.memory_space<vmem>>, %arg16: memref<128x256xbf16, #tpu.memory_space<vmem>>, %arg17: memref<128x1xf32, #tpu.memory_space<vmem>>, %arg18: memref<1x128x128xf32, #tpu.memory_space<vmem>>, %arg19: memref<128x256xbf16, #tpu.memory_space<vmem>>, %arg20: memref<128x256xbf16, #tpu.memory_space<vmem>>, %arg21: memref<128x128xbf16, #tpu.memory_space<vmem>>, %arg22: memref<128x128xbf16, #tpu.memory_space<vmem>>, %arg23: memref<256x256xbf16, #tpu.memory_space<vmem>>, %arg24: memref<256x1xf32, #tpu.memory_space<vmem>>, %arg25: memref<256x1xf32, #tpu.memory_space<vmem>>) attributes {dimension_semantics = [#tpu.dimension_semantics<parallel>, #tpu.dimension_semantics<arbitrary>, #tpu.dimension_semantics<arbitrary>], iteration_bounds = array<i64: 2, 2, 2>, scalar_prefetch = 0 : i64, scratch_operands = 7 : i64, tpu.core_type = #tpu.core_type<tc>, window_params = [{transform_indices = @transform_0, window_bounds = array<i64: 1, 128, 128>}, {transform_indices = @transform_1, window_bounds = array<i64: 1, 128, 256>}, {pipeline_mode = #tpu.pipeline_mode<synchronous>, transform_indices = @transform_2, window_bounds = array<i64: 128, 128>}, {pipeline_mode = #tpu.pipeline_mode<synchronous>, transform_indices = @transform_3, window_bounds = array<i64: 128, 1>}, {pipeline_mode = #tpu.pipeline_mode<synchronous>, transform_indices = @transform_4, window_bounds = array<i64: 128, 128>}, {pipeline_mode = #tpu.pipeline_mode<synchronous>, transform_indices = @transform_5, window_bounds = array<i64: 128, 1>}, {pipeline_mode = #tpu.pipeline_mode<synchronous>, transform_indices = @transform_6, window_bounds = array<i64: 128, 128>}, {pipeline_mode = #tpu.pipeline_mode<synchronous>, transform_indices = @transform_7, window_bounds = array<i64: 128, 1>}, {pipeline_mode = #tpu.pipeline_mode<synchronous>, transform_indices = @transform_8, window_bounds = array<i64: 128, 128>}, {pipeline_mode = #tpu.pipeline_mode<synchronous>, transform_indices = @transform_9, window_bounds = array<i64: 128, 1>}, {pipeline_mode = #tpu.pipeline_mode<synchronous>, transform_indices = @transform_10, window_bounds = array<i64: 256, 128>}, {pipeline_mode = #tpu.pipeline_mode<synchronous>, transform_indices = @transform_11, window_bounds = array<i64: 256, 128>}, {pipeline_mode = #tpu.pipeline_mode<synchronous>, transform_indices = @transform_12, window_bounds = array<i64: 256, 1>}, {pipeline_mode = #tpu.pipeline_mode<synchronous>, transform_indices = @transform_13, window_bounds = array<i64: 128, 256>}, {pipeline_mode = #tpu.pipeline_mode<synchronous>, transform_indices = @transform_14, window_bounds = array<i64: 128, 1>}, {transform_indices = @transform_15, window_bounds = array<i64: 1, 128, 128>}]} {
    %c0_i32 = arith.constant 0 : i32
    %0 = arith.cmpi eq, %arg1, %c0_i32 : i32
    %c0_i32_0 = arith.constant 0 : i32
    %1 = arith.cmpi eq, %arg2, %c0_i32_0 : i32
    %2 = arith.andi %0, %1 : i1
    %3 = arith.extui %2 : i1 to i32
    %c0_i32_1 = arith.constant 0 : i32
    %4 = arith.cmpi ne, %3, %c0_i32_1 : i32
    scf.if %4 {
      %c0 = arith.constant 0 : index
      %c0_5 = arith.constant 0 : index
      %c0_6 = arith.constant 0 : index
      %11 = vector.load %arg4[%c0, %c0_5, %c0_6] : memref<1x128x256xbf16, #tpu.memory_space<vmem>>, vector<1x128x256xbf16>
      %12 = vector.shape_cast %11 : vector<1x128x256xbf16> to vector<128x256xbf16>
      %c0_7 = arith.constant 0 : index
      %c0_8 = arith.constant 0 : index
      %13 = vector.load %arg7[%c0_7, %c0_8] : memref<128x128xbf16, #tpu.memory_space<vmem>>, vector<128x128xbf16>
      %cst = arith.constant dense<0.000000e+00> : vector<128x256xf32>
      %14 = tpu.matmul %13, %12, %cst {dimension_numbers = #tpu.dot_dimension_numbers<[1], [0], [0], [1], [0, 0, 1, 1], [], []>} : vector<128x128xbf16>, vector<128x256xbf16>, vector<128x256xf32> -> vector<128x256xf32>
      %c0_9 = arith.constant 0 : index
      %c0_10 = arith.constant 0 : index
      %15 = vector.load %arg8[%c0_9, %c0_10] : memref<128x1xf32, #tpu.memory_space<vmem>>, vector<128x1xf32>
      %16 = vector.broadcast %15 : vector<128x1xf32> to vector<128x256xf32>
      %17 = arith.addf %14, %16 : vector<128x256xf32>
      %c0_11 = arith.constant 0 : index
      %c0_12 = arith.constant 0 : index
      %18 = vector.load %arg9[%c0_11, %c0_12] : memref<128x128xbf16, #tpu.memory_space<vmem>>, vector<128x128xbf16>
      %cst_13 = arith.constant dense<0.000000e+00> : vector<128x256xf32>
      %19 = tpu.matmul %18, %12, %cst_13 {dimension_numbers = #tpu.dot_dimension_numbers<[1], [0], [0], [1], [0, 0, 1, 1], [], []>} : vector<128x128xbf16>, vector<128x256xbf16>, vector<128x256xf32> -> vector<128x256xf32>
      %c0_14 = arith.constant 0 : index
      %c0_15 = arith.constant 0 : index
      %20 = vector.load %arg10[%c0_14, %c0_15] : memref<128x1xf32, #tpu.memory_space<vmem>>, vector<128x1xf32>
      %21 = vector.broadcast %20 : vector<128x1xf32> to vector<128x256xf32>
      %22 = arith.addf %19, %21 : vector<128x256xf32>
      %23 = arith.truncf %17 : vector<128x256xf32> to vector<128x256xbf16>
      %c0_16 = arith.constant 0 : index
      %c0_17 = arith.constant 0 : index
      %24 = vector.load %arg19[%c0_16, %c0_17] : memref<128x256xbf16, #tpu.memory_space<vmem>>, vector<128x256xbf16>
      tpu.vector_store %arg19[%c0_16, %c0_17], %23 {strides = array<i32>} : memref<128x256xbf16, #tpu.memory_space<vmem>>, vector<128x256xbf16>,
      %25 = arith.truncf %22 : vector<128x256xf32> to vector<128x256xbf16>
      %c0_18 = arith.constant 0 : index
      %c0_19 = arith.constant 0 : index
      %26 = vector.load %arg20[%c0_18, %c0_19] : memref<128x256xbf16, #tpu.memory_space<vmem>>, vector<128x256xbf16>
      tpu.vector_store %arg20[%c0_18, %c0_19], %25 {strides = array<i32>} : memref<128x256xbf16, #tpu.memory_space<vmem>>, vector<128x256xbf16>,
      %cst_20 = arith.constant 0.000000e+00 : f32
      %27 = vector.broadcast %cst_20 : f32 to vector<256x1xf32>
      %c0_21 = arith.constant 0 : index
      %c0_22 = arith.constant 0 : index
      %28 = vector.load %arg24[%c0_21, %c0_22] : memref<256x1xf32, #tpu.memory_space<vmem>>, vector<256x1xf32>
      tpu.vector_store %arg24[%c0_21, %c0_22], %27 {strides = array<i32>} : memref<256x1xf32, #tpu.memory_space<vmem>>, vector<256x1xf32>,
      %cst_23 = arith.constant 0.000000e+00 : f32
      %29 = vector.broadcast %cst_23 : f32 to vector<256x1xf32>
      %c0_24 = arith.constant 0 : index
      %c0_25 = arith.constant 0 : index
      %30 = vector.load %arg25[%c0_24, %c0_25] : memref<256x1xf32, #tpu.memory_space<vmem>>, vector<256x1xf32>
      tpu.vector_store %arg25[%c0_24, %c0_25], %29 {strides = array<i32>} : memref<256x1xf32, #tpu.memory_space<vmem>>, vector<256x1xf32>,
    } else {
    }
    %c0_i32_2 = arith.constant 0 : i32
    %5 = arith.cmpi eq, %arg1, %c0_i32_2 : i32
    %6 = arith.extui %5 : i1 to i32
    %c0_i32_3 = arith.constant 0 : i32
    %7 = arith.cmpi ne, %6, %c0_i32_3 : i32
    scf.if %7 {
      %c0 = arith.constant 0 : index
      %c0_5 = arith.constant 0 : index
      %c0_6 = arith.constant 0 : index
      %11 = vector.load %arg3[%c0, %c0_5, %c0_6] : memref<1x128x128xbf16, #tpu.memory_space<vmem>>, vector<1x128x128xbf16>
      %12 = vector.shape_cast %11 : vector<1x128x128xbf16> to vector<128x128xbf16>
      %c0_7 = arith.constant 0 : index
      %c0_8 = arith.constant 0 : index
      %13 = vector.load %arg5[%c0_7, %c0_8] : memref<128x128xbf16, #tpu.memory_space<vmem>>, vector<128x128xbf16>
      %cst = arith.constant dense<0.000000e+00> : vector<128x128xf32>
      %14 = tpu.matmul %13, %12, %cst {dimension_numbers = #tpu.dot_dimension_numbers<[1], [0], [0], [1], [0, 0, 1, 1], [], []>} : vector<128x128xbf16>, vector<128x128xbf16>, vector<128x128xf32> -> vector<128x128xf32>
      %c0_9 = arith.constant 0 : index
      %c0_10 = arith.constant 0 : index
      %15 = vector.load %arg6[%c0_9, %c0_10] : memref<128x1xf32, #tpu.memory_space<vmem>>, vector<128x1xf32>
      %16 = vector.broadcast %15 : vector<128x1xf32> to vector<128x128xf32>
      %17 = arith.addf %14, %16 : vector<128x128xf32>
      %18 = arith.truncf %17 : vector<128x128xf32> to vector<128x128xbf16>
      %c0_11 = arith.constant 0 : index
      %c0_12 = arith.constant 0 : index
      %19 = vector.load %arg21[%c0_11, %c0_12] : memref<128x128xbf16, #tpu.memory_space<vmem>>, vector<128x128xbf16>
      tpu.vector_store %arg21[%c0_11, %c0_12], %18 {strides = array<i32>} : memref<128x128xbf16, #tpu.memory_space<vmem>>, vector<128x128xbf16>,
      %c0_i32_13 = arith.constant 0 : i32
      %c32_i32 = arith.constant 32 : i32
      %20 = arith.muli %c0_i32_13, %c32_i32 : i32
      %21 = tpu.assume_multiple %20, 32 : i32
      %22 = arith.index_cast %21 : i32 to index
      %c0_14 = arith.constant 0 : index
      %23 = vector.load %arg21[%22, %c0_14] : memref<128x128xbf16, #tpu.memory_space<vmem>>, vector<32x128xbf16>
      %24 = arith.index_cast %21 : i32 to index
      %c0_15 = arith.constant 0 : index
      %25 = vector.load %arg19[%24, %c0_15] : memref<128x256xbf16, #tpu.memory_space<vmem>>, vector<32x256xbf16>
      %26 = arith.index_cast %21 : i32 to index
      %c0_16 = arith.constant 0 : index
      %27 = vector.load %arg20[%26, %c0_16] : memref<128x256xbf16, #tpu.memory_space<vmem>>, vector<32x256xbf16>
      %cst_17 = arith.constant dense<0.000000e+00> : vector<256x128xf32>
      %28 = tpu.matmul %25, %23, %cst_17 {dimension_numbers = #tpu.dot_dimension_numbers<[0], [0], [1], [1], [0, 1, 1, 1], [], []>} : vector<32x256xbf16>, vector<32x128xbf16>, vector<256x128xf32> -> vector<256x128xf32>
      %cst_18 = arith.constant dense<0xFF800000> : vector<128xf32>
      %29 = vector.multi_reduction <maximumf>, %28, %cst_18 [0] : vector<256x128xf32> to vector<128xf32>
      %30 = vector.shape_cast %29 : vector<128xf32> to vector<1x128xf32>
      %31 = vector.broadcast %30 : vector<1x128xf32> to vector<256x128xf32>
      %32 = arith.subf %28, %31 : vector<256x128xf32>
      %33 = math.exp %32 : vector<256x128xf32>
      %cst_19 = arith.constant dense<0.000000e+00> : vector<128xf32>
      %34 = vector.multi_reduction <add>, %33, %cst_19 [0] : vector<256x128xf32> to vector<128xf32>
      %35 = vector.shape_cast %34 : vector<128xf32> to vector<1x128xf32>
      %36 = tpu.reciprocal %35 {approx = true} : vector<1x128xf32> -> vector<1x128xf32>
      %37 = arith.truncf %33 : vector<256x128xf32> to vector<256x128xbf16>
      %cst_20 = arith.constant dense<0.000000e+00> : vector<32x128xf32>
      %38 = tpu.matmul %27, %37, %cst_20 {dimension_numbers = #tpu.dot_dimension_numbers<[1], [0], [0], [1], [0, 0, 1, 1], [], []>} : vector<32x256xbf16>, vector<256x128xbf16>, vector<32x128xf32> -> vector<32x128xf32>
      %39 = vector.broadcast %36 : vector<1x128xf32> to vector<32x128xf32>
      %40 = arith.mulf %38, %39 : vector<32x128xf32>
      %41 = arith.truncf %40 : vector<32x128xf32> to vector<32x128xbf16>
      %42 = arith.index_cast %21 : i32 to index
      %c0_21 = arith.constant 0 : index
      %43 = vector.load %arg22[%42, %c0_21] : memref<128x128xbf16, #tpu.memory_space<vmem>>, vector<32x128xbf16>
      tpu.vector_store %arg22[%42, %c0_21], %41 {strides = array<i32>} : memref<128x128xbf16, #tpu.memory_space<vmem>>, vector<32x128xbf16>,
      %c1_i32_22 = arith.constant 1 : i32
      %c32_i32_23 = arith.constant 32 : i32
      %44 = arith.muli %c1_i32_22, %c32_i32_23 : i32
      %45 = tpu.assume_multiple %44, 32 : i32
      %46 = arith.index_cast %45 : i32 to index
      %c0_24 = arith.constant 0 : index
      %47 = vector.load %arg21[%46, %c0_24] : memref<128x128xbf16, #tpu.memory_space<vmem>>, vector<32x128xbf16>
      %48 = arith.index_cast %45 : i32 to index
      %c0_25 = arith.constant 0 : index
      %49 = vector.load %arg19[%48, %c0_25] : memref<128x256xbf16, #tpu.memory_space<vmem>>, vector<32x256xbf16>
      %50 = arith.index_cast %45 : i32 to index
      %c0_26 = arith.constant 0 : index
      %51 = vector.load %arg20[%50, %c0_26] : memref<128x256xbf16, #tpu.memory_space<vmem>>, vector<32x256xbf16>
      %cst_27 = arith.constant dense<0.000000e+00> : vector<256x128xf32>
      %52 = tpu.matmul %49, %47, %cst_27 {dimension_numbers = #tpu.dot_dimension_numbers<[0], [0], [1], [1], [0, 1, 1, 1], [], []>} : vector<32x256xbf16>, vector<32x128xbf16>, vector<256x128xf32> -> vector<256x128xf32>
      %cst_28 = arith.constant dense<0xFF800000> : vector<128xf32>
      %53 = vector.multi_reduction <maximumf>, %52, %cst_28 [0] : vector<256x128xf32> to vector<128xf32>
      %54 = vector.shape_cast %53 : vector<128xf32> to vector<1x128xf32>
      %55 = vector.broadcast %54 : vector<1x128xf32> to vector<256x128xf32>
      %56 = arith.subf %52, %55 : vector<256x128xf32>
      %57 = math.exp %56 : vector<256x128xf32>
      %cst_29 = arith.constant dense<0.000000e+00> : vector<128xf32>
      %58 = vector.multi_reduction <add>, %57, %cst_29 [0] : vector<256x128xf32> to vector<128xf32>
      %59 = vector.shape_cast %58 : vector<128xf32> to vector<1x128xf32>
      %60 = tpu.reciprocal %59 {approx = true} : vector<1x128xf32> -> vector<1x128xf32>
      %61 = arith.truncf %57 : vector<256x128xf32> to vector<256x128xbf16>
      %cst_30 = arith.constant dense<0.000000e+00> : vector<32x128xf32>
      %62 = tpu.matmul %51, %61, %cst_30 {dimension_numbers = #tpu.dot_dimension_numbers<[1], [0], [0], [1], [0, 0, 1, 1], [], []>} : vector<32x256xbf16>, vector<256x128xbf16>, vector<32x128xf32> -> vector<32x128xf32>
      %63 = vector.broadcast %60 : vector<1x128xf32> to vector<32x128xf32>
      %64 = arith.mulf %62, %63 : vector<32x128xf32>
      %65 = arith.truncf %64 : vector<32x128xf32> to vector<32x128xbf16>
      %66 = arith.index_cast %45 : i32 to index
      %c0_31 = arith.constant 0 : index
      %67 = vector.load %arg22[%66, %c0_31] : memref<128x128xbf16, #tpu.memory_space<vmem>>, vector<32x128xbf16>
      tpu.vector_store %arg22[%66, %c0_31], %65 {strides = array<i32>} : memref<128x128xbf16, #tpu.memory_space<vmem>>, vector<32x128xbf16>,
      %c2_i32 = arith.constant 2 : i32
      %c32_i32_32 = arith.constant 32 : i32
      %68 = arith.muli %c2_i32, %c32_i32_32 : i32
      %69 = tpu.assume_multiple %68, 32 : i32
      %70 = arith.index_cast %69 : i32 to index
      %c0_33 = arith.constant 0 : index
      %71 = vector.load %arg21[%70, %c0_33] : memref<128x128xbf16, #tpu.memory_space<vmem>>, vector<32x128xbf16>
      %72 = arith.index_cast %69 : i32 to index
      %c0_34 = arith.constant 0 : index
      %73 = vector.load %arg19[%72, %c0_34] : memref<128x256xbf16, #tpu.memory_space<vmem>>, vector<32x256xbf16>
      %74 = arith.index_cast %69 : i32 to index
      %c0_35 = arith.constant 0 : index
      %75 = vector.load %arg20[%74, %c0_35] : memref<128x256xbf16, #tpu.memory_space<vmem>>, vector<32x256xbf16>
      %cst_36 = arith.constant dense<0.000000e+00> : vector<256x128xf32>
      %76 = tpu.matmul %73, %71, %cst_36 {dimension_numbers = #tpu.dot_dimension_numbers<[0], [0], [1], [1], [0, 1, 1, 1], [], []>} : vector<32x256xbf16>, vector<32x128xbf16>, vector<256x128xf32> -> vector<256x128xf32>
      %cst_37 = arith.constant dense<0xFF800000> : vector<128xf32>
      %77 = vector.multi_reduction <maximumf>, %76, %cst_37 [0] : vector<256x128xf32> to vector<128xf32>
      %78 = vector.shape_cast %77 : vector<128xf32> to vector<1x128xf32>
      %79 = vector.broadcast %78 : vector<1x128xf32> to vector<256x128xf32>
      %80 = arith.subf %76, %79 : vector<256x128xf32>
      %81 = math.exp %80 : vector<256x128xf32>
      %cst_38 = arith.constant dense<0.000000e+00> : vector<128xf32>
      %82 = vector.multi_reduction <add>, %81, %cst_38 [0] : vector<256x128xf32> to vector<128xf32>
      %83 = vector.shape_cast %82 : vector<128xf32> to vector<1x128xf32>
      %84 = tpu.reciprocal %83 {approx = true} : vector<1x128xf32> -> vector<1x128xf32>
      %85 = arith.truncf %81 : vector<256x128xf32> to vector<256x128xbf16>
      %cst_39 = arith.constant dense<0.000000e+00> : vector<32x128xf32>
      %86 = tpu.matmul %75, %85, %cst_39 {dimension_numbers = #tpu.dot_dimension_numbers<[1], [0], [0], [1], [0, 0, 1, 1], [], []>} : vector<32x256xbf16>, vector<256x128xbf16>, vector<32x128xf32> -> vector<32x128xf32>
      %87 = vector.broadcast %84 : vector<1x128xf32> to vector<32x128xf32>
      %88 = arith.mulf %86, %87 : vector<32x128xf32>
      %89 = arith.truncf %88 : vector<32x128xf32> to vector<32x128xbf16>
      %90 = arith.index_cast %69 : i32 to index
      %c0_40 = arith.constant 0 : index
      %91 = vector.load %arg22[%90, %c0_40] : memref<128x128xbf16, #tpu.memory_space<vmem>>, vector<32x128xbf16>
      tpu.vector_store %arg22[%90, %c0_40], %89 {strides = array<i32>} : memref<128x128xbf16, #tpu.memory_space<vmem>>, vector<32x128xbf16>,
      %c3_i32 = arith.constant 3 : i32
      %c32_i32_41 = arith.constant 32 : i32
      %92 = arith.muli %c3_i32, %c32_i32_41 : i32
      %93 = tpu.assume_multiple %92, 32 : i32
      %94 = arith.index_cast %93 : i32 to index
      %c0_42 = arith.constant 0 : index
      %95 = vector.load %arg21[%94, %c0_42] : memref<128x128xbf16, #tpu.memory_space<vmem>>, vector<32x128xbf16>
      %96 = arith.index_cast %93 : i32 to index
      %c0_43 = arith.constant 0 : index
      %97 = vector.load %arg19[%96, %c0_43] : memref<128x256xbf16, #tpu.memory_space<vmem>>, vector<32x256xbf16>
      %98 = arith.index_cast %93 : i32 to index
      %c0_44 = arith.constant 0 : index
      %99 = vector.load %arg20[%98, %c0_44] : memref<128x256xbf16, #tpu.memory_space<vmem>>, vector<32x256xbf16>
      %cst_45 = arith.constant dense<0.000000e+00> : vector<256x128xf32>
      %100 = tpu.matmul %97, %95, %cst_45 {dimension_numbers = #tpu.dot_dimension_numbers<[0], [0], [1], [1], [0, 1, 1, 1], [], []>} : vector<32x256xbf16>, vector<32x128xbf16>, vector<256x128xf32> -> vector<256x128xf32>
      %cst_46 = arith.constant dense<0xFF800000> : vector<128xf32>
      %101 = vector.multi_reduction <maximumf>, %100, %cst_46 [0] : vector<256x128xf32> to vector<128xf32>
      %102 = vector.shape_cast %101 : vector<128xf32> to vector<1x128xf32>
      %103 = vector.broadcast %102 : vector<1x128xf32> to vector<256x128xf32>
      %104 = arith.subf %100, %103 : vector<256x128xf32>
      %105 = math.exp %104 : vector<256x128xf32>
      %cst_47 = arith.constant dense<0.000000e+00> : vector<128xf32>
      %106 = vector.multi_reduction <add>, %105, %cst_47 [0] : vector<256x128xf32> to vector<128xf32>
      %107 = vector.shape_cast %106 : vector<128xf32> to vector<1x128xf32>
      %108 = tpu.reciprocal %107 {approx = true} : vector<1x128xf32> -> vector<1x128xf32>
      %109 = arith.truncf %105 : vector<256x128xf32> to vector<256x128xbf16>
      %cst_48 = arith.constant dense<0.000000e+00> : vector<32x128xf32>
      %110 = tpu.matmul %99, %109, %cst_48 {dimension_numbers = #tpu.dot_dimension_numbers<[1], [0], [0], [1], [0, 0, 1, 1], [], []>} : vector<32x256xbf16>, vector<256x128xbf16>, vector<32x128xf32> -> vector<32x128xf32>
      %111 = vector.broadcast %108 : vector<1x128xf32> to vector<32x128xf32>
      %112 = arith.mulf %110, %111 : vector<32x128xf32>
      %113 = arith.truncf %112 : vector<32x128xf32> to vector<32x128xbf16>
      %114 = arith.index_cast %93 : i32 to index
      %c0_49 = arith.constant 0 : index
      %115 = vector.load %arg22[%114, %c0_49] : memref<128x128xbf16, #tpu.memory_space<vmem>>, vector<32x128xbf16>
      tpu.vector_store %arg22[%114, %c0_49], %113 {strides = array<i32>} : memref<128x128xbf16, #tpu.memory_space<vmem>>, vector<32x128xbf16>,
      %c4_i32 = arith.constant 4 : i32
      %c0_50 = arith.constant 0 : index
      %c0_51 = arith.constant 0 : index
      %116 = vector.load %arg11[%c0_50, %c0_51] : memref<128x128xbf16, #tpu.memory_space<vmem>>, vector<128x128xbf16>
      %c0_52 = arith.constant 0 : index
      %c0_53 = arith.constant 0 : index
      %117 = vector.load %arg22[%c0_52, %c0_53] : memref<128x128xbf16, #tpu.memory_space<vmem>>, vector<128x128xbf16>
      %cst_54 = arith.constant dense<0.000000e+00> : vector<128x128xf32>
      %118 = tpu.matmul %116, %117, %cst_54 {dimension_numbers = #tpu.dot_dimension_numbers<[0], [0], [1], [1], [0, 1, 1, 1], [], []>} : vector<128x128xbf16>, vector<128x128xbf16>, vector<128x128xf32> -> vector<128x128xf32>
      %c0_55 = arith.constant 0 : index
      %c0_56 = arith.constant 0 : index
      %119 = vector.load %arg12[%c0_55, %c0_56] : memref<128x1xf32, #tpu.memory_space<vmem>>, vector<128x1xf32>
      %120 = vector.broadcast %119 : vector<128x1xf32> to vector<128x128xf32>
      %121 = arith.addf %118, %120 : vector<128x128xf32>
      %c0_57 = arith.constant 0 : index
      %c0_58 = arith.constant 0 : index
      %122 = vector.load %arg13[%c0_57, %c0_58] : memref<256x128xbf16, #tpu.memory_space<vmem>>, vector<256x128xbf16>
      %cst_59 = arith.constant dense<0.000000e+00> : vector<256x128xf32>
      %123 = tpu.matmul %122, %12, %cst_59 {dimension_numbers = #tpu.dot_dimension_numbers<[1], [0], [0], [1], [0, 0, 1, 1], [], []>} : vector<256x128xbf16>, vector<128x128xbf16>, vector<256x128xf32> -> vector<256x128xf32>
      %c0_60 = arith.constant 0 : index
      %c0_61 = arith.constant 0 : index
      %124 = vector.load %arg14[%c0_60, %c0_61] : memref<256x128xbf16, #tpu.memory_space<vmem>>, vector<256x128xbf16>
      %125 = arith.truncf %121 : vector<128x128xf32> to vector<128x128xbf16>
      %cst_62 = arith.constant dense<0.000000e+00> : vector<256x128xf32>
      %126 = tpu.matmul %124, %125, %cst_62 {dimension_numbers = #tpu.dot_dimension_numbers<[1], [0], [0], [1], [0, 0, 1, 1], [], []>} : vector<256x128xbf16>, vector<128x128xbf16>, vector<256x128xf32> -> vector<256x128xf32>
      %127 = arith.addf %123, %126 : vector<256x128xf32>
      %c0_63 = arith.constant 0 : index
      %c0_64 = arith.constant 0 : index
      %128 = vector.load %arg15[%c0_63, %c0_64] : memref<256x1xf32, #tpu.memory_space<vmem>>, vector<256x1xf32>
      %129 = vector.broadcast %128 : vector<256x1xf32> to vector<256x128xf32>
      %130 = arith.addf %127, %129 : vector<256x128xf32>
      %c0_65 = arith.constant 0 : index
      %c0_66 = arith.constant 0 : index
      %131 = vector.load %arg24[%c0_65, %c0_66] : memref<256x1xf32, #tpu.memory_space<vmem>>, vector<256x1xf32>
      %cst_67 = arith.constant dense<0.000000e+00> : vector<256xf32>
      %132 = vector.multi_reduction <add>, %130, %cst_67 [1] : vector<256x128xf32> to vector<256xf32>
      %133 = vector.shape_cast %132 : vector<256xf32> to vector<256x1xf32>
      %134 = arith.addf %131, %133 : vector<256x1xf32>
      %c0_68 = arith.constant 0 : index
      %c0_69 = arith.constant 0 : index
      %135 = vector.load %arg24[%c0_68, %c0_69] : memref<256x1xf32, #tpu.memory_space<vmem>>, vector<256x1xf32>
      tpu.vector_store %arg24[%c0_68, %c0_69], %134 {strides = array<i32>} : memref<256x1xf32, #tpu.memory_space<vmem>>, vector<256x1xf32>,
      %c0_70 = arith.constant 0 : index
      %c0_71 = arith.constant 0 : index
      %136 = vector.load %arg25[%c0_70, %c0_71] : memref<256x1xf32, #tpu.memory_space<vmem>>, vector<256x1xf32>
      %137 = arith.mulf %130, %130 : vector<256x128xf32>
      %cst_72 = arith.constant dense<0.000000e+00> : vector<256xf32>
      %138 = vector.multi_reduction <add>, %137, %cst_72 [1] : vector<256x128xf32> to vector<256xf32>
      %139 = vector.shape_cast %138 : vector<256xf32> to vector<256x1xf32>
      %140 = arith.addf %136, %139 : vector<256x1xf32>
      %c0_73 = arith.constant 0 : index
      %c0_74 = arith.constant 0 : index
      %141 = vector.load %arg25[%c0_73, %c0_74] : memref<256x1xf32, #tpu.memory_space<vmem>>, vector<256x1xf32>
      tpu.vector_store %arg25[%c0_73, %c0_74], %140 {strides = array<i32>} : memref<256x1xf32, #tpu.memory_space<vmem>>, vector<256x1xf32>,
      %c128_i32 = arith.constant 128 : i32
      %142 = arith.muli %arg2, %c128_i32 : i32
      %143 = tpu.assume_multiple %142, 128 : i32
      %144 = arith.truncf %130 : vector<256x128xf32> to vector<256x128xbf16>
      %c0_75 = arith.constant 0 : index
      %145 = arith.index_cast %143 : i32 to index
      %146 = vector.load %arg23[%c0_75, %145] : memref<256x256xbf16, #tpu.memory_space<vmem>>, vector<256x128xbf16>
      tpu.vector_store %arg23[%c0_75, %145], %144 {strides = array<i32>} : memref<256x256xbf16, #tpu.memory_space<vmem>>, vector<256x128xbf16>,
    } else {
    }
    %c1_i32 = arith.constant 1 : i32
    %8 = arith.cmpi eq, %arg1, %c1_i32 : i32
    %9 = arith.extui %8 : i1 to i32
    %c0_i32_4 = arith.constant 0 : i32
    %10 = arith.cmpi ne, %9, %c0_i32_4 : i32
    scf.if %10 {
      %c128_i32 = arith.constant 128 : i32
      %11 = arith.muli %arg2, %c128_i32 : i32
      %12 = tpu.assume_multiple %11, 128 : i32
      %c0 = arith.constant 0 : index
      %13 = arith.index_cast %12 : i32 to index
      %14 = vector.load %arg23[%c0, %13] : memref<256x256xbf16, #tpu.memory_space<vmem>>, vector<256x128xbf16>
      %15 = arith.extf %14 : vector<256x128xbf16> to vector<256x128xf32>
      %c0_5 = arith.constant 0 : index
      %c0_6 = arith.constant 0 : index
      %16 = vector.load %arg24[%c0_5, %c0_6] : memref<256x1xf32, #tpu.memory_space<vmem>>, vector<256x1xf32>
      %cst = arith.constant 3.906250e-03 : f32
      %17 = vector.broadcast %cst : f32 to vector<256x1xf32>
      %18 = arith.mulf %16, %17 : vector<256x1xf32>
      %c0_7 = arith.constant 0 : index
      %c0_8 = arith.constant 0 : index
      %19 = vector.load %arg25[%c0_7, %c0_8] : memref<256x1xf32, #tpu.memory_space<vmem>>, vector<256x1xf32>
      %cst_9 = arith.constant 3.906250e-03 : f32
      %20 = vector.broadcast %cst_9 : f32 to vector<256x1xf32>
      %21 = arith.mulf %19, %20 : vector<256x1xf32>
      %22 = arith.mulf %18, %18 : vector<256x1xf32>
      %23 = arith.subf %21, %22 : vector<256x1xf32>
      %cst_10 = arith.constant 0.000000e+00 : f32
      %24 = vector.broadcast %cst_10 : f32 to vector<256x1xf32>
      %25 = arith.maximumf %23, %24 : vector<256x1xf32>
      %26 = vector.broadcast %18 : vector<256x1xf32> to vector<256x128xf32>
      %27 = arith.subf %15, %26 : vector<256x128xf32>
      %cst_11 = arith.constant 9.99999974E-6 : f32
      %28 = vector.broadcast %cst_11 : f32 to vector<256x1xf32>
      %29 = arith.addf %25, %28 : vector<256x1xf32>
      %30 = math.rsqrt %29 : vector<256x1xf32>
      %31 = vector.broadcast %30 : vector<256x1xf32> to vector<256x128xf32>
      %32 = arith.mulf %27, %31 : vector<256x128xf32>
      %cst_12 = arith.constant 0.000000e+00 : f32
      %33 = vector.broadcast %cst_12 : f32 to vector<256x128xf32>
      %34 = arith.maximumf %32, %33 : vector<256x128xf32>
      %35 = arith.truncf %34 : vector<256x128xf32> to vector<256x128xbf16>
      %c0_13 = arith.constant 0 : index
      %c0_14 = arith.constant 0 : index
      %36 = vector.load %arg16[%c0_13, %c0_14] : memref<128x256xbf16, #tpu.memory_space<vmem>>, vector<128x256xbf16>
      %cst_15 = arith.constant dense<0.000000e+00> : vector<128x128xf32>
      %37 = tpu.matmul %36, %35, %cst_15 {dimension_numbers = #tpu.dot_dimension_numbers<[1], [0], [0], [1], [0, 0, 1, 1], [], []>} : vector<128x256xbf16>, vector<256x128xbf16>, vector<128x128xf32> -> vector<128x128xf32>
      %c0_16 = arith.constant 0 : index
      %c0_17 = arith.constant 0 : index
      %38 = vector.load %arg17[%c0_16, %c0_17] : memref<128x1xf32, #tpu.memory_space<vmem>>, vector<128x1xf32>
      %39 = vector.broadcast %38 : vector<128x1xf32> to vector<128x128xf32>
      %40 = arith.addf %37, %39 : vector<128x128xf32>
      %c0_18 = arith.constant 0 : index
      %c0_19 = arith.constant 0 : index
      %c0_20 = arith.constant 0 : index
      %41 = vector.load %arg18[%c0_18, %c0_19, %c0_20] : memref<1x128x128xf32, #tpu.memory_space<vmem>>, vector<1x128x128xf32>
      %42 = vector.shape_cast %41 : vector<1x128x128xf32> to vector<128x128xf32>
      %43 = vector.shape_cast %40 : vector<128x128xf32> to vector<1x128x128xf32>
      tpu.vector_store %arg18[%c0_18, %c0_19, %c0_20], %43 {strides = array<i32>} : memref<1x128x128xf32, #tpu.memory_space<vmem>>, vector<1x128x128xf32>,
    } else {
    }
    return
  }
  func.func @transform_0(%arg0: i32, %arg1: i32, %arg2: i32) -> (i32, i32, i32) {
    %c1_i32 = arith.constant 1 : i32
    %0 = arith.subi %c1_i32, %arg1 : i32
    %1 = arith.muli %arg2, %0 : i32
    %c0_i32 = arith.constant 0 : i32
    %c0_i32_0 = arith.constant 0 : i32
    return %arg0, %c0_i32, %1 : i32, i32, i32
  }
  func.func @transform_1(%arg0: i32, %arg1: i32, %arg2: i32) -> (i32, i32, i32) {
    %c0_i32 = arith.constant 0 : i32
    %c0_i32_0 = arith.constant 0 : i32
    %c0_i32_1 = arith.constant 0 : i32
    return %arg0, %c0_i32, %c0_i32_0 : i32, i32, i32
  }
  func.func @transform_2(%arg0: i32, %arg1: i32, %arg2: i32) -> (i32, i32) {
    %c0_i32 = arith.constant 0 : i32
    %c0_i32_0 = arith.constant 0 : i32
    %c0_i32_1 = arith.constant 0 : i32
    return %c0_i32, %c0_i32_0 : i32, i32
  }
  func.func @transform_3(%arg0: i32, %arg1: i32, %arg2: i32) -> (i32, i32) {
    %c0_i32 = arith.constant 0 : i32
    %c0_i32_0 = arith.constant 0 : i32
    %c0_i32_1 = arith.constant 0 : i32
    return %c0_i32, %c0_i32_0 : i32, i32
  }
  func.func @transform_4(%arg0: i32, %arg1: i32, %arg2: i32) -> (i32, i32) {
    %c0_i32 = arith.constant 0 : i32
    %c0_i32_0 = arith.constant 0 : i32
    %c0_i32_1 = arith.constant 0 : i32
    return %c0_i32, %c0_i32_0 : i32, i32
  }
  func.func @transform_5(%arg0: i32, %arg1: i32, %arg2: i32) -> (i32, i32) {
    %c0_i32 = arith.constant 0 : i32
    %c0_i32_0 = arith.constant 0 : i32
    %c0_i32_1 = arith.constant 0 : i32
    return %c0_i32, %c0_i32_0 : i32, i32
  }
  func.func @transform_6(%arg0: i32, %arg1: i32, %arg2: i32) -> (i32, i32) {
    %c0_i32 = arith.constant 0 : i32
    %c0_i32_0 = arith.constant 0 : i32
    %c0_i32_1 = arith.constant 0 : i32
    return %c0_i32, %c0_i32_0 : i32, i32
  }
  func.func @transform_7(%arg0: i32, %arg1: i32, %arg2: i32) -> (i32, i32) {
    %c0_i32 = arith.constant 0 : i32
    %c0_i32_0 = arith.constant 0 : i32
    %c0_i32_1 = arith.constant 0 : i32
    return %c0_i32, %c0_i32_0 : i32, i32
  }
  func.func @transform_8(%arg0: i32, %arg1: i32, %arg2: i32) -> (i32, i32) {
    %c0_i32 = arith.constant 0 : i32
    %c0_i32_0 = arith.constant 0 : i32
    %c0_i32_1 = arith.constant 0 : i32
    return %c0_i32, %c0_i32_0 : i32, i32
  }
  func.func @transform_9(%arg0: i32, %arg1: i32, %arg2: i32) -> (i32, i32) {
    %c0_i32 = arith.constant 0 : i32
    %c0_i32_0 = arith.constant 0 : i32
    %c0_i32_1 = arith.constant 0 : i32
    return %c0_i32, %c0_i32_0 : i32, i32
  }
  func.func @transform_10(%arg0: i32, %arg1: i32, %arg2: i32) -> (i32, i32) {
    %c0_i32 = arith.constant 0 : i32
    %c0_i32_0 = arith.constant 0 : i32
    %c0_i32_1 = arith.constant 0 : i32
    return %c0_i32, %c0_i32_0 : i32, i32
  }
  func.func @transform_11(%arg0: i32, %arg1: i32, %arg2: i32) -> (i32, i32) {
    %c0_i32 = arith.constant 0 : i32
    %c0_i32_0 = arith.constant 0 : i32
    %c0_i32_1 = arith.constant 0 : i32
    return %c0_i32, %c0_i32_0 : i32, i32
  }
  func.func @transform_12(%arg0: i32, %arg1: i32, %arg2: i32) -> (i32, i32) {
    %c0_i32 = arith.constant 0 : i32
    %c0_i32_0 = arith.constant 0 : i32
    %c0_i32_1 = arith.constant 0 : i32
    return %c0_i32, %c0_i32_0 : i32, i32
  }
  func.func @transform_13(%arg0: i32, %arg1: i32, %arg2: i32) -> (i32, i32) {
    %c0_i32 = arith.constant 0 : i32
    %c0_i32_0 = arith.constant 0 : i32
    %c0_i32_1 = arith.constant 0 : i32
    return %c0_i32, %c0_i32_0 : i32, i32
  }
  func.func @transform_14(%arg0: i32, %arg1: i32, %arg2: i32) -> (i32, i32) {
    %c0_i32 = arith.constant 0 : i32
    %c0_i32_0 = arith.constant 0 : i32
    %c0_i32_1 = arith.constant 0 : i32
    return %c0_i32, %c0_i32_0 : i32, i32
  }
  func.func @transform_15(%arg0: i32, %arg1: i32, %arg2: i32) -> (i32, i32, i32) {
    %0 = arith.muli %arg2, %arg1 : i32
    %c0_i32 = arith.constant 0 : i32
    %c0_i32_0 = arith.constant 0 : i32
    return %arg0, %c0_i32, %0 : i32, i32, i32
  }
}

</mosaic_0001>

<bundles_post_ra>
// kernel: tpu_custom_call.1
= control target key start
LH: loop header
LB: loop body
LE: loop exit
PB: predicated region body
PF: predicated region fallthrough
CT: control target
= control target key end

     0   :  { %s11196_s0 = inlined_call_operand.vmem [shape: bf16[2,128,256], index: 0, kind: input, shape index: {}]   ;;  %s11197_s1 = inlined_call_operand.vmem [shape: bf16[2,128,256], index: 1, kind: input, shape index: {}]   ;;  %s11198_s2 = inlined_call_operand.hbm [shape: bf16[128,128], index: 2, kind: input, shape index: {}]   ;;  %s11199_s3 = inlined_call_operand.vmem [shape: f32[128,1], index: 3, kind: input, shape index: {}]   ;;  %s11200_s4 = inlined_call_operand.hbm [shape: bf16[128,128], index: 4, kind: input, shape index: {}]   ;;  %s11201_s5 = inlined_call_operand.vmem [shape: f32[128,1], index: 5, kind: input, shape index: {}]   ;;  %s11202_s6 = inlined_call_operand.hbm [shape: bf16[128,128], index: 6, kind: input, shape index: {}]   ;;  %s11203_s7 = inlined_call_operand.vmem [shape: f32[128,1], index: 7, kind: input, shape index: {}]   ;;  %s11204_s8 = inlined_call_operand.hbm [shape: bf16[128,128], index: 8, kind: input, shape index: {}]   ;;  %s11205_s9 = inlined_call_operand.vmem [shape: f32[128,1], index: 9, kind: input, shape index: {}]   ;;  %s11206_s10 = inlined_call_operand.vmem [shape: bf16[256,128], index: 10, kind: input, shape index: {}]   ;;  %s11207_s11 = inlined_call_operand.vmem [shape: bf16[256,128], index: 11, kind: input, shape index: {}]   ;;  %s11208_s12 = inlined_call_operand.vmem [shape: f32[256,1], index: 12, kind: input, shape index: {}]   ;;  %s11209_s13 = inlined_call_operand.vmem [shape: bf16[128,256], index: 13, kind: input, shape index: {}]   ;;  %s11210_s14 = inlined_call_operand.vmem [shape: f32[128,1], index: 14, kind: input, shape index: {}]   ;;  %s11211_s15 = inlined_call_operand.hbm [shape: f32[2,128,256], index: 15, kind: output, shape index: {}]  }
   0x1   :  { %11245 = sst [smem:[#allocation61_spill]] %s11196_s0 }
   0x2   :  { %11246 = sst [smem:[#allocation62_spill]] %s11197_s1 }
   0x3   :  { %11247 = sst [smem:[#allocation63_spill]] %s11198_s2 }
   0x4   :  { %11248 = sst [smem:[#allocation64_spill]] %s11199_s3 }
   0x5   :  { %11249 = sst [smem:[#allocation65_spill]] %s11200_s4 }
   0x6   :  { %11250 = sst [smem:[#allocation66_spill]] %s11201_s5 }
   0x7   :  { %11251 = sst [smem:[#allocation67_spill]] %s11202_s6 }
   0x8   :  { %11252 = sst [smem:[#allocation68_spill]] %s11203_s7 }
   0x9   :  { %11253 = sst [smem:[#allocation69_spill]] %s11205_s9 }
   0xa   :  { %11254 = sst [smem:[#allocation70_spill]] %s11206_s10 }
   0xb   :  { %11255 = sst [smem:[#allocation71_spill]] %s11207_s11 }
   0xc   :  { %11256 = sst [smem:[#allocation72_spill]] %s11208_s12 }
   0xd   :  { %11257 = sst [smem:[#allocation73_spill]] %s11209_s13 }
   0xe   :  { %11258 = sst [smem:[#allocation74_spill]] %s11210_s14 }
   0xf   :  { %11259 = sst [smem:[#allocation75_spill]] %s11211_s15 }
  0x10   :  { %20 = vsyncpa [#allocation11], 0 }
  0x11   :  { %21 = vsyncpa [#allocation14], 0 }
  0x12   :  { %22 = vsyncpa [#allocation17], 0 }
  0x13   :  { %23 = vsyncpa [#allocation12], 0 }
  0x14   :  { %25 = vsyncpa [#allocation12 + $0x1], 0  ;;  %s8406_s18 = smov 0   ;;  %s8408_s19 = smov 0  }
  0x15   :  { %s8410_s20 = smov 0   ;;  %s8412_s21 = smov 0  }
  0x16   :  { %s8414_s22 = smov 0   ;;  %s8416_s23 = smov 0  }
  0x17   :  { %s8418_s24 = smov 0   ;;  %s8420_s25 = smov 0  }
  0x18   :  { %s8422_s26 = smov 0   ;;  %s8424_s27 = smov 0  }
  0x19   :  { %s8426_s28 = smov 0   ;;  %s8428_s29 = smov 0  }
  0x1a LB: > { %11260 = sst [smem:[#allocation23_spill]] %s8266_s18  ;;  %s43_s17 = sadd.s32 1, %s8298_s26  ;;  %s8310_s29 = sphi %s8428_s29, %s31_s29   ;;  %s8306_s28 = sphi %s8426_s28, %s11391_s28   ;;  %s8302_s27 = sphi %s8424_s27, %s11386_s27   ;;  %s8298_s26 = sphi %s8422_s26, %s11385_s26   ;;  %s8294_s25 = sphi %s8420_s25, %s11390_s25   ;;  %s8290_s24 = sphi %s8418_s24, %s11384_s24   ;;  %s8286_s23 = sphi %s8416_s23, %s11383_s23   ;;  %s8282_s22 = sphi %s8414_s22, %s11389_s22   ;;  %s8278_s21 = sphi %s8412_s21, %s11388_s21   ;;  %s8274_s20 = sphi %s8410_s20, %s11381_s20   ;;  %s8270_s19 = sphi %s8408_s19, %s11380_s19   ;;  %s8266_s18 = sphi %s8406_s18, %s11379_s18  }
  0x1b   : > { %11261 = sst [smem:[#allocation24_spill]] %s8270_s19  ;;  %s46_s15 = sadd.s32 1, %s8302_s27 }
  0x1c   : > { %11262 = sst [smem:[#allocation25_spill]] %s8274_s20  ;;  %p44_p0 = scmp.ge.s32.totalorder %s43_s17, 2 }
  0x1d   : > { %11263 = sst [smem:[#allocation26_spill]] %s8286_s23  ;;  %s50_s13 = sadd.s32 1, %s8306_s28 }
  0x1e   : > { %11264 = sst [smem:[#allocation27_spill]] %s8290_s24  ;;  %s54_s14 = ssub.s32 1, %s8302_s27 }
  0x1f   : > { %11265 = sst [smem:[#allocation28_spill]] %s8294_s25  ;;  %s63_s10 = sadd.s32 1, %s8282_s22 }
  0x20   : > { %11266 = sst [smem:[#allocation29_spill]] %s8298_s26  ;;  %s11393_s17 = smov (%p44_p0, %s43_s17), 0 }
  0x21   : > { %11267 = sst [smem:[#allocation30_spill]] %s8302_s27  ;;  %s11395_s15 = smov (!%p44_p0, %s46_s15), %s8302_s27 }
  0x22   : > { %11268 = sst [smem:[#allocation31_spill]] %s11393_s17  ;;  %s8477_s11 = smul.u32 %s8298_s26, %s54_s14 }
  0x23   : > { %p70_p1 = scmp.ne.s32.totalorder %s8282_s22, %s8278_s21  ;;  %p48_p2 = scmp.ge.s32.totalorder %s11395_s15, 2 }
  0x24   : > { %p71_p3 = scmp.eq.s32.totalorder %s8310_s29, 0  ;;  %s385_s16 = smul.u32 %s8298_s26, %s8302_s27 }
  0x25   : > { %s392_s30 = sadd.s32 1, %s8274_s20  ;;  %s11397_s15 = smov (%p48_p2, %s11395_s15), 0 }
  0x26   : > { %11269 = sst [smem:[#allocation32_spill]] %s11397_s15  ;;  %s11399_s13 = smov (!%p48_p2, %s50_s13), %s8306_s28 }
  0x27   : > { %s56_s12 = ssub.s32 1, %s11397_s15  ;;  %p8489_p4 = por %p71_p3, %p70_p1 }
  0x28   : > { %p52_p5 = scmp.ge.s32.totalorder %s11399_s13, 2  ;;  %s57_s14 = smul.u32 %s56_s12, %s11393_s17 }
  0x29   : > { %s11270_s9 = scalar_select %p8489_p4, 1, 0 }
  0x2a   : > { %s386_s3 = smul.u32 %s11397_s15, %s11393_s17  ;;  %p402_p6 = scmp.ne.s32.totalorder %s8274_s20, %s8270_s19 }
  0x2b   : > { %s11401_s13 = smov (%p52_p5, %s11399_s13), 0  ;;  %s59_s27 = ssub.s32 %s8477_s11, %s57_s14 }
  0x2c   : > { %11271 = sst [smem:[#allocation33_spill]] %s11401_s13  ;;  %s388_s26 = ssub.s32 %s385_s16, %s386_s3 }
  0x2d   : > { %s58_s7 = ssub.s32 %s8306_s28, %s11401_s13  ;;  %s11272_s5 = sadd.s32 4294967295, %s8310_s29  }
  0x2e   : > { %p403_p7 = scmp.eq.s32.totalorder %s11272_s5, 7  ;;  %s60_s1 = sor.u32 %s59_s27, %s58_s7 }
  0x2f   : > { %s389_s23 = sor.u32 %s388_s26, %s58_s7  ;;  %p61_p8 = scmp.eq.s32.totalorder %s60_s1, 0 }
  0x30   : > { %p390_p9 = scmp.eq.s32.totalorder %s389_s23, 0  ;;  %p8505_p10 = por %p403_p7, %p402_p6 }
  0x31   : > { %p408_p11 = scmp.ne.s32.totalorder %s8270_s19, %s8266_s18  ;;  %s11277_s24 = sadd.s32 4294967294, %s8310_s29  }
  0x32   : > { %s11273_s12 = scalar_select %p8505_p10, 1, 0 }
  0x33   : > { %s8512_s15 = scalar_select %p61_p8, %s8282_s22, %s63_s10  }
  0x34   : > { %11274 = sst [smem:[#allocation34_spill]] %s11273_s12  ;;  %p409_p12 = scmp.eq.s32.totalorder %s11277_s24, 7 }
  0x35   : > { %11275 = sst [smem:[#allocation35_spill]] %s8512_s15  ;;  %p6567_p13 = scmp.ge.s32.totalorder %s8310_s29, 1 }
  0x36   : > { %s8515_s17 = scalar_select %p390_p9, %s8274_s20, %s392_s30  }
  0x37   : > { %p416_p0 = scmp.lt.s32.totalorder %s8310_s29, 9  ;;  %p8521_p1 = por %p409_p12, %p408_p11 }
  0x38   : > { %11276 = sst [smem:[#allocation36_spill]] %s8515_s17  ;;  %p8527_p2 = scmp.eq.s32.totalorder %s11272_s5, 0 }
  0x39   : > { %s11278_s3 = scalar_select %p8521_p1, 1, 0 }
  0x3a   : > { %s11280_s1 = scalar_select %p8527_p2, 1, 0 }
  0x3b   : > { %11279 = sst [smem:[#allocation37_spill]] %s11278_s3  ;;  %p8531_p3 = pnand %p6567_p13, %p416_p0 }
  0x3c   : > { %s8312_s10 = smov [#allocation13]   ;;  %s11283_s4 = sld [smem:[#allocation65_spill]] }
  0x3d   : > { %s11281_s7 = scalar_select %p8531_p3, 1, 0 }
  0x3e   : > { %p7463_p5 = pneg %p8531_p3  ;;  %s444_s23 = sshll.u32 %s8312_s10, 4  ;;  %s445_s23 = int_to_ptr.vmem [resolvable:$true] %s444_s23 }
  0x40   : > { %p8539_p6 = pnand %p8527_p2, %p7463_p5 }
  0x42   : > { %s8060_s30 = scalar_lea.hbm %s11283_s4, 1024  ;;  %p8551_p8 = pneg %p8539_p6 }
  0x43   : > { %p8061_p7 = scmp.ne.s32.totalorder %s11283_s4, %s8060_s30  ;;  %p8067_p12 = scmp.lt.u32.totalorder %s8060_s30, %s11283_s4 }
  0x45   : > { %p8063_p9 = pnand %p8551_p8, %p8061_p7 }
  0x47   : > { %p8064_p11 = pneg %p8063_p9 }
  0x49   : > { %p8069_p13 = pnand %p8067_p12, %p8064_p11 }
  0x4b   : > { %8072 = shalt.err (!%p8069_p13)
}
  0x4c   : > { %s8073_s26 = scalar_lea.vmem %s445_s23, 1024  ;;  %p8081_p10 = scmp.lt.s32.totalorder %s445_s23, %s445_s23 }
  0x4d   : > { %p8074_p0 = scmp.ne.s32.totalorder %s445_s23, %s8073_s26  ;;  %p8082_p2 = scmp.lt.s32.totalorder %s8073_s26, %s8073_s26 }
  0x4f   : > { %p8076_p5 = pnand %p8074_p0, %p8551_p8  ;;  %p8083_p3 = por %p8082_p2, %p8081_p10 }
  0x51   : > { %p8077_p1 = pneg %p8076_p5 }
  0x53   : > { %p8084_p4 = pnand %p8083_p3, %p8077_p1 }
  0x55   : > { %8087 = shalt.err (!%p8084_p4)
}
  0x56   : > { %s8313_s27 = smov 64   ;;  %s8314_s16 = smov 4  }
  0x57   : > { %7469 = dma.hbm_to_vmem [thread:$0]  (!%p8539_p6), %s11283_s4, 1024, %s445_s23, [#allocation14], %s8313_s27, %s8313_s27, %s8314_s16  }
  0x58   : > { %s8315_s14 = smov [#allocation10]   ;;  %s8316_s15 = smov [#allocation15]  }
  0x59   : > { %s428_s10 = sshll.u32 %s8315_s14, 4  ;;  %s460_s26 = sshll.u32 %s8316_s15, 4  ;;  %s429_s10 = int_to_ptr.vmem [resolvable:$true] %s428_s10  ;;  %s461_s26 = int_to_ptr.vmem [resolvable:$true] %s460_s26 }
  0x5a   : > { %s11285_s2 = sld [smem:[#allocation63_spill]] }
  0x60   : > { %s8088_s3 = scalar_lea.hbm %s11285_s2, 1024 }
  0x61   : > { %p8089_p4 = scmp.ne.s32.totalorder %s11285_s2, %s8088_s3  ;;  %p8095_p2 = scmp.lt.u32.totalorder %s8088_s3, %s11285_s2 }
  0x63   : > { %p8091_p10 = pnand %p8089_p4, %p8551_p8 }
  0x65   : > { %p8092_p1 = pneg %p8091_p10 }
  0x67   : > { %p8097_p3 = pnand %p8095_p2, %p8092_p1 }
  0x69   : > { %8100 = shalt.err (!%p8097_p3)
}
  0x6a   : > { %s8101_s23 = scalar_lea.vmem %s429_s10, 1024  ;;  %p8109_p12 = scmp.lt.s32.totalorder %s429_s10, %s429_s10 }
  0x6b   : > { %p8102_p7 = scmp.ne.s32.totalorder %s429_s10, %s8101_s23  ;;  %p8110_p13 = scmp.lt.s32.totalorder %s8101_s23, %s8101_s23 }
  0x6d   : > { %p8104_p9 = pnand %p8102_p7, %p8551_p8  ;;  %p8111_p0 = por %p8110_p13, %p8109_p12 }
  0x6f   : > { %p8105_p11 = pneg %p8104_p9 }
  0x71   : > { %p8112_p5 = pnand %p8111_p0, %p8105_p11 }
  0x73   : > { %8115 = shalt.err (!%p8112_p5)
}
  0x74   : > { %7466 = dma.hbm_to_vmem [thread:$0]  (!%p8539_p6), %s11285_s2, 1024, %s429_s10, [#allocation11], %s8313_s27, %s8313_s27, %s8314_s16  }
  0x75   : > { %s11286_s6 = sld [smem:[#allocation67_spill]] }
  0x7b   : > { %s8116_s25 = scalar_lea.hbm %s11286_s6, 1024 }
  0x7c   : > { %p8117_p4 = scmp.ne.s32.totalorder %s11286_s6, %s8116_s25  ;;  %p8123_p2 = scmp.lt.u32.totalorder %s8116_s25, %s11286_s6 }
  0x7e   : > { %p8119_p10 = pnand %p8117_p4, %p8551_p8 }
  0x80   : > { %p8120_p1 = pneg %p8119_p10 }
  0x82   : > { %p8125_p3 = pnand %p8123_p2, %p8120_p1 }
  0x84   : > { %8128 = shalt.err (!%p8125_p3)
}
  0x85   : > { %s8129_s30 = scalar_lea.vmem %s461_s26, 1024  ;;  %p8137_p12 = scmp.lt.s32.totalorder %s461_s26, %s461_s26 }
  0x86   : > { %p8130_p7 = scmp.ne.s32.totalorder %s461_s26, %s8129_s30  ;;  %p8138_p13 = scmp.lt.s32.totalorder %s8129_s30, %s8129_s30 }
  0x88   : > { %p8132_p9 = pnand %p8130_p7, %p8551_p8  ;;  %p8139_p0 = por %p8138_p13, %p8137_p12 }
  0x8a   : > { %p8133_p11 = pneg %p8132_p9 }
  0x8c   : > { %p8140_p5 = pnand %p8139_p0, %p8133_p11 }
  0x8e   : > { %8143 = shalt.err (!%p8140_p5)
}
  0x8f   : > { %7472 = dma.hbm_to_vmem [thread:$0]  (!%p8539_p6), %s11286_s6, 1024, %s461_s26, [#allocation14], %s8313_s27, %s8313_s27, %s8314_s16  }
  0x90   : > { %s8317_s23 = smov [#allocation16]   ;;  %s8144_s20 = scalar_lea.hbm %s11204_s8, 1024 }
  0x91   : > { %s476_s15 = sshll.u32 %s8317_s23, 4  ;;  %p8145_p4 = scmp.ne.s32.totalorder %s11204_s8, %s8144_s20  ;;  %s477_s15 = int_to_ptr.vmem [resolvable:$true] %s476_s15 }
  0x92   : > { %p8151_p2 = scmp.lt.u32.totalorder %s8144_s20, %s11204_s8 }
  0x93   : > { %p8147_p10 = pnand %p8145_p4, %p8551_p8 }
  0x95   : > { %p8148_p1 = pneg %p8147_p10 }
  0x97   : > { %p8153_p3 = pnand %p8151_p2, %p8148_p1 }
  0x99   : > { %8156 = shalt.err (!%p8153_p3)
}
  0x9a   : > { %s8157_s26 = scalar_lea.vmem %s477_s15, 1024  ;;  %p8165_p12 = scmp.lt.s32.totalorder %s477_s15, %s477_s15 }
  0x9b   : > { %p8158_p7 = scmp.ne.s32.totalorder %s477_s15, %s8157_s26  ;;  %p8166_p13 = scmp.lt.s32.totalorder %s8157_s26, %s8157_s26 }
  0x9d   : > { %p8160_p9 = pnand %p8158_p7, %p8551_p8  ;;  %p8167_p0 = por %p8166_p13, %p8165_p12 }
  0x9f   : > { %p8161_p11 = pneg %p8160_p9 }
  0xa1   : > { %p8168_p5 = pnand %p8167_p0, %p8161_p11 }
  0xa3   : > { %8171 = shalt.err (!%p8168_p5)
}
  0xa4   : > { %7475 = dma.hbm_to_vmem [thread:$0]  (!%p8539_p6), %s11204_s8, 1024, %s477_s15, [#allocation17], %s8313_s27, %s8313_s27, %s8314_s16  }
  0xa5   : > { %p6572_p4 = scmp.ge.s32.totalorder %s8310_s29, 8 }
  0xa6   : > { %p11287_p8 = scmp.ne.s32.totalorder (!%p6572_p4), %s11270_s9, 0 }
  0xa7   : > { %504 = sbr.rel (%p6572_p4) target bundleno = 194 (0xc2), region = 68 }
  0xae   : > { %507 = sbr.rel (!%p11287_p8) target bundleno = 194 (0xc2), region = 72  ;;  %s509_s5 = sand.u32 (%p11287_p8), 1, %s8282_s22  }
  0xaf   : > { %s6574_s14 = sshll.u32 (%p11287_p8), %s8306_s28, 5  ;;  %s6573_s10 = sshll.u32 (%p11287_p8), %s509_s5, 6 }
  0xb0   : > { %s515_s24 = sadd.s32 (%p11287_p8), %s6574_s14, %s8477_s11  ;;  %s11288_s0 = sld [smem:[#allocation61_spill]] (%p11287_p8) }
  0xb1   : > { %s6575_s23 = sshll.u32 (%p11287_p8), %s515_s24, 2  ;;  %s511_s9 = scalar_lea.vmem (%p11287_p8), [#allocation9], %s6573_s10 }
  0xb6   : > { %s8642_s20 = scalar_lea.vmem %s11288_s0, %s6575_s23 }
  0xb7   : > { %v533_v0 = vld [vmem:[%s8642_s20] sm:$0xf]  ;;  %v535_v1 = vld [vmem:[%s8642_s20 + $0x8] sm:$0xf]  ;;  %v537_v2 = vld [vmem:[%s8642_s20 + $0x10] sm:$0xf] }
  0xb8   : > { %534 = vst [vmem:[%s511_s9] sm:$0xf] %v533_v0  ;;  %536 = vst [vmem:[%s511_s9 + $0x4] sm:$0xf] %v535_v1  ;;  %v539_v3 = vld [vmem:[%s8642_s20 + $0x18] sm:$0xf] }
  0xb9   : > { %538 = vst [vmem:[%s511_s9 + $0x8] sm:$0xf] %v537_v2  ;;  %v541_v4 = vld [vmem:[%s8642_s20 + $0x20] sm:$0xf]  ;;  %v543_v5 = vld [vmem:[%s8642_s20 + $0x28] sm:$0xf] }
  0xba   : > { %540 = vst [vmem:[%s511_s9 + $0xc] sm:$0xf] %v539_v3  ;;  %542 = vst [vmem:[%s511_s9 + $0x10] sm:$0xf] %v541_v4  ;;  %v545_v6 = vld [vmem:[%s8642_s20 + $0x30] sm:$0xf] }
  0xbb   : > { %544 = vst [vmem:[%s511_s9 + $0x14] sm:$0xf] %v543_v5  ;;  %v547_v7 = vld [vmem:[%s8642_s20 + $0x38] sm:$0xf]  ;;  %v549_v8 = vld [vmem:[%s8642_s20 + $0x40] sm:$0xf] }
  0xbc   : > { %546 = vst [vmem:[%s511_s9 + $0x18] sm:$0xf] %v545_v6  ;;  %548 = vst [vmem:[%s511_s9 + $0x1c] sm:$0xf] %v547_v7  ;;  %v551_v9 = vld [vmem:[%s8642_s20 + $0x48] sm:$0xf] }
  0xbd   : > { %550 = vst [vmem:[%s511_s9 + $0x20] sm:$0xf] %v549_v8  ;;  %v553_v10 = vld [vmem:[%s8642_s20 + $0x50] sm:$0xf]  ;;  %v555_v11 = vld [vmem:[%s8642_s20 + $0x58] sm:$0xf] }
  0xbe   : > { %552 = vst [vmem:[%s511_s9 + $0x24] sm:$0xf] %v551_v9  ;;  %554 = vst [vmem:[%s511_s9 + $0x28] sm:$0xf] %v553_v10  ;;  %v557_v12 = vld [vmem:[%s8642_s20 + $0x60] sm:$0xf] }
  0xbf   : > { %556 = vst [vmem:[%s511_s9 + $0x2c] sm:$0xf] %v555_v11  ;;  %v559_v13 = vld [vmem:[%s8642_s20 + $0x68] sm:$0xf]  ;;  %v561_v14 = vld [vmem:[%s8642_s20 + $0x70] sm:$0xf] }
  0xc0   : > { %558 = vst [vmem:[%s511_s9 + $0x30] sm:$0xf] %v557_v12  ;;  %560 = vst [vmem:[%s511_s9 + $0x34] sm:$0xf] %v559_v13  ;;  %v563_v15 = vld [vmem:[%s8642_s20 + $0x78] sm:$0xf] }
  0xc1   : > { %562 = vst [vmem:[%s511_s9 + $0x38] sm:$0xf] %v561_v14  ;;  %564 = vst [vmem:[%s511_s9 + $0x3c] sm:$0xf] %v563_v15 }
  0xc2 PF: > { %p11289_p6 = scmp.ne.s32.totalorder %s11281_s7, 0 }
  0xc3   : > { %s633_s11 = sand.u32 (!%p11289_p6), 1, %s8278_s21   ;;  %p11290_p10 = scmp.ne.s32.totalorder (!%p11289_p6), %s11280_s1, 0 }
  0xc4   : > { %630 = sbr.rel (%p11289_p6) target bundleno = 3885 (0xf2d), region = 117  ;;  %s6577_s27 = sshll.u32 (!%p11289_p6), %s633_s11, 6 }
  0xc5   : > { %s8663_s16 = scalar_lea.vmem (!%p11289_p6), [#allocation9], %s6577_s27 }
  0xcb   : > { %8249 = dma.done.wait (%p11290_p10), [#allocation11], 1024  }
  0xcc   : > { %8251 = vsyncadd (%p11290_p10), [#allocation11], 4294966272 }
  0xcd   : > { %8253 = dma.done.wait (%p11290_p10), [#allocation14], 2048  }
  0xce   : > { %8255 = vsyncadd (%p11290_p10), [#allocation14], 4294965248 }
  0xcf   : > { %8257 = dma.done.wait (%p11290_p10), [#allocation17], 1024  }
  0xd0   : > { %8259 = vsyncadd (%p11290_p10), [#allocation17], 4294966272  ;;  %s11291_s21 = sld [smem:[#allocation24_spill]]  ;;  %s11292_s7 = sld [smem:[#allocation28_spill]] }
  0xd1   : > { %s11293_s15 = sld [smem:[#allocation27_spill]]  ;;  %s11294_s25 = sld [smem:[#allocation26_spill]] }
  0xd2   : > { %s11295_s30 = sld [smem:[#allocation62_spill]] }
  0xd6   : > { %s11243_s17 = sand.u32 1, %s11291_s21   ;;  %p703_p1 = scmp.lt.s32.totalorder %s11292_s7, 1 }
  0xd7   : > { %s6582_s12 = sshll.u32 %s11243_s17, 7  ;;  %p710_p2 = scmp.eq.s32.totalorder %s11293_s15, 0 }
  0xd8   : > { %p711_p3 = scmp.eq.s32.totalorder %s11294_s25, 0  ;;  %s11403_s7 = smov (!%p703_p1, %s11292_s7), 1 }
  0xd9   : > { %s6764_s3 = sshll.u32 %s11403_s7, 7  ;;  %s8689_s5 = scalar_lea.vmem [#allocation18], %s6582_s12 }
  0xda   : > { %p712_p7 = pnand %p711_p3, %p710_p2  ;;  %s8687_s1 = scalar_lea.vmem %s11295_s30, %s6764_s3 }
  0xdb   : > { %v7600_v16 = vld [vmem:[%s8687_s1 + $0x4] ss:$8 sps:$4 sm:$0xff] (!%p712_p7)   ;;  %v7602_v17 = vld [vmem:[%s8687_s1] ss:$8 sps:$4 sm:$0xff] (!%p712_p7)   ;;  %v8318_v18 = vmov (!%p712_p7), 0   ;;  %s11296_s24 = sld [smem:[#allocation66_spill]] (!%p712_p7) }
  0xdc   : > { %715 = sbr.rel (%p712_p7) target bundleno = 529 (0x211), region = 141  ;;  %1004 = vmatprep.mubr.bf16.mxu0 (!%p712_p7), %v8318_v18  ;;  %1277 = vmatprep.mubr.bf16.mxu1 (!%p712_p7), %v8318_v18  ;;  %v7603_v19 = vld [vmem:[%s8687_s1 + $0x14] ss:$8 sps:$4 sm:$0xff] (!%p712_p7)   ;;  %v7605_v20 = vld [vmem:[%s8687_s1 + $0x10] ss:$8 sps:$4 sm:$0xff] (!%p712_p7)   ;;  %v7624_v41 = vld [vmem:[#allocation13] sm:$0xff] (!%p712_p7)  }
  0xdd   : > { %972 = vmatprep.subr.bf16.mxu0 (!%p712_p7), %v7600_v16  ;;  %1245 = vmatprep.subr.bf16.mxu1 (!%p712_p7), %v7600_v16  ;;  %v7606_v21 = vld [vmem:[%s8687_s1 + $0x24] ss:$8 sps:$4 sm:$0xff] (!%p712_p7)   ;;  %v7608_v22 = vld [vmem:[%s8687_s1 + $0x20] ss:$8 sps:$4 sm:$0xff] (!%p712_p7)   ;;  %v7609_v23 = vld [vmem:[%s8687_s1 + $0x34] ss:$8 sps:$4 sm:$0xff] (!%p712_p7)  }
  0xde   : > { %973 = vmatpush1.bf16.msra.mxu0 (!%p712_p7), %v7602_v17  ;;  %1246 = vmatpush1.bf16.msra.mxu1 (!%p712_p7), %v7602_v17  ;;  %v7611_v24 = vld [vmem:[%s8687_s1 + $0x30] ss:$8 sps:$4 sm:$0xff] (!%p712_p7)   ;;  %v7612_v25 = vld [vmem:[%s8687_s1 + $0x44] ss:$8 sps:$4 sm:$0xff] (!%p712_p7)   ;;  %v7614_v26 = vld [vmem:[%s8687_s1 + $0x40] ss:$8 sps:$4 sm:$0xff] (!%p712_p7)  }
  0xdf   : > { %974 = vmatprep.subr.bf16.mxu0 (!%p712_p7), %v7603_v19  ;;  %1247 = vmatprep.subr.bf16.mxu1 (!%p712_p7), %v7603_v19  ;;  %v7615_v27 = vld [vmem:[%s8687_s1 + $0x54] ss:$8 sps:$4 sm:$0xff] (!%p712_p7)   ;;  %v7617_v30 = vld [vmem:[%s8687_s1 + $0x50] ss:$8 sps:$4 sm:$0xff] (!%p712_p7)   ;;  %v7618_v33 = vld [vmem:[%s8687_s1 + $0x64] ss:$8 sps:$4 sm:$0xff] (!%p712_p7)  }
  0xe0   : > { %7599 = vset.pattern.permute.xlu1 (!%p712_p7), %v8318_v18  ;;  %7598 = vset.pattern.permute.xlu0 (!%p712_p7), %v8318_v18  ;;  %v7620_v35 = vld [vmem:[%s8687_s1 + $0x60] ss:$8 sps:$4 sm:$0xff] (!%p712_p7)   ;;  %v7621_v37 = vld [vmem:[%s8687_s1 + $0x74] ss:$8 sps:$4 sm:$0xff] (!%p712_p7)   ;;  %v7623_v38 = vld [vmem:[%s8687_s1 + $0x70] ss:$8 sps:$4 sm:$0xff] (!%p712_p7)  }
  0xe1   : > { %s11297_s9 = smov (!%p712_p7), %s11296_s24  ;;  %v750_v28 = vld [vmem:[%s11296_s24 + $0x10] sm:$0xff] (!%p712_p7)  ;;  %v7625_v42 = vld [vmem:[#allocation15] sm:$0xff] (!%p712_p7)   ;;  %v7626_v47 = vld [vmem:[#allocation13 + $0x8] sm:$0xff] (!%p712_p7)   ;;  %s11298_s13 = sld [smem:[#allocation68_spill]] (!%p712_p7)  ;;  %vm1422_vm0 = vcmask (!%p712_p7), 7168   ;;  %v8319_v17 = vmov (!%p712_p7), 0.0  }
  0xe2   : > { %975 = vmatpush1.bf16.msra.mxu0 (!%p712_p7), %v7605_v20  ;;  %1248 = vmatpush1.bf16.msra.mxu1 (!%p712_p7), %v7605_v20  ;;  %v748_v29 = vld [vmem:[%s11297_s9] sm:$0xff] (!%p712_p7)  ;;  %v751_v31 = vld [vmem:[%s11297_s9 + $0x18] sm:$0xff] (!%p712_p7)  ;;  %v749_v32 = vld [vmem:[%s11297_s9 + $0x8] sm:$0xff] (!%p712_p7)  ;;  %1423 = vst.msk [vmem:[#allocation7] sm:$0xff] (!%p712_p7), %vm1422_vm0, %v8319_v17 }
  0xe3   : > { %976 = vmatprep.subr.bf16.mxu0 %v7606_v21  ;;  %1249 = vmatprep.subr.bf16.mxu1 %v7606_v21  ;;  %v753_v34 = vld [vmem:[%s11297_s9 + $0x28] sm:$0xff]  ;;  %v752_v36 = vld [vmem:[%s11297_s9 + $0x20] sm:$0xff]  ;;  %v755_v39 = vld [vmem:[%s11297_s9 + $0x38] sm:$0xff]  ;;  %1424 = vst.msk [vmem:[#allocation7 + $0x8] sm:$0xff] %vm1422_vm0, %v8319_v17 }
  0xe4   : > { %776 = vperm.xlu1 %7599, %v750_v28   ;;  %766 = vperm.xlu0 %7598, %v748_v29   ;;  %v754_v40 = vld [vmem:[%s11297_s9 + $0x30] sm:$0xff]  ;;  %v757_v43 = vld [vmem:[%s11297_s9 + $0x48] sm:$0xff]  ;;  %v756_v44 = vld [vmem:[%s11297_s9 + $0x40] sm:$0xff]  ;;  %1425 = vst.msk [vmem:[#allocation7 + $0x10] sm:$0xff] %vm1422_vm0, %v8319_v17 }
  0xe5   : > { %v759_v45 = vld [vmem:[%s11297_s9 + $0x58] sm:$0xff]  ;;  %v758_v46 = vld [vmem:[%s11297_s9 + $0x50] sm:$0xff]  ;;  %v7627_v48 = vld [vmem:[#allocation15 + $0x8] sm:$0xff]   ;;  %1426 = vst.msk [vmem:[#allocation7 + $0x18] sm:$0xff] %vm1422_vm0, %v8319_v17 }
  0xe6   : > { %977 = vmatpush1.bf16.msra.mxu0 %v7608_v22  ;;  %1250 = vmatpush1.bf16.msra.mxu1 %v7608_v22  ;;  %v761_v49 = vld [vmem:[%s11297_s9 + $0x68] sm:$0xff]  ;;  %v760_v50 = vld [vmem:[%s11297_s9 + $0x60] sm:$0xff]  ;;  %v763_v51 = vld [vmem:[%s11297_s9 + $0x78] sm:$0xff]  ;;  %1427 = vst.msk [vmem:[#allocation7 + $0x20] sm:$0xff] %vm1422_vm0, %v8319_v17 }
  0xe7   : > { %978 = vmatprep.subr.bf16.mxu0 %v7609_v23  ;;  %1251 = vmatprep.subr.bf16.mxu1 %v7609_v23  ;;  %v762_v52 = vld [vmem:[%s11297_s9 + $0x70] sm:$0xff]  ;;  %v1102_v55 = vld [vmem:[%s11298_s13 + $0x8] sm:$0xff]  ;;  %v1101_v56 = vld [vmem:[%s11298_s13] sm:$0xff]  ;;  %1428 = vst.msk [vmem:[#allocation7 + $0x28] sm:$0xff] %vm1422_vm0, %v8319_v17 }
  0xe8   : > { %781 = vperm.xlu1 %7599, %v751_v31   ;;  %771 = vperm.xlu0 %7598, %v749_v32   ;;  %v7628_v53 = vld [vmem:[#allocation13 + $0x10] sm:$0xff]   ;;  %v1104_v57 = vld [vmem:[%s11298_s13 + $0x18] sm:$0xff]  ;;  %v1106_v61 = vld [vmem:[%s11298_s13 + $0x28] sm:$0xff]  ;;  %1429 = vst.msk [vmem:[#allocation7 + $0x30] sm:$0xff] %vm1422_vm0, %v8319_v17 }
  0xe9   : > { %v7629_v54 = vld [vmem:[#allocation15 + $0x10] sm:$0xff]   ;;  %v7630_v59 = vld [vmem:[#allocation13 + $0x18] sm:$0xff]   ;;  %v1105_v62 = vld [vmem:[%s11298_s13 + $0x20] sm:$0xff]  ;;  %1430 = vst.msk [vmem:[#allocation7 + $0x38] sm:$0xff] %vm1422_vm0, %v8319_v17 }
  0xea   : > { %979 = vmatpush1.bf16.msra.mxu0 %v7611_v24  ;;  %1252 = vmatpush1.bf16.msra.mxu1 %v7611_v24  ;;  %v1103_v58 = vld [vmem:[%s11298_s13 + $0x10] sm:$0xff]  ;;  %v7631_v60 = vld [vmem:[#allocation15 + $0x18] sm:$0xff]   ;;  %v7632_v1 = vld [vmem:[#allocation13 + $0x20] sm:$0xff]   ;;  %1431 = vst.msk [vmem:[#allocation7 + $0x40] sm:$0xff] %vm1422_vm0, %v8319_v17 }
  0xeb   : > { %980 = vmatprep.subr.bf16.mxu0 %v7612_v25  ;;  %1253 = vmatprep.subr.bf16.mxu1 %v7612_v25  ;;  %v1108_v63 = vld [vmem:[%s11298_s13 + $0x38] sm:$0xff]  ;;  %v1107_v0 = vld [vmem:[%s11298_s13 + $0x30] sm:$0xff]  ;;  %v7633_v2 = vld [vmem:[#allocation15 + $0x20] sm:$0xff]   ;;  %1432 = vst.msk [vmem:[#allocation7 + $0x48] sm:$0xff] %vm1422_vm0, %v8319_v17 }
  0xec   : > { %791 = vperm.xlu1 %7599, %v753_v34   ;;  %786 = vperm.xlu0 %7598, %v752_v36   ;;  %v1110_v3 = vld [vmem:[%s11298_s13 + $0x48] sm:$0xff]  ;;  %v1109_v4 = vld [vmem:[%s11298_s13 + $0x40] sm:$0xff]  ;;  %v1112_v5 = vld [vmem:[%s11298_s13 + $0x58] sm:$0xff]  ;;  %1433 = vst.msk [vmem:[#allocation7 + $0x50] sm:$0xff] %vm1422_vm0, %v8319_v17 }
  0xed   : > { %v1111_v6 = vld [vmem:[%s11298_s13 + $0x50] sm:$0xff]  ;;  %v7634_v7 = vld [vmem:[#allocation13 + $0x28] sm:$0xff]   ;;  %v1113_v10 = vld [vmem:[%s11298_s13 + $0x60] sm:$0xff]  ;;  %1434 = vst.msk [vmem:[#allocation7 + $0x58] sm:$0xff] %vm1422_vm0, %v8319_v17 }
  0xee   : > { %981 = vmatpush1.bf16.msra.mxu0 %v7614_v26  ;;  %1254 = vmatpush1.bf16.msra.mxu1 %v7614_v26  ;;  %v7635_v8 = vld [vmem:[#allocation15 + $0x28] sm:$0xff]   ;;  %v1116_v11 = vld [vmem:[%s11298_s13 + $0x78] sm:$0xff]  ;;  %v1115_v12 = vld [vmem:[%s11298_s13 + $0x70] sm:$0xff]  ;;  %1435 = vst.msk [vmem:[#allocation7 + $0x60] sm:$0xff] %vm1422_vm0, %v8319_v17 }
  0xef   : > { %982 = vmatprep.subr.bf16.mxu0 %v7615_v27  ;;  %1255 = vmatprep.subr.bf16.mxu1 %v7615_v27  ;;  %v1114_v9 = vld [vmem:[%s11298_s13 + $0x68] sm:$0xff]  ;;  %v7636_v13 = vld [vmem:[#allocation13 + $0x30] sm:$0xff]   ;;  %v7638_v15 = vld [vmem:[#allocation13 + $0x38] sm:$0xff]   ;;  %1436 = vst.msk [vmem:[#allocation7 + $0x68] sm:$0xff] %vm1422_vm0, %v8319_v17 }
  0xf0   : > { %801 = vperm.xlu1 %7599, %v755_v39   ;;  %796 = vperm.xlu0 %7598, %v754_v40   ;;  %v7637_v14 = vld [vmem:[#allocation15 + $0x30] sm:$0xff]   ;;  %v7639_v16 = vld [vmem:[#allocation15 + $0x38] sm:$0xff]   ;;  %1437 = vst.msk [vmem:[#allocation7 + $0x70] sm:$0xff] %vm1422_vm0, %v8319_v17  ;;  %1438 = vst.msk [vmem:[#allocation7 + $0x78] sm:$0xff] %vm1422_vm0, %v8319_v17 }
  0xf1   : > { %1439 = vst.msk [vmem:[#allocation7 + $0x80] sm:$0xff] %vm1422_vm0, %v8319_v17  ;;  %1440 = vst.msk [vmem:[#allocation7 + $0x88] sm:$0xff] %vm1422_vm0, %v8319_v17 }
  0xf2   : > { %983 = vmatpush1.bf16.msra.mxu0 %v7617_v30  ;;  %1256 = vmatpush1.bf16.msra.mxu1 %v7617_v30  ;;  %1441 = vst.msk [vmem:[#allocation7 + $0x90] sm:$0xff] %vm1422_vm0, %v8319_v17  ;;  %1442 = vst.msk [vmem:[#allocation7 + $0x98] sm:$0xff] %vm1422_vm0, %v8319_v17 }
  0xf3   : > { %984 = vmatprep.subr.bf16.mxu0 %v7618_v33  ;;  %1257 = vmatprep.subr.bf16.mxu1 %v7618_v33  ;;  %1443 = vst.msk [vmem:[#allocation7 + $0xa0] sm:$0xff] %vm1422_vm0, %v8319_v17  ;;  %1444 = vst.msk [vmem:[#allocation7 + $0xa8] sm:$0xff] %vm1422_vm0, %v8319_v17 }
  0xf4   : > { %811 = vperm.xlu1 %7599, %v757_v43   ;;  %806 = vperm.xlu0 %7598, %v756_v44   ;;  %1445 = vst.msk [vmem:[#allocation7 + $0xb0] sm:$0xff] %vm1422_vm0, %v8319_v17  ;;  %1446 = vst.msk [vmem:[#allocation7 + $0xb8] sm:$0xff] %vm1422_vm0, %v8319_v17 }
  0xf5   : > { %1447 = vst.msk [vmem:[#allocation7 + $0xc0] sm:$0xff] %vm1422_vm0, %v8319_v17  ;;  %1448 = vst.msk [vmem:[#allocation7 + $0xc8] sm:$0xff] %vm1422_vm0, %v8319_v17 }
  0xf6   : > { %985 = vmatpush1.bf16.msra.mxu0 %v7620_v35  ;;  %1258 = vmatpush1.bf16.msra.mxu1 %v7620_v35  ;;  %1449 = vst.msk [vmem:[#allocation7 + $0xd0] sm:$0xff] %vm1422_vm0, %v8319_v17  ;;  %1450 = vst.msk [vmem:[#allocation7 + $0xd8] sm:$0xff] %vm1422_vm0, %v8319_v17 }
  0xf7   : > { %986 = vmatprep.subr.bf16.mxu0 %v7621_v37  ;;  %1259 = vmatprep.subr.bf16.mxu1 %v7621_v37  ;;  %1451 = vst.msk [vmem:[#allocation7 + $0xe0] sm:$0xff] %vm1422_vm0, %v8319_v17  ;;  %1452 = vst.msk [vmem:[#allocation7 + $0xe8] sm:$0xff] %vm1422_vm0, %v8319_v17 }
  0xf8   : > { %821 = vperm.xlu1 %7599, %v759_v45   ;;  %816 = vperm.xlu0 %7598, %v758_v46   ;;  %1453 = vst.msk [vmem:[#allocation7 + $0xf0] sm:$0xff] %vm1422_vm0, %v8319_v17  ;;  %1454 = vst.msk [vmem:[#allocation7 + $0xf8] sm:$0xff] %vm1422_vm0, %v8319_v17 }
  0xf9   : > { %1455 = vst.msk [vmem:[#allocation8] sm:$0xff] %vm1422_vm0, %v8319_v17  ;;  %1456 = vst.msk [vmem:[#allocation8 + $0x8] sm:$0xff] %vm1422_vm0, %v8319_v17 }
  0xfa   : > { %987 = vmatpush1.bf16.msra.mxu0 %v7623_v38  ;;  %1260 = vmatpush1.bf16.msra.mxu1 %v7623_v38  ;;  %1457 = vst.msk [vmem:[#allocation8 + $0x10] sm:$0xff] %vm1422_vm0, %v8319_v17  ;;  %1458 = vst.msk [vmem:[#allocation8 + $0x18] sm:$0xff] %vm1422_vm0, %v8319_v17 }
  0xfb   : > { %1459 = vst.msk [vmem:[#allocation8 + $0x20] sm:$0xff] %vm1422_vm0, %v8319_v17  ;;  %1460 = vst.msk [vmem:[#allocation8 + $0x28] sm:$0xff] %vm1422_vm0, %v8319_v17 }
  0xfc   : > { %831 = vperm.xlu1 %7599, %v761_v49   ;;  %826 = vperm.xlu0 %7598, %v760_v50   ;;  %1461 = vst.msk [vmem:[#allocation8 + $0x30] sm:$0xff] %vm1422_vm0, %v8319_v17  ;;  %1462 = vst.msk [vmem:[#allocation8 + $0x38] sm:$0xff] %vm1422_vm0, %v8319_v17 }
  0xfd   : > { %1005 = vmatmul.mubr.bf16.vlgmr.msra.gmra.mrb[0].mxu0 %v7624_v41  ;;  %1278 = vmatmul.mubr.bf16.vlgmr.msra.gmra.mrb[0].mxu1 %v7625_v42  ;;  %1463 = vst.msk [vmem:[#allocation8 + $0x40] sm:$0xff] %vm1422_vm0, %v8319_v17  ;;  %1464 = vst.msk [vmem:[#allocation8 + $0x48] sm:$0xff] %vm1422_vm0, %v8319_v17 }
  0xfe   : > { %1014 = vmatprep.mubr.bf16.mxu0 %v8318_v18  ;;  %1287 = vmatprep.mubr.bf16.mxu1 %v8318_v18  ;;  %1465 = vst.msk [vmem:[#allocation8 + $0x50] sm:$0xff] %vm1422_vm0, %v8319_v17  ;;  %1466 = vst.msk [vmem:[#allocation8 + $0x58] sm:$0xff] %vm1422_vm0, %v8319_v17 }
  0xff   : > { %1467 = vst.msk [vmem:[#allocation8 + $0x60] sm:$0xff] %vm1422_vm0, %v8319_v17  ;;  %1468 = vst.msk [vmem:[#allocation8 + $0x68] sm:$0xff] %vm1422_vm0, %v8319_v17 }
 0x100   : > { %841 = vperm.xlu1 %7599, %v763_v51   ;;  %836 = vperm.xlu0 %7598, %v762_v52   ;;  %1469 = vst.msk [vmem:[#allocation8 + $0x70] sm:$0xff] %vm1422_vm0, %v8319_v17  ;;  %1470 = vst.msk [vmem:[#allocation8 + $0x78] sm:$0xff] %vm1422_vm0, %v8319_v17 }
 0x101   : > { %1471 = vst.msk [vmem:[#allocation8 + $0x80] sm:$0xff] %vm1422_vm0, %v8319_v17  ;;  %1472 = vst.msk [vmem:[#allocation8 + $0x88] sm:$0xff] %vm1422_vm0, %v8319_v17 }
 0x102   : > { %1473 = vst.msk [vmem:[#allocation8 + $0x90] sm:$0xff] %vm1422_vm0, %v8319_v17  ;;  %1474 = vst.msk [vmem:[#allocation8 + $0x98] sm:$0xff] %vm1422_vm0, %v8319_v17 }
 0x103   : > { %1475 = vst.msk [vmem:[#allocation8 + $0xa0] sm:$0xff] %vm1422_vm0, %v8319_v17  ;;  %1476 = vst.msk [vmem:[#allocation8 + $0xa8] sm:$0xff] %vm1422_vm0, %v8319_v17 }
 0x104   : > { %1124 = vperm.xlu1 %7599, %v1102_v55   ;;  %1119 = vperm.xlu0 %7598, %v1101_v56   ;;  %1477 = vst.msk [vmem:[#allocation8 + $0xb0] sm:$0xff] %vm1422_vm0, %v8319_v17  ;;  %1478 = vst.msk [vmem:[#allocation8 + $0xb8] sm:$0xff] %vm1422_vm0, %v8319_v17 }
 0x105   : > { %1015 = vmatmul.mubr.bf16.gmra.mrb[4].mxu0 %v7626_v47  ;;  %1288 = vmatmul.mubr.bf16.gmra.mrb[4].mxu1 %v7627_v48  ;;  %1479 = vst.msk [vmem:[#allocation8 + $0xc0] sm:$0xff] %vm1422_vm0, %v8319_v17  ;;  %1480 = vst.msk [vmem:[#allocation8 + $0xc8] sm:$0xff] %vm1422_vm0, %v8319_v17 }
 0x106   : > { %1024 = vmatprep.mubr.bf16.mxu0 %v8318_v18  ;;  %1297 = vmatprep.mubr.bf16.mxu1 %v8318_v18  ;;  %1481 = vst.msk [vmem:[#allocation8 + $0xd0] sm:$0xff] %vm1422_vm0, %v8319_v17  ;;  %1482 = vst.msk [vmem:[#allocation8 + $0xd8] sm:$0xff] %vm1422_vm0, %v8319_v17 }
 0x107   : > { %1483 = vst.msk [vmem:[#allocation8 + $0xe0] sm:$0xff] %vm1422_vm0, %v8319_v17  ;;  %1484 = vst.msk [vmem:[#allocation8 + $0xe8] sm:$0xff] %vm1422_vm0, %v8319_v17 }
 0x108   : > { %1134 = vperm.xlu1 %7599, %v1104_v57   ;;  %1129 = vperm.xlu0 %7598, %v1103_v58   ;;  %1485 = vst.msk [vmem:[#allocation8 + $0xf0] sm:$0xff] %vm1422_vm0, %v8319_v17  ;;  %1486 = vst.msk [vmem:[#allocation8 + $0xf8] sm:$0xff] %vm1422_vm0, %v8319_v17 }
 0x10c   : > { %1144 = vperm.xlu1 %7599, %v1106_v61   ;;  %1139 = vperm.xlu0 %7598, %v1105_v62  }
 0x10d   : > { %1025 = vmatmul.mubr.bf16.gmra.mrb[8].mxu0 %v7628_v53  ;;  %1298 = vmatmul.mubr.bf16.gmra.mrb[8].mxu1 %v7629_v54 }
 0x10e   : > { %1034 = vmatprep.mubr.bf16.mxu0 %v8318_v18  ;;  %1307 = vmatprep.mubr.bf16.mxu1 %v8318_v18 }
 0x110   : > { %1154 = vperm.xlu1 %7599, %v1108_v63   ;;  %1149 = vperm.xlu0 %7598, %v1107_v0  }
 0x114   : > { %1164 = vperm.xlu1 %7599, %v1110_v3   ;;  %1159 = vperm.xlu0 %7598, %v1109_v4  }
 0x115   : > { %1035 = vmatmul.mubr.bf16.gmra.mrb[12].mxu0 %v7630_v59  ;;  %1308 = vmatmul.mubr.bf16.gmra.mrb[12].mxu1 %v7631_v60 }
 0x116   : > { %1044 = vmatprep.mubr.bf16.mxu0 %v8318_v18  ;;  %1317 = vmatprep.mubr.bf16.mxu1 %v8318_v18 }
 0x118   : > { %1174 = vperm.xlu1 %7599, %v1112_v5   ;;  %1169 = vperm.xlu0 %7598, %v1111_v6  }
 0x11c   : > { %1184 = vperm.xlu1 %7599, %v1114_v9   ;;  %1179 = vperm.xlu0 %7598, %v1113_v10  }
 0x11d   : > { %1045 = vmatmul.mubr.bf16.gmra.mrb[16].mxu0 %v7632_v1  ;;  %1318 = vmatmul.mubr.bf16.gmra.mrb[16].mxu1 %v7633_v2 }
 0x11e   : > { %1054 = vmatprep.mubr.bf16.mxu0 %v8318_v18  ;;  %1327 = vmatprep.mubr.bf16.mxu1 %v8318_v18 }
 0x120   : > { %1194 = vperm.xlu1 %7599, %v1116_v11   ;;  %1189 = vperm.xlu0 %7598, %v1115_v12  }
 0x125   : > { %1055 = vmatmul.mubr.bf16.gmra.mrb[20].mxu0 %v7634_v7  ;;  %1328 = vmatmul.mubr.bf16.gmra.mrb[20].mxu1 %v7635_v8 }
 0x126   : > { %1064 = vmatprep.mubr.bf16.mxu0 %v8318_v18  ;;  %1337 = vmatprep.mubr.bf16.mxu1 %v8318_v18 }
 0x12d   : > { %1065 = vmatmul.mubr.bf16.gmra.mrb[24].mxu0 %v7636_v13  ;;  %1338 = vmatmul.mubr.bf16.gmra.mrb[24].mxu1 %v7637_v14 }
 0x12e   : > { %1074 = vmatprep.mubr.bf16.mxu0 %v8318_v18  ;;  %1347 = vmatprep.mubr.bf16.mxu1 %v8318_v18 }
 0x135   : > { %1075 = vmatmul.mubr.bf16.gmra.mrb[28].mxu0 %v7638_v15  ;;  %1348 = vmatmul.mubr.bf16.gmra.mrb[28].mxu1 %v7639_v16 }
 0x163   : > { %v777_v18 = vpop.permute.xlu1 %776  ;;  %v767_v19 = vpop.permute.xlu0 %766 }
 0x167   : > { %v782_v20 = vpop.permute.xlu1 %781  ;;  %v772_v21 = vpop.permute.xlu0 %771 }
 0x16b   : > { %v8949_v22 = vpop.permute.xlu1 %791  ;;  %v8951_v23 = vpop.permute.xlu0 %786 }
 0x16f   : > { %v8953_v24 = vpop.permute.xlu1 %801  ;;  %v8955_v25 = vpop.permute.xlu0 %796 }
 0x173   : > { %v8957_v26 = vpop.permute.xlu1 %811  ;;  %v8959_v27 = vpop.permute.xlu0 %806 }
 0x177   : > { %v8961_v28 = vpop.permute.xlu1 %821  ;;  %v8963_v29 = vpop.permute.xlu0 %816 }
 0x17b   : > { %v8965_v30 = vpop.permute.xlu1 %831  ;;  %v8967_v31 = vpop.permute.xlu0 %826 }
 0x17f   : > { %v8969_v32 = vpop.permute.xlu1 %841  ;;  %v8971_v33 = vpop.permute.xlu0 %836 }
 0x183   : > { %v1125_v34 = vpop.permute.xlu1 %1124  ;;  %v1120_v35 = vpop.permute.xlu0 %1119 }
 0x187   : > { %v1135_v56 = vpop.permute.xlu1 %1134  ;;  %v1130_v57 = vpop.permute.xlu0 %1129 }
 0x18b   : > { %v1145_v14 = vpop.permute.xlu1 %1144  ;;  %v1140_v15 = vpop.permute.xlu0 %1139 }
 0x1d0   : > { %v1006_v36 = vpop.f32.mrb[0].mxu0  ;;  %v1279_v37 = vpop.f32.mrb[0].mxu1 }
 0x1d1   : > { %v1008_v38 = vpop.f32.mrb[1].mxu0  ;;  %v1281_v39 = vpop.f32.mrb[1].mxu1  ;;  %v1007_v42 = vadd.f32 %v1006_v36, %v767_v19  ;;  %v1280_v43 = vadd.f32 %v1279_v37, %v1120_v35 }
 0x1d2   : > { %v1010_v40 = vpop.f32.mrb[2].mxu0  ;;  %v1283_v41 = vpop.f32.mrb[2].mxu1  ;;  %v1009_v48 = vadd.f32 %v1008_v38, %v767_v19  ;;  %v1282_v49 = vadd.f32 %v1281_v39, %v1120_v35 }
 0x1d3   : > { %v1011_v44 = vadd.f32 %v1010_v40, %v772_v21  ;;  %v1284_v45 = vadd.f32 %v1283_v41, %v1125_v34  ;;  %v1012_v46 = vpop.f32.mrb[3].mxu0  ;;  %v1285_v47 = vpop.f32.mrb[3].mxu1 }
 0x1d4   : > { %v1013_v50 = vadd.f32 %v1012_v46, %v772_v21  ;;  %v1286_v51 = vadd.f32 %v1285_v47, %v1125_v34 }
 0x1d5   : > { %v1358_v52 = vpack.c.bf16 %v1011_v44, %v1007_v42  ;;  %v1390_v53 = vpack.c.bf16 %v1284_v45, %v1280_v43 }
 0x1d6   : > { %v1359_v54 = vpack.c.bf16 %v1013_v50, %v1009_v48  ;;  %v1391_v55 = vpack.c.bf16 %v1286_v51, %v1282_v49  ;;  %v1155_v48 = vpop.permute.xlu1 %1154  ;;  %v1150_v49 = vpop.permute.xlu0 %1149 }
 0x1d7   : > { %1374 = vst [vmem:[#allocation2] sm:$0xff] %v1358_v52  ;;  %1406 = vst [vmem:[#allocation3] sm:$0xff] %v1390_v53 }
 0x1d8   : > { %1375 = vst [vmem:[#allocation2 + $0x8] sm:$0xff] %v1359_v54  ;;  %1407 = vst [vmem:[#allocation3 + $0x8] sm:$0xff] %v1391_v55  ;;  %v1016_v58 = vpop.f32.mrb[4].mxu0  ;;  %v1289_v59 = vpop.f32.mrb[4].mxu1 }
 0x1d9   : > { %v1018_v60 = vpop.f32.mrb[5].mxu0  ;;  %v1291_v61 = vpop.f32.mrb[5].mxu1  ;;  %v1017_v0 = vadd.f32 %v1016_v58, %v777_v18  ;;  %v1290_v1 = vadd.f32 %v1289_v59, %v1130_v57 }
 0x1da   : > { %v1020_v62 = vpop.f32.mrb[6].mxu0  ;;  %v1293_v63 = vpop.f32.mrb[6].mxu1  ;;  %v1019_v6 = vadd.f32 %v1018_v60, %v777_v18  ;;  %v1292_v7 = vadd.f32 %v1291_v61, %v1130_v57 }
 0x1db   : > { %v1021_v2 = vadd.f32 %v1020_v62, %v782_v20  ;;  %v1294_v3 = vadd.f32 %v1293_v63, %v1135_v56  ;;  %v1022_v4 = vpop.f32.mrb[7].mxu0  ;;  %v1295_v5 = vpop.f32.mrb[7].mxu1 }
 0x1dc   : > { %v1023_v8 = vadd.f32 %v1022_v4, %v782_v20  ;;  %v1296_v9 = vadd.f32 %v1295_v5, %v1135_v56  ;;  %v1165_v4 = vpop.permute.xlu1 %1164  ;;  %v1160_v5 = vpop.permute.xlu0 %1159 }
 0x1dd   : > { %v1360_v10 = vpack.c.bf16 %v1021_v2, %v1017_v0  ;;  %v1392_v11 = vpack.c.bf16 %v1294_v3, %v1290_v1 }
 0x1de   : > { %v1361_v12 = vpack.c.bf16 %v1023_v8, %v1019_v6  ;;  %v1393_v13 = vpack.c.bf16 %v1296_v9, %v1292_v7 }
 0x1df   : > { %1376 = vst [vmem:[#allocation2 + $0x10] sm:$0xff] %v1360_v10  ;;  %1408 = vst [vmem:[#allocation3 + $0x10] sm:$0xff] %v1392_v11 }
 0x1e0   : > { %1377 = vst [vmem:[#allocation2 + $0x18] sm:$0xff] %v1361_v12  ;;  %1409 = vst [vmem:[#allocation3 + $0x18] sm:$0xff] %v1393_v13  ;;  %v1026_v16 = vpop.f32.mrb[8].mxu0  ;;  %v1299_v17 = vpop.f32.mrb[8].mxu1 }
 0x1e1   : > { %v1028_v19 = vpop.f32.mrb[9].mxu0  ;;  %v1301_v21 = vpop.f32.mrb[9].mxu1  ;;  %v1027_v18 = vadd.f32 %v1026_v16, %v8951_v23  ;;  %v1300_v20 = vadd.f32 %v1299_v17, %v1140_v15 }
 0x1e2   : > { %v1030_v34 = vpop.f32.mrb[10].mxu0  ;;  %v1303_v35 = vpop.f32.mrb[10].mxu1  ;;  %v1029_v40 = vadd.f32 %v1028_v19, %v8951_v23  ;;  %v1302_v41 = vadd.f32 %v1301_v21, %v1140_v15 }
 0x1e3   : > { %v1031_v36 = vadd.f32 %v1030_v34, %v8949_v22  ;;  %v1304_v37 = vadd.f32 %v1303_v35, %v1145_v14  ;;  %v1032_v38 = vpop.f32.mrb[11].mxu0  ;;  %v1305_v39 = vpop.f32.mrb[11].mxu1 }
 0x1e4   : > { %v1033_v42 = vadd.f32 %v1032_v38, %v8949_v22  ;;  %v1306_v43 = vadd.f32 %v1305_v39, %v1145_v14 }
 0x1e5   : > { %v1362_v44 = vpack.c.bf16 %v1031_v36, %v1027_v18  ;;  %v1394_v45 = vpack.c.bf16 %v1304_v37, %v1300_v20  ;;  %v1175_v36 = vpop.permute.xlu1 %1174  ;;  %v1170_v37 = vpop.permute.xlu0 %1169 }
 0x1e6   : > { %v1363_v46 = vpack.c.bf16 %v1033_v42, %v1029_v40  ;;  %v1395_v47 = vpack.c.bf16 %v1306_v43, %v1302_v41 }
 0x1e7   : > { %1378 = vst [vmem:[#allocation2 + $0x20] sm:$0xff] %v1362_v44  ;;  %1410 = vst [vmem:[#allocation3 + $0x20] sm:$0xff] %v1394_v45 }
 0x1e8   : > { %1379 = vst [vmem:[#allocation2 + $0x28] sm:$0xff] %v1363_v46  ;;  %1411 = vst [vmem:[#allocation3 + $0x28] sm:$0xff] %v1395_v47  ;;  %v1036_v50 = vpop.f32.mrb[12].mxu0  ;;  %v1309_v51 = vpop.f32.mrb[12].mxu1 }
 0x1e9   : > { %v1038_v52 = vpop.f32.mrb[13].mxu0  ;;  %v1311_v53 = vpop.f32.mrb[13].mxu1  ;;  %v1037_v55 = vadd.f32 %v1036_v50, %v8955_v25  ;;  %v1310_v22 = vadd.f32 %v1309_v51, %v1150_v49 }
 0x1ea   : > { %v1040_v54 = vpop.f32.mrb[14].mxu0  ;;  %v1313_v23 = vpop.f32.mrb[14].mxu1  ;;  %v1039_v60 = vadd.f32 %v1038_v52, %v8955_v25  ;;  %v1312_v61 = vadd.f32 %v1311_v53, %v1150_v49 }
 0x1eb   : > { %v1041_v56 = vadd.f32 %v1040_v54, %v8953_v24  ;;  %v1314_v57 = vadd.f32 %v1313_v23, %v1155_v48  ;;  %v1042_v58 = vpop.f32.mrb[15].mxu0  ;;  %v1315_v59 = vpop.f32.mrb[15].mxu1 }
 0x1ec   : > { %v1043_v62 = vadd.f32 %v1042_v58, %v8953_v24  ;;  %v1316_v63 = vadd.f32 %v1315_v59, %v1155_v48 }
 0x1ed   : > { %v1364_v0 = vpack.c.bf16 %v1041_v56, %v1037_v55  ;;  %v1396_v1 = vpack.c.bf16 %v1314_v57, %v1310_v22  ;;  %v1185_v55 = vpop.permute.xlu1 %1184  ;;  %v1180_v22 = vpop.permute.xlu0 %1179 }
 0x1ee   : > { %v1365_v2 = vpack.c.bf16 %v1043_v62, %v1039_v60  ;;  %v1397_v3 = vpack.c.bf16 %v1316_v63, %v1312_v61 }
 0x1ef   : > { %1380 = vst [vmem:[#allocation2 + $0x30] sm:$0xff] %v1364_v0  ;;  %1412 = vst [vmem:[#allocation3 + $0x30] sm:$0xff] %v1396_v1 }
 0x1f0   : > { %1381 = vst [vmem:[#allocation2 + $0x38] sm:$0xff] %v1365_v2  ;;  %1413 = vst [vmem:[#allocation3 + $0x38] sm:$0xff] %v1397_v3  ;;  %v1046_v6 = vpop.f32.mrb[16].mxu0  ;;  %v1319_v7 = vpop.f32.mrb[16].mxu1 }
 0x1f1   : > { %v1048_v8 = vpop.f32.mrb[17].mxu0  ;;  %v1321_v9 = vpop.f32.mrb[17].mxu1  ;;  %v1047_v11 = vadd.f32 %v1046_v6, %v8959_v27  ;;  %v1320_v24 = vadd.f32 %v1319_v7, %v1160_v5 }
 0x1f2   : > { %v1050_v10 = vpop.f32.mrb[18].mxu0  ;;  %v1323_v25 = vpop.f32.mrb[18].mxu1  ;;  %v1049_v16 = vadd.f32 %v1048_v8, %v8959_v27  ;;  %v1322_v17 = vadd.f32 %v1321_v9, %v1160_v5 }
 0x1f3   : > { %v1051_v12 = vadd.f32 %v1050_v10, %v8957_v26  ;;  %v1324_v13 = vadd.f32 %v1323_v25, %v1165_v4  ;;  %v1052_v14 = vpop.f32.mrb[19].mxu0  ;;  %v1325_v15 = vpop.f32.mrb[19].mxu1 }
 0x1f4   : > { %v1053_v19 = vadd.f32 %v1052_v14, %v8957_v26  ;;  %v1326_v21 = vadd.f32 %v1325_v15, %v1165_v4  ;;  %v1195_v10 = vpop.permute.xlu1 %1194  ;;  %v1190_v25 = vpop.permute.xlu0 %1189 }
 0x1f5   : > { %v1366_v34 = vpack.c.bf16 %v1051_v12, %v1047_v11  ;;  %v1398_v35 = vpack.c.bf16 %v1324_v13, %v1320_v24 }
 0x1f6   : > { %v1367_v18 = vpack.c.bf16 %v1053_v19, %v1049_v16  ;;  %v1399_v20 = vpack.c.bf16 %v1326_v21, %v1322_v17 }
 0x1f7   : > { %1382 = vst [vmem:[#allocation2 + $0x40] sm:$0xff] %v1366_v34  ;;  %1414 = vst [vmem:[#allocation3 + $0x40] sm:$0xff] %v1398_v35 }
 0x1f8   : > { %1383 = vst [vmem:[#allocation2 + $0x48] sm:$0xff] %v1367_v18  ;;  %1415 = vst [vmem:[#allocation3 + $0x48] sm:$0xff] %v1399_v20  ;;  %v1056_v38 = vpop.f32.mrb[20].mxu0  ;;  %v1329_v39 = vpop.f32.mrb[20].mxu1 }
 0x1f9   : > { %v1058_v40 = vpop.f32.mrb[21].mxu0  ;;  %v1331_v41 = vpop.f32.mrb[21].mxu1  ;;  %v1057_v43 = vadd.f32 %v1056_v38, %v8963_v29  ;;  %v1330_v26 = vadd.f32 %v1329_v39, %v1170_v37 }
 0x1fa   : > { %v1060_v42 = vpop.f32.mrb[22].mxu0  ;;  %v1333_v27 = vpop.f32.mrb[22].mxu1  ;;  %v1059_v48 = vadd.f32 %v1058_v40, %v8963_v29  ;;  %v1332_v49 = vadd.f32 %v1331_v41, %v1170_v37 }
 0x1fb   : > { %v1061_v44 = vadd.f32 %v1060_v42, %v8961_v28  ;;  %v1334_v45 = vadd.f32 %v1333_v27, %v1175_v36  ;;  %v1062_v46 = vpop.f32.mrb[23].mxu0  ;;  %v1335_v47 = vpop.f32.mrb[23].mxu1 }
 0x1fc   : > { %v1063_v50 = vadd.f32 %v1062_v46, %v8961_v28  ;;  %v1336_v51 = vadd.f32 %v1335_v47, %v1175_v36 }
 0x1fd   : > { %v1368_v52 = vpack.c.bf16 %v1061_v44, %v1057_v43  ;;  %v1400_v53 = vpack.c.bf16 %v1334_v45, %v1330_v26 }
 0x1fe   : > { %v1369_v54 = vpack.c.bf16 %v1063_v50, %v1059_v48  ;;  %v1401_v23 = vpack.c.bf16 %v1336_v51, %v1332_v49 }
 0x1ff   : > { %1384 = vst [vmem:[#allocation2 + $0x50] sm:$0xff] %v1368_v52  ;;  %1416 = vst [vmem:[#allocation3 + $0x50] sm:$0xff] %v1400_v53 }
 0x200   : > { %1385 = vst [vmem:[#allocation2 + $0x58] sm:$0xff] %v1369_v54  ;;  %1417 = vst [vmem:[#allocation3 + $0x58] sm:$0xff] %v1401_v23  ;;  %v1066_v56 = vpop.f32.mrb[24].mxu0  ;;  %v1339_v57 = vpop.f32.mrb[24].mxu1 }
 0x201   : > { %v1068_v58 = vpop.f32.mrb[25].mxu0  ;;  %v1341_v59 = vpop.f32.mrb[25].mxu1  ;;  %v1067_v61 = vadd.f32 %v1066_v56, %v8967_v31  ;;  %v1340_v28 = vadd.f32 %v1339_v57, %v1180_v22 }
 0x202   : > { %v1070_v60 = vpop.f32.mrb[26].mxu0  ;;  %v1343_v29 = vpop.f32.mrb[26].mxu1  ;;  %v1069_v2 = vadd.f32 %v1068_v58, %v8967_v31  ;;  %v1342_v3 = vadd.f32 %v1341_v59, %v1180_v22 }
 0x203   : > { %v1071_v62 = vadd.f32 %v1070_v60, %v8965_v30  ;;  %v1344_v63 = vadd.f32 %v1343_v29, %v1185_v55  ;;  %v1072_v0 = vpop.f32.mrb[27].mxu0  ;;  %v1345_v1 = vpop.f32.mrb[27].mxu1 }
 0x204   : > { %v1073_v4 = vadd.f32 %v1072_v0, %v8965_v30  ;;  %v1346_v5 = vadd.f32 %v1345_v1, %v1185_v55 }
 0x205   : > { %v1370_v6 = vpack.c.bf16 %v1071_v62, %v1067_v61  ;;  %v1402_v7 = vpack.c.bf16 %v1344_v63, %v1340_v28 }
 0x206   : > { %v1371_v8 = vpack.c.bf16 %v1073_v4, %v1069_v2  ;;  %v1403_v9 = vpack.c.bf16 %v1346_v5, %v1342_v3 }
 0x207   : > { %1386 = vst [vmem:[#allocation2 + $0x60] sm:$0xff] %v1370_v6  ;;  %1418 = vst [vmem:[#allocation3 + $0x60] sm:$0xff] %v1402_v7 }
 0x208   : > { %1387 = vst [vmem:[#allocation2 + $0x68] sm:$0xff] %v1371_v8  ;;  %1419 = vst [vmem:[#allocation3 + $0x68] sm:$0xff] %v1403_v9  ;;  %v1076_v11 = vpop.f32.mrb[28].mxu0  ;;  %v1349_v24 = vpop.f32.mrb[28].mxu1 }
 0x209   : > { %v1078_v12 = vpop.f32.mrb[29].mxu0  ;;  %v1351_v13 = vpop.f32.mrb[29].mxu1  ;;  %v1077_v15 = vadd.f32 %v1076_v11, %v8971_v33  ;;  %v1350_v30 = vadd.f32 %v1349_v24, %v1190_v25 }
 0x20a   : > { %v1080_v14 = vpop.f32.mrb[30].mxu0  ;;  %v1353_v31 = vpop.f32.mrb[30].mxu1  ;;  %v1079_v34 = vadd.f32 %v1078_v12, %v8971_v33  ;;  %v1352_v35 = vadd.f32 %v1351_v13, %v1190_v25 }
 0x20b   : > { %v1081_v16 = vadd.f32 %v1080_v14, %v8969_v32  ;;  %v1354_v17 = vadd.f32 %v1353_v31, %v1195_v10  ;;  %v1082_v19 = vpop.f32.mrb[31].mxu0  ;;  %v1355_v21 = vpop.f32.mrb[31].mxu1 }
 0x20c   : > { %v1083_v18 = vadd.f32 %v1082_v19, %v8969_v32  ;;  %v1356_v20 = vadd.f32 %v1355_v21, %v1195_v10 }
 0x20d   : > { %v1372_v36 = vpack.c.bf16 %v1081_v16, %v1077_v15  ;;  %v1404_v37 = vpack.c.bf16 %v1354_v17, %v1350_v30 }
 0x20e   : > { %v1373_v38 = vpack.c.bf16 %v1083_v18, %v1079_v34  ;;  %v1405_v39 = vpack.c.bf16 %v1356_v20, %v1352_v35 }
 0x20f   : > { %1388 = vst [vmem:[#allocation2 + $0x70] sm:$0xff] %v1372_v36  ;;  %1420 = vst [vmem:[#allocation3 + $0x70] sm:$0xff] %v1404_v37 }
 0x210   : > { %1389 = vst [vmem:[#allocation2 + $0x78] sm:$0xff] %v1373_v38  ;;  %1421 = vst [vmem:[#allocation3 + $0x78] sm:$0xff] %v1405_v39 }
 0x211 PF: > { %s11299_s7 = sld [smem:[#allocation27_spill]] }
 0x217   : > { %p6617_p9 = scmp.ne.s32.totalorder %s11299_s7, 0 }
 0x219   : > { %1489 = sbr.rel (%p6617_p9) target bundleno = 3331 (0xd03), region = 145 }
 0x220   : > { %s11300_s12 = sld [smem:[#allocation64_spill]]  ;;  %v8320_v40 = vmov 0   ;;  %v7642_v41 = vld [vmem:[%s8663_s16] sm:$0xff]   ;;  %v7643_v43 = vld [vmem:[%s8663_s16 + $0x8] sm:$0xff]   ;;  %v7644_v26 = vld [vmem:[%s8663_s16 + $0x10] sm:$0xff]   ;;  %vm1874_vm1 = vcmask 261120  }
 0x221   : > { %7641 = vset.pattern.permute.xlu1 %v8320_v40  ;;  %7640 = vset.pattern.permute.xlu0 %v8320_v40  ;;  %v7645_v44 = vld [vmem:[%s8663_s16 + $0x18] sm:$0xff]   ;;  %v7650_v45 = vld [vmem:[#allocation10] sm:$0xff]   ;;  %v7647_v47 = vld [vmem:[%s8663_s16 + $0x28] sm:$0xff]   ;;  %s11306_s15 = sld [smem:[#allocation69_spill]]  ;;  %s11319_s25 = sld [smem:[#allocation72_spill]]  ;;  %vm5053_vm2 = vcmask 7168  }
 0x222   : > { %7093 = vmatprep.subr.bf16.mxu0 %v7642_v41  ;;  %7109 = vmatprep.mubr.bf16.mxu0 %v7650_v45  ;;  %v7646_v46 = vld [vmem:[%s8663_s16 + $0x20] sm:$0xff]   ;;  %v7648_v48 = vld [vmem:[%s8663_s16 + $0x30] sm:$0xff]   ;;  %v7649_v49 = vld [vmem:[%s8663_s16 + $0x38] sm:$0xff]   ;;  %s11357_s10 = sld [smem:[#allocation71_spill]]  ;;  %s11358_s19 = sld [smem:[#allocation70_spill]] }
 0x223   : > { %7094 = vmatpush3.bf16.msra.mxu0 %v7642_v41  ;;  %v7651_v50 = vld [vmem:[#allocation10 + $0x8] sm:$0xff]   ;;  %v7652_v51 = vld [vmem:[#allocation10 + $0x10] sm:$0xff]   ;;  %v1832_v52 = vld [vmem:[#allocation2] sm:$0xff]  ;;  %s11360_s20 = sld [smem:[#allocation26_spill]] }
 0x224   : > { %7095 = vmatprep.subr.bf16.mxu0 %v7643_v43  ;;  %v1834_v53 = vld [vmem:[#allocation2 + $0x10] sm:$0xff]  ;;  %v1833_v54 = vld [vmem:[#allocation2 + $0x8] sm:$0xff]  ;;  %v7653_v23 = vld [vmem:[#allocation10 + $0x18] sm:$0xff]  }
 0x225   : > { %v7654_v55 = vld [vmem:[#allocation10 + $0x20] sm:$0xff]   ;;  %v1835_v22 = vld [vmem:[#allocation2 + $0x18] sm:$0xff]  ;;  %v7655_v56 = vld [vmem:[#allocation10 + $0x28] sm:$0xff]  }
 0x226   : > { %v1524_v32 = vld [vmem:[%s11300_s12 + $0x10] sm:$0xff]  ;;  %v1522_v33 = vld [vmem:[%s11300_s12] sm:$0xff]  ;;  %v1525_v42 = vld [vmem:[%s11300_s12 + $0x18] sm:$0xff] }
 0x227   : > { %1550 = vperm.xlu1 %7641, %v1524_v32   ;;  %1540 = vperm.xlu0 %7640, %v1522_v33   ;;  %v1523_v27 = vld [vmem:[%s11300_s12 + $0x8] sm:$0xff]  ;;  %v7656_v57 = vld [vmem:[#allocation10 + $0x30] sm:$0xff]   ;;  %v7657_v58 = vld [vmem:[#allocation10 + $0x38] sm:$0xff]   ;;  %s11320_s3 = smov %s11319_s25 }
 0x228   : > { %7096 = vmatpush3.bf16.msra.mxu0 %v7643_v43  ;;  %v1527_v59 = vld [vmem:[%s11300_s12 + $0x28] sm:$0xff]  ;;  %v1526_v60 = vld [vmem:[%s11300_s12 + $0x20] sm:$0xff]  ;;  %v1529_v29 = vld [vmem:[%s11300_s12 + $0x38] sm:$0xff]  ;;  %s11359_s11 = smov %s11358_s19 }
 0x229   : > { %7097 = vmatprep.subr.bf16.mxu0 %v7644_v26  ;;  %v1528_v61 = vld [vmem:[%s11300_s12 + $0x30] sm:$0xff]  ;;  %v2334_v28 = vld [vmem:[#allocation2 + $0x20] sm:$0xff]  ;;  %v2335_v63 = vld [vmem:[#allocation2 + $0x28] sm:$0xff]  ;;  %s6738_s7 = sshll.u32 %s11360_s20, 7 }
 0x22a   : > { %v2336_v62 = vld [vmem:[#allocation2 + $0x30] sm:$0xff]  ;;  %v2337_v0 = vld [vmem:[#allocation2 + $0x38] sm:$0xff]  ;;  %v1531_v4 = vld [vmem:[%s11300_s12 + $0x48] sm:$0xff] }
 0x22b   : > { %1555 = vperm.xlu1 %7641, %v1525_v42   ;;  %1545 = vperm.xlu0 %7640, %v1523_v27   ;;  %v1530_v5 = vld [vmem:[%s11300_s12 + $0x40] sm:$0xff]  ;;  %v1533_v6 = vld [vmem:[%s11300_s12 + $0x58] sm:$0xff]  ;;  %v1532_v7 = vld [vmem:[%s11300_s12 + $0x50] sm:$0xff] }
 0x22c   : > { %7098 = vmatpush3.bf16.msra.mxu0 %v7644_v26  ;;  %v2836_v12 = vld [vmem:[#allocation2 + $0x40] sm:$0xff]  ;;  %v2838_v14 = vld [vmem:[#allocation2 + $0x50] sm:$0xff]  ;;  %v2837_v31 = vld [vmem:[#allocation2 + $0x48] sm:$0xff] }
 0x22d   : > { %7099 = vmatprep.subr.bf16.mxu0 %v7645_v44  ;;  %v2839_v16 = vld [vmem:[#allocation2 + $0x58] sm:$0xff]  ;;  %v1535_v39 = vld [vmem:[%s11300_s12 + $0x68] sm:$0xff]  ;;  %v1534_v32 = vld [vmem:[%s11300_s12 + $0x60] sm:$0xff] }
 0x22e   : > { %v1537_v33 = vld [vmem:[%s11300_s12 + $0x78] sm:$0xff]  ;;  %v1536_v40 = vld [vmem:[%s11300_s12 + $0x70] sm:$0xff] }
 0x230   : > { %7100 = vmatpush3.bf16.msra.mxu0 %v7645_v44 }
 0x231   : > { %7101 = vmatprep.subr.bf16.mxu0 %v7646_v46 }
 0x234   : > { %7102 = vmatpush3.bf16.msra.mxu0 %v7646_v46 }
 0x235   : > { %7103 = vmatprep.subr.bf16.mxu0 %v7647_v47 }
 0x238   : > { %7104 = vmatpush3.bf16.msra.mxu0 %v7647_v47 }
 0x239   : > { %7105 = vmatprep.subr.bf16.mxu0 %v7648_v48 }
 0x23c   : > { %7106 = vmatpush3.bf16.msra.mxu0 %v7648_v48 }
 0x23d   : > { %7107 = vmatprep.subr.bf16.mxu0 %v7649_v49 }
 0x240   : > { %7108 = vmatpush3.bf16.msra.mxu0 %v7649_v49 }
 0x243   : > { %7110 = vmatmul.mubr.bf16.vlgmr.msra.gmra.mrb[0].mxu0 %v7651_v50  ;;  %v3338_v50 = vld [vmem:[#allocation2 + $0x60] sm:$0xff] }
 0x244   : > { %7113 = vmatprep.mubr.bf16.mxu0 %v7652_v51 }
 0x249   : > { %1842 = vxpose.xlu0.c.b16.start [1/2] (short) %v1832_v52, 128 }
 0x24b   : > { %7114 = vmatmul.mubr.bf16.gmra.mrb[4].mxu0 %v7653_v23 }
 0x24c   : > { %7117 = vmatprep.mubr.bf16.mxu0 %v7654_v55 }
 0x24d   : > { %1843 = vxpose.xlu0.c.b16.end [2/2] (short) %v1834_v53, 128 }
 0x24e   : > { %1858 = vxpose.xlu1.c.b16.start [1/2] (short) %v1833_v54, 128 }
 0x252   : > { %1859 = vxpose.xlu1.c.b16.end [2/2] (short) %v1835_v22, 128 }
 0x253   : > { %7118 = vmatmul.mubr.bf16.gmra.mrb[8].mxu0 %v7655_v56 }
 0x254   : > { %7121 = vmatprep.mubr.bf16.mxu0 %v7656_v57 }
 0x25b   : > { %7122 = vmatmul.mubr.bf16.gmra.mrb[12].mxu0 %v7657_v58  ;;  %v3340_v58 = vld [vmem:[#allocation2 + $0x70] sm:$0xff] }
 0x26e   : > { %1565 = vperm.xlu1 %7641, %v1527_v59   ;;  %1560 = vperm.xlu0 %7640, %v1526_v60   ;;  %v3339_v60 = vld [vmem:[#allocation2 + $0x68] sm:$0xff] }
 0x272   : > { %1575 = vperm.xlu1 %7641, %v1529_v29   ;;  %1570 = vperm.xlu0 %7640, %v1528_v61  }
 0x290   : > { %2344 = vxpose.xlu0.c.b16.start [1/2] (short) %v2334_v28, 128 }
 0x294   : > { %2345 = vxpose.xlu0.c.b16.end [2/2] (short) %v2336_v62, 128 }
 0x295   : > { %2360 = vxpose.xlu1.c.b16.start [1/2] (short) %v2335_v63, 128 }
 0x299   : > { %2361 = vxpose.xlu1.c.b16.end [2/2] (short) %v2337_v0, 128  ;;  %v3341_v0 = vld [vmem:[#allocation2 + $0x78] sm:$0xff] }
 0x2a6   : > { %v9030_v1 = vpop.permute.xlu0 %1540  ;;  %v1551_v8 = vpop.permute.xlu1 %1550 }
 0x2aa   : > { %v9032_v2 = vpop.permute.xlu0 %1545  ;;  %v1556_v9 = vpop.permute.xlu1 %1555 }
 0x2af   : > { %v1850_v3 = vpop.trf.xlu0 }
 0x2b0   : > { %7129 = vmatprep.mubr.msk.bf16.mxu1 %vm1874_vm1, %v1850_v3 }
 0x2b3   : > { %v9049_v25 = vpop.trf.xlu0 }
 0x2b4   : > { %v9047_v10 = vpop.trf.xlu1 }
 0x2b5   : > { %1585 = vperm.xlu1 %7641, %v1531_v4   ;;  %1580 = vperm.xlu0 %7640, %v1530_v5  }
 0x2b7   : > { %v9053_v24 = vpop.trf.xlu0 }
 0x2b8   : > { %v9051_v11 = vpop.trf.xlu1 }
 0x2b9   : > { %1595 = vperm.xlu1 %7641, %v1533_v6   ;;  %1590 = vperm.xlu0 %7640, %v1532_v7  }
 0x2bb   : > { %v9057_v15 = vpop.trf.xlu0 }
 0x2bc   : > { %v9055_v13 = vpop.trf.xlu1 }
 0x2bf   : > { %v9061_v17 = vpop.trf.xlu0 }
 0x2c0   : > { %v9059_v30 = vpop.trf.xlu1 }
 0x2c3   : > { %v9065_v21 = vpop.trf.xlu0 }
 0x2c4   : > { %v9063_v19 = vpop.trf.xlu1 }
 0x2c7   : > { %v9069_v35 = vpop.trf.xlu0 }
 0x2c8   : > { %v9067_v34 = vpop.trf.xlu1 }
 0x2cb   : > { %v9073_v20 = vpop.trf.xlu0 }
 0x2cc   : > { %v9071_v18 = vpop.trf.xlu1 }
 0x2d0   : > { %v9075_v36 = vpop.trf.xlu1 }
 0x2d7   : > { %2846 = vxpose.xlu0.c.b16.start [1/2] (short) %v2836_v12, 128 }
 0x2db   : > { %2847 = vxpose.xlu0.c.b16.end [2/2] (short) %v2838_v14, 128 }
 0x2dc   : > { %2862 = vxpose.xlu1.c.b16.start [1/2] (short) %v2837_v31, 128 }
 0x2e0   : > { %2863 = vxpose.xlu1.c.b16.end [2/2] (short) %v2839_v16, 128 }
 0x2ed   : > { %v1561_v37 = vpop.permute.xlu0 %1560  ;;  %v1566_v38 = vpop.permute.xlu1 %1565 }
 0x2f1   : > { %v1571_v41 = vpop.permute.xlu0 %1570  ;;  %v1576_v42 = vpop.permute.xlu1 %1575 }
 0x2f6   : > { %v9089_v27 = vpop.trf.xlu0 }
 0x2fa   : > { %v9093_v26 = vpop.trf.xlu0 }
 0x2fb   : > { %v9091_v43 = vpop.trf.xlu1 }
 0x2fc   : > { %1605 = vperm.xlu1 %7641, %v1535_v39   ;;  %1600 = vperm.xlu0 %7640, %v1534_v32  }
 0x2fe   : > { %v9097_v45 = vpop.trf.xlu0 }
 0x2ff   : > { %v9095_v44 = vpop.trf.xlu1 }
 0x300   : > { %1615 = vperm.xlu1 %7641, %v1537_v33   ;;  %1610 = vperm.xlu0 %7640, %v1536_v40  }
 0x302   : > { %v9101_v47 = vpop.trf.xlu0 }
 0x303   : > { %v9099_v46 = vpop.trf.xlu1 }
 0x306   : > { %v9105_v51 = vpop.trf.xlu0 }
 0x307   : > { %v9103_v48 = vpop.trf.xlu1 }
 0x30a   : > { %v9111_v61 = vpop.trf.xlu0 }
 0x30b   : > { %v9107_v53 = vpop.trf.xlu1 }
 0x30e   : > { %v9115_v7 = vpop.trf.xlu0 }
 0x30f   : > { %v9113_v28 = vpop.trf.xlu1 }
 0x310   : > { %11301 = vst [vmem:[#allocation38_spill] sm:$0xff] %v9113_v28 }
 0x312   : > { %v9127_v16 = vpop.trf.xlu0 }
 0x316   : > { %v7111_v49 = vpop.f32.mrb[0].mxu0 }
 0x317   : > { %v1748_v52 = vpop.f32.mrb[1].mxu0  ;;  %v1757_v23 = vadd.f32 %v7111_v49, %v1551_v8 }
 0x318   : > { %v7112_v54 = vpop.f32.mrb[2].mxu0  ;;  %v1749_v56 = vadd.f32 %v1748_v52, %v9030_v1 }
 0x319   : > { %v1760_v55 = vadd.f32 %v7112_v54, %v1556_v9  ;;  %v1751_v22 = vpop.f32.mrb[3].mxu0  ;;  %v9119_v9 = vpop.trf.xlu1 }
 0x31a   : > { %v1752_v57 = vadd.f32 %v1751_v22, %v9032_v2  ;;  %11302 = vst [vmem:[#allocation39_spill] sm:$0xff] %v9119_v9 }
 0x31b   : > { %v1812_v59 = vpack.c.bf16 %v1760_v55, %v1757_v23 }
 0x31c   : > { %v1811_v29 = vpack.c.bf16 %v1752_v57, %v1749_v56  ;;  %v7660_v56 = vld [vmem:[#allocation16 + $0x10] sm:$0xff]   ;;  %v3858_v57 = vld [vmem:[%s11306_s15] sm:$0xff] }
 0x31e   : > { %3348 = vxpose.xlu0.c.b16.start [1/2] (short) %v3338_v50, 128  ;;  %v7115_v62 = vpop.f32.mrb[4].mxu0  ;;  %7125 = vmatprep.subr.bf16.mxu1 %v1811_v29  ;;  %v7658_v50 = vld [vmem:[#allocation16] sm:$0xff]  }
 0x31f   : > { %v1764_v63 = vpop.f32.mrb[5].mxu0  ;;  %7126 = vmatpush3.bf16.msra.mxu1 %v1811_v29  ;;  %v1773_v1 = vadd.f32 %v7115_v62, %v1571_v41  ;;  %v7664_v62 = vld [vmem:[#allocation16 + $0x30] sm:$0xff]  }
 0x320   : > { %v7116_v3 = vpop.f32.mrb[6].mxu0  ;;  %7127 = vmatprep.subr.bf16.mxu1 %v1812_v59  ;;  %v1765_v5 = vadd.f32 %v1764_v63, %v1561_v37  ;;  %v3862_v63 = vld [vmem:[%s11306_s15 + $0x20] sm:$0xff] }
 0x321   : > { %v1776_v4 = vadd.f32 %v7116_v3, %v1576_v42  ;;  %v1767_v2 = vpop.f32.mrb[7].mxu0 }
 0x322   : > { %3349 = vxpose.xlu0.c.b16.end [2/2] (short) %v3340_v58, 128  ;;  %v1768_v6 = vadd.f32 %v1767_v2, %v1566_v38  ;;  %v9129_v38 = vpop.trf.xlu1  ;;  %v7661_v58 = vld [vmem:[#allocation16 + $0x18] sm:$0xff]  }
 0x323   : > { %3364 = vxpose.xlu1.c.b16.start [1/2] (short) %v3339_v60, 128  ;;  %v9117_v8 = vpack.c.bf16 %v1776_v4, %v1773_v1  ;;  %7128 = vmatpush3.bf16.msra.mxu1 %v1812_v59  ;;  %11303 = vst [vmem:[#allocation40_spill] sm:$0xff] %v9129_v38  ;;  %v3860_v59 = vld [vmem:[%s11306_s15 + $0x10] sm:$0xff]  ;;  %v7663_v60 = vld [vmem:[#allocation16 + $0x28] sm:$0xff]   ;;  %v3865_v2 = vld [vmem:[%s11306_s15 + $0x38] sm:$0xff] }
 0x324   : > { %v9121_v12 = vpack.c.bf16 %v1768_v6, %v1765_v5 }
 0x326   : > { %7130 = vmatmul.mubr.msk.bf16.vlgmr.msra.gmra.mrb[0].mxu1 %vm1874_vm1, %v9049_v25  ;;  %v7119_v14 = vpop.f32.mrb[8].mxu0 }
 0x327   : > { %3365 = vxpose.xlu1.c.b16.end [2/2] (short) %v3341_v0, 128  ;;  %7133 = vmatprep.mubr.msk.bf16.mxu1 %vm1874_vm1, %v9053_v24  ;;  %v1780_v31 = vpop.f32.mrb[9].mxu0 }
 0x328   : > { %v7120_v37 = vpop.f32.mrb[10].mxu0 }
 0x329   : > { %v1783_v39 = vpop.f32.mrb[11].mxu0 }
 0x32e   : > { %7134 = vmatmul.mubr.msk.bf16.gmra.mrb[4].mxu1 %vm1874_vm1, %v9057_v15  ;;  %v9133_v32 = vpop.f32.mrb[12].mxu0 }
 0x32f   : > { %7137 = vmatprep.mubr.msk.bf16.mxu1 %vm1874_vm1, %v9061_v17  ;;  %v9137_v24 = vpop.f32.mrb[13].mxu0  ;;  %v7659_v17 = vld [vmem:[#allocation16 + $0x8] sm:$0xff]  }
 0x330   : > { %v9139_v42 = vpop.f32.mrb[14].mxu0 }
 0x331   : > { %v9143_v52 = vpop.f32.mrb[15].mxu0 }
 0x334   : > { %v1586_v33 = vpop.permute.xlu1 %1585  ;;  %v1581_v40 = vpop.permute.xlu0 %1580 }
 0x335   : > { %v1781_v25 = vadd.f32 %v1780_v31, %v1581_v40  ;;  %v1784_v41 = vadd.f32 %v1783_v39, %v1586_v33  ;;  %v3870_v39 = vld [vmem:[%s11306_s15 + $0x60] sm:$0xff]  ;;  %v3871_v33 = vld [vmem:[%s11306_s15 + $0x68] sm:$0xff]  ;;  %v3872_v40 = vld [vmem:[%s11306_s15 + $0x70] sm:$0xff] }
 0x336   : > { %7138 = vmatmul.mubr.msk.bf16.gmra.mrb[8].mxu1 %vm1874_vm1, %v9065_v21  ;;  %v3859_v21 = vld [vmem:[%s11306_s15 + $0x8] sm:$0xff] }
 0x337   : > { %v9141_v49 = vpack.c.bf16 %v1784_v41, %v1781_v25  ;;  %7141 = vmatprep.mubr.msk.bf16.mxu1 %vm1874_vm1, %v9069_v35  ;;  %v7662_v35 = vld [vmem:[#allocation16 + $0x20] sm:$0xff]   ;;  %v3873_v41 = vld [vmem:[%s11306_s15 + $0x78] sm:$0xff] }
 0x338   : > { %v1596_v54 = vpop.permute.xlu1 %1595  ;;  %v1591_v15 = vpop.permute.xlu0 %1590 }
 0x339   : > { %11304 = vst [vmem:[#allocation41_spill] sm:$0xff] %v9141_v49  ;;  %v1792_v23 = vadd.f32 %v7120_v37, %v1596_v54  ;;  %v1789_v55 = vadd.f32 %v7119_v14, %v1591_v15  ;;  %v3868_v14 = vld [vmem:[%s11306_s15 + $0x50] sm:$0xff]  ;;  %v3869_v37 = vld [vmem:[%s11306_s15 + $0x58] sm:$0xff] }
 0x33b   : > { %v9145_v22 = vpack.c.bf16 %v1792_v23, %v1789_v55  ;;  %4002 = vxpose.xlu0.c.b16.start [1/8] %v7658_v50, 128  ;;  %v4701_v50 = vld [vmem:[%s11319_s25] sm:$0xff]  ;;  %v4702_v23 = vld [vmem:[%s11320_s3 + $0x8] sm:$0xff]  ;;  %v4703_v55 = vld [vmem:[%s11320_s3 + $0x10] sm:$0xff]  ;;  %s5295_s25 = sshra.s32 %s6738_s7, 7 }
 0x33d   : > { %11305 = vst [vmem:[#allocation42_spill] sm:$0xff] %v9145_v22 }
 0x33e   : > { %7142 = vmatmul.mubr.msk.bf16.gmra.mrb[12].mxu1 %vm1874_vm1, %v9073_v20  ;;  %v9166_v20 = vpop.trf.xlu0 }
 0x33f   : > { %4003 = vxpose.xlu0.c.b16.cont [2/8] %v7659_v17, 128  ;;  %7145 = vmatprep.mubr.msk.bf16.mxu1 %vm1874_vm1, %v9047_v10  ;;  %11308 = vst [vmem:[#allocation44_spill] sm:$0xff] %v9166_v20  ;;  %v3861_v10 = vld [vmem:[%s11306_s15 + $0x18] sm:$0xff] }
 0x340   : > { %v4704_v17 = vld [vmem:[%s11320_s3 + $0x18] sm:$0xff] }
 0x342   : > { %v9164_v29 = vpop.trf.xlu1  ;;  %v9180_v3 = vpop.trf.xlu0 }
 0x343   : > { %3876 = vperm.xlu1 %7641, %v3858_v57   ;;  %4004 = vxpose.xlu0.c.b16.cont [3/8] %v7660_v56, 128  ;;  %11307 = vst [vmem:[#allocation43_spill] sm:$0xff] %v9164_v29  ;;  %11310 = vst [vmem:[#allocation46_spill] sm:$0xff] %v9180_v3 }
 0x346   : > { %7146 = vmatmul.mubr.msk.bf16.gmra.mrb[16].mxu1 %vm1874_vm1, %v9051_v11  ;;  %v9178_v0 = vpop.trf.xlu1  ;;  %v7665_v11 = vld [vmem:[#allocation16 + $0x38] sm:$0xff]   ;;  %v9191_v4 = vpop.trf.xlu0 }
 0x347   : > { %3881 = vperm.xlu1 %7641, %v3859_v21   ;;  %4005 = vxpose.xlu0.c.b16.cont [4/8] %v7661_v58, 128  ;;  %11309 = vst [vmem:[#allocation45_spill] sm:$0xff] %v9178_v0  ;;  %11312 = vst [vmem:[#allocation48_spill] sm:$0xff] %v9191_v4  ;;  %v4705_v58 = vld [vmem:[%s11320_s3 + $0x20] sm:$0xff]  ;;  %v4706_v21 = vld [vmem:[%s11320_s3 + $0x28] sm:$0xff] }
 0x348   : > { %7149 = vmatprep.mubr.msk.bf16.mxu1 %vm1874_vm1, %v9055_v13  ;;  %v3863_v13 = vld [vmem:[%s11306_s15 + $0x28] sm:$0xff] }
 0x34a   : > { %v9189_v1 = vpop.trf.xlu1  ;;  %v9208_v6 = vpop.trf.xlu0 }
 0x34b   : > { %3886 = vperm.xlu1 %7641, %v3860_v59   ;;  %4006 = vxpose.xlu0.c.b16.cont [5/8] %v7662_v35, 128  ;;  %11311 = vst [vmem:[#allocation47_spill] sm:$0xff] %v9189_v1  ;;  %11314 = vst [vmem:[#allocation50_spill] sm:$0xff] %v9208_v6  ;;  %v4707_v35 = vld [vmem:[%s11320_s3 + $0x30] sm:$0xff] }
 0x34e   : > { %7150 = vmatmul.mubr.msk.bf16.gmra.mrb[20].mxu1 %vm1874_vm1, %v9059_v30  ;;  %v3866_v30 = vld [vmem:[%s11306_s15 + $0x40] sm:$0xff]  ;;  %v9206_v5 = vpop.trf.xlu1  ;;  %v9218_v31 = vpop.trf.xlu0 }
 0x34f   : > { %3891 = vperm.xlu1 %7641, %v3861_v10   ;;  %4007 = vxpose.xlu0.c.b16.cont [6/8] %v7663_v60, 128  ;;  %11313 = vst [vmem:[#allocation49_spill] sm:$0xff] %v9206_v5  ;;  %11316 = vst [vmem:[#allocation52_spill] sm:$0xff] %v9218_v31 }
 0x350   : > { %7153 = vmatprep.mubr.msk.bf16.mxu1 %vm1874_vm1, %v9063_v19  ;;  %v3864_v19 = vld [vmem:[%s11306_s15 + $0x30] sm:$0xff] }
 0x352   : > { %v9236_v25 = vpop.trf.xlu0 }
 0x353   : > { %3896 = vperm.xlu1 %7641, %v3862_v63   ;;  %4008 = vxpose.xlu0.c.b16.cont [7/8] %v7664_v62, 128  ;;  %11318 = vst [vmem:[#allocation54_spill] sm:$0xff] %v9236_v25  ;;  %v4708_v63 = vld [vmem:[%s11320_s3 + $0x38] sm:$0xff] }
 0x356   : > { %7154 = vmatmul.mubr.msk.bf16.gmra.mrb[24].mxu1 %vm1874_vm1, %v9067_v34  ;;  %v3867_v34 = vld [vmem:[%s11306_s15 + $0x48] sm:$0xff]  ;;  %v9246_v15 = vpop.trf.xlu0 }
 0x357   : > { %3901 = vperm.xlu1 %7641, %v3863_v13   ;;  %4009 = vxpose.xlu0.c.b16.end [8/8] %v7665_v11, 128  ;;  %11322 = vst [vmem:[#allocation56_spill] sm:$0xff] %v9246_v15  ;;  %v4709_v11 = vld [vmem:[%s11320_s3 + $0x40] sm:$0xff] }
 0x358   : > { %7157 = vmatprep.mubr.msk.bf16.mxu1 %vm1874_vm1, %v9071_v18  ;;  %v9216_v18 = vpop.trf.xlu1 }
 0x359   : > { %11315 = vst [vmem:[#allocation51_spill] sm:$0xff] %v9216_v18 }
 0x35a   : > { %v9259_v57 = vpop.trf.xlu0 }
 0x35b   : > { %3911 = vperm.xlu1 %7641, %v3865_v2   ;;  %11324 = vst [vmem:[#allocation58_spill] sm:$0xff] %v9259_v57 }
 0x35e   : > { %7158 = vmatmul.mubr.msk.bf16.gmra.mrb[28].mxu1 %vm1874_vm1, %v9075_v36  ;;  %v9234_v36 = vpop.trf.xlu1 }
 0x35f   : > { %3916 = vperm.xlu1 %7641, %v3866_v30   ;;  %11317 = vst [vmem:[#allocation53_spill] sm:$0xff] %v9234_v36 }
 0x360   : > { %3906 = vperm.xlu0 %7640, %v3864_v19  }
 0x362   : > { %v9244_v54 = vpop.trf.xlu1 }
 0x363   : > { %3921 = vperm.xlu1 %7641, %v3867_v34   ;;  %11321 = vst [vmem:[#allocation55_spill] sm:$0xff] %v9244_v54  ;;  %v4711_v34 = vld [vmem:[%s11320_s3 + $0x50] sm:$0xff] }
 0x364   : > { %3926 = vperm.xlu0 %7640, %v3868_v14  }
 0x366   : > { %v9257_v56 = vpop.trf.xlu1 }
 0x367   : > { %3931 = vperm.xlu1 %7641, %v3869_v37   ;;  %11323 = vst [vmem:[#allocation57_spill] sm:$0xff] %v9257_v56  ;;  %v4712_v37 = vld [vmem:[%s11320_s3 + $0x58] sm:$0xff]  ;;  %v1839_v56 = vld [vmem:[#allocation3 + $0x8] sm:$0xff] }
 0x368   : > { %3936 = vperm.xlu0 %7640, %v3870_v39   ;;  %v4715_v39 = vld [vmem:[%s11320_s3 + $0x70] sm:$0xff]  ;;  %2303 = vmatprep.mubr.bf16.mxu0 %v1839_v56 }
 0x36b   : > { %3941 = vperm.xlu1 %7641, %v3871_v33   ;;  %v4716_v33 = vld [vmem:[%s11320_s3 + $0x78] sm:$0xff] }
 0x36c   : > { %3946 = vperm.xlu0 %7640, %v3872_v40   ;;  %v4717_v40 = vld [vmem:[%s11320_s3 + $0x80] sm:$0xff] }
 0x36f   : > { %3951 = vperm.xlu1 %7641, %v3873_v41   ;;  %v4718_v41 = vld [vmem:[%s11320_s3 + $0x88] sm:$0xff] }
 0x370   : > { %4735 = vperm.xlu0 %7640, %v4701_v50   ;;  %v4719_v50 = vld [vmem:[%s11320_s3 + $0x90] sm:$0xff] }
 0x373   : > { %4740 = vperm.xlu1 %7641, %v4702_v23   ;;  %v4720_v23 = vld [vmem:[%s11320_s3 + $0x98] sm:$0xff] }
 0x374   : > { %4745 = vperm.xlu0 %7640, %v4703_v55   ;;  %v4721_v55 = vld [vmem:[%s11320_s3 + $0xa0] sm:$0xff] }
 0x377   : > { %4750 = vperm.xlu1 %7641, %v4704_v17   ;;  %v4722_v17 = vld [vmem:[%s11320_s3 + $0xa8] sm:$0xff] }
 0x378   : > { %4755 = vperm.xlu0 %7640, %v4705_v58   ;;  %v4723_v58 = vld [vmem:[%s11320_s3 + $0xb0] sm:$0xff] }
 0x37b   : > { %4760 = vperm.xlu1 %7641, %v4706_v21   ;;  %v1606_v59 = vpop.permute.xlu1 %1605  ;;  %v1601_v60 = vpop.permute.xlu0 %1600  ;;  %v4724_v21 = vld [vmem:[%s11320_s3 + $0xb8] sm:$0xff] }
 0x37c   : > { %v1797_v10 = vadd.f32 %v9137_v24, %v1601_v60  ;;  %v1800_v62 = vadd.f32 %v9143_v52, %v1606_v59  ;;  %4765 = vperm.xlu0 %7640, %v4707_v35   ;;  %v4710_v52 = vld [vmem:[%s11320_s3 + $0x48] sm:$0xff]  ;;  %v4725_v35 = vld [vmem:[%s11320_s3 + $0xc0] sm:$0xff]  ;;  %v4727_v60 = vld [vmem:[%s11320_s3 + $0xd0] sm:$0xff] }
 0x37d   : > { %v4726_v59 = vld [vmem:[%s11320_s3 + $0xc8] sm:$0xff] }
 0x37e   : > { %v9278_v13 = vpack.c.bf16 %v1800_v62, %v1797_v10  ;;  %v4728_v10 = vld [vmem:[%s11320_s3 + $0xd8] sm:$0xff]  ;;  %v4729_v62 = vld [vmem:[%s11320_s3 + $0xe0] sm:$0xff] }
 0x37f   : > { %4770 = vperm.xlu1 %7641, %v4708_v63   ;;  %v1616_v2 = vpop.permute.xlu1 %1615  ;;  %v1611_v30 = vpop.permute.xlu0 %1610  ;;  %v4730_v63 = vld [vmem:[%s11320_s3 + $0xe8] sm:$0xff] }
 0x380   : > { %11325 = vst [vmem:[#allocation59_spill] sm:$0xff] %v9278_v13  ;;  %v1808_v19 = vadd.f32 %v9139_v42, %v1616_v2  ;;  %v1805_v24 = vadd.f32 %v9133_v32, %v1611_v30  ;;  %4775 = vperm.xlu0 %7640, %v4709_v11   ;;  %v4713_v32 = vld [vmem:[%s11320_s3 + $0x60] sm:$0xff]  ;;  %v4714_v42 = vld [vmem:[%s11320_s3 + $0x68] sm:$0xff]  ;;  %v4731_v11 = vld [vmem:[%s11320_s3 + $0xf0] sm:$0xff] }
 0x381   : > { %v4732_v2 = vld [vmem:[%s11320_s3 + $0xf8] sm:$0xff] }
 0x382   : > { %v9288_v14 = vpack.c.bf16 %v1808_v19, %v1805_v24 }
 0x383   : > { %4780 = vperm.xlu1 %7641, %v4710_v52  }
 0x384   : > { %11326 = vst [vmem:[#allocation60_spill] sm:$0xff] %v9288_v14  ;;  %4785 = vperm.xlu0 %7640, %v4711_v34  }
 0x387   : > { %4790 = vperm.xlu1 %7641, %v4712_v37  }
 0x388   : > { %4795 = vperm.xlu0 %7640, %v4713_v32  }
 0x38b   : > { %4800 = vperm.xlu1 %7641, %v4714_v42  }
 0x38c   : > { %4805 = vperm.xlu0 %7640, %v4715_v39  }
 0x38f   : > { %4810 = vperm.xlu1 %7641, %v4716_v33  }
 0x390   : > { %4815 = vperm.xlu0 %7640, %v4717_v40  }
 0x393   : > { %4820 = vperm.xlu1 %7641, %v4718_v41  }
 0x394   : > { %4825 = vperm.xlu0 %7640, %v4719_v50  }
 0x397   : > { %4830 = vperm.xlu1 %7641, %v4720_v23  }
 0x398   : > { %4835 = vperm.xlu0 %7640, %v4721_v55  }
 0x39b   : > { %4840 = vperm.xlu1 %7641, %v4722_v17  }
 0x39c   : > { %4845 = vperm.xlu0 %7640, %v4723_v58  }
 0x39f   : > { %4850 = vperm.xlu1 %7641, %v4724_v21  }
 0x3a0   : > { %4855 = vperm.xlu0 %7640, %v4725_v35  }
 0x3a3   : > { %4860 = vperm.xlu1 %7641, %v4726_v59  }
 0x3a4   : > { %4865 = vperm.xlu0 %7640, %v4727_v60  }
 0x3a7   : > { %4870 = vperm.xlu1 %7641, %v4728_v10  }
 0x3a8   : > { %4875 = vperm.xlu0 %7640, %v4729_v62  }
 0x3ab   : > { %4880 = vperm.xlu1 %7641, %v4730_v63  }
 0x3ac   : > { %4885 = vperm.xlu0 %7640, %v4731_v11  }
 0x3af   : > { %4890 = vperm.xlu1 %7641, %v4732_v2  }
 0x3f9   : > { %v9353_v30 = vpop.f32.mrb[0].mxu1 }
 0x3fa   : > { %v9355_v19 = vpop.f32.mrb[1].mxu1 }
 0x3fb   : > { %v9357_v24 = vpop.f32.mrb[2].mxu1 }
 0x3fc   : > { %v9359_v52 = vpop.f32.mrb[3].mxu1 }
 0x401   : > { %v9361_v34 = vpop.f32.mrb[4].mxu1 }
 0x402   : > { %v2086_v37 = vmax.f32 %v9353_v30, %v9361_v34  ;;  %v9365_v32 = vpop.f32.mrb[5].mxu1 }
 0x403   : > { %v2084_v42 = vmax.f32 %v9355_v19, %v9365_v32  ;;  %v9369_v39 = vpop.f32.mrb[6].mxu1 }
 0x404   : > { %v2087_v33 = vmax.f32 %v9357_v24, %v9369_v39  ;;  %v9373_v40 = vpop.f32.mrb[7].mxu1 }
 0x405   : > { %v2085_v41 = vmax.f32 %v9359_v52, %v9373_v40 }
 0x409   : > { %v9377_v50 = vpop.f32.mrb[8].mxu1 }
 0x40a   : > { %v2090_v23 = vmax.f32 %v2086_v37, %v9377_v50  ;;  %v9380_v55 = vpop.f32.mrb[9].mxu1 }
 0x40b   : > { %v2088_v17 = vmax.f32 %v2084_v42, %v9380_v55  ;;  %v9383_v58 = vpop.f32.mrb[10].mxu1 }
 0x40c   : > { %v2091_v21 = vmax.f32 %v2087_v33, %v9383_v58  ;;  %v9386_v35 = vpop.f32.mrb[11].mxu1 }
 0x40d   : > { %v2089_v59 = vmax.f32 %v2085_v41, %v9386_v35 }
 0x411   : > { %v9389_v60 = vpop.f32.mrb[12].mxu1 }
 0x412   : > { %v2094_v10 = vmax.f32 %v2090_v23, %v9389_v60  ;;  %v9392_v62 = vpop.f32.mrb[13].mxu1 }
 0x413   : > { %v2092_v63 = vmax.f32 %v2088_v17, %v9392_v62  ;;  %v9395_v11 = vpop.f32.mrb[14].mxu1 }
 0x414   : > { %v2095_v2 = vmax.f32 %v2091_v21, %v9395_v11  ;;  %v9398_v37 = vpop.f32.mrb[15].mxu1 }
 0x415   : > { %v2093_v42 = vmax.f32 %v2089_v59, %v9398_v37 }
 0x419   : > { %v9401_v33 = vpop.f32.mrb[16].mxu1 }
 0x41a   : > { %v2098_v41 = vmax.f32 %v2094_v10, %v9401_v33  ;;  %v9404_v14 = vpop.f32.mrb[17].mxu1 }
 0x41b   : > { %v2096_v23 = vmax.f32 %v2092_v63, %v9404_v14  ;;  %v9407_v13 = vpop.f32.mrb[18].mxu1 }
 0x41c   : > { %v2099_v17 = vmax.f32 %v2095_v2, %v9407_v13  ;;  %v9410_v54 = vpop.f32.mrb[19].mxu1 }
 0x41d   : > { %v2097_v21 = vmax.f32 %v2093_v42, %v9410_v54 }
 0x421   : > { %v9413_v36 = vpop.f32.mrb[20].mxu1 }
 0x422   : > { %v2102_v59 = vmax.f32 %v2098_v41, %v9413_v36  ;;  %v9416_v18 = vpop.f32.mrb[21].mxu1 }
 0x423   : > { %v2100_v10 = vmax.f32 %v2096_v23, %v9416_v18  ;;  %v9419_v5 = vpop.f32.mrb[22].mxu1 }
 0x424   : > { %v2103_v63 = vmax.f32 %v2099_v17, %v9419_v5  ;;  %v9422_v1 = vpop.f32.mrb[23].mxu1 }
 0x425   : > { %v2101_v2 = vmax.f32 %v2097_v21, %v9422_v1 }
 0x429   : > { %v9425_v0 = vpop.f32.mrb[24].mxu1 }
 0x42a   : > { %v2106_v56 = vmax.f32 %v2102_v59, %v9425_v0  ;;  %v9428_v42 = vpop.f32.mrb[25].mxu1 }
 0x42b   : > { %v2104_v41 = vmax.f32 %v2100_v10, %v9428_v42  ;;  %v9431_v29 = vpop.f32.mrb[26].mxu1 }
 0x42c   : > { %v2107_v23 = vmax.f32 %v2103_v63, %v9431_v29  ;;  %v9434_v57 = vpop.f32.mrb[27].mxu1 }
 0x42d   : > { %v2105_v17 = vmax.f32 %v2101_v2, %v9434_v57 }
 0x431   : > { %v9437_v15 = vpop.f32.mrb[28].mxu1 }
 0x432   : > { %v2110_v21 = vmax.f32 %v2106_v56, %v9437_v15  ;;  %v9440_v25 = vpop.f32.mrb[29].mxu1 }
 0x433   : > { %v2108_v59 = vmax.f32 %v2104_v41, %v9440_v25  ;;  %v9443_v31 = vpop.f32.mrb[30].mxu1 }
 0x434   : > { %v2111_v10 = vmax.f32 %v2107_v23, %v9443_v31  ;;  %v9446_v6 = vpop.f32.mrb[31].mxu1 }
 0x435   : > { %v2109_v63 = vmax.f32 %v2105_v17, %v9446_v6 }
 0x436   : > { %v2113_v4 = vmax.f32 %v2110_v21, %v2111_v10 }
 0x437   : > { %v2112_v3 = vmax.f32 %v2108_v59, %v2109_v63 }
 0x439   : > { %v2114_v20 = vmax.f32 %v2112_v3, %v2113_v4 }
 0x43b   : > { %v2115_v2 = vrot.slane %v2114_v20, 4 }
 0x43d   : > { %v2116_v22 = vmax.f32 %v2114_v20, %v2115_v2 }
 0x43f   : > { %v2117_v49 = vrot.slane %v2116_v22, 2 }
 0x441   : > { %v2118_v38 = vmax.f32 %v2116_v22, %v2117_v49 }
 0x443   : > { %v2119_v56 = vrot.slane %v2118_v38, 1 }
 0x445   : > { %v9449_v9 = vmax.f32 %v2118_v38, %v2119_v56 }
 0x447   : > { %v2121_v41 = vsub.f32 %v9355_v19, %v9449_v9  ;;  %v2122_v23 = vsub.f32 %v9359_v52, %v9449_v9  ;;  %v2123_v28 = vsub.f32 %v9353_v30, %v9449_v9  ;;  %v2124_v17 = vsub.f32 %v9357_v24, %v9449_v9 }
 0x448   : > { %v2125_v20 = vsub.f32 %v9365_v32, %v9449_v9  ;;  %v2126_v49 = vsub.f32 %v9373_v40, %v9449_v9  ;;  %v2127_v38 = vsub.f32 %v9361_v34, %v9449_v9  ;;  %v2128_v22 = vsub.f32 %v9369_v39, %v9449_v9 }
 0x449   : > { %v2129_v3 = vsub.f32 %v9380_v55, %v9449_v9  ;;  %v2130_v4 = vsub.f32 %v9386_v35, %v9449_v9  ;;  %v2131_v30 = vsub.f32 %v9377_v50, %v9449_v9  ;;  %v2132_v19 = vsub.f32 %v9383_v58, %v9449_v9 }
 0x44a   : > { %v2133_v24 = vsub.f32 %v9392_v62, %v9449_v9  ;;  %v2134_v52 = vsub.f32 %v9398_v37, %v9449_v9  ;;  %v2135_v34 = vsub.f32 %v9389_v60, %v9449_v9  ;;  %v2136_v32 = vsub.f32 %v9395_v11, %v9449_v9 }
 0x44b   : > { %v2137_v39 = vsub.f32 %v9404_v14, %v9449_v9  ;;  %v2138_v40 = vsub.f32 %v9410_v54, %v9449_v9  ;;  %v2139_v50 = vsub.f32 %v9401_v33, %v9449_v9  ;;  %v2140_v55 = vsub.f32 %v9407_v13, %v9449_v9 }
 0x44c   : > { %v2141_v58 = vsub.f32 %v9416_v18, %v9449_v9  ;;  %v2142_v35 = vsub.f32 %v9422_v1, %v9449_v9  ;;  %v2143_v60 = vsub.f32 %v9413_v36, %v9449_v9  ;;  %v2144_v14 = vsub.f32 %v9419_v5, %v9449_v9 }
 0x44d   : > { %v2145_v54 = vsub.f32 %v9428_v42, %v9449_v9  ;;  %v2153_v59 = vmul.f32 1.442695, %v2121_v41  ;;  %v2155_v10 = vmul.f32 1.442695, %v2122_v23  ;;  %v2157_v63 = vmul.f32 1.442695, %v2123_v28 }
 0x44e   : > { %v2159_v2 = vmul.f32 1.442695, %v2124_v17  ;;  %v2161_v56 = vmul.f32 1.442695, %v2125_v20  ;;  %v2163_v18 = vmul.f32 1.442695, %v2126_v49 }
 0x44f   : > { %7698 = vpow2.f32 %v2153_v59  ;;  %v2165_v13 = vmul.f32 1.442695, %v2127_v38  ;;  %v2167_v11 = vmul.f32 1.442695, %v2128_v22  ;;  %v2169_v37 = vmul.f32 1.442695, %v2129_v3 }
 0x450   : > { %7700 = vpow2.f32 %v2155_v10  ;;  %v2171_v62 = vmul.f32 1.442695, %v2130_v4  ;;  %v2173_v33 = vmul.f32 1.442695, %v2131_v30  ;;  %v2175_v21 = vmul.f32 1.442695, %v2132_v19 }
 0x451   : > { %7702 = vpow2.f32 %v2157_v63  ;;  %v2177_v41 = vmul.f32 1.442695, %v2133_v24  ;;  %v2179_v28 = vmul.f32 1.442695, %v2134_v52  ;;  %v2181_v17 = vmul.f32 1.442695, %v2135_v34 }
 0x452   : > { %7704 = vpow2.f32 %v2159_v2  ;;  %v2183_v49 = vmul.f32 1.442695, %v2136_v32  ;;  %v2185_v22 = vmul.f32 1.442695, %v2137_v39  ;;  %v2187_v19 = vmul.f32 1.442695, %v2138_v40 }
 0x453   : > { %7706 = vpow2.f32 %v2161_v56  ;;  %v2189_v52 = vmul.f32 1.442695, %v2139_v50  ;;  %v2195_v50 = vmul.f32 1.442695, %v2142_v35  ;;  %v2199_v1 = vmul.f32 1.442695, %v2144_v14 }
 0x454   : > { %7708 = vpow2.f32 %v2163_v18  ;;  %v2193_v18 = vmul.f32 1.442695, %v2141_v58  ;;  %v2201_v36 = vmul.f32 1.442695, %v2145_v54  ;;  %v11327_v2 = vsub.f32 %v9434_v57, %v9449_v9 }
 0x455   : > { %7710 = vpow2.f32 %v2165_v13  ;;  %v11328_v56 = vsub.f32 %v9425_v0, %v9449_v9 }
 0x456   : > { %7712 = vpow2.f32 %v2167_v11  ;;  %v2203_v5 = vmul.f32 1.442695, %v11327_v2 }
 0x457   : > { %7714 = vpow2.f32 %v2169_v37  ;;  %v2205_v42 = vmul.f32 1.442695, %v11328_v56 }
 0x458   : > { %7716 = vpow2.f32 %v2171_v62  ;;  %v2191_v62 = vmul.f32 1.442695, %v2140_v55  ;;  %v2197_v55 = vmul.f32 1.442695, %v2143_v60 }
 0x459   : > { %v9515_v23 = vpop.eup %7698  ;;  %7718 = vpow2.f32 %v2173_v33 }
 0x45a   : > { %v9517_v20 = vpop.eup %7700  ;;  %7720 = vpow2.f32 %v2175_v21 }
 0x45b   : > { %v9519_v38 = vpop.eup %7702  ;;  %7722 = vpow2.f32 %v2177_v41  ;;  %v2217_v3 = vadd.f32 %v9517_v20, %v9515_v23  ;;  %v2255_v4 = vpack.c.bf16 %v9517_v20, %v9515_v23 }
 0x45c   : > { %v9525_v30 = vpop.eup %7704  ;;  %7724 = vpow2.f32 %v2179_v28 }
 0x45d   : > { %v9527_v24 = vpop.eup %7706  ;;  %7726 = vpow2.f32 %v2181_v17  ;;  %v2218_v34 = vadd.f32 %v9519_v38, %v2217_v3  ;;  %v2256_v32 = vpack.c.bf16 %v9525_v30, %v9519_v38  ;;  %v11329_v17 = vsub.f32 %v9431_v29, %v9449_v9 }
 0x45e   : > { %v9532_v39 = vpop.eup %7708  ;;  %7728 = vpow2.f32 %v2183_v49 }
 0x45f   : > { %v9534_v13 = vpop.eup %7710  ;;  %7730 = vpow2.f32 %v2185_v22  ;;  %v2219_v11 = vadd.f32 %v9525_v30, %v2218_v34  ;;  %v2257_v40 = vpack.c.bf16 %v9532_v39, %v9527_v24  ;;  %v2207_v57 = vmul.f32 1.442695, %v11329_v17 }
 0x460   : > { %v9539_v37 = vpop.eup %7712  ;;  %7732 = vpow2.f32 %v2187_v19  ;;  %v11330_v22 = vsub.f32 %v9440_v25, %v9449_v9  ;;  %v11331_v34 = vsub.f32 %v9446_v6, %v9449_v9 }
 0x461   : > { %v9544_v33 = vpop.eup %7714  ;;  %7734 = vpow2.f32 %v2189_v52  ;;  %v2220_v58 = vadd.f32 %v9527_v24, %v2219_v11  ;;  %v2258_v21 = vpack.c.bf16 %v9539_v37, %v9534_v13 }
 0x462   : > { %v9552_v59 = vpop.eup %7716  ;;  %7736 = vpow2.f32 %v2191_v62  ;;  %v2209_v0 = vmul.f32 1.442695, %v11330_v22  ;;  %v2211_v29 = vmul.f32 1.442695, %v11331_v34 }
 0x463   : > { %v9557_v35 = vpop.eup %7718  ;;  %7738 = vpow2.f32 %v2193_v18  ;;  %v2221_v60 = vadd.f32 %v9532_v39, %v2220_v58  ;;  %v2259_v10 = vpack.c.bf16 %v9552_v59, %v9544_v33  ;;  %v11332_v18 = vsub.f32 %v9437_v15, %v9449_v9 }
 0x464   : > { %v9565_v63 = vpop.eup %7720  ;;  %7740 = vpow2.f32 %v2195_v50  ;;  %v11333_v58 = vsub.f32 %v9443_v31, %v9449_v9 }
 0x465   : > { %v9570_v14 = vpop.eup %7722  ;;  %7742 = vpow2.f32 %v2197_v55  ;;  %v2222_v54 = vadd.f32 %v9534_v13, %v2221_v60  ;;  %v2260_v41 = vpack.c.bf16 %v9565_v63, %v9557_v35  ;;  %v2213_v11 = vmul.f32 1.442695, %v11332_v18 }
 0x466   : > { %v9578_v28 = vpop.eup %7724  ;;  %7744 = vpow2.f32 %v2199_v1  ;;  %v2215_v1 = vmul.f32 1.442695, %v11333_v58 }
 0x467   : > { %v9583_v49 = vpop.eup %7726  ;;  %7746 = vpow2.f32 %v2201_v36  ;;  %v2223_v3 = vadd.f32 %v9539_v37, %v2222_v54  ;;  %v2261_v19 = vpack.c.bf16 %v9578_v28, %v9570_v14 }
 0x468   : > { %v9591_v52 = vpop.eup %7728  ;;  %7748 = vpow2.f32 %v2203_v5 }
 0x469   : > { %v7731_v62 = vpop.eup %7730  ;;  %7750 = vpow2.f32 %v2205_v42  ;;  %v2224_v25 = vadd.f32 %v9544_v33, %v2223_v3  ;;  %v2262_v50 = vpack.c.bf16 %v9591_v52, %v9583_v49  ;;  %v1838_v33 = vld [vmem:[#allocation3] sm:$0xff] }
 0x46a   : > { %v7733_v55 = vpop.eup %7732  ;;  %7752 = vpow2.f32 %v2207_v57 }
 0x46b   : > { %v7735_v36 = vpop.eup %7734  ;;  %7754 = vpow2.f32 %v2209_v0  ;;  %v2225_v6 = vadd.f32 %v9552_v59, %v2224_v25  ;;  %v2263_v60 = vpack.c.bf16 %v7733_v55, %v7731_v62  ;;  %v1841_v59 = vld [vmem:[#allocation3 + $0x18] sm:$0xff] }
 0x46c   : > { %v7737_v2 = vpop.eup %7736  ;;  %7756 = vpow2.f32 %v2211_v29 }
 0x46d   : > { %v7739_v15 = vpop.eup %7738  ;;  %7758 = vpow2.f32 %v2213_v11  ;;  %v2226_v5 = vadd.f32 %v9557_v35, %v2225_v6  ;;  %6799 = vmatprep.subr.bf16.mxu0 %v2263_v60  ;;  %v2264_v56 = vpack.c.bf16 %v7737_v2, %v7735_v36 }
 0x46e   : > { %v7741_v42 = vpop.eup %7740  ;;  %7760 = vpow2.f32 %v2215_v1  ;;  %6800 = vmatpush3.bf16.msra.mxu0 %v2255_v4 }
 0x46f   : > { %v7743_v9 = vpop.eup %7742  ;;  %v2227_v31 = vadd.f32 %v9565_v63, %v2226_v5  ;;  %6801 = vmatprep.subr.bf16.mxu0 %v2264_v56  ;;  %v2265_v54 = vpack.c.bf16 %v7741_v42, %v7739_v15 }
 0x470   : > { %v7745_v17 = vpop.eup %7744 }
 0x471   : > { %v7747_v57 = vpop.eup %7746  ;;  %v2228_v22 = vadd.f32 %v9570_v14, %v2227_v31  ;;  %v2266_v0 = vpack.c.bf16 %v7745_v17, %v7743_v9  ;;  %v1840_v14 = vld [vmem:[#allocation3 + $0x10] sm:$0xff] }
 0x472   : > { %v7749_v3 = vpop.eup %7748  ;;  %6802 = vmatpush3.bf16.msra.mxu0 %v2256_v32 }
 0x473   : > { %v7751_v34 = vpop.eup %7750  ;;  %v2229_v29 = vadd.f32 %v9578_v28, %v2228_v22  ;;  %6803 = vmatprep.subr.bf16.mxu0 %v2265_v54  ;;  %v2267_v23 = vpack.c.bf16 %v7749_v3, %v7747_v57 }
 0x474   : > { %v7753_v20 = vpop.eup %7752 }
 0x475   : > { %v7755_v4 = vpop.eup %7754  ;;  %v2230_v18 = vadd.f32 %v9583_v49, %v2229_v29  ;;  %v2268_v11 = vpack.c.bf16 %v7753_v20, %v7751_v34 }
 0x476   : > { %v7757_v25 = vpop.eup %7756  ;;  %6804 = vmatpush3.bf16.msra.mxu0 %v2257_v40 }
 0x477   : > { %v7759_v58 = vpop.eup %7758  ;;  %v2231_v1 = vadd.f32 %v9591_v52, %v2230_v18  ;;  %6805 = vmatprep.subr.bf16.mxu0 %v2266_v0  ;;  %v2269_v38 = vpack.c.bf16 %v7757_v25, %v7755_v4 }
 0x478   : > { %v7761_v30 = vpop.eup %7760 }
 0x479   : > { %v2232_v32 = vadd.f32 %v7731_v62, %v2231_v1  ;;  %v2270_v6 = vpack.c.bf16 %v7761_v30, %v7759_v58 }
 0x47a   : > { %6806 = vmatpush3.bf16.msra.mxu0 %v2258_v21 }
 0x47b   : > { %v2233_v60 = vadd.f32 %v7733_v55, %v2232_v32  ;;  %6807 = vmatprep.subr.bf16.mxu0 %v2267_v23 }
 0x47d   : > { %v2234_v49 = vadd.f32 %v7735_v36, %v2233_v60 }
 0x47e   : > { %6808 = vmatpush3.bf16.msra.mxu0 %v2259_v10 }
 0x47f   : > { %v2235_v24 = vadd.f32 %v7737_v2, %v2234_v49  ;;  %6809 = vmatprep.subr.bf16.mxu0 %v2268_v11 }
 0x481   : > { %v2236_v39 = vadd.f32 %v7739_v15, %v2235_v24 }
 0x482   : > { %6810 = vmatpush3.bf16.msra.mxu0 %v2260_v41 }
 0x483   : > { %v2237_v40 = vadd.f32 %v7741_v42, %v2236_v39  ;;  %6811 = vmatprep.subr.bf16.mxu0 %v2269_v38 }
 0x485   : > { %v2238_v52 = vadd.f32 %v7743_v9, %v2237_v40 }
 0x486   : > { %6812 = vmatpush3.bf16.msra.mxu0 %v2261_v19 }
 0x487   : > { %v2239_v13 = vadd.f32 %v7745_v17, %v2238_v52  ;;  %6813 = vmatprep.subr.bf16.mxu0 %v2270_v6 }
 0x489   : > { %v2240_v37 = vadd.f32 %v7747_v57, %v2239_v13 }
 0x48a   : > { %6814 = vmatpush3.bf16.msra.mxu0 %v2262_v50 }
 0x48b   : > { %v2241_v21 = vadd.f32 %v7749_v3, %v2240_v37  ;;  %7161 = vmatprep.subr.bf16.mxu0 %v9121_v12 }
 0x48d   : > { %v2242_v10 = vadd.f32 %v7751_v34, %v2241_v21  ;;  %2304 = vmatmul.mubr.bf16.vlgmr.msra.gmra.mrb[16].mxu0 %v1838_v33 }
 0x48e   : > { %7162 = vmatpush3.bf16.msra.mxu0 %v9121_v12  ;;  %2311 = vmatprep.mubr.bf16.mxu0 %v1841_v59 }
 0x48f   : > { %v2243_v35 = vadd.f32 %v7753_v20, %v2242_v10  ;;  %7163 = vmatprep.subr.bf16.mxu0 %v9117_v8 }
 0x491   : > { %v2244_v63 = vadd.f32 %v7755_v4, %v2243_v35 }
 0x492   : > { %7164 = vmatpush3.bf16.msra.mxu0 %v9117_v8 }
 0x493   : > { %v2245_v41 = vadd.f32 %v7757_v25, %v2244_v63 }
 0x495   : > { %v2246_v28 = vadd.f32 %v7759_v58, %v2245_v41  ;;  %2312 = vmatmul.mubr.bf16.gmra.mrb[20].mxu0 %v1840_v14  ;;  %v2341_v41 = vld [vmem:[#allocation3 + $0x28] sm:$0xff] }
 0x496   : > { %7165 = vmatprep.mubr.msk.bf16.mxu0 %vm1874_vm1, %v9089_v27  ;;  %v11334_v27 = vld [vmem:[#allocation38_spill] sm:$0xff] }
 0x497   : > { %v2247_v19 = vadd.f32 %v7761_v30, %v2246_v28 }
 0x49d   : > { %7166 = vmatmul.mubr.msk.bf16.vlgmr.msra.gmra.mrb[24].mxu0 %vm1874_vm1, %v9093_v26  ;;  %v11335_v26 = vld [vmem:[#allocation39_spill] sm:$0xff] }
 0x49e   : > { %7169 = vmatprep.mubr.msk.bf16.mxu0 %vm1874_vm1, %v9097_v45  ;;  %v11336_v45 = vld [vmem:[#allocation40_spill] sm:$0xff] }
 0x4a5   : > { %7170 = vmatmul.mubr.msk.bf16.gmra.mrb[28].mxu0 %vm1874_vm1, %v9101_v47 }
 0x4a6   : > { %7173 = vmatprep.mubr.msk.bf16.mxu0 %vm1874_vm1, %v9105_v51 }
 0x4ad   : > { %7174 = vmatmul.mubr.msk.bf16.gmra.mrb[32].mxu0 %vm1874_vm1, %v9111_v61 }
 0x4ae   : > { %7177 = vmatprep.mubr.msk.bf16.mxu0 %vm1874_vm1, %v9115_v7 }
 0x4b5   : > { %7178 = vmatmul.mubr.msk.bf16.gmra.mrb[36].mxu0 %vm1874_vm1, %v9127_v16 }
 0x4b6   : > { %7181 = vmatprep.mubr.msk.bf16.mxu0 %vm1874_vm1, %v9091_v43  ;;  %v2248_v43 = vrot.slane %v2247_v19, 4 }
 0x4bd   : > { %7182 = vmatmul.mubr.msk.bf16.gmra.mrb[40].mxu0 %vm1874_vm1, %v9095_v44  ;;  %v2249_v44 = vadd.f32 %v2248_v43, %v2247_v19 }
 0x4be   : > { %7185 = vmatprep.mubr.msk.bf16.mxu0 %vm1874_vm1, %v9099_v46 }
 0x4bf   : > { %v2250_v47 = vrot.slane %v2249_v44, 2 }
 0x4c1   : > { %v2251_v51 = vadd.f32 %v2250_v47, %v2249_v44 }
 0x4c3   : > { %v2252_v46 = vrot.slane %v2251_v51, 1 }
 0x4c5   : > { %7186 = vmatmul.mubr.msk.bf16.gmra.mrb[44].mxu0 %vm1874_vm1, %v9103_v48  ;;  %v2253_v61 = vadd.f32 %v2252_v46, %v2251_v51 }
 0x4c6   : > { %7189 = vmatprep.mubr.msk.bf16.mxu0 %vm1874_vm1, %v9107_v53 }
 0x4c7   : > { %7762 = vrcp.f32 %v2253_v61 }
 0x4cd   : > { %7190 = vmatmul.mubr.msk.bf16.gmra.mrb[48].mxu0 %vm1874_vm1, %v11334_v27 }
 0x4ce   : > { %7193 = vmatprep.mubr.msk.bf16.mxu0 %vm1874_vm1, %v11335_v26 }
 0x4d1   : > { %v7763_v12 = vpop.eup %7762 }
 0x4d5   : > { %7194 = vmatmul.mubr.msk.bf16.gmra.mrb[52].mxu0 %vm1874_vm1, %v11336_v45 }
 0x4d6   : > { %2804 = vmatprep.mubr.bf16.mxu0 %v2341_v41 }
 0x560   : > { %v6815_v48 = vpop.f32.mrb[16].mxu0 }
 0x561   : > { %v6816_v7 = vpop.f32.mrb[17].mxu0 }
 0x562   : > { %v6817_v8 = vadd.f32 %v6816_v7, %v6815_v48  ;;  %v6818_v53 = vpop.f32.mrb[18].mxu0 }
 0x563   : > { %v6819_v16 = vpop.f32.mrb[19].mxu0 }
 0x564   : > { %v2320_v62 = vmul.f32 %v7763_v12, %v6817_v8  ;;  %v6820_v50 = vadd.f32 %v6819_v16, %v6818_v53 }
 0x566   : > { %v2321_v55 = vmul.f32 %v7763_v12, %v6820_v50 }
 0x568   : > { %v6821_v36 = vpop.f32.mrb[20].mxu0  ;;  %v9669_v2 = vpack.c.bf16 %v2321_v55, %v2320_v62 }
 0x569   : > { %v6822_v15 = vpop.f32.mrb[21].mxu0 }
 0x56a   : > { %v6823_v5 = vadd.f32 %v6822_v15, %v6821_v36  ;;  %v6824_v56 = vpop.f32.mrb[22].mxu0 }
 0x56b   : > { %v6825_v42 = vpop.f32.mrb[23].mxu0 }
 0x56c   : > { %v2322_v9 = vmul.f32 %v7763_v12, %v6823_v5  ;;  %v6826_v31 = vadd.f32 %v6825_v42, %v6824_v56 }
 0x56e   : > { %v2323_v54 = vmul.f32 %v7763_v12, %v6826_v31 }
 0x570   : > { %v9671_v17 = vpop.f32.mrb[24].mxu0  ;;  %v9673_v57 = vpack.c.bf16 %v2323_v54, %v2322_v9 }
 0x571   : > { %v9675_v22 = vpop.f32.mrb[25].mxu0 }
 0x572   : > { %v9677_v0 = vpop.f32.mrb[26].mxu0 }
 0x573   : > { %v9679_v3 = vpop.f32.mrb[27].mxu0 }
 0x578   : > { %v9681_v34 = vpop.f32.mrb[28].mxu0 }
 0x579   : > { %v2587_v29 = vmax.f32 %v9671_v17, %v9681_v34  ;;  %v9685_v23 = vpop.f32.mrb[29].mxu0 }
 0x57a   : > { %v2585_v20 = vmax.f32 %v9675_v22, %v9685_v23  ;;  %v9689_v4 = vpop.f32.mrb[30].mxu0 }
 0x57b   : > { %v2588_v18 = vmax.f32 %v9677_v0, %v9689_v4  ;;  %v9693_v11 = vpop.f32.mrb[31].mxu0 }
 0x57c   : > { %v2586_v25 = vmax.f32 %v9679_v3, %v9693_v11 }
 0x580   : > { %v9697_v58 = vpop.f32.mrb[32].mxu0 }
 0x581   : > { %v2591_v1 = vmax.f32 %v2587_v29, %v9697_v58  ;;  %v9700_v38 = vpop.f32.mrb[33].mxu0 }
 0x582   : > { %v2589_v30 = vmax.f32 %v2585_v20, %v9700_v38  ;;  %v9703_v32 = vpop.f32.mrb[34].mxu0 }
 0x583   : > { %v2592_v6 = vmax.f32 %v2588_v18, %v9703_v32  ;;  %v9706_v60 = vpop.f32.mrb[35].mxu0 }
 0x584   : > { %v2590_v49 = vmax.f32 %v2586_v25, %v9706_v60 }
 0x588   : > { %v9709_v24 = vpop.f32.mrb[36].mxu0 }
 0x589   : > { %v2595_v39 = vmax.f32 %v2591_v1, %v9709_v24  ;;  %v9712_v40 = vpop.f32.mrb[37].mxu0 }
 0x58a   : > { %v2593_v52 = vmax.f32 %v2589_v30, %v9712_v40  ;;  %v9715_v13 = vpop.f32.mrb[38].mxu0 }
 0x58b   : > { %v2596_v37 = vmax.f32 %v2592_v6, %v9715_v13  ;;  %v9718_v33 = vpop.f32.mrb[39].mxu0 }
 0x58c   : > { %v2594_v21 = vmax.f32 %v2590_v49, %v9718_v33 }
 0x590   : > { %v9721_v59 = vpop.f32.mrb[40].mxu0 }
 0x591   : > { %v2599_v10 = vmax.f32 %v2595_v39, %v9721_v59  ;;  %v9724_v35 = vpop.f32.mrb[41].mxu0 }
 0x592   : > { %v2597_v63 = vmax.f32 %v2593_v52, %v9724_v35  ;;  %v9727_v14 = vpop.f32.mrb[42].mxu0 }
 0x593   : > { %v2600_v28 = vmax.f32 %v2596_v37, %v9727_v14  ;;  %v9730_v19 = vpop.f32.mrb[43].mxu0 }
 0x594   : > { %v2598_v27 = vmax.f32 %v2594_v21, %v9730_v19 }
 0x598   : > { %v9733_v26 = vpop.f32.mrb[44].mxu0 }
 0x599   : > { %v2603_v45 = vmax.f32 %v2599_v10, %v9733_v26  ;;  %v9736_v43 = vpop.f32.mrb[45].mxu0 }
 0x59a   : > { %v2601_v44 = vmax.f32 %v2597_v63, %v9736_v43  ;;  %v9739_v47 = vpop.f32.mrb[46].mxu0 }
 0x59b   : > { %v2604_v51 = vmax.f32 %v2600_v28, %v9739_v47  ;;  %v9742_v46 = vpop.f32.mrb[47].mxu0 }
 0x59c   : > { %v2602_v61 = vmax.f32 %v2598_v27, %v9742_v46 }
 0x5a0   : > { %v9745_v48 = vpop.f32.mrb[48].mxu0 }
 0x5a1   : > { %v2607_v7 = vmax.f32 %v2603_v45, %v9745_v48  ;;  %v9748_v8 = vpop.f32.mrb[49].mxu0 }
 0x5a2   : > { %v2605_v53 = vmax.f32 %v2601_v44, %v9748_v8  ;;  %v9751_v12 = vpop.f32.mrb[50].mxu0 }
 0x5a3   : > { %v2608_v16 = vmax.f32 %v2604_v51, %v9751_v12  ;;  %v9754_v62 = vpop.f32.mrb[51].mxu0 }
 0x5a4   : > { %v2606_v50 = vmax.f32 %v2602_v61, %v9754_v62 }
 0x5a8   : > { %v9757_v55 = vpop.f32.mrb[52].mxu0 }
 0x5a9   : > { %v2611_v36 = vmax.f32 %v2607_v7, %v9757_v55  ;;  %v9760_v15 = vpop.f32.mrb[53].mxu0 }
 0x5aa   : > { %v2609_v5 = vmax.f32 %v2605_v53, %v9760_v15  ;;  %v9763_v56 = vpop.f32.mrb[54].mxu0 }
 0x5ab   : > { %v2612_v42 = vmax.f32 %v2608_v16, %v9763_v56  ;;  %v9766_v9 = vpop.f32.mrb[55].mxu0 }
 0x5ac   : > { %v2610_v31 = vmax.f32 %v2606_v50, %v9766_v9 }
 0x5ad   : > { %v2614_v54 = vmax.f32 %v2611_v36, %v2612_v42 }
 0x5ae   : > { %v2613_v29 = vmax.f32 %v2609_v5, %v2610_v31 }
 0x5b0   : > { %v2615_v20 = vmax.f32 %v2613_v29, %v2614_v54 }
 0x5b2   : > { %v2616_v18 = vrot.slane %v2615_v20, 4 }
 0x5b4   : > { %v2617_v25 = vmax.f32 %v2615_v20, %v2616_v18 }
 0x5b6   : > { %v2618_v1 = vrot.slane %v2617_v25, 2 }
 0x5b8   : > { %v2619_v30 = vmax.f32 %v2617_v25, %v2618_v1 }
 0x5ba   : > { %v2620_v6 = vrot.slane %v2619_v30, 1 }
 0x5bc   : > { %v9769_v49 = vmax.f32 %v2619_v30, %v2620_v6 }
 0x5be   : > { %v2622_v39 = vsub.f32 %v9675_v22, %v9769_v49  ;;  %v2623_v52 = vsub.f32 %v9679_v3, %v9769_v49  ;;  %v2624_v37 = vsub.f32 %v9671_v17, %v9769_v49  ;;  %v2625_v21 = vsub.f32 %v9677_v0, %v9769_v49 }
 0x5bf   : > { %v2626_v10 = vsub.f32 %v9685_v23, %v9769_v49  ;;  %v2627_v63 = vsub.f32 %v9693_v11, %v9769_v49  ;;  %v2628_v41 = vsub.f32 %v9681_v34, %v9769_v49  ;;  %v2629_v22 = vsub.f32 %v9689_v4, %v9769_v49 }
 0x5c0   : > { %v2630_v3 = vsub.f32 %v9700_v38, %v9769_v49  ;;  %v2631_v17 = vsub.f32 %v9706_v60, %v9769_v49  ;;  %v2632_v0 = vsub.f32 %v9697_v58, %v9769_v49  ;;  %v2633_v23 = vsub.f32 %v9703_v32, %v9769_v49 }
 0x5c1   : > { %v2634_v11 = vsub.f32 %v9712_v40, %v9769_v49  ;;  %v2635_v34 = vsub.f32 %v9718_v33, %v9769_v49  ;;  %v2636_v4 = vsub.f32 %v9709_v24, %v9769_v49  ;;  %v2637_v38 = vsub.f32 %v9715_v13, %v9769_v49 }
 0x5c2   : > { %v2638_v60 = vsub.f32 %v9724_v35, %v9769_v49  ;;  %v2639_v58 = vsub.f32 %v9730_v19, %v9769_v49  ;;  %v2640_v32 = vsub.f32 %v9721_v59, %v9769_v49  ;;  %v2641_v40 = vsub.f32 %v9727_v14, %v9769_v49 }
 0x5c3   : > { %v2642_v33 = vsub.f32 %v9736_v43, %v9769_v49  ;;  %v2643_v24 = vsub.f32 %v9742_v46, %v9769_v49  ;;  %v2644_v13 = vsub.f32 %v9733_v26, %v9769_v49  ;;  %v2645_v35 = vsub.f32 %v9739_v47, %v9769_v49 }
 0x5c4   : > { %v2646_v28 = vsub.f32 %v9748_v8, %v9769_v49  ;;  %v2647_v59 = vsub.f32 %v9754_v62, %v9769_v49  ;;  %v2648_v14 = vsub.f32 %v9745_v48, %v9769_v49  ;;  %v2649_v19 = vsub.f32 %v9751_v12, %v9769_v49 }
 0x5c5   : > { %v2650_v27 = vsub.f32 %v9760_v15, %v9769_v49  ;;  %v2651_v45 = vsub.f32 %v9766_v9, %v9769_v49  ;;  %v2652_v43 = vsub.f32 %v9757_v55, %v9769_v49  ;;  %v2653_v44 = vsub.f32 %v9763_v56, %v9769_v49 }
 0x5c6   : > { %v2654_v51 = vmul.f32 1.442695, %v2622_v39  ;;  %v2656_v61 = vmul.f32 1.442695, %v2623_v52  ;;  %v2658_v7 = vmul.f32 1.442695, %v2624_v37 }
 0x5c7   : > { %v2660_v53 = vmul.f32 1.442695, %v2625_v21  ;;  %v2662_v16 = vmul.f32 1.442695, %v2626_v10  ;;  %v2664_v50 = vmul.f32 1.442695, %v2627_v63 }
 0x5c8   : > { %7764 = vpow2.f32 %v2654_v51  ;;  %v2666_v36 = vmul.f32 1.442695, %v2628_v41  ;;  %v2668_v5 = vmul.f32 1.442695, %v2629_v22  ;;  %v2670_v42 = vmul.f32 1.442695, %v2630_v3 }
 0x5c9   : > { %7766 = vpow2.f32 %v2656_v61  ;;  %v2672_v31 = vmul.f32 1.442695, %v2631_v17  ;;  %v2674_v54 = vmul.f32 1.442695, %v2632_v0  ;;  %v2676_v29 = vmul.f32 1.442695, %v2633_v23 }
 0x5ca   : > { %7768 = vpow2.f32 %v2658_v7  ;;  %v2678_v20 = vmul.f32 1.442695, %v2634_v11  ;;  %v2680_v18 = vmul.f32 1.442695, %v2635_v34  ;;  %v2682_v1 = vmul.f32 1.442695, %v2636_v4 }
 0x5cb   : > { %7770 = vpow2.f32 %v2660_v53  ;;  %v2684_v6 = vmul.f32 1.442695, %v2637_v38  ;;  %v2686_v52 = vmul.f32 1.442695, %v2638_v60  ;;  %v2688_v63 = vmul.f32 1.442695, %v2639_v58 }
 0x5cc   : > { %7772 = vpow2.f32 %v2662_v16  ;;  %v2690_v22 = vmul.f32 1.442695, %v2640_v32  ;;  %v2692_v23 = vmul.f32 1.442695, %v2641_v40  ;;  %v2694_v34 = vmul.f32 1.442695, %v2642_v33 }
 0x5cd   : > { %7774 = vpow2.f32 %v2664_v50  ;;  %v2696_v58 = vmul.f32 1.442695, %v2643_v24  ;;  %v2698_v40 = vmul.f32 1.442695, %v2644_v13  ;;  %v2700_v46 = vmul.f32 1.442695, %v2645_v35 }
 0x5ce   : > { %7776 = vpow2.f32 %v2666_v36  ;;  %v2702_v26 = vmul.f32 1.442695, %v2646_v28  ;;  %v2704_v47 = vmul.f32 1.442695, %v2647_v59  ;;  %v2706_v8 = vmul.f32 1.442695, %v2648_v14 }
 0x5cf   : > { %7778 = vpow2.f32 %v2668_v5  ;;  %v2708_v62 = vmul.f32 1.442695, %v2649_v19  ;;  %v2710_v48 = vmul.f32 1.442695, %v2650_v27  ;;  %v2712_v12 = vmul.f32 1.442695, %v2651_v45 }
 0x5d0   : > { %7780 = vpow2.f32 %v2670_v42  ;;  %v2714_v42 = vmul.f32 1.442695, %v2652_v43 }
 0x5d1   : > { %7782 = vpow2.f32 %v2672_v31 }
 0x5d2   : > { %v9835_v25 = vpop.eup %7764  ;;  %7784 = vpow2.f32 %v2674_v54  ;;  %v2716_v54 = vmul.f32 1.442695, %v2653_v44 }
 0x5d3   : > { %v9837_v30 = vpop.eup %7766  ;;  %7786 = vpow2.f32 %v2676_v29 }
 0x5d4   : > { %v9839_v39 = vpop.eup %7768  ;;  %7788 = vpow2.f32 %v2678_v20  ;;  %v2718_v37 = vadd.f32 %v9837_v30, %v9835_v25  ;;  %v2756_v21 = vpack.c.bf16 %v9837_v30, %v9835_v25 }
 0x5d5   : > { %v9845_v10 = vpop.eup %7770  ;;  %7790 = vpow2.f32 %v2680_v18 }
 0x5d6   : > { %v9847_v41 = vpop.eup %7772  ;;  %7792 = vpow2.f32 %v2682_v1  ;;  %v2719_v3 = vadd.f32 %v9839_v39, %v2718_v37  ;;  %v2757_v17 = vpack.c.bf16 %v9845_v10, %v9839_v39 }
 0x5d7   : > { %v9852_v0 = vpop.eup %7774  ;;  %7794 = vpow2.f32 %v2684_v6 }
 0x5d8   : > { %v9854_v11 = vpop.eup %7776  ;;  %7796 = vpow2.f32 %v2686_v52  ;;  %v2720_v4 = vadd.f32 %v9845_v10, %v2719_v3  ;;  %v2758_v38 = vpack.c.bf16 %v9852_v0, %v9847_v41 }
 0x5d9   : > { %v9859_v60 = vpop.eup %7778  ;;  %7798 = vpow2.f32 %v2688_v63 }
 0x5da   : > { %v9864_v32 = vpop.eup %7780  ;;  %7800 = vpow2.f32 %v2690_v22  ;;  %v2721_v33 = vadd.f32 %v9847_v41, %v2720_v4  ;;  %v2759_v51 = vpack.c.bf16 %v9859_v60, %v9854_v11 }
 0x5db   : > { %v9872_v61 = vpop.eup %7782  ;;  %7802 = vpow2.f32 %v2692_v23 }
 0x5dc   : > { %v9877_v24 = vpop.eup %7784  ;;  %7804 = vpow2.f32 %v2694_v34  ;;  %v2722_v13 = vadd.f32 %v9852_v0, %v2721_v33  ;;  %v2760_v7 = vpack.c.bf16 %v9872_v61, %v9864_v32 }
 0x5dd   : > { %v9885_v53 = vpop.eup %7786  ;;  %7806 = vpow2.f32 %v2696_v58 }
 0x5de   : > { %v9890_v35 = vpop.eup %7788  ;;  %7808 = vpow2.f32 %v2698_v40  ;;  %v2723_v28 = vadd.f32 %v9854_v11, %v2722_v13  ;;  %v2761_v16 = vpack.c.bf16 %v9885_v53, %v9877_v24 }
 0x5df   : > { %v9898_v50 = vpop.eup %7790  ;;  %7810 = vpow2.f32 %v2700_v46 }
 0x5e0   : > { %v9903_v59 = vpop.eup %7792  ;;  %7812 = vpow2.f32 %v2702_v26  ;;  %v2724_v14 = vadd.f32 %v9859_v60, %v2723_v28  ;;  %v2762_v36 = vpack.c.bf16 %v9898_v50, %v9890_v35 }
 0x5e1   : > { %v9911_v5 = vpop.eup %7794  ;;  %7814 = vpow2.f32 %v2704_v47 }
 0x5e2   : > { %v7797_v19 = vpop.eup %7796  ;;  %7816 = vpow2.f32 %v2706_v8  ;;  %v2725_v15 = vadd.f32 %v9864_v32, %v2724_v14  ;;  %v2763_v27 = vpack.c.bf16 %v9911_v5, %v9903_v59  ;;  %v2340_v32 = vld [vmem:[#allocation3 + $0x20] sm:$0xff]  ;;  %v11341_v14 = vld [vmem:[#allocation48_spill] sm:$0xff] }
 0x5e3   : > { %v7799_v31 = vpop.eup %7798  ;;  %7818 = vpow2.f32 %v2708_v62  ;;  %v11339_v62 = vld [vmem:[#allocation44_spill] sm:$0xff] }
 0x5e4   : > { %v7801_v29 = vpop.eup %7800  ;;  %7820 = vpow2.f32 %v2710_v48  ;;  %v2726_v9 = vadd.f32 %v9872_v61, %v2725_v15  ;;  %v2764_v45 = vpack.c.bf16 %v7799_v31, %v7797_v19  ;;  %v11337_v61 = vld [vmem:[#allocation41_spill] sm:$0xff]  ;;  %v11340_v48 = vld [vmem:[#allocation46_spill] sm:$0xff]  ;;  %v11347_v15 = vld [vmem:[#allocation43_spill] sm:$0xff] }
 0x5e5   : > { %v7803_v20 = vpop.eup %7802  ;;  %7822 = vpow2.f32 %v2712_v12  ;;  %v11344_v12 = vld [vmem:[#allocation54_spill] sm:$0xff] }
 0x5e6   : > { %v7805_v55 = vpop.eup %7804  ;;  %7824 = vpow2.f32 %v2714_v42  ;;  %v2727_v43 = vadd.f32 %v9877_v24, %v2726_v9  ;;  %6845 = vmatprep.subr.bf16.mxu0 %v2764_v45  ;;  %v2765_v18 = vpack.c.bf16 %v7803_v20, %v7801_v29  ;;  %v11346_v42 = vld [vmem:[#allocation58_spill] sm:$0xff]  ;;  %v11352_v9 = vld [vmem:[#allocation53_spill] sm:$0xff]  ;;  %v11353_v45 = vld [vmem:[#allocation55_spill] sm:$0xff] }
 0x5e7   : > { %v7807_v1 = vpop.eup %7806  ;;  %7826 = vpow2.f32 %v2716_v54  ;;  %6846 = vmatpush3.bf16.msra.mxu0 %v2756_v21  ;;  %v11350_v54 = vld [vmem:[#allocation49_spill] sm:$0xff] }
 0x5e8   : > { %v7809_v56 = vpop.eup %7808  ;;  %v2728_v49 = vadd.f32 %v9885_v53, %v2727_v43  ;;  %6847 = vmatprep.subr.bf16.mxu0 %v2765_v18  ;;  %v2766_v44 = vpack.c.bf16 %v7807_v1, %v7805_v55  ;;  %v11338_v53 = vld [vmem:[#allocation42_spill] sm:$0xff] }
 0x5e9   : > { %v7811_v6 = vpop.eup %7810 }
 0x5ea   : > { %v7813_v52 = vpop.eup %7812  ;;  %v2729_v37 = vadd.f32 %v9890_v35, %v2728_v49  ;;  %v2767_v63 = vpack.c.bf16 %v7811_v6, %v7809_v56  ;;  %v2342_v35 = vld [vmem:[#allocation3 + $0x30] sm:$0xff] }
 0x5eb   : > { %v7815_v22 = vpop.eup %7814  ;;  %6848 = vmatpush3.bf16.msra.mxu0 %v2757_v17 }
 0x5ec   : > { %v7817_v3 = vpop.eup %7816  ;;  %v2730_v23 = vadd.f32 %v9898_v50, %v2729_v37  ;;  %6849 = vmatprep.subr.bf16.mxu0 %v2766_v44  ;;  %v2768_v25 = vpack.c.bf16 %v7815_v22, %v7813_v52 }
 0x5ed   : > { %v7819_v30 = vpop.eup %7818 }
 0x5ee   : > { %v7821_v21 = vpop.eup %7820  ;;  %v2731_v34 = vadd.f32 %v9903_v59, %v2730_v23  ;;  %v2769_v4 = vpack.c.bf16 %v7819_v30, %v7817_v3 }
 0x5ef   : > { %v7823_v58 = vpop.eup %7822  ;;  %6850 = vmatpush3.bf16.msra.mxu0 %v2758_v38 }
 0x5f0   : > { %v7825_v40 = vpop.eup %7824  ;;  %v2732_v33 = vadd.f32 %v9911_v5, %v2731_v34  ;;  %6851 = vmatprep.subr.bf16.mxu0 %v2767_v63  ;;  %v2770_v39 = vpack.c.bf16 %v7823_v58, %v7821_v21  ;;  %v11343_v5 = vld [vmem:[#allocation52_spill] sm:$0xff] }
 0x5f1   : > { %v7827_v10 = vpop.eup %7826 }
 0x5f2   : > { %v2733_v17 = vadd.f32 %v7797_v19, %v2732_v33  ;;  %v2771_v46 = vpack.c.bf16 %v7827_v10, %v7825_v40  ;;  %v11345_v19 = vld [vmem:[#allocation56_spill] sm:$0xff] }
 0x5f3   : > { %6852 = vmatpush3.bf16.msra.mxu0 %v2759_v51 }
 0x5f4   : > { %v2734_v26 = vadd.f32 %v7799_v31, %v2733_v17  ;;  %6853 = vmatprep.subr.bf16.mxu0 %v2768_v25  ;;  %v11349_v31 = vld [vmem:[#allocation47_spill] sm:$0xff] }
 0x5f6   : > { %v2735_v13 = vadd.f32 %v7801_v29, %v2734_v26  ;;  %v11351_v29 = vld [vmem:[#allocation51_spill] sm:$0xff] }
 0x5f7   : > { %6854 = vmatpush3.bf16.msra.mxu0 %v2760_v7  ;;  %v2343_v7 = vld [vmem:[#allocation3 + $0x38] sm:$0xff] }
 0x5f8   : > { %v2736_v41 = vadd.f32 %v7803_v20, %v2735_v13  ;;  %6855 = vmatprep.subr.bf16.mxu0 %v2769_v4  ;;  %v11354_v20 = vld [vmem:[#allocation57_spill] sm:$0xff] }
 0x5fa   : > { %v2737_v0 = vadd.f32 %v7805_v55, %v2736_v41 }
 0x5fb   : > { %6856 = vmatpush3.bf16.msra.mxu0 %v2761_v16 }
 0x5fc   : > { %v2738_v38 = vadd.f32 %v7807_v1, %v2737_v0  ;;  %6857 = vmatprep.subr.bf16.mxu0 %v2770_v39 }
 0x5fe   : > { %v2739_v47 = vadd.f32 %v7809_v56, %v2738_v38 }
 0x5ff   : > { %6858 = vmatpush3.bf16.msra.mxu0 %v2762_v36  ;;  %v11342_v36 = vld [vmem:[#allocation50_spill] sm:$0xff] }
 0x600   : > { %v2740_v11 = vadd.f32 %v7811_v6, %v2739_v47  ;;  %6859 = vmatprep.subr.bf16.mxu0 %v2771_v46 }
 0x602   : > { %v2741_v60 = vadd.f32 %v7813_v52, %v2740_v11 }
 0x603   : > { %6860 = vmatpush3.bf16.msra.mxu0 %v2763_v27  ;;  %v11348_v27 = vld [vmem:[#allocation45_spill] sm:$0xff] }
 0x604   : > { %v2742_v51 = vadd.f32 %v7815_v22, %v2741_v60  ;;  %7197 = vmatprep.subr.bf16.mxu0 %v11337_v61 }
 0x606   : > { %v2743_v8 = vadd.f32 %v7817_v3, %v2742_v51  ;;  %2805 = vmatmul.mubr.bf16.vlgmr.msra.gmra.mrb[56].mxu0 %v2340_v32 }
 0x607   : > { %7198 = vmatpush3.bf16.msra.mxu0 %v11337_v61  ;;  %2812 = vmatprep.mubr.bf16.mxu0 %v2343_v7 }
 0x608   : > { %v2744_v24 = vadd.f32 %v7819_v30, %v2743_v8  ;;  %7199 = vmatprep.subr.bf16.mxu0 %v11338_v53 }
 0x60a   : > { %v2745_v28 = vadd.f32 %v7821_v21, %v2744_v24 }
 0x60b   : > { %7200 = vmatpush3.bf16.msra.mxu0 %v11338_v53 }
 0x60c   : > { %v2746_v16 = vadd.f32 %v7823_v58, %v2745_v28 }
 0x60e   : > { %v2747_v50 = vadd.f32 %v7825_v40, %v2746_v16  ;;  %2813 = vmatmul.mubr.bf16.gmra.mrb[60].mxu0 %v2342_v35 }
 0x60f   : > { %7201 = vmatprep.mubr.msk.bf16.mxu0 %vm1874_vm1, %v11339_v62 }
 0x610   : > { %v2748_v59 = vadd.f32 %v7827_v10, %v2747_v50 }
 0x612   : > { %v2749_v55 = vrot.slane %v2748_v59, 4 }
 0x614   : > { %v2750_v43 = vadd.f32 %v2749_v55, %v2748_v59 }
 0x616   : > { %7202 = vmatmul.mubr.msk.bf16.vlgmr.msra.gmra.mrb[64].mxu0 %vm1874_vm1, %v11340_v48  ;;  %v2751_v18 = vrot.slane %v2750_v43, 2 }
 0x617   : > { %7205 = vmatprep.mubr.msk.bf16.mxu0 %vm1874_vm1, %v11341_v14 }
 0x618   : > { %v2752_v1 = vadd.f32 %v2751_v18, %v2750_v43 }
 0x61a   : > { %v2753_v56 = vrot.slane %v2752_v1, 1 }
 0x61c   : > { %v2754_v49 = vadd.f32 %v2753_v56, %v2752_v1 }
 0x61e   : > { %7206 = vmatmul.mubr.msk.bf16.gmra.mrb[68].mxu0 %vm1874_vm1, %v11342_v36  ;;  %7828 = vrcp.f32 %v2754_v49 }
 0x61f   : > { %7209 = vmatprep.mubr.msk.bf16.mxu0 %vm1874_vm1, %v11343_v5 }
 0x626   : > { %7210 = vmatmul.mubr.msk.bf16.gmra.mrb[72].mxu0 %vm1874_vm1, %v11344_v12 }
 0x627   : > { %7213 = vmatprep.mubr.msk.bf16.mxu0 %vm1874_vm1, %v11345_v19 }
 0x628   : > { %v7829_v63 = vpop.eup %7828 }
 0x62e   : > { %7214 = vmatmul.mubr.msk.bf16.gmra.mrb[76].mxu0 %vm1874_vm1, %v11346_v42 }
 0x62f   : > { %7217 = vmatprep.mubr.msk.bf16.mxu0 %vm1874_vm1, %v11347_v15 }
 0x636   : > { %7218 = vmatmul.mubr.msk.bf16.gmra.mrb[80].mxu0 %vm1874_vm1, %v11348_v27 }
 0x637   : > { %7221 = vmatprep.mubr.msk.bf16.mxu0 %vm1874_vm1, %v11349_v31 }
 0x63e   : > { %7222 = vmatmul.mubr.msk.bf16.gmra.mrb[84].mxu0 %vm1874_vm1, %v11350_v54 }
 0x63f   : > { %7225 = vmatprep.mubr.msk.bf16.mxu0 %vm1874_vm1, %v11351_v29  ;;  %v2843_v29 = vld [vmem:[#allocation3 + $0x48] sm:$0xff] }
 0x640   : > { %3306 = vmatprep.mubr.bf16.mxu1 %v2843_v29 }
 0x646   : > { %7226 = vmatmul.mubr.msk.bf16.gmra.mrb[88].mxu0 %vm1874_vm1, %v11352_v9 }
 0x647   : > { %7229 = vmatprep.mubr.msk.bf16.mxu0 %vm1874_vm1, %v11353_v45 }
 0x64e   : > { %7230 = vmatmul.mubr.msk.bf16.gmra.mrb[92].mxu0 %vm1874_vm1, %v11354_v20 }
 0x6d9   : > { %v6861_v44 = vpop.f32.mrb[56].mxu0 }
 0x6da   : > { %v6862_v6 = vpop.f32.mrb[57].mxu0 }
 0x6db   : > { %v6863_v52 = vadd.f32 %v6862_v6, %v6861_v44  ;;  %v6864_v37 = vpop.f32.mrb[58].mxu0 }
 0x6dc   : > { %v6865_v22 = vpop.f32.mrb[59].mxu0 }
 0x6dd   : > { %v2821_v3 = vmul.f32 %v7829_v63, %v6863_v52  ;;  %v6866_v23 = vadd.f32 %v6865_v22, %v6864_v37 }
 0x6df   : > { %v2822_v25 = vmul.f32 %v7829_v63, %v6866_v23 }
 0x6e1   : > { %v6867_v30 = vpop.f32.mrb[60].mxu0  ;;  %v9989_v21 = vpack.c.bf16 %v2822_v25, %v2821_v3 }
 0x6e2   : > { %v6868_v34 = vpop.f32.mrb[61].mxu0 }
 0x6e3   : > { %v6869_v4 = vadd.f32 %v6868_v34, %v6867_v30  ;;  %v6870_v58 = vpop.f32.mrb[62].mxu0 }
 0x6e4   : > { %v6871_v40 = vpop.f32.mrb[63].mxu0 }
 0x6e5   : > { %v2823_v33 = vmul.f32 %v7829_v63, %v6869_v4  ;;  %v6872_v39 = vadd.f32 %v6871_v40, %v6870_v58 }
 0x6e7   : > { %v2824_v10 = vmul.f32 %v7829_v63, %v6872_v39 }
 0x6e9   : > { %v9991_v17 = vpop.f32.mrb[64].mxu0  ;;  %v9993_v46 = vpack.c.bf16 %v2824_v10, %v2823_v33 }
 0x6ea   : > { %v9995_v26 = vpop.f32.mrb[65].mxu0 }
 0x6eb   : > { %v9997_v13 = vpop.f32.mrb[66].mxu0 }
 0x6ec   : > { %v9999_v41 = vpop.f32.mrb[67].mxu0 }
 0x6f1   : > { %v10001_v0 = vpop.f32.mrb[68].mxu0 }
 0x6f2   : > { %v3089_v38 = vmax.f32 %v9991_v17, %v10001_v0  ;;  %v10005_v47 = vpop.f32.mrb[69].mxu0 }
 0x6f3   : > { %v3087_v11 = vmax.f32 %v9995_v26, %v10005_v47  ;;  %v10009_v60 = vpop.f32.mrb[70].mxu0 }
 0x6f4   : > { %v3090_v32 = vmax.f32 %v9997_v13, %v10009_v60  ;;  %v10013_v51 = vpop.f32.mrb[71].mxu0 }
 0x6f5   : > { %v3088_v61 = vmax.f32 %v9999_v41, %v10013_v51 }
 0x6f9   : > { %v10017_v7 = vpop.f32.mrb[72].mxu0 }
 0x6fa   : > { %v3093_v8 = vmax.f32 %v3089_v38, %v10017_v7  ;;  %v10020_v24 = vpop.f32.mrb[73].mxu0 }
 0x6fb   : > { %v3091_v53 = vmax.f32 %v3087_v11, %v10020_v24  ;;  %v10023_v28 = vpop.f32.mrb[74].mxu0 }
 0x6fc   : > { %v3094_v35 = vmax.f32 %v3090_v32, %v10023_v28  ;;  %v10026_v16 = vpop.f32.mrb[75].mxu0 }
 0x6fd   : > { %v3092_v50 = vmax.f32 %v3088_v61, %v10026_v16 }
 0x701   : > { %v10029_v62 = vpop.f32.mrb[76].mxu0 }
 0x702   : > { %v3097_v59 = vmax.f32 %v3093_v8, %v10029_v62  ;;  %v10032_v48 = vpop.f32.mrb[77].mxu0 }
 0x703   : > { %v3095_v14 = vmax.f32 %v3091_v53, %v10032_v48  ;;  %v10035_v36 = vpop.f32.mrb[78].mxu0 }
 0x704   : > { %v3098_v5 = vmax.f32 %v3094_v35, %v10035_v36  ;;  %v10038_v12 = vpop.f32.mrb[79].mxu0 }
 0x705   : > { %v3096_v19 = vmax.f32 %v3092_v50, %v10038_v12 }
 0x709   : > { %v10041_v42 = vpop.f32.mrb[80].mxu0 }
 0x70a   : > { %v3101_v15 = vmax.f32 %v3097_v59, %v10041_v42  ;;  %v10044_v27 = vpop.f32.mrb[81].mxu0 }
 0x70b   : > { %v3099_v31 = vmax.f32 %v3095_v14, %v10044_v27  ;;  %v10047_v54 = vpop.f32.mrb[82].mxu0 }
 0x70c   : > { %v3102_v9 = vmax.f32 %v3098_v5, %v10047_v54  ;;  %v10050_v45 = vpop.f32.mrb[83].mxu0 }
 0x70d   : > { %v3100_v20 = vmax.f32 %v3096_v19, %v10050_v45 }
 0x711   : > { %v10053_v55 = vpop.f32.mrb[84].mxu0 }
 0x712   : > { %v3105_v43 = vmax.f32 %v3101_v15, %v10053_v55  ;;  %v10056_v18 = vpop.f32.mrb[85].mxu0 }
 0x713   : > { %v3103_v1 = vmax.f32 %v3099_v31, %v10056_v18  ;;  %v10059_v56 = vpop.f32.mrb[86].mxu0 }
 0x714   : > { %v3106_v49 = vmax.f32 %v3102_v9, %v10059_v56  ;;  %v10062_v44 = vpop.f32.mrb[87].mxu0 }
 0x715   : > { %v3104_v6 = vmax.f32 %v3100_v20, %v10062_v44 }
 0x719   : > { %v10065_v52 = vpop.f32.mrb[88].mxu0 }
 0x71a   : > { %v3109_v37 = vmax.f32 %v3105_v43, %v10065_v52  ;;  %v10068_v63 = vpop.f32.mrb[89].mxu0 }
 0x71b   : > { %v3107_v22 = vmax.f32 %v3103_v1, %v10068_v63  ;;  %v10071_v3 = vpop.f32.mrb[90].mxu0 }
 0x71c   : > { %v3110_v23 = vmax.f32 %v3106_v49, %v10071_v3  ;;  %v10074_v25 = vpop.f32.mrb[91].mxu0 }
 0x71d   : > { %v3108_v30 = vmax.f32 %v3104_v6, %v10074_v25 }
 0x721   : > { %v10077_v34 = vpop.f32.mrb[92].mxu0 }
 0x722   : > { %v3113_v4 = vmax.f32 %v3109_v37, %v10077_v34  ;;  %v10080_v58 = vpop.f32.mrb[93].mxu0 }
 0x723   : > { %v3111_v40 = vmax.f32 %v3107_v22, %v10080_v58  ;;  %v10083_v33 = vpop.f32.mrb[94].mxu0 }
 0x724   : > { %v3114_v39 = vmax.f32 %v3110_v23, %v10083_v33  ;;  %v10086_v10 = vpop.f32.mrb[95].mxu0 }
 0x725   : > { %v3112_v38 = vmax.f32 %v3108_v30, %v10086_v10 }
 0x726   : > { %v3116_v11 = vmax.f32 %v3113_v4, %v3114_v39 }
 0x727   : > { %v3115_v32 = vmax.f32 %v3111_v40, %v3112_v38 }
 0x729   : > { %v3117_v61 = vmax.f32 %v3115_v32, %v3116_v11 }
 0x72b   : > { %v3118_v8 = vrot.slane %v3117_v61, 4 }
 0x72d   : > { %v3119_v53 = vmax.f32 %v3117_v61, %v3118_v8 }
 0x72f   : > { %v3120_v35 = vrot.slane %v3119_v53, 2 }
 0x731   : > { %v3121_v50 = vmax.f32 %v3119_v53, %v3120_v35 }
 0x733   : > { %v3122_v59 = vrot.slane %v3121_v50, 1 }
 0x735   : > { %v10089_v14 = vmax.f32 %v3121_v50, %v3122_v59 }
 0x737   : > { %v3124_v5 = vsub.f32 %v9995_v26, %v10089_v14  ;;  %v3125_v19 = vsub.f32 %v9999_v41, %v10089_v14  ;;  %v3126_v15 = vsub.f32 %v9991_v17, %v10089_v14  ;;  %v3127_v31 = vsub.f32 %v9997_v13, %v10089_v14 }
 0x738   : > { %v3128_v29 = vsub.f32 %v10005_v47, %v10089_v14  ;;  %v3129_v9 = vsub.f32 %v10013_v51, %v10089_v14  ;;  %v3130_v20 = vsub.f32 %v10001_v0, %v10089_v14  ;;  %v3131_v26 = vsub.f32 %v10009_v60, %v10089_v14 }
 0x739   : > { %v3132_v41 = vsub.f32 %v10020_v24, %v10089_v14  ;;  %v3133_v17 = vsub.f32 %v10026_v16, %v10089_v14  ;;  %v3134_v13 = vsub.f32 %v10017_v7, %v10089_v14  ;;  %v3135_v47 = vsub.f32 %v10023_v28, %v10089_v14 }
 0x73a   : > { %v3136_v51 = vsub.f32 %v10032_v48, %v10089_v14  ;;  %v3137_v0 = vsub.f32 %v10038_v12, %v10089_v14  ;;  %v3138_v60 = vsub.f32 %v10029_v62, %v10089_v14  ;;  %v3139_v24 = vsub.f32 %v10035_v36, %v10089_v14 }
 0x73b   : > { %v3140_v16 = vsub.f32 %v10044_v27, %v10089_v14  ;;  %v3141_v7 = vsub.f32 %v10050_v45, %v10089_v14  ;;  %v3142_v28 = vsub.f32 %v10041_v42, %v10089_v14  ;;  %v3143_v48 = vsub.f32 %v10047_v54, %v10089_v14 }
 0x73c   : > { %v3144_v12 = vsub.f32 %v10056_v18, %v10089_v14  ;;  %v3145_v62 = vsub.f32 %v10062_v44, %v10089_v14  ;;  %v3146_v36 = vsub.f32 %v10053_v55, %v10089_v14  ;;  %v3147_v27 = vsub.f32 %v10059_v56, %v10089_v14 }
 0x73d   : > { %v3148_v45 = vsub.f32 %v10068_v63, %v10089_v14  ;;  %v3149_v42 = vsub.f32 %v10074_v25, %v10089_v14  ;;  %v3150_v54 = vsub.f32 %v10065_v52, %v10089_v14  ;;  %v3151_v43 = vsub.f32 %v10071_v3, %v10089_v14 }
 0x73e   : > { %v3152_v18 = vsub.f32 %v10080_v58, %v10089_v14  ;;  %v3153_v1 = vsub.f32 %v10086_v10, %v10089_v14  ;;  %v3154_v49 = vsub.f32 %v10077_v34, %v10089_v14  ;;  %v3155_v6 = vsub.f32 %v10083_v33, %v10089_v14 }
 0x73f   : > { %v3156_v37 = vmul.f32 1.442695, %v3124_v5  ;;  %v3158_v22 = vmul.f32 1.442695, %v3125_v19  ;;  %v3160_v23 = vmul.f32 1.442695, %v3126_v15 }
 0x740   : > { %v3162_v30 = vmul.f32 1.442695, %v3127_v31  ;;  %v3164_v4 = vmul.f32 1.442695, %v3128_v29  ;;  %v3166_v40 = vmul.f32 1.442695, %v3129_v9 }
 0x741   : > { %7830 = vpow2.f32 %v3156_v37  ;;  %v3168_v39 = vmul.f32 1.442695, %v3130_v20  ;;  %v3170_v38 = vmul.f32 1.442695, %v3131_v26  ;;  %v3172_v11 = vmul.f32 1.442695, %v3132_v41 }
 0x742   : > { %7832 = vpow2.f32 %v3158_v22  ;;  %v3174_v32 = vmul.f32 1.442695, %v3133_v17  ;;  %v3176_v61 = vmul.f32 1.442695, %v3134_v13  ;;  %v3178_v8 = vmul.f32 1.442695, %v3135_v47 }
 0x743   : > { %7834 = vpow2.f32 %v3160_v23  ;;  %v3180_v53 = vmul.f32 1.442695, %v3136_v51  ;;  %v3182_v35 = vmul.f32 1.442695, %v3137_v0  ;;  %v3184_v59 = vmul.f32 1.442695, %v3138_v60 }
 0x744   : > { %7836 = vpow2.f32 %v3162_v30  ;;  %v3186_v19 = vmul.f32 1.442695, %v3139_v24  ;;  %v3188_v31 = vmul.f32 1.442695, %v3140_v16  ;;  %v3190_v26 = vmul.f32 1.442695, %v3141_v7 }
 0x745   : > { %7838 = vpow2.f32 %v3164_v4  ;;  %v3192_v17 = vmul.f32 1.442695, %v3142_v28  ;;  %v3194_v0 = vmul.f32 1.442695, %v3143_v48  ;;  %v3196_v24 = vmul.f32 1.442695, %v3144_v12 }
 0x746   : > { %7840 = vpow2.f32 %v3166_v40  ;;  %v3198_v28 = vmul.f32 1.442695, %v3145_v62  ;;  %v3200_v48 = vmul.f32 1.442695, %v3146_v36  ;;  %v3202_v44 = vmul.f32 1.442695, %v3147_v27 }
 0x747   : > { %7842 = vpow2.f32 %v3168_v39  ;;  %v3204_v55 = vmul.f32 1.442695, %v3148_v45  ;;  %v3206_v56 = vmul.f32 1.442695, %v3149_v42  ;;  %v3208_v63 = vmul.f32 1.442695, %v3150_v54 }
 0x748   : > { %7844 = vpow2.f32 %v3170_v38  ;;  %v3210_v25 = vmul.f32 1.442695, %v3151_v43  ;;  %v3212_v52 = vmul.f32 1.442695, %v3152_v18  ;;  %v3214_v3 = vmul.f32 1.442695, %v3153_v1 }
 0x749   : > { %7846 = vpow2.f32 %v3172_v11 }
 0x74a   : > { %7848 = vpow2.f32 %v3174_v32 }
 0x74b   : > { %v10155_v50 = vpop.eup %7830  ;;  %7850 = vpow2.f32 %v3176_v61  ;;  %v3216_v61 = vmul.f32 1.442695, %v3154_v49 }
 0x74c   : > { %v10157_v5 = vpop.eup %7832  ;;  %7852 = vpow2.f32 %v3178_v8 }
 0x74d   : > { %v10159_v15 = vpop.eup %7834  ;;  %7854 = vpow2.f32 %v3180_v53  ;;  %v3220_v29 = vadd.f32 %v10157_v5, %v10155_v50  ;;  %v3258_v9 = vpack.c.bf16 %v10157_v5, %v10155_v50  ;;  %v3218_v53 = vmul.f32 1.442695, %v3155_v6 }
 0x74e   : > { %v10165_v20 = vpop.eup %7836  ;;  %7856 = vpow2.f32 %v3182_v35 }
 0x74f   : > { %v10167_v41 = vpop.eup %7838  ;;  %7858 = vpow2.f32 %v3184_v59  ;;  %v3221_v13 = vadd.f32 %v10159_v15, %v3220_v29  ;;  %v3259_v47 = vpack.c.bf16 %v10165_v20, %v10159_v15 }
 0x750   : > { %v10172_v51 = vpop.eup %7840  ;;  %7860 = vpow2.f32 %v3186_v19 }
 0x751   : > { %v10174_v60 = vpop.eup %7842  ;;  %7862 = vpow2.f32 %v3188_v31  ;;  %v3222_v16 = vadd.f32 %v10165_v20, %v3221_v13  ;;  %v3260_v7 = vpack.c.bf16 %v10172_v51, %v10167_v41 }
 0x752   : > { %v10179_v37 = vpop.eup %7844  ;;  %7864 = vpow2.f32 %v3190_v26 }
 0x753   : > { %v10184_v22 = vpop.eup %7846  ;;  %7866 = vpow2.f32 %v3192_v17  ;;  %v3223_v12 = vadd.f32 %v10167_v41, %v3222_v16  ;;  %v3261_v23 = vpack.c.bf16 %v10179_v37, %v10174_v60 }
 0x754   : > { %v10192_v30 = vpop.eup %7848  ;;  %7868 = vpow2.f32 %v3194_v0 }
 0x755   : > { %v10197_v62 = vpop.eup %7850  ;;  %7870 = vpow2.f32 %v3196_v24  ;;  %v3224_v36 = vadd.f32 %v10172_v51, %v3223_v12  ;;  %v3262_v4 = vpack.c.bf16 %v10192_v30, %v10184_v22 }
 0x756   : > { %v10205_v40 = vpop.eup %7852  ;;  %7872 = vpow2.f32 %v3198_v28 }
 0x757   : > { %v10210_v27 = vpop.eup %7854  ;;  %7874 = vpow2.f32 %v3200_v48  ;;  %v3225_v45 = vadd.f32 %v10174_v60, %v3224_v36  ;;  %v3263_v39 = vpack.c.bf16 %v10205_v40, %v10197_v62 }
 0x758   : > { %v10218_v38 = vpop.eup %7856  ;;  %7876 = vpow2.f32 %v3202_v44 }
 0x759   : > { %v10223_v42 = vpop.eup %7858  ;;  %7878 = vpow2.f32 %v3204_v55  ;;  %v3226_v54 = vadd.f32 %v10179_v37, %v3225_v45  ;;  %v3264_v11 = vpack.c.bf16 %v10218_v38, %v10210_v27  ;;  %v3356_v37 = vpop.trf.xlu0 }
 0x75a   : > { %v10231_v32 = vpop.eup %7860  ;;  %7880 = vpow2.f32 %v3206_v56 }
 0x75b   : > { %v7863_v43 = vpop.eup %7862  ;;  %7882 = vpow2.f32 %v3208_v63  ;;  %v3227_v58 = vadd.f32 %v10184_v22, %v3226_v54  ;;  %v3265_v18 = vpack.c.bf16 %v10231_v32, %v10223_v42  ;;  %v2842_v22 = vld [vmem:[#allocation3 + $0x40] sm:$0xff] }
 0x75c   : > { %v7865_v8 = vpop.eup %7864  ;;  %7884 = vpow2.f32 %v3210_v25  ;;  %v2845_v25 = vld [vmem:[#allocation3 + $0x58] sm:$0xff] }
 0x75d   : > { %v7867_v35 = vpop.eup %7866  ;;  %7886 = vpow2.f32 %v3212_v52  ;;  %v3228_v10 = vadd.f32 %v10192_v30, %v3227_v58  ;;  %v3266_v1 = vpack.c.bf16 %v7865_v8, %v7863_v43  ;;  %v3372_v58 = vpop.trf.xlu1 }
 0x75e   : > { %v7869_v59 = vpop.eup %7868  ;;  %7888 = vpow2.f32 %v3214_v3 }
 0x75f   : > { %v7871_v34 = vpop.eup %7870  ;;  %7890 = vpow2.f32 %v3216_v61  ;;  %v3229_v49 = vadd.f32 %v10197_v62, %v3228_v10  ;;  %6891 = vmatprep.subr.bf16.mxu1 %v3266_v1  ;;  %v3267_v19 = vpack.c.bf16 %v7869_v59, %v7867_v35  ;;  %v3357_v62 = vpop.trf.xlu0 }
 0x760   : > { %v7873_v31 = vpop.eup %7872  ;;  %7892 = vpow2.f32 %v3218_v53  ;;  %6892 = vmatpush3.bf16.msra.mxu1 %v3258_v9 }
 0x761   : > { %v7875_v33 = vpop.eup %7874  ;;  %v3230_v14 = vadd.f32 %v10205_v40, %v3229_v49  ;;  %6893 = vmatprep.subr.bf16.mxu1 %v3267_v19  ;;  %v3268_v6 = vpack.c.bf16 %v7873_v31, %v7871_v34 }
 0x762   : > { %v7877_v29 = vpop.eup %7876 }
 0x763   : > { %v7879_v26 = vpop.eup %7878  ;;  %v3231_v17 = vadd.f32 %v10210_v27, %v3230_v14  ;;  %v3269_v13 = vpack.c.bf16 %v7877_v29, %v7875_v33  ;;  %v3358_v54 = vpop.trf.xlu0 }
 0x764   : > { %v7881_v0 = vpop.eup %7880  ;;  %6894 = vmatpush3.bf16.msra.mxu1 %v3259_v47 }
 0x765   : > { %v7883_v24 = vpop.eup %7882  ;;  %v3232_v16 = vadd.f32 %v10218_v38, %v3231_v17  ;;  %6895 = vmatprep.subr.bf16.mxu1 %v3268_v6  ;;  %v3270_v50 = vpack.c.bf16 %v7881_v0, %v7879_v26  ;;  %v2844_v38 = vld [vmem:[#allocation3 + $0x50] sm:$0xff] }
 0x766   : > { %v7885_v5 = vpop.eup %7884 }
 0x767   : > { %v7887_v9 = vpop.eup %7886  ;;  %v3233_v28 = vadd.f32 %v10223_v42, %v3232_v16  ;;  %v3271_v48 = vpack.c.bf16 %v7885_v5, %v7883_v24  ;;  %v3359_v3 = vpop.trf.xlu0 }
 0x768   : > { %v7889_v12 = vpop.eup %7888  ;;  %6896 = vmatpush3.bf16.msra.mxu1 %v3260_v7 }
 0x769   : > { %v7891_v44 = vpop.eup %7890  ;;  %v3234_v55 = vadd.f32 %v10231_v32, %v3233_v28  ;;  %6897 = vmatprep.subr.bf16.mxu1 %v3269_v13  ;;  %v3272_v15 = vpack.c.bf16 %v7889_v12, %v7887_v9 }
 0x76a   : > { %v7893_v20 = vpop.eup %7892 }
 0x76b   : > { %v3235_v47 = vadd.f32 %v7863_v43, %v3234_v55  ;;  %v3273_v36 = vpack.c.bf16 %v7893_v20, %v7891_v44  ;;  %v3360_v43 = vpop.trf.xlu0 }
 0x76c   : > { %6898 = vmatpush3.bf16.msra.mxu1 %v3261_v23 }
 0x76d   : > { %v3236_v56 = vadd.f32 %v7865_v8, %v3235_v47  ;;  %6899 = vmatprep.subr.bf16.mxu1 %v3270_v50  ;;  %v3373_v8 = vpop.trf.xlu1 }
 0x76f   : > { %v3237_v63 = vadd.f32 %v7867_v35, %v3236_v56  ;;  %v3361_v61 = vpop.trf.xlu0 }
 0x770   : > { %6900 = vmatpush3.bf16.msra.mxu1 %v3262_v4  ;;  %v11355_v4 = vld [vmem:[#allocation59_spill] sm:$0xff] }
 0x771   : > { %v3238_v41 = vadd.f32 %v7869_v59, %v3237_v63  ;;  %6901 = vmatprep.subr.bf16.mxu1 %v3271_v48  ;;  %v3374_v35 = vpop.trf.xlu1 }
 0x773   : > { %v3239_v51 = vadd.f32 %v7871_v34, %v3238_v41 }
 0x774   : > { %6902 = vmatpush3.bf16.msra.mxu1 %v3263_v39  ;;  %v11356_v39 = vld [vmem:[#allocation60_spill] sm:$0xff] }
 0x775   : > { %v3240_v7 = vadd.f32 %v7873_v31, %v3239_v51  ;;  %6903 = vmatprep.subr.bf16.mxu1 %v3272_v15  ;;  %v3375_v10 = vpop.trf.xlu1 }
 0x777   : > { %v3241_v45 = vadd.f32 %v7875_v33, %v3240_v7 }
 0x778   : > { %6904 = vmatpush3.bf16.msra.mxu1 %v3264_v11 }
 0x779   : > { %v3242_v60 = vadd.f32 %v7877_v29, %v3241_v45  ;;  %6905 = vmatprep.subr.bf16.mxu1 %v3273_v36  ;;  %v3376_v1 = vpop.trf.xlu1 }
 0x77b   : > { %v3243_v23 = vadd.f32 %v7879_v26, %v3242_v60 }
 0x77c   : > { %6906 = vmatpush3.bf16.msra.mxu1 %v3265_v18  ;;  %v3362_v18 = vpop.trf.xlu0 }
 0x77d   : > { %v3244_v30 = vadd.f32 %v7881_v0, %v3243_v23  ;;  %7233 = vmatprep.subr.bf16.mxu1 %v11355_v4  ;;  %v3377_v59 = vpop.trf.xlu1 }
 0x77f   : > { %v3245_v42 = vadd.f32 %v7883_v24, %v3244_v30  ;;  %3307 = vmatmul.mubr.bf16.vlgmr.msra.gmra.mrb[32].mxu1 %v2842_v22 }
 0x780   : > { %7234 = vmatpush3.bf16.msra.mxu1 %v11355_v4  ;;  %3314 = vmatprep.mubr.bf16.mxu1 %v2845_v25  ;;  %v3363_v53 = vpop.trf.xlu0 }
 0x781   : > { %v3246_v40 = vadd.f32 %v7885_v5, %v3245_v42  ;;  %7235 = vmatprep.subr.bf16.mxu1 %v11356_v39  ;;  %v3378_v34 = vpop.trf.xlu1 }
 0x783   : > { %v3247_v27 = vadd.f32 %v7887_v9, %v3246_v40 }
 0x784   : > { %7236 = vmatpush3.bf16.msra.mxu1 %v11356_v39 }
 0x785   : > { %v3248_v52 = vadd.f32 %v7889_v12, %v3247_v27  ;;  %v3379_v49 = vpop.trf.xlu1 }
 0x787   : > { %v3249_v11 = vadd.f32 %v7891_v44, %v3248_v52  ;;  %3315 = vmatmul.mubr.bf16.gmra.mrb[36].mxu1 %v2844_v38 }
 0x788   : > { %7237 = vmatprep.mubr.msk.bf16.mxu1 %vm1874_vm1, %v3356_v37 }
 0x789   : > { %v3250_v32 = vadd.f32 %v7893_v20, %v3249_v11 }
 0x78b   : > { %v3251_v19 = vrot.slane %v3250_v32, 4 }
 0x78d   : > { %v3252_v31 = vadd.f32 %v3251_v19, %v3250_v32 }
 0x78f   : > { %7238 = vmatmul.mubr.msk.bf16.vlgmr.msra.gmra.mrb[40].mxu1 %vm1874_vm1, %v3357_v62  ;;  %v3253_v33 = vrot.slane %v3252_v31, 2 }
 0x790   : > { %7241 = vmatprep.mubr.msk.bf16.mxu1 %vm1874_vm1, %v3358_v54 }
 0x791   : > { %v3254_v14 = vadd.f32 %v3253_v33, %v3252_v31 }
 0x793   : > { %v3255_v6 = vrot.slane %v3254_v14, 1 }
 0x795   : > { %v3256_v29 = vadd.f32 %v3255_v6, %v3254_v14 }
 0x797   : > { %7242 = vmatmul.mubr.msk.bf16.gmra.mrb[44].mxu1 %vm1874_vm1, %v3359_v3  ;;  %7894 = vrcp.f32 %v3256_v29 }
 0x798   : > { %7245 = vmatprep.mubr.msk.bf16.mxu1 %vm1874_vm1, %v3360_v43 }
 0x79f   : > { %7246 = vmatmul.mubr.msk.bf16.gmra.mrb[48].mxu1 %vm1874_vm1, %v3361_v61 }
 0x7a0   : > { %7249 = vmatprep.mubr.msk.bf16.mxu1 %vm1874_vm1, %v3362_v18 }
 0x7a1   : > { %v7895_v24 = vpop.eup %7894 }
 0x7a7   : > { %7250 = vmatmul.mubr.msk.bf16.gmra.mrb[52].mxu1 %vm1874_vm1, %v3363_v53 }
 0x7a8   : > { %7253 = vmatprep.mubr.msk.bf16.mxu1 %vm1874_vm1, %v3372_v58 }
 0x7af   : > { %7254 = vmatmul.mubr.msk.bf16.gmra.mrb[56].mxu1 %vm1874_vm1, %v3373_v8 }
 0x7b0   : > { %7257 = vmatprep.mubr.msk.bf16.mxu1 %vm1874_vm1, %v3374_v35 }
 0x7b7   : > { %7258 = vmatmul.mubr.msk.bf16.gmra.mrb[60].mxu1 %vm1874_vm1, %v3375_v10 }
 0x7b8   : > { %7261 = vmatprep.mubr.msk.bf16.mxu1 %vm1874_vm1, %v3376_v1 }
 0x7bf   : > { %7262 = vmatmul.mubr.msk.bf16.gmra.mrb[64].mxu1 %vm1874_vm1, %v3377_v59 }
 0x7c0   : > { %7265 = vmatprep.mubr.msk.bf16.mxu1 %vm1874_vm1, %v3378_v34  ;;  %v3345_v34 = vld [vmem:[#allocation3 + $0x68] sm:$0xff] }
 0x7c1   : > { %3808 = vmatprep.mubr.bf16.mxu0 %v3345_v34 }
 0x7c7   : > { %7266 = vmatmul.mubr.msk.bf16.gmra.mrb[68].mxu1 %vm1874_vm1, %v3379_v49 }
 0x852   : > { %v6907_v26 = vpop.f32.mrb[32].mxu1 }
 0x853   : > { %v6908_v17 = vpop.f32.mrb[33].mxu1 }
 0x854   : > { %v6909_v13 = vadd.f32 %v6908_v17, %v6907_v26  ;;  %v6910_v0 = vpop.f32.mrb[34].mxu1 }
 0x855   : > { %v6911_v16 = vpop.f32.mrb[35].mxu1 }
 0x856   : > { %v3323_v50 = vmul.f32 %v7895_v24, %v6909_v13  ;;  %v6912_v5 = vadd.f32 %v6911_v16, %v6910_v0 }
 0x858   : > { %v3324_v9 = vmul.f32 %v7895_v24, %v6912_v5 }
 0x85a   : > { %v6913_v28 = vpop.f32.mrb[36].mxu1  ;;  %v10293_v48 = vpack.c.bf16 %v3324_v9, %v3323_v50 }
 0x85b   : > { %v6914_v12 = vpop.f32.mrb[37].mxu1 }
 0x85c   : > { %v6915_v44 = vadd.f32 %v6914_v12, %v6913_v28  ;;  %v6916_v55 = vpop.f32.mrb[38].mxu1 }
 0x85d   : > { %v6917_v15 = vpop.f32.mrb[39].mxu1 }
 0x85e   : > { %v3325_v20 = vmul.f32 %v7895_v24, %v6915_v44  ;;  %v6918_v47 = vadd.f32 %v6917_v15, %v6916_v55 }
 0x860   : > { %v3326_v36 = vmul.f32 %v7895_v24, %v6918_v47 }
 0x862   : > { %v10295_v56 = vpop.f32.mrb[40].mxu1  ;;  %v10297_v63 = vpack.c.bf16 %v3326_v36, %v3325_v20 }
 0x863   : > { %v10299_v41 = vpop.f32.mrb[41].mxu1 }
 0x864   : > { %v10301_v51 = vpop.f32.mrb[42].mxu1 }
 0x865   : > { %v10303_v7 = vpop.f32.mrb[43].mxu1 }
 0x86a   : > { %v10305_v45 = vpop.f32.mrb[44].mxu1 }
 0x86b   : > { %v3591_v60 = vmax.f32 %v10295_v56, %v10305_v45  ;;  %v10309_v37 = vpop.f32.mrb[45].mxu1 }
 0x86c   : > { %v3589_v23 = vmax.f32 %v10299_v41, %v10309_v37  ;;  %v10313_v22 = vpop.f32.mrb[46].mxu1 }
 0x86d   : > { %v3592_v30 = vmax.f32 %v10301_v51, %v10313_v22  ;;  %v10317_v4 = vpop.f32.mrb[47].mxu1 }
 0x86e   : > { %v3590_v25 = vmax.f32 %v10303_v7, %v10317_v4 }
 0x872   : > { %v10321_v42 = vpop.f32.mrb[48].mxu1 }
 0x873   : > { %v3595_v62 = vmax.f32 %v3591_v60, %v10321_v42  ;;  %v10324_v40 = vpop.f32.mrb[49].mxu1 }
 0x874   : > { %v3593_v39 = vmax.f32 %v3589_v23, %v10324_v40  ;;  %v10327_v27 = vpop.f32.mrb[50].mxu1 }
 0x875   : > { %v3596_v38 = vmax.f32 %v3592_v30, %v10327_v27  ;;  %v10330_v52 = vpop.f32.mrb[51].mxu1 }
 0x876   : > { %v3594_v54 = vmax.f32 %v3590_v25, %v10330_v52 }
 0x87a   : > { %v10333_v11 = vpop.f32.mrb[52].mxu1 }
 0x87b   : > { %v3599_v32 = vmax.f32 %v3595_v62, %v10333_v11  ;;  %v10336_v3 = vpop.f32.mrb[53].mxu1 }
 0x87c   : > { %v3597_v43 = vmax.f32 %v3593_v39, %v10336_v3  ;;  %v10339_v61 = vpop.f32.mrb[54].mxu1 }
 0x87d   : > { %v3600_v58 = vmax.f32 %v3596_v38, %v10339_v61  ;;  %v10342_v18 = vpop.f32.mrb[55].mxu1 }
 0x87e   : > { %v3598_v8 = vmax.f32 %v3594_v54, %v10342_v18 }
 0x882   : > { %v10345_v53 = vpop.f32.mrb[56].mxu1 }
 0x883   : > { %v3603_v35 = vmax.f32 %v3599_v32, %v10345_v53  ;;  %v10348_v10 = vpop.f32.mrb[57].mxu1 }
 0x884   : > { %v3601_v1 = vmax.f32 %v3597_v43, %v10348_v10  ;;  %v10351_v59 = vpop.f32.mrb[58].mxu1 }
 0x885   : > { %v3604_v49 = vmax.f32 %v3600_v58, %v10351_v59  ;;  %v10354_v19 = vpop.f32.mrb[59].mxu1 }
 0x886   : > { %v3602_v31 = vmax.f32 %v3598_v8, %v10354_v19 }
 0x88a   : > { %v10357_v33 = vpop.f32.mrb[60].mxu1 }
 0x88b   : > { %v3607_v14 = vmax.f32 %v3603_v35, %v10357_v33  ;;  %v10360_v6 = vpop.f32.mrb[61].mxu1 }
 0x88c   : > { %v3605_v29 = vmax.f32 %v3601_v1, %v10360_v6  ;;  %v10363_v26 = vpop.f32.mrb[62].mxu1 }
 0x88d   : > { %v3608_v17 = vmax.f32 %v3604_v49, %v10363_v26  ;;  %v10366_v13 = vpop.f32.mrb[63].mxu1 }
 0x88e   : > { %v3606_v0 = vmax.f32 %v3602_v31, %v10366_v13 }
 0x892   : > { %v10369_v24 = vpop.f32.mrb[64].mxu1 }
 0x893   : > { %v3611_v16 = vmax.f32 %v3607_v14, %v10369_v24  ;;  %v10372_v50 = vpop.f32.mrb[65].mxu1 }
 0x894   : > { %v3609_v5 = vmax.f32 %v3605_v29, %v10372_v50  ;;  %v10375_v9 = vpop.f32.mrb[66].mxu1 }
 0x895   : > { %v3612_v28 = vmax.f32 %v3608_v17, %v10375_v9  ;;  %v10378_v12 = vpop.f32.mrb[67].mxu1 }
 0x896   : > { %v3610_v44 = vmax.f32 %v3606_v0, %v10378_v12 }
 0x89a   : > { %v10381_v55 = vpop.f32.mrb[68].mxu1 }
 0x89b   : > { %v3615_v15 = vmax.f32 %v3611_v16, %v10381_v55  ;;  %v10384_v20 = vpop.f32.mrb[69].mxu1 }
 0x89c   : > { %v3613_v47 = vmax.f32 %v3609_v5, %v10384_v20  ;;  %v10387_v36 = vpop.f32.mrb[70].mxu1 }
 0x89d   : > { %v3616_v60 = vmax.f32 %v3612_v28, %v10387_v36  ;;  %v10390_v23 = vpop.f32.mrb[71].mxu1 }
 0x89e   : > { %v3614_v30 = vmax.f32 %v3610_v44, %v10390_v23 }
 0x89f   : > { %v3618_v25 = vmax.f32 %v3615_v15, %v3616_v60 }
 0x8a0   : > { %v3617_v62 = vmax.f32 %v3613_v47, %v3614_v30 }
 0x8a2   : > { %v3619_v39 = vmax.f32 %v3617_v62, %v3618_v25 }
 0x8a4   : > { %v3620_v38 = vrot.slane %v3619_v39, 4 }
 0x8a6   : > { %v3621_v54 = vmax.f32 %v3619_v39, %v3620_v38 }
 0x8a8   : > { %v3622_v32 = vrot.slane %v3621_v54, 2 }
 0x8aa   : > { %v3623_v43 = vmax.f32 %v3621_v54, %v3622_v32 }
 0x8ac   : > { %v3624_v58 = vrot.slane %v3623_v43, 1 }
 0x8ae   : > { %v10393_v8 = vmax.f32 %v3623_v43, %v3624_v58 }
 0x8b0   : > { %v3626_v35 = vsub.f32 %v10299_v41, %v10393_v8  ;;  %v3627_v1 = vsub.f32 %v10303_v7, %v10393_v8  ;;  %v3628_v34 = vsub.f32 %v10295_v56, %v10393_v8  ;;  %v3629_v49 = vsub.f32 %v10301_v51, %v10393_v8 }
 0x8b1   : > { %v3630_v31 = vsub.f32 %v10309_v37, %v10393_v8  ;;  %v3631_v14 = vsub.f32 %v10317_v4, %v10393_v8  ;;  %v3632_v29 = vsub.f32 %v10305_v45, %v10393_v8  ;;  %v3633_v41 = vsub.f32 %v10313_v22, %v10393_v8 }
 0x8b2   : > { %v3634_v7 = vsub.f32 %v10324_v40, %v10393_v8  ;;  %v3635_v56 = vsub.f32 %v10330_v52, %v10393_v8  ;;  %v3636_v51 = vsub.f32 %v10321_v42, %v10393_v8  ;;  %v3637_v37 = vsub.f32 %v10327_v27, %v10393_v8 }
 0x8b3   : > { %v3638_v4 = vsub.f32 %v10336_v3, %v10393_v8  ;;  %v3639_v45 = vsub.f32 %v10342_v18, %v10393_v8  ;;  %v3640_v22 = vsub.f32 %v10333_v11, %v10393_v8  ;;  %v3641_v40 = vsub.f32 %v10339_v61, %v10393_v8 }
 0x8b4   : > { %v3642_v52 = vsub.f32 %v10348_v10, %v10393_v8  ;;  %v3643_v42 = vsub.f32 %v10354_v19, %v10393_v8  ;;  %v3644_v27 = vsub.f32 %v10345_v53, %v10393_v8  ;;  %v3645_v3 = vsub.f32 %v10351_v59, %v10393_v8 }
 0x8b5   : > { %v3646_v18 = vsub.f32 %v10360_v6, %v10393_v8  ;;  %v3647_v11 = vsub.f32 %v10366_v13, %v10393_v8  ;;  %v3648_v61 = vsub.f32 %v10357_v33, %v10393_v8  ;;  %v3649_v10 = vsub.f32 %v10363_v26, %v10393_v8 }
 0x8b6   : > { %v3650_v19 = vsub.f32 %v10372_v50, %v10393_v8  ;;  %v3651_v53 = vsub.f32 %v10378_v12, %v10393_v8  ;;  %v3652_v59 = vsub.f32 %v10369_v24, %v10393_v8  ;;  %v3653_v6 = vsub.f32 %v10375_v9, %v10393_v8 }
 0x8b7   : > { %v3654_v17 = vsub.f32 %v10384_v20, %v10393_v8  ;;  %v3655_v0 = vsub.f32 %v10390_v23, %v10393_v8  ;;  %v3656_v16 = vsub.f32 %v10381_v55, %v10393_v8  ;;  %v3657_v5 = vsub.f32 %v10387_v36, %v10393_v8 }
 0x8b8   : > { %v3658_v28 = vmul.f32 1.442695, %v3626_v35  ;;  %v3660_v44 = vmul.f32 1.442695, %v3627_v1  ;;  %v3662_v15 = vmul.f32 1.442695, %v3628_v34 }
 0x8b9   : > { %v3664_v47 = vmul.f32 1.442695, %v3629_v49  ;;  %v3666_v60 = vmul.f32 1.442695, %v3630_v31  ;;  %v3668_v30 = vmul.f32 1.442695, %v3631_v14 }
 0x8ba   : > { %7896 = vpow2.f32 %v3658_v28  ;;  %v3670_v25 = vmul.f32 1.442695, %v3632_v29  ;;  %v3672_v62 = vmul.f32 1.442695, %v3633_v41  ;;  %v3674_v39 = vmul.f32 1.442695, %v3634_v7 }
 0x8bb   : > { %7898 = vpow2.f32 %v3660_v44  ;;  %v3676_v38 = vmul.f32 1.442695, %v3635_v56  ;;  %v3678_v54 = vmul.f32 1.442695, %v3636_v51  ;;  %v3680_v32 = vmul.f32 1.442695, %v3637_v37 }
 0x8bc   : > { %7900 = vpow2.f32 %v3662_v15  ;;  %v3682_v43 = vmul.f32 1.442695, %v3638_v4  ;;  %v3684_v58 = vmul.f32 1.442695, %v3639_v45  ;;  %v3686_v1 = vmul.f32 1.442695, %v3640_v22 }
 0x8bd   : > { %7902 = vpow2.f32 %v3664_v47  ;;  %v3688_v49 = vmul.f32 1.442695, %v3641_v40  ;;  %v3690_v14 = vmul.f32 1.442695, %v3642_v52  ;;  %v3692_v56 = vmul.f32 1.442695, %v3643_v42 }
 0x8be   : > { %7904 = vpow2.f32 %v3666_v60  ;;  %v3694_v37 = vmul.f32 1.442695, %v3644_v27  ;;  %v3696_v40 = vmul.f32 1.442695, %v3645_v3  ;;  %v3698_v28 = vmul.f32 1.442695, %v3646_v18 }
 0x8bf   : > { %7906 = vpow2.f32 %v3668_v30  ;;  %v3700_v27 = vmul.f32 1.442695, %v3647_v11  ;;  %v3702_v3 = vmul.f32 1.442695, %v3648_v61  ;;  %v3704_v13 = vmul.f32 1.442695, %v3649_v10 }
 0x8c0   : > { %7908 = vpow2.f32 %v3670_v25  ;;  %v3706_v33 = vmul.f32 1.442695, %v3650_v19  ;;  %v3708_v26 = vmul.f32 1.442695, %v3651_v53  ;;  %v3710_v50 = vmul.f32 1.442695, %v3652_v59 }
 0x8c1   : > { %7910 = vpow2.f32 %v3672_v62  ;;  %v3712_v12 = vmul.f32 1.442695, %v3653_v6  ;;  %v3714_v24 = vmul.f32 1.442695, %v3654_v17  ;;  %v3716_v9 = vmul.f32 1.442695, %v3655_v0 }
 0x8c2   : > { %7912 = vpow2.f32 %v3674_v39 }
 0x8c3   : > { %7914 = vpow2.f32 %v3676_v38 }
 0x8c4   : > { %v10459_v35 = vpop.eup %7896  ;;  %7916 = vpow2.f32 %v3678_v54 }
 0x8c5   : > { %v10461_v34 = vpop.eup %7898  ;;  %7918 = vpow2.f32 %v3680_v32 }
 0x8c6   : > { %v10463_v31 = vpop.eup %7900  ;;  %7920 = vpow2.f32 %v3682_v43  ;;  %v3722_v29 = vadd.f32 %v10461_v34, %v10459_v35  ;;  %v3760_v41 = vpack.c.bf16 %v10461_v34, %v10459_v35  ;;  %v3718_v43 = vmul.f32 1.442695, %v3656_v16 }
 0x8c7   : > { %v10469_v7 = vpop.eup %7902  ;;  %7922 = vpow2.f32 %v3684_v58 }
 0x8c8   : > { %v10471_v51 = vpop.eup %7904  ;;  %7924 = vpow2.f32 %v3686_v1  ;;  %v3723_v4 = vadd.f32 %v10463_v31, %v3722_v29  ;;  %v3761_v45 = vpack.c.bf16 %v10469_v7, %v10463_v31  ;;  %v3720_v1 = vmul.f32 1.442695, %v3657_v5 }
 0x8c9   : > { %v10476_v22 = vpop.eup %7906  ;;  %7926 = vpow2.f32 %v3688_v49 }
 0x8ca   : > { %v10478_v52 = vpop.eup %7908  ;;  %7928 = vpow2.f32 %v3690_v14  ;;  %v3724_v44 = vadd.f32 %v10469_v7, %v3723_v4  ;;  %v3762_v42 = vpack.c.bf16 %v10476_v22, %v10471_v51 }
 0x8cb   : > { %v10483_v15 = vpop.eup %7910  ;;  %7930 = vpow2.f32 %v3692_v56 }
 0x8cc   : > { %v10488_v47 = vpop.eup %7912  ;;  %7932 = vpow2.f32 %v3694_v37  ;;  %v3725_v18 = vadd.f32 %v10471_v51, %v3724_v44  ;;  %v3763_v60 = vpack.c.bf16 %v10483_v15, %v10478_v52 }
 0x8cd   : > { %v10496_v30 = vpop.eup %7914  ;;  %7934 = vpow2.f32 %v3696_v40 }
 0x8ce   : > { %v10501_v11 = vpop.eup %7916  ;;  %7936 = vpow2.f32 %v3698_v28  ;;  %v3726_v61 = vadd.f32 %v10476_v22, %v3725_v18  ;;  %v3764_v25 = vpack.c.bf16 %v10496_v30, %v10488_v47 }
 0x8cf   : > { %v10509_v62 = vpop.eup %7918  ;;  %7938 = vpow2.f32 %v3700_v27 }
 0x8d0   : > { %v10514_v10 = vpop.eup %7920  ;;  %7940 = vpow2.f32 %v3702_v3  ;;  %v3727_v19 = vadd.f32 %v10478_v52, %v3726_v61  ;;  %v3765_v39 = vpack.c.bf16 %v10509_v62, %v10501_v11 }
 0x8d1   : > { %v10522_v38 = vpop.eup %7922  ;;  %7942 = vpow2.f32 %v3704_v13 }
 0x8d2   : > { %v10527_v53 = vpop.eup %7924  ;;  %7944 = vpow2.f32 %v3706_v33  ;;  %v3728_v59 = vadd.f32 %v10483_v15, %v3727_v19  ;;  %v3766_v54 = vpack.c.bf16 %v10522_v38, %v10514_v10 }
 0x8d3   : > { %v10535_v32 = vpop.eup %7926  ;;  %7946 = vpow2.f32 %v3708_v26 }
 0x8d4   : > { %v7929_v6 = vpop.eup %7928  ;;  %7948 = vpow2.f32 %v3710_v50  ;;  %v3729_v20 = vadd.f32 %v10488_v47, %v3728_v59  ;;  %v3767_v17 = vpack.c.bf16 %v10535_v32, %v10527_v53  ;;  %v3344_v47 = vld [vmem:[#allocation3 + $0x60] sm:$0xff] }
 0x8d5   : > { %v7931_v58 = vpop.eup %7930  ;;  %7950 = vpow2.f32 %v3712_v12 }
 0x8d6   : > { %v7933_v49 = vpop.eup %7932  ;;  %7952 = vpow2.f32 %v3714_v24  ;;  %v3730_v23 = vadd.f32 %v10496_v30, %v3729_v20  ;;  %v3768_v0 = vpack.c.bf16 %v7931_v58, %v7929_v6  ;;  %v3347_v30 = vld [vmem:[#allocation3 + $0x78] sm:$0xff] }
 0x8d7   : > { %v7935_v14 = vpop.eup %7934  ;;  %7954 = vpow2.f32 %v3716_v9 }
 0x8d8   : > { %v7937_v55 = vpop.eup %7936  ;;  %7956 = vpow2.f32 %v3718_v43  ;;  %v3731_v16 = vadd.f32 %v10501_v11, %v3730_v23  ;;  %6937 = vmatprep.subr.bf16.mxu0 %v3768_v0  ;;  %v3769_v29 = vpack.c.bf16 %v7935_v14, %v7933_v49 }
 0x8d9   : > { %v7939_v56 = vpop.eup %7938  ;;  %7958 = vpow2.f32 %v3720_v1  ;;  %6938 = vmatpush3.bf16.msra.mxu0 %v3760_v41 }
 0x8da   : > { %v7941_v36 = vpop.eup %7940  ;;  %v3732_v8 = vadd.f32 %v10509_v62, %v3731_v16  ;;  %6939 = vmatprep.subr.bf16.mxu0 %v3769_v29  ;;  %v3770_v5 = vpack.c.bf16 %v7939_v56, %v7937_v55 }
 0x8db   : > { %v7943_v37 = vpop.eup %7942 }
 0x8dc   : > { %v7945_v4 = vpop.eup %7944  ;;  %v3733_v40 = vadd.f32 %v10514_v10, %v3732_v8  ;;  %v3771_v28 = vpack.c.bf16 %v7943_v37, %v7941_v36  ;;  %v3346_v10 = vld [vmem:[#allocation3 + $0x70] sm:$0xff] }
 0x8dd   : > { %v7947_v44 = vpop.eup %7946  ;;  %6940 = vmatpush3.bf16.msra.mxu0 %v3761_v45 }
 0x8de   : > { %v7949_v27 = vpop.eup %7948  ;;  %v3734_v3 = vadd.f32 %v10522_v38, %v3733_v40  ;;  %6941 = vmatprep.subr.bf16.mxu0 %v3770_v5  ;;  %v3772_v35 = vpack.c.bf16 %v7947_v44, %v7945_v4  ;;  %v4010_v38 = vpop.trf.xlu0 }
 0x8df   : > { %v7951_v34 = vpop.eup %7950 }
 0x8e0   : > { %v7953_v41 = vpop.eup %7952  ;;  %v3735_v18 = vadd.f32 %v10527_v53, %v3734_v3  ;;  %v3773_v13 = vpack.c.bf16 %v7951_v34, %v7949_v27  ;;  %v7666_v3 = vld [vmem:[%s11357_s10] sm:$0xff]  }
 0x8e1   : > { %v7955_v33 = vpop.eup %7954  ;;  %6942 = vmatpush3.bf16.msra.mxu0 %v3762_v42  ;;  %7317 = vmatprep.mubr.bf16.mxu1 %v7666_v3  ;;  %v7965_v3 = vld [vmem:[%s8663_s16 + $0x18] sm:$0xff]  }
 0x8e2   : > { %v7957_v61 = vpop.eup %7956  ;;  %v3736_v26 = vadd.f32 %v10535_v32, %v3735_v18  ;;  %6943 = vmatprep.subr.bf16.mxu0 %v3771_v28  ;;  %v3774_v31 = vpack.c.bf16 %v7955_v33, %v7953_v41  ;;  %v4011_v23 = vpop.trf.xlu0 }
 0x8e3   : > { %v7959_v7 = vpop.eup %7958 }
 0x8e4   : > { %v3737_v45 = vadd.f32 %v7929_v6, %v3736_v26  ;;  %v3775_v50 = vpack.c.bf16 %v7959_v7, %v7957_v61 }
 0x8e5   : > { %6944 = vmatpush3.bf16.msra.mxu0 %v3763_v60 }
 0x8e6   : > { %v3738_v19 = vadd.f32 %v7931_v58, %v3737_v45  ;;  %6945 = vmatprep.subr.bf16.mxu0 %v3772_v35  ;;  %v4012_v8 = vpop.trf.xlu0  ;;  %v3877_v35 = vpop.permute.xlu1 %3876 }
 0x8e8   : > { %v3739_v12 = vadd.f32 %v7933_v49, %v3738_v19 }
 0x8e9   : > { %6946 = vmatpush3.bf16.msra.mxu0 %v3764_v25 }
 0x8ea   : > { %v3740_v51 = vadd.f32 %v7935_v14, %v3739_v12  ;;  %6947 = vmatprep.subr.bf16.mxu0 %v3773_v13 }
 0x8ec   : > { %v3741_v22 = vadd.f32 %v7937_v55, %v3740_v51 }
 0x8ed   : > { %6948 = vmatpush3.bf16.msra.mxu0 %v3765_v39 }
 0x8ee   : > { %v3742_v42 = vadd.f32 %v7939_v56, %v3741_v22  ;;  %6949 = vmatprep.subr.bf16.mxu0 %v3774_v31 }
 0x8f0   : > { %v3743_v53 = vadd.f32 %v7941_v36, %v3742_v42 }
 0x8f1   : > { %6950 = vmatpush3.bf16.msra.mxu0 %v3766_v54 }
 0x8f2   : > { %v3744_v52 = vadd.f32 %v7943_v37, %v3743_v53  ;;  %6951 = vmatprep.subr.bf16.mxu0 %v3775_v50 }
 0x8f4   : > { %v3745_v15 = vadd.f32 %v7945_v4, %v3744_v52  ;;  %v4013_v4 = vpop.trf.xlu0 }
 0x8f5   : > { %6952 = vmatpush3.bf16.msra.mxu0 %v3767_v17 }
 0x8f6   : > { %v3746_v60 = vadd.f32 %v7947_v44, %v3745_v15  ;;  %7269 = vmatprep.subr.bf16.mxu0 %v9669_v2 }
 0x8f8   : > { %v3747_v25 = vadd.f32 %v7949_v27, %v3746_v60  ;;  %3809 = vmatmul.mubr.bf16.vlgmr.msra.gmra.mrb[96].mxu0 %v3344_v47  ;;  %v4014_v40 = vpop.trf.xlu0 }
 0x8f9   : > { %7270 = vmatpush3.bf16.msra.mxu0 %v9669_v2  ;;  %3816 = vmatprep.mubr.bf16.mxu0 %v3347_v30 }
 0x8fa   : > { %v3748_v11 = vadd.f32 %v7951_v34, %v3747_v25  ;;  %7271 = vmatprep.subr.bf16.mxu0 %v9673_v57  ;;  %v3882_v34 = vpop.permute.xlu1 %3881 }
 0x8fc   : > { %v3749_v62 = vadd.f32 %v7953_v41, %v3748_v11  ;;  %v4015_v28 = vpop.trf.xlu0 }
 0x8fd   : > { %7272 = vmatpush3.bf16.msra.mxu0 %v9673_v57 }
 0x8fe   : > { %v3750_v39 = vadd.f32 %v7955_v33, %v3749_v62  ;;  %7273 = vmatprep.subr.bf16.mxu0 %v9989_v21  ;;  %v3887_v41 = vpop.permute.xlu1 %3886 }
 0x900   : > { %v3751_v24 = vadd.f32 %v7957_v61, %v3750_v39  ;;  %3817 = vmatmul.mubr.bf16.gmra.mrb[100].mxu0 %v3346_v10  ;;  %v4016_v44 = vpop.trf.xlu0 }
 0x901   : > { %7274 = vmatpush3.bf16.msra.mxu0 %v9989_v21  ;;  %7285 = vmatprep.mubr.bf16.mxu0 %v4010_v38 }
 0x902   : > { %v3752_v59 = vadd.f32 %v7959_v7, %v3751_v24  ;;  %7275 = vmatprep.subr.bf16.mxu0 %v9993_v46  ;;  %v3892_v18 = vpop.permute.xlu1 %3891 }
 0x904   : > { %v3753_v2 = vrot.slane %v3752_v59, 4  ;;  %v4017_v27 = vpop.trf.xlu0 }
 0x905   : > { %7276 = vmatpush3.bf16.msra.mxu0 %v9993_v46 }
 0x906   : > { %7277 = vmatprep.subr.bf16.mxu0 %v10293_v48  ;;  %v3754_v57 = vadd.f32 %v3753_v2, %v3752_v59  ;;  %v3897_v13 = vpop.permute.xlu1 %3896 }
 0x908   : > { %v3755_v54 = vrot.slane %v3754_v57, 2  ;;  %v3907_v52 = vpop.permute.xlu0 %3906 }
 0x909   : > { %7278 = vmatpush3.bf16.msra.mxu0 %v10293_v48 }
 0x90a   : > { %7279 = vmatprep.subr.bf16.mxu0 %v10297_v63  ;;  %v3756_v32 = vadd.f32 %v3755_v54, %v3754_v57  ;;  %v3902_v33 = vpop.permute.xlu1 %3901 }
 0x90c   : > { %v3757_v9 = vrot.slane %v3756_v32, 1  ;;  %v3927_v38 = vpop.permute.xlu0 %3926 }
 0x90d   : > { %7280 = vmatpush3.bf16.msra.mxu0 %v10297_v63 }
 0x90e   : > { %v3758_v21 = vadd.f32 %v3757_v9, %v3756_v32  ;;  %v3912_v61 = vpop.permute.xlu1 %3911 }
 0x910   : > { %7960 = vrcp.f32 %v3758_v21  ;;  %v3937_v9 = vpop.permute.xlu0 %3936 }
 0x912   : > { %v3917_v7 = vpop.permute.xlu1 %3916 }
 0x916   : > { %v3922_v15 = vpop.permute.xlu1 %3921 }
 0x91a   : > { %v7961_v46 = vpop.eup %7960  ;;  %v3932_v59 = vpop.permute.xlu1 %3931 }
 0x9cb   : > { %v6953_v6 = vpop.f32.mrb[96].mxu0 }
 0x9cc   : > { %v6954_v43 = vpop.f32.mrb[97].mxu0 }
 0x9cd   : > { %v6955_v20 = vadd.f32 %v6954_v43, %v6953_v6  ;;  %v6956_v17 = vpop.f32.mrb[98].mxu0 }
 0x9ce   : > { %v6957_v58 = vpop.f32.mrb[99].mxu0 }
 0x9cf   : > { %v3825_v1 = vmul.f32 %v7961_v46, %v6955_v20  ;;  %v6958_v49 = vadd.f32 %v6957_v58, %v6956_v17  ;;  %v3942_v20 = vpop.permute.xlu1 %3941 }
 0x9d1   : > { %v3826_v48 = vmul.f32 %v7961_v46, %v6958_v49 }
 0x9d3   : > { %v6959_v0 = vpop.f32.mrb[100].mxu0  ;;  %v3829_v14 = vpack.c.bf16 %v3826_v48, %v3825_v1  ;;  %v3947_v48 = vpop.permute.xlu0 %3946 }
 0x9d4   : > { %v6960_v63 = vpop.f32.mrb[101].mxu0 }
 0x9d5   : > { %v6961_v55 = vadd.f32 %v6960_v63, %v6959_v0  ;;  %v6962_v16 = vpop.f32.mrb[102].mxu0  ;;  %7281 = vmatprep.subr.bf16.mxu0 %v3829_v14  ;;  %v3952_v0 = vpop.permute.xlu1 %3951 }
 0x9d6   : > { %v6963_v29 = vpop.f32.mrb[103].mxu0  ;;  %7282 = vmatpush3.bf16.msra.mxu0 %v3829_v14 }
 0x9d7   : > { %v3827_v56 = vmul.f32 %v7961_v46, %v6961_v55  ;;  %v6964_v36 = vadd.f32 %v6963_v29, %v6962_v16 }
 0x9d9   : > { %v3828_v5 = vmul.f32 %v7961_v46, %v6964_v36 }
 0x9db   : > { %v3830_v37 = vpack.c.bf16 %v3828_v5, %v3827_v56  ;;  %v7667_v5 = vld [vmem:[%s11357_s10 + $0x8] sm:$0xff]  }
 0x9dd   : > { %7283 = vmatprep.subr.bf16.mxu0 %v3830_v37 }
 0x9de   : > { %7284 = vmatpush3.bf16.msra.mxu0 %v3830_v37  ;;  %v7668_v37 = vld [vmem:[%s11357_s10 + $0x10] sm:$0xff]  }
 0x9e1   : > { %7286 = vmatmul.mubr.bf16.vlgmr.msra.gmra.mrb[104].mxu0 %v4011_v23 }
 0x9e2   : > { %7289 = vmatprep.mubr.bf16.mxu0 %v4012_v8 }
 0x9e9   : > { %7290 = vmatmul.mubr.bf16.gmra.mrb[108].mxu0 %v4013_v4  ;;  %v7962_v4 = vld [vmem:[%s8663_s16] sm:$0xff]  }
 0x9ea   : > { %7293 = vmatprep.mubr.bf16.mxu0 %v4014_v40  ;;  %v7963_v40 = vld [vmem:[%s8663_s16 + $0x8] sm:$0xff]  }
 0x9f1   : > { %7294 = vmatmul.mubr.bf16.gmra.mrb[112].mxu0 %v4015_v28  ;;  %v7669_v28 = vld [vmem:[%s11357_s10 + $0x18] sm:$0xff]  }
 0x9f2   : > { %7297 = vmatprep.mubr.bf16.mxu0 %v4016_v44  ;;  %v7670_v44 = vld [vmem:[%s11357_s10 + $0x20] sm:$0xff]  }
 0x9f9   : > { %7298 = vmatmul.mubr.bf16.gmra.mrb[116].mxu0 %v4017_v27  ;;  %v7964_v27 = vld [vmem:[%s8663_s16 + $0x10] sm:$0xff]  }
 0xab4   : > { %v7287_v26 = vpop.f32.mrb[104].mxu0 }
 0xab5   : > { %v4052_v31 = vpop.f32.mrb[105].mxu0  ;;  %v4061_v50 = vadd.f32 %v7287_v26, %v3887_v41  ;;  %v7966_v41 = vld [vmem:[%s8663_s16 + $0x20] sm:$0xff]   ;;  %v7969_v26 = vld [vmem:[%s8663_s16 + $0x38] sm:$0xff]  }
 0xab6   : > { %v7288_v45 = vpop.f32.mrb[106].mxu0  ;;  %v4053_v51 = vadd.f32 %v4052_v31, %v3877_v35  ;;  %v7671_v35 = vld [vmem:[%s11357_s10 + $0x28] sm:$0xff]  }
 0xab7   : > { %v4064_v19 = vadd.f32 %v7288_v45, %v3892_v18  ;;  %v4055_v12 = vpop.f32.mrb[107].mxu0  ;;  %v7967_v18 = vld [vmem:[%s8663_s16 + $0x28] sm:$0xff]   ;;  %v7677_v45 = vld [vmem:[%s11357_s10 + $0x58] sm:$0xff]  }
 0xab8   : > { %v4056_v22 = vadd.f32 %v4055_v12, %v3882_v34  ;;  %v7672_v34 = vld [vmem:[%s11357_s10 + $0x30] sm:$0xff]   ;;  %v7675_v31 = vld [vmem:[%s11357_s10 + $0x48] sm:$0xff]  }
 0xab9   : > { %v4180_v42 = vpack.c.bf16 %v4064_v19, %v4061_v50  ;;  %v7678_v50 = vld [vmem:[%s11357_s10 + $0x60] sm:$0xff]   ;;  %v7679_v19 = vld [vmem:[%s11357_s10 + $0x68] sm:$0xff]   ;;  %v7680_v12 = vld [vmem:[%s11357_s10 + $0x70] sm:$0xff]  }
 0xaba   : > { %v4179_v53 = vpack.c.bf16 %v4056_v22, %v4053_v51  ;;  %v7681_v51 = vld [vmem:[%s11357_s10 + $0x78] sm:$0xff]   ;;  %v7682_v22 = vld [vmem:[%s11358_s19] sm:$0xff]  }
 0xabc   : > { %v7291_v47 = vpop.f32.mrb[108].mxu0  ;;  %7301 = vmatprep.subr.bf16.mxu1 %v4179_v53 }
 0xabd   : > { %v4068_v60 = vpop.f32.mrb[109].mxu0  ;;  %7302 = vmatpush3.bf16.msra.mxu1 %v4179_v53  ;;  %v4077_v25 = vadd.f32 %v7291_v47, %v3907_v52  ;;  %v7684_v53 = vld [vmem:[%s11359_s11 + $0x10] sm:$0xff]   ;;  %v7685_v52 = vld [vmem:[%s11359_s11 + $0x18] sm:$0xff]   ;;  %v7687_v47 = vld [vmem:[%s11359_s11 + $0x28] sm:$0xff]  }
 0xabe   : > { %v7292_v30 = vpop.f32.mrb[110].mxu0  ;;  %7303 = vmatprep.subr.bf16.mxu1 %v4180_v42  ;;  %v4069_v10 = vadd.f32 %v4068_v60, %v3897_v13  ;;  %v7673_v13 = vld [vmem:[%s11357_s10 + $0x38] sm:$0xff]   ;;  %v7688_v60 = vld [vmem:[%s11359_s11 + $0x30] sm:$0xff]  }
 0xabf   : > { %v4080_v11 = vadd.f32 %v7292_v30, %v3912_v61  ;;  %v4071_v62 = vpop.f32.mrb[111].mxu0  ;;  %v7968_v61 = vld [vmem:[%s8663_s16 + $0x30] sm:$0xff]   ;;  %v7689_v30 = vld [vmem:[%s11359_s11 + $0x38] sm:$0xff]   ;;  %s6739_s16 = sshll.u32 %s5295_s25, 3 }
 0xac0   : > { %v4072_v39 = vadd.f32 %v4071_v62, %v3902_v33  ;;  %v7674_v33 = vld [vmem:[%s11357_s10 + $0x40] sm:$0xff]   ;;  %v7692_v62 = vld [vmem:[%s11359_s11 + $0x50] sm:$0xff]   ;;  %s10698_s26 = scalar_lea.vmem [#allocation6], %s6739_s16 }
 0xac1   : > { %v4182_v24 = vpack.c.bf16 %v4080_v11, %v4077_v25  ;;  %7304 = vmatpush3.bf16.msra.mxu1 %v4180_v42  ;;  %v7683_v42 = vld [vmem:[%s11359_s11 + $0x8] sm:$0xff]   ;;  %v7690_v25 = vld [vmem:[%s11359_s11 + $0x40] sm:$0xff]  }
 0xac2   : > { %v4181_v2 = vpack.c.bf16 %v4072_v39, %v4069_v10  ;;  %v7691_v11 = vld [vmem:[%s11359_s11 + $0x48] sm:$0xff]   ;;  %v7693_v10 = vld [vmem:[%s11359_s11 + $0x58] sm:$0xff]   ;;  %v7694_v39 = vld [vmem:[%s11359_s11 + $0x60] sm:$0xff]  }
 0xac4   : > { %v7295_v57 = vpop.f32.mrb[112].mxu0  ;;  %7305 = vmatprep.subr.bf16.mxu1 %v4181_v2 }
 0xac5   : > { %v4084_v54 = vpop.f32.mrb[113].mxu0  ;;  %7306 = vmatpush3.bf16.msra.mxu1 %v4181_v2  ;;  %v4093_v21 = vadd.f32 %v7295_v57, %v3927_v38  ;;  %v7695_v38 = vld [vmem:[%s11359_s11 + $0x68] sm:$0xff]   ;;  %v4736_v2 = vpop.permute.xlu0 %4735 }
 0xac6   : > { %v7296_v32 = vpop.f32.mrb[114].mxu0  ;;  %7307 = vmatprep.subr.bf16.mxu1 %v4182_v24  ;;  %v4085_v17 = vadd.f32 %v4084_v54, %v3917_v7  ;;  %v7676_v7 = vld [vmem:[%s11357_s10 + $0x50] sm:$0xff]   ;;  %v4741_v57 = vpop.permute.xlu1 %4740 }
 0xac7   : > { %v4096_v6 = vadd.f32 %v7296_v32, %v3932_v59  ;;  %v4087_v43 = vpop.f32.mrb[115].mxu0  ;;  %v7697_v59 = vld [vmem:[%s11359_s11 + $0x78] sm:$0xff]  }
 0xac8   : > { %v4088_v46 = vadd.f32 %v4087_v43, %v3922_v15  ;;  %v7686_v15 = vld [vmem:[%s11359_s11 + $0x20] sm:$0xff]  }
 0xac9   : > { %v4184_v58 = vpack.c.bf16 %v4096_v6, %v4093_v21  ;;  %7308 = vmatpush3.bf16.msra.mxu1 %v4182_v24  ;;  %v7696_v24 = vld [vmem:[%s11359_s11 + $0x70] sm:$0xff]   ;;  %v4746_v54 = vpop.permute.xlu0 %4745 }
 0xaca   : > { %v4183_v1 = vpack.c.bf16 %v4088_v46, %v4085_v17  ;;  %v4751_v32 = vpop.permute.xlu1 %4750 }
 0xacc   : > { %v7299_v49 = vpop.f32.mrb[116].mxu0  ;;  %7309 = vmatprep.subr.bf16.mxu1 %v4183_v1 }
 0xacd   : > { %v4100_v23 = vpop.f32.mrb[117].mxu0  ;;  %7310 = vmatpush3.bf16.msra.mxu1 %v4183_v1  ;;  %v4109_v63 = vadd.f32 %v7299_v49, %v3947_v48 }
 0xace   : > { %v7300_v14 = vpop.f32.mrb[118].mxu0  ;;  %7311 = vmatprep.subr.bf16.mxu1 %v4184_v58  ;;  %v4101_v29 = vadd.f32 %v4100_v23, %v3937_v9  ;;  %v4756_v9 = vpop.permute.xlu0 %4755 }
 0xacf   : > { %v4112_v55 = vadd.f32 %v7300_v14, %v3952_v0  ;;  %v4103_v16 = vpop.f32.mrb[119].mxu0  ;;  %v4761_v21 = vpop.permute.xlu1 %4760 }
 0xad0   : > { %v4104_v56 = vadd.f32 %v4103_v16, %v3942_v20 }
 0xad1   : > { %v4186_v36 = vpack.c.bf16 %v4112_v55, %v4109_v63  ;;  %7312 = vmatpush3.bf16.msra.mxu1 %v4184_v58 }
 0xad2   : > { %v4185_v8 = vpack.c.bf16 %v4104_v56, %v4101_v29  ;;  %v4766_v6 = vpop.permute.xlu0 %4765 }
 0xad3   : > { %v4771_v43 = vpop.permute.xlu1 %4770 }
 0xad4   : > { %7313 = vmatprep.subr.bf16.mxu1 %v4185_v8 }
 0xad5   : > { %7314 = vmatpush3.bf16.msra.mxu1 %v4185_v8 }
 0xad6   : > { %7315 = vmatprep.subr.bf16.mxu1 %v4186_v36  ;;  %v4776_v20 = vpop.permute.xlu0 %4775 }
 0xad7   : > { %v4781_v17 = vpop.permute.xlu1 %4780 }
 0xad9   : > { %7316 = vmatpush3.bf16.msra.mxu1 %v4186_v36 }
 0xada   : > { %7349 = vmatprep.subr.bf16.mxu1 %v7962_v4  ;;  %v4786_v46 = vpop.permute.xlu0 %4785 }
 0xadb   : > { %v4791_v58 = vpop.permute.xlu1 %4790 }
 0xadc   : > { %7318 = vmatmul.mubr.bf16.vlgmr.msra.gmra.mrb[72].mxu1 %v7667_v5 }
 0xadd   : > { %7321 = vmatprep.mubr.bf16.mxu1 %v7668_v37  ;;  %7350 = vmatpush3.bf16.msra.mxu1 %v7962_v4 }
 0xade   : > { %7351 = vmatprep.subr.bf16.mxu1 %v7963_v40  ;;  %v10694_v0 = vpop.permute.xlu0 %4795 }
 0xadf   : > { %v10696_v55 = vpop.permute.xlu1 %4800 }
 0xae1   : > { %7352 = vmatpush3.bf16.msra.mxu1 %v7963_v40 }
 0xae2   : > { %7353 = vmatprep.subr.bf16.mxu1 %v7964_v27  ;;  %v4806_v37 = vpop.permute.xlu0 %4805 }
 0xae3   : > { %v4811_v40 = vpop.permute.xlu1 %4810 }
 0xae4   : > { %7322 = vmatmul.mubr.bf16.gmra.mrb[76].mxu1 %v7669_v28 }
 0xae5   : > { %7325 = vmatprep.mubr.bf16.mxu1 %v7670_v44  ;;  %7354 = vmatpush3.bf16.msra.mxu1 %v7964_v27 }
 0xae6   : > { %7355 = vmatprep.subr.bf16.mxu1 %v7965_v3 }
 0xae9   : > { %7356 = vmatpush3.bf16.msra.mxu1 %v7965_v3 }
 0xaea   : > { %7357 = vmatprep.subr.bf16.mxu1 %v7966_v41 }
 0xaec   : > { %7326 = vmatmul.mubr.bf16.gmra.mrb[80].mxu1 %v7671_v35 }
 0xaed   : > { %7329 = vmatprep.mubr.bf16.mxu1 %v7672_v34  ;;  %7358 = vmatpush3.bf16.msra.mxu1 %v7966_v41 }
 0xaee   : > { %7359 = vmatprep.subr.bf16.mxu1 %v7967_v18 }
 0xaf1   : > { %7360 = vmatpush3.bf16.msra.mxu1 %v7967_v18 }
 0xaf2   : > { %7361 = vmatprep.subr.bf16.mxu1 %v7968_v61 }
 0xaf4   : > { %7330 = vmatmul.mubr.bf16.gmra.mrb[84].mxu1 %v7673_v13 }
 0xaf5   : > { %7333 = vmatprep.mubr.bf16.mxu1 %v7674_v33  ;;  %7362 = vmatpush3.bf16.msra.mxu1 %v7968_v61  ;;  %v4816_v61 = vpop.permute.xlu0 %4815 }
 0xaf6   : > { %7363 = vmatprep.subr.bf16.mxu1 %v7969_v26 }
 0xaf9   : > { %7364 = vmatpush3.bf16.msra.mxu1 %v7969_v26  ;;  %v4821_v26 = vpop.permute.xlu1 %4820 }
 0xafc   : > { %7334 = vmatmul.mubr.bf16.gmra.mrb[88].mxu1 %v7675_v31 }
 0xafd   : > { %7337 = vmatprep.mubr.bf16.mxu1 %v7676_v7 }
 0xb04   : > { %7338 = vmatmul.mubr.bf16.gmra.mrb[92].mxu1 %v7677_v45 }
 0xb05   : > { %7341 = vmatprep.mubr.bf16.mxu1 %v7678_v50 }
 0xb0c   : > { %7342 = vmatmul.mubr.bf16.gmra.mrb[96].mxu1 %v7679_v19 }
 0xb0d   : > { %7345 = vmatprep.mubr.bf16.mxu1 %v7680_v12 }
 0xb14   : > { %7346 = vmatmul.mubr.bf16.gmra.mrb[100].mxu1 %v7681_v51 }
 0xb15   : > { %7365 = vmatprep.mubr.bf16.mxu1 %v7682_v22 }
 0xb1c   : > { %7366 = vmatmul.mubr.bf16.vlgmr.msra.gmra.mrb[72].mxu1 %v7683_v42 }
 0xb1d   : > { %7369 = vmatprep.mubr.bf16.mxu1 %v7684_v53  ;;  %v4826_v53 = vpop.permute.xlu0 %4825 }
 0xb24   : > { %7370 = vmatmul.mubr.bf16.gmra.mrb[76].mxu1 %v7685_v52 }
 0xb25   : > { %7373 = vmatprep.mubr.bf16.mxu1 %v7686_v15  ;;  %v4831_v15 = vpop.permute.xlu1 %4830 }
 0xb2c   : > { %7374 = vmatmul.mubr.bf16.gmra.mrb[80].mxu1 %v7687_v47 }
 0xb2d   : > { %7377 = vmatprep.mubr.bf16.mxu1 %v7688_v60 }
 0xb34   : > { %7378 = vmatmul.mubr.bf16.gmra.mrb[84].mxu1 %v7689_v30 }
 0xb35   : > { %7381 = vmatprep.mubr.bf16.mxu1 %v7690_v25 }
 0xb3c   : > { %7382 = vmatmul.mubr.bf16.gmra.mrb[88].mxu1 %v7691_v11 }
 0xb3d   : > { %7385 = vmatprep.mubr.bf16.mxu1 %v7692_v62  ;;  %v4836_v62 = vpop.permute.xlu0 %4835 }
 0xb44   : > { %7386 = vmatmul.mubr.bf16.gmra.mrb[92].mxu1 %v7693_v10 }
 0xb45   : > { %7389 = vmatprep.mubr.bf16.mxu1 %v7694_v39 }
 0xb4c   : > { %7390 = vmatmul.mubr.bf16.gmra.mrb[96].mxu1 %v7695_v38 }
 0xb4d   : > { %7393 = vmatprep.mubr.bf16.mxu1 %v7696_v24  ;;  %v4841_v24 = vpop.permute.xlu1 %4840 }
 0xb54   : > { %7394 = vmatmul.mubr.bf16.gmra.mrb[100].mxu1 %v7697_v59 }
 0xbef   : > { %v7367_v1 = vpop.f32.mrb[72].mxu1 }
 0xbf0   : > { %v4895_v49 = vadd.f32 %v7367_v1, %v4746_v54  ;;  %v4574_v48 = vpop.f32.mrb[73].mxu1 }
 0xbf1   : > { %v7368_v23 = vpop.f32.mrb[74].mxu1  ;;  %v4893_v16 = vadd.f32 %v4736_v2, %v4574_v48 }
 0xbf2   : > { %v4896_v14 = vadd.f32 %v7368_v23, %v4751_v32  ;;  %4961 = vadd.xlane.f32.xlu0 %v4895_v49  ;;  %v4577_v63 = vpop.f32.mrb[75].mxu1  ;;  %v5120_v13 = vmul.f32 %v4895_v49, %v4895_v49 }
 0xbf3   : > { %v4894_v29 = vadd.f32 %v4741_v57, %v4577_v63  ;;  %v5118_v45 = vmul.f32 %v4893_v16, %v4893_v16 }
 0xbf4   : > { %v5280_v56 = vpack.c.bf16 %v4896_v14, %v4895_v49  ;;  %v5121_v5 = vmul.f32 %v4896_v14, %v4896_v14 }
 0xbf5   : > { %v5279_v36 = vpack.c.bf16 %v4894_v29, %v4893_v16  ;;  %4959 = vadd.xlane.f32.xlu1 %v4894_v29  ;;  %v5119_v41 = vmul.f32 %v4894_v29, %v4894_v29 }
 0xbf6   : > { %5300 = vst [vmem:[%s10698_s26 + $0x10] sm:$0xff] %v5280_v56  ;;  %4957 = vadd.xlane.f32.xlu0 %v4893_v16 }
 0xbf7   : > { %5299 = vst [vmem:[%s10698_s26] sm:$0xff] %v5279_v36  ;;  %v7371_v8 = vpop.f32.mrb[76].mxu1 }
 0xbf8   : > { %v4590_v4 = vpop.f32.mrb[77].mxu1  ;;  %v4899_v44 = vadd.f32 %v7371_v8, %v4766_v6  ;;  %v4846_v6 = vpop.permute.xlu0 %4845 }
 0xbf9   : > { %5156 = vadd.xlane.f32.xlu1 %v5121_v5  ;;  %v7372_v28 = vpop.f32.mrb[78].mxu1  ;;  %v4897_v35 = vadd.f32 %v4756_v9, %v4590_v4 }
 0xbfa   : > { %v4900_v27 = vadd.f32 %v7372_v28, %v4771_v43  ;;  %4963 = vadd.xlane.f32.xlu0 %v4896_v14  ;;  %v4593_v3 = vpop.f32.mrb[79].mxu1  ;;  %v5124_v32 = vmul.f32 %v4899_v44, %v4899_v44 }
 0xbfb   : > { %v4898_v34 = vadd.f32 %v4761_v21, %v4593_v3 }
 0xbfc   : > { %v5282_v18 = vpack.c.bf16 %v4900_v27, %v4899_v44  ;;  %v5125_v30 = vmul.f32 %v4900_v27, %v4900_v27  ;;  %v4856_v63 = vpop.permute.xlu0 %4855 }
 0xbfd   : > { %v5281_v33 = vpack.c.bf16 %v4898_v34, %v4897_v35  ;;  %5152 = vadd.xlane.f32.xlu1 %v5119_v41  ;;  %v5123_v57 = vmul.f32 %v4898_v34, %v4898_v34 }
 0xbfe   : > { %5302 = vst [vmem:[%s10698_s26 + $0x30] sm:$0xff] %v5282_v18  ;;  %5154 = vadd.xlane.f32.xlu0 %v5120_v13 }
 0xbff   : > { %5301 = vst [vmem:[%s10698_s26 + $0x20] sm:$0xff] %v5281_v33  ;;  %v7375_v31 = vpop.f32.mrb[80].mxu1 }
 0xc00   : > { %v4606_v7 = vpop.f32.mrb[81].mxu1  ;;  %v10704_v19 = vadd.f32 %v7375_v31, %v4786_v46 }
 0xc01   : > { %4971 = vadd.xlane.f32.xlu1 %v4900_v27  ;;  %v7376_v50 = vpop.f32.mrb[82].mxu1  ;;  %v10706_v22 = vadd.f32 %v4776_v20, %v4606_v7  ;;  %v5122_v20 = vmul.f32 %v4897_v35, %v4897_v35 }
 0xc02   : > { %v4904_v12 = vadd.f32 %v7376_v50, %v4791_v58  ;;  %5150 = vadd.xlane.f32.xlu0 %v5118_v45  ;;  %v4609_v51 = vpop.f32.mrb[83].mxu1  ;;  %v5128_v3 = vmul.f32 %v10704_v19, %v10704_v19 }
 0xc03   : > { %v4902_v42 = vadd.f32 %v4781_v17, %v4609_v51  ;;  %v4851_v17 = vpop.permute.xlu1 %4850  ;;  %v5126_v13 = vmul.f32 %v10706_v22, %v10706_v22 }
 0xc04   : > { %v5284_v52 = vpack.c.bf16 %v4904_v12, %v10704_v19  ;;  %v5129_v29 = vmul.f32 %v4904_v12, %v4904_v12 }
 0xc05   : > { %v5283_v47 = vpack.c.bf16 %v4902_v42, %v10706_v22  ;;  %4967 = vadd.xlane.f32.xlu1 %v4898_v34  ;;  %v5127_v28 = vmul.f32 %v4902_v42, %v4902_v42 }
 0xc06   : > { %5304 = vst [vmem:[%s10698_s26 + $0x50] sm:$0xff] %v5284_v52  ;;  %4969 = vadd.xlane.f32.xlu0 %v4899_v44  ;;  %v4866_v44 = vpop.permute.xlu0 %4865 }
 0xc07   : > { %5303 = vst [vmem:[%s10698_s26 + $0x40] sm:$0xff] %v5283_v47  ;;  %v7379_v60 = vpop.f32.mrb[84].mxu1 }
 0xc08   : > { %v4622_v25 = vpop.f32.mrb[85].mxu1  ;;  %v10712_v10 = vadd.f32 %v7379_v60, %v4806_v37 }
 0xc09   : > { %5164 = vadd.xlane.f32.xlu1 %v5125_v30  ;;  %v7380_v11 = vpop.f32.mrb[86].mxu1  ;;  %v10717_v59 = vadd.f32 %v10694_v0, %v4622_v25 }
 0xc0a   : > { %v10714_v39 = vadd.f32 %v7380_v11, %v4811_v40  ;;  %4965 = vadd.xlane.f32.xlu0 %v4897_v35  ;;  %v4625_v38 = vpop.f32.mrb[87].mxu1 }
 0xc0b   : > { %v10720_v2 = vadd.f32 %v10696_v55, %v4625_v38  ;;  %v4861_v55 = vpop.permute.xlu1 %4860 }
 0xc0c   : > { %v5286_v54 = vpack.c.bf16 %v10714_v39, %v10712_v10 }
 0xc0d   : > { %v5285_v9 = vpack.c.bf16 %v10720_v2, %v10717_v59  ;;  %5160 = vadd.xlane.f32.xlu1 %v5123_v57  ;;  %v5131_v38 = vmul.f32 %v10720_v2, %v10720_v2 }
 0xc0e   : > { %5306 = vst [vmem:[%s10698_s26 + $0x70] sm:$0xff] %v5286_v54  ;;  %5162 = vadd.xlane.f32.xlu0 %v5124_v32  ;;  %v5130_v54 = vmul.f32 %v10717_v59, %v10717_v59 }
 0xc0f   : > { %5305 = vst [vmem:[%s10698_s26 + $0x60] sm:$0xff] %v5285_v9  ;;  %v7383_v21 = vpop.f32.mrb[88].mxu1  ;;  %v4871_v35 = vpop.permute.xlu1 %4870 }
 0xc10   : > { %v4638_v43 = vpop.f32.mrb[89].mxu1  ;;  %v10728_v58 = vadd.f32 %v7383_v21, %v4826_v53 }
 0xc11   : > { %4979 = vadd.xlane.f32.xlu1 %v4904_v12  ;;  %v7384_v46 = vpop.f32.mrb[90].mxu1  ;;  %v10732_v48 = vadd.f32 %v4816_v61, %v4638_v43  ;;  %v4876_v61 = vpop.permute.xlu0 %4875 }
 0xc12   : > { %v10730_v1 = vadd.f32 %v7384_v46, %v4831_v15  ;;  %5158 = vadd.xlane.f32.xlu0 %v5122_v20  ;;  %v4641_v49 = vpop.f32.mrb[91].mxu1  ;;  %v5136_v32 = vmul.f32 %v10728_v58, %v10728_v58 }
 0xc13   : > { %v10734_v23 = vadd.f32 %v4821_v26, %v4641_v49  ;;  %v4881_v45 = vpop.permute.xlu1 %4880 }
 0xc14   : > { %v5288_v0 = vpack.c.bf16 %v10730_v1, %v10728_v58 }
 0xc15   : > { %v5287_v14 = vpack.c.bf16 %v10734_v23, %v10732_v48  ;;  %4975 = vadd.xlane.f32.xlu1 %v4902_v42  ;;  %v5133_v42 = vmul.f32 %v10714_v39, %v10714_v39  ;;  %v4886_v53 = vpop.permute.xlu0 %4885 }
 0xc16   : > { %5308 = vst [vmem:[%s10698_s26 + $0x90] sm:$0xff] %v5288_v0  ;;  %4977 = vadd.xlane.f32.xlu0 %v10704_v19  ;;  %v4927_v0 = vld [vmem:[#allocation7 + $0x10] sm:$0xff] }
 0xc17   : > { %5307 = vst [vmem:[%s10698_s26 + $0x80] sm:$0xff] %v5287_v14  ;;  %v7387_v16 = vpop.f32.mrb[92].mxu1  ;;  %v4891_v15 = vpop.permute.xlu1 %4890 }
 0xc18   : > { %v4654_v56 = vpop.f32.mrb[93].mxu1  ;;  %v10743_v8 = vadd.f32 %v7387_v16, %v4846_v6  ;;  %v4925_v16 = vld [vmem:[#allocation7] sm:$0xff] }
 0xc19   : > { %5172 = vadd.xlane.f32.xlu1 %v5129_v29  ;;  %v7388_v36 = vpop.f32.mrb[94].mxu1  ;;  %v10748_v4 = vadd.f32 %v4836_v62, %v4654_v56 }
 0xc1a   : > { %v10745_v5 = vadd.f32 %v7388_v36, %v4851_v17  ;;  %4973 = vadd.xlane.f32.xlu0 %v10706_v22  ;;  %v4657_v37 = vpop.f32.mrb[95].mxu1  ;;  %v5140_v6 = vmul.f32 %v10743_v8, %v10743_v8 }
 0xc1b   : > { %v10750_v40 = vadd.f32 %v4841_v24, %v4657_v37  ;;  %v5138_v43 = vmul.f32 %v10748_v4, %v10748_v4  ;;  %v4928_v37 = vld [vmem:[#allocation7 + $0x18] sm:$0xff] }
 0xc1c   : > { %v5290_v27 = vpack.c.bf16 %v10745_v5, %v10743_v8  ;;  %v5141_v9 = vmul.f32 %v10745_v5, %v10745_v5 }
 0xc1d   : > { %v5289_v34 = vpack.c.bf16 %v10750_v40, %v10748_v4  ;;  %5168 = vadd.xlane.f32.xlu1 %v5127_v28  ;;  %v5139_v21 = vmul.f32 %v10750_v40, %v10750_v40 }
 0xc1e   : > { %5310 = vst [vmem:[%s10698_s26 + $0xb0] sm:$0xff] %v5290_v27  ;;  %5170 = vadd.xlane.f32.xlu0 %v5128_v3  ;;  %v5087_v27 = vld [vmem:[#allocation8 + $0x8] sm:$0xff]  ;;  %v5088_v3 = vld [vmem:[#allocation8 + $0x10] sm:$0xff] }
 0xc1f   : > { %5309 = vst [vmem:[%s10698_s26 + $0xa0] sm:$0xff] %v5289_v34  ;;  %v7391_v41 = vpop.f32.mrb[96].mxu1 }
 0xc20   : > { %v4670_v18 = vpop.f32.mrb[97].mxu1  ;;  %v10763_v26 = vadd.f32 %v7391_v41, %v4866_v44 }
 0xc21   : > { %4987 = vadd.xlane.f32.xlu1 %v10714_v39  ;;  %v7392_v33 = vpop.f32.mrb[98].mxu1  ;;  %v10765_v50 = vadd.f32 %v4856_v63, %v4670_v18  ;;  %v5132_v39 = vmul.f32 %v10712_v10, %v10712_v10 }
 0xc22   : > { %v4920_v31 = vadd.f32 %v7392_v33, %v4871_v35  ;;  %5166 = vadd.xlane.f32.xlu0 %v5126_v13  ;;  %v4673_v7 = vpop.f32.mrb[99].mxu1  ;;  %v5144_v46 = vmul.f32 %v10763_v26, %v10763_v26  ;;  %v4932_v13 = vld [vmem:[#allocation7 + $0x38] sm:$0xff]  ;;  %v5086_v33 = vld [vmem:[#allocation8] sm:$0xff] }
 0xc23   : > { %v4918_v19 = vadd.f32 %v4861_v55, %v4673_v7  ;;  %v4926_v55 = vld [vmem:[#allocation7 + $0x8] sm:$0xff] }
 0xc24   : > { %v5292_v12 = vpack.c.bf16 %v4920_v31, %v10763_v26  ;;  %v5145_v20 = vmul.f32 %v4920_v31, %v4920_v31 }
 0xc25   : > { %v5291_v51 = vpack.c.bf16 %v4918_v19, %v10765_v50  ;;  %4983 = vadd.xlane.f32.xlu1 %v10720_v2  ;;  %v5137_v2 = vmul.f32 %v10730_v1, %v10730_v1  ;;  %v5143_v17 = vmul.f32 %v4918_v19, %v4918_v19 }
 0xc26   : > { %5312 = vst [vmem:[%s10698_s26 + $0xd0] sm:$0xff] %v5292_v12  ;;  %4985 = vadd.xlane.f32.xlu0 %v10712_v10  ;;  %v5135_v10 = vmul.f32 %v10734_v23, %v10734_v23 }
 0xc27   : > { %5311 = vst [vmem:[%s10698_s26 + $0xc0] sm:$0xff] %v5291_v51  ;;  %v7395_v22 = vpop.f32.mrb[100].mxu1 }
 0xc28   : > { %v4686_v52 = vpop.f32.mrb[101].mxu1  ;;  %v4923_v60 = vadd.f32 %v7395_v22, %v4886_v53  ;;  %v4929_v53 = vld [vmem:[#allocation7 + $0x20] sm:$0xff] }
 0xc29   : > { %5180 = vadd.xlane.f32.xlu1 %v5133_v42  ;;  %v7396_v47 = vpop.f32.mrb[102].mxu1  ;;  %v4921_v11 = vadd.f32 %v4876_v61, %v4686_v52  ;;  %v5093_v42 = vld [vmem:[#allocation8 + $0x38] sm:$0xff] }
 0xc2a   : > { %v4924_v30 = vadd.f32 %v7396_v47, %v4891_v15  ;;  %4981 = vadd.xlane.f32.xlu0 %v10717_v59  ;;  %v4689_v25 = vpop.f32.mrb[103].mxu1  ;;  %v5134_v59 = vmul.f32 %v10732_v48, %v10732_v48 }
 0xc2b   : > { %v4922_v62 = vadd.f32 %v4881_v45, %v4689_v25  ;;  %v4930_v45 = vld [vmem:[#allocation7 + $0x28] sm:$0xff]  ;;  %v5092_v25 = vld [vmem:[#allocation8 + $0x30] sm:$0xff] }
 0xc2c   : > { %v5294_v24 = vpack.c.bf16 %v4924_v30, %v4923_v60  ;;  %v5149_v49 = vmul.f32 %v4924_v30, %v4924_v30 }
 0xc2d   : > { %v5293_v57 = vpack.c.bf16 %v4922_v62, %v4921_v11  ;;  %5176 = vadd.xlane.f32.xlu1 %v5131_v38 }
 0xc2e   : > { %5314 = vst [vmem:[%s10698_s26 + $0xf0] sm:$0xff] %v5294_v24  ;;  %5178 = vadd.xlane.f32.xlu0 %v5132_v39  ;;  %v4936_v39 = vld [vmem:[#allocation7 + $0x58] sm:$0xff] }
 0xc2f   : > { %5313 = vst [vmem:[%s10698_s26 + $0xe0] sm:$0xff] %v5293_v57  ;;  %v5090_v57 = vld [vmem:[#allocation8 + $0x20] sm:$0xff] }
 0xc31   : > { %4995 = vadd.xlane.f32.xlu1 %v10730_v1  ;;  %v5147_v1 = vmul.f32 %v4922_v62, %v4922_v62 }
 0xc32   : > { %5174 = vadd.xlane.f32.xlu0 %v5130_v54 }
 0xc35   : > { %4991 = vadd.xlane.f32.xlu1 %v10734_v23  ;;  %v5148_v23 = vmul.f32 %v4923_v60, %v4923_v60 }
 0xc36   : > { %4993 = vadd.xlane.f32.xlu0 %v10728_v58  ;;  %v5142_v58 = vmul.f32 %v10765_v50, %v10765_v50 }
 0xc39   : > { %5188 = vadd.xlane.f32.xlu1 %v5137_v2 }
 0xc3a   : > { %4989 = vadd.xlane.f32.xlu0 %v10732_v48  ;;  %v5146_v48 = vmul.f32 %v4921_v11, %v4921_v11 }
 0xc3d   : > { %5184 = vadd.xlane.f32.xlu1 %v5135_v10 }
 0xc3e   : > { %5186 = vadd.xlane.f32.xlu0 %v5136_v32 }
 0xc41   : > { %5003 = vadd.xlane.f32.xlu1 %v10745_v5  ;;  %v5089_v5 = vld [vmem:[#allocation8 + $0x18] sm:$0xff] }
 0xc42   : > { %5182 = vadd.xlane.f32.xlu0 %v5134_v59  ;;  %v4934_v59 = vld [vmem:[#allocation7 + $0x48] sm:$0xff] }
 0xc45   : > { %4999 = vadd.xlane.f32.xlu1 %v10750_v40 }
 0xc46   : > { %5001 = vadd.xlane.f32.xlu0 %v10743_v8 }
 0xc49   : > { %5196 = vadd.xlane.f32.xlu1 %v5141_v9  ;;  %v4935_v9 = vld [vmem:[#allocation7 + $0x50] sm:$0xff] }
 0xc4a   : > { %4997 = vadd.xlane.f32.xlu0 %v10748_v4 }
 0xc4d   : > { %5192 = vadd.xlane.f32.xlu1 %v5139_v21 }
 0xc4e   : > { %5194 = vadd.xlane.f32.xlu0 %v5140_v6 }
 0xc51   : > { %5011 = vadd.xlane.f32.xlu1 %v4920_v31 }
 0xc52   : > { %5190 = vadd.xlane.f32.xlu0 %v5138_v43 }
 0xc55   : > { %5007 = vadd.xlane.f32.xlu1 %v4918_v19 }
 0xc56   : > { %5009 = vadd.xlane.f32.xlu0 %v10763_v26 }
 0xc59   : > { %5204 = vadd.xlane.f32.xlu1 %v5145_v20 }
 0xc5a   : > { %5005 = vadd.xlane.f32.xlu0 %v10765_v50  ;;  %v4931_v50 = vld [vmem:[#allocation7 + $0x30] sm:$0xff] }
 0xc5d   : > { %5200 = vadd.xlane.f32.xlu1 %v5143_v17  ;;  %v5097_v17 = vld [vmem:[#allocation8 + $0x58] sm:$0xff] }
 0xc5e   : > { %5202 = vadd.xlane.f32.xlu0 %v5144_v46  ;;  %v4933_v46 = vld [vmem:[#allocation7 + $0x40] sm:$0xff] }
 0xc61   : > { %5019 = vadd.xlane.f32.xlu1 %v4924_v30  ;;  %v5091_v30 = vld [vmem:[#allocation8 + $0x28] sm:$0xff] }
 0xc62   : > { %5198 = vadd.xlane.f32.xlu0 %v5142_v58 }
 0xc65   : > { %5015 = vadd.xlane.f32.xlu1 %v4922_v62 }
 0xc66   : > { %5017 = vadd.xlane.f32.xlu0 %v4923_v60 }
 0xc69   : > { %5208 = vadd.xlane.f32.xlu1 %v5147_v1 }
 0xc6a   : > { %5013 = vadd.xlane.f32.xlu0 %v4921_v11 }
 0xc6d   : > { %5212 = vadd.xlane.f32.xlu1 %v5149_v49 }
 0xc6e   : > { %5206 = vadd.xlane.f32.xlu0 %v5146_v48 }
 0xc72   : > { %5210 = vadd.xlane.f32.xlu0 %v5148_v23  ;;  %v5095_v23 = vld [vmem:[#allocation8 + $0x48] sm:$0xff] }
 0xc7f   : > { %v4962_v14 = vpop.xlane.xlu0 %4961 }
 0xc80   : > { %v5023_v63 = vadd.f32 %v4962_v14, %v4927_v0  ;;  %v5096_v0 = vld [vmem:[#allocation8 + $0x50] sm:$0xff] }
 0xc82   : > { %5056 = vst.msk [vmem:[#allocation7 + $0x10] sm:$0xff] %vm5053_vm2, %v5023_v63  ;;  %v4960_v29 = vpop.xlane.xlu1 %4959 }
 0xc83   : > { %v5022_v56 = vadd.f32 %v4960_v29, %v4926_v55  ;;  %v4958_v36 = vpop.xlane.xlu0 %4957  ;;  %v4940_v29 = vld [vmem:[#allocation7 + $0x78] sm:$0xff] }
 0xc84   : > { %v5021_v8 = vadd.f32 %v4958_v36, %v4925_v16 }
 0xc85   : > { %5055 = vst.msk [vmem:[#allocation7 + $0x8] sm:$0xff] %vm5053_vm2, %v5022_v56  ;;  %v5094_v56 = vld [vmem:[#allocation8 + $0x40] sm:$0xff] }
 0xc86   : > { %5054 = vst.msk [vmem:[#allocation7] sm:$0xff] %vm5053_vm2, %v5021_v8  ;;  %v5157_v4 = vpop.xlane.xlu1 %5156 }
 0xc87   : > { %v5217_v40 = vadd.f32 %v5157_v4, %v5089_v5  ;;  %v4964_v28 = vpop.xlane.xlu0 %4963  ;;  %v4938_v4 = vld [vmem:[#allocation7 + $0x68] sm:$0xff] }
 0xc88   : > { %v5024_v44 = vadd.f32 %v4964_v28, %v4928_v37 }
 0xc89   : > { %5249 = vst.msk [vmem:[#allocation8 + $0x18] sm:$0xff] %vm5053_vm2, %v5217_v40  ;;  %v4939_v40 = vld [vmem:[#allocation7 + $0x70] sm:$0xff] }
 0xc8a   : > { %5057 = vst.msk [vmem:[#allocation7 + $0x18] sm:$0xff] %vm5053_vm2, %v5024_v44  ;;  %v5153_v35 = vpop.xlane.xlu1 %5152 }
 0xc8b   : > { %v5215_v34 = vadd.f32 %v5153_v35, %v5087_v27  ;;  %v5155_v41 = vpop.xlane.xlu0 %5154  ;;  %v5101_v35 = vld [vmem:[#allocation8 + $0x78] sm:$0xff] }
 0xc8c   : > { %v5216_v18 = vadd.f32 %v5155_v41, %v5088_v3 }
 0xc8d   : > { %5247 = vst.msk [vmem:[#allocation8 + $0x8] sm:$0xff] %vm5053_vm2, %v5215_v34  ;;  %v4937_v34 = vld [vmem:[#allocation7 + $0x60] sm:$0xff] }
 0xc8e   : > { %5248 = vst.msk [vmem:[#allocation8 + $0x10] sm:$0xff] %vm5053_vm2, %v5216_v18  ;;  %v4972_v61 = vpop.xlane.xlu1 %4971 }
 0xc8f   : > { %v5028_v26 = vadd.f32 %v4972_v61, %v4932_v13  ;;  %v5151_v31 = vpop.xlane.xlu0 %5150  ;;  %v5099_v61 = vld [vmem:[#allocation8 + $0x68] sm:$0xff] }
 0xc90   : > { %v5214_v7 = vadd.f32 %v5151_v31, %v5086_v33 }
 0xc91   : > { %5061 = vst.msk [vmem:[#allocation7 + $0x38] sm:$0xff] %vm5053_vm2, %v5028_v26  ;;  %v5100_v26 = vld [vmem:[#allocation8 + $0x70] sm:$0xff] }
 0xc92   : > { %5246 = vst.msk [vmem:[#allocation8] sm:$0xff] %vm5053_vm2, %v5214_v7  ;;  %v4968_v19 = vpop.xlane.xlu1 %4967 }
 0xc93   : > { %v5026_v12 = vadd.f32 %v4968_v19, %v4930_v45  ;;  %v4970_v51 = vpop.xlane.xlu0 %4969  ;;  %v4944_v19 = vld [vmem:[#allocation7 + $0x98] sm:$0xff] }
 0xc94   : > { %v5027_v22 = vadd.f32 %v4970_v51, %v4931_v50 }
 0xc95   : > { %5059 = vst.msk [vmem:[#allocation7 + $0x28] sm:$0xff] %vm5053_vm2, %v5026_v12  ;;  %v5098_v12 = vld [vmem:[#allocation8 + $0x60] sm:$0xff] }
 0xc96   : > { %5060 = vst.msk [vmem:[#allocation7 + $0x30] sm:$0xff] %vm5053_vm2, %v5027_v22  ;;  %v5165_v52 = vpop.xlane.xlu1 %5164 }
 0xc97   : > { %v5221_v15 = vadd.f32 %v5165_v52, %v5093_v42  ;;  %v4966_v47 = vpop.xlane.xlu0 %4965  ;;  %v4942_v52 = vld [vmem:[#allocation7 + $0x88] sm:$0xff] }
 0xc98   : > { %v5025_v60 = vadd.f32 %v4966_v47, %v4929_v53 }
 0xc99   : > { %5253 = vst.msk [vmem:[#allocation8 + $0x38] sm:$0xff] %vm5053_vm2, %v5221_v15  ;;  %v4943_v15 = vld [vmem:[#allocation7 + $0x90] sm:$0xff] }
 0xc9a   : > { %5058 = vst.msk [vmem:[#allocation7 + $0x20] sm:$0xff] %vm5053_vm2, %v5025_v60  ;;  %v5161_v11 = vpop.xlane.xlu1 %5160 }
 0xc9b   : > { %v5219_v62 = vadd.f32 %v5161_v11, %v5091_v30  ;;  %v5163_v38 = vpop.xlane.xlu0 %5162  ;;  %v5105_v11 = vld [vmem:[#allocation8 + $0x98] sm:$0xff] }
 0xc9c   : > { %v5220_v24 = vadd.f32 %v5163_v38, %v5092_v25 }
 0xc9d   : > { %5251 = vst.msk [vmem:[#allocation8 + $0x28] sm:$0xff] %vm5053_vm2, %v5219_v62  ;;  %v4941_v62 = vld [vmem:[#allocation7 + $0x80] sm:$0xff] }
 0xc9e   : > { %5252 = vst.msk [vmem:[#allocation8 + $0x30] sm:$0xff] %vm5053_vm2, %v5220_v24  ;;  %v4980_v54 = vpop.xlane.xlu1 %4979 }
 0xc9f   : > { %v5032_v2 = vadd.f32 %v4980_v54, %v4936_v39  ;;  %v5159_v10 = vpop.xlane.xlu0 %5158  ;;  %v5103_v54 = vld [vmem:[#allocation8 + $0x88] sm:$0xff] }
 0xca0   : > { %v5218_v32 = vadd.f32 %v5159_v10, %v5090_v57 }
 0xca1   : > { %5065 = vst.msk [vmem:[#allocation7 + $0x58] sm:$0xff] %vm5053_vm2, %v5032_v2  ;;  %v5104_v2 = vld [vmem:[#allocation8 + $0x90] sm:$0xff] }
 0xca2   : > { %5250 = vst.msk [vmem:[#allocation8 + $0x20] sm:$0xff] %vm5053_vm2, %v5218_v32  ;;  %v4976_v21 = vpop.xlane.xlu1 %4975 }
 0xca3   : > { %v5030_v6 = vadd.f32 %v4976_v21, %v4934_v59  ;;  %v4978_v43 = vpop.xlane.xlu0 %4977  ;;  %v4948_v21 = vld [vmem:[#allocation7 + $0xb8] sm:$0xff] }
 0xca4   : > { %v5031_v20 = vadd.f32 %v4978_v43, %v4935_v9 }
 0xca5   : > { %5063 = vst.msk [vmem:[#allocation7 + $0x48] sm:$0xff] %vm5053_vm2, %v5030_v6  ;;  %v5102_v6 = vld [vmem:[#allocation8 + $0x80] sm:$0xff] }
 0xca6   : > { %5064 = vst.msk [vmem:[#allocation7 + $0x50] sm:$0xff] %vm5053_vm2, %v5031_v20  ;;  %v5173_v58 = vpop.xlane.xlu1 %5172 }
 0xca7   : > { %v5225_v1 = vadd.f32 %v5173_v58, %v5097_v17  ;;  %v4974_v49 = vpop.xlane.xlu0 %4973  ;;  %v4946_v58 = vld [vmem:[#allocation7 + $0xa8] sm:$0xff] }
 0xca8   : > { %v5029_v48 = vadd.f32 %v4974_v49, %v4933_v46 }
 0xca9   : > { %5257 = vst.msk [vmem:[#allocation8 + $0x58] sm:$0xff] %vm5053_vm2, %v5225_v1  ;;  %v4947_v1 = vld [vmem:[#allocation7 + $0xb0] sm:$0xff] }
 0xcaa   : > { %5062 = vst.msk [vmem:[#allocation7 + $0x40] sm:$0xff] %vm5053_vm2, %v5029_v48  ;;  %v5169_v14 = vpop.xlane.xlu1 %5168 }
 0xcab   : > { %v5223_v63 = vadd.f32 %v5169_v14, %v5095_v23  ;;  %v5171_v55 = vpop.xlane.xlu0 %5170  ;;  %v5109_v14 = vld [vmem:[#allocation8 + $0xb8] sm:$0xff] }
 0xcac   : > { %v5224_v16 = vadd.f32 %v5171_v55, %v5096_v0 }
 0xcad   : > { %5255 = vst.msk [vmem:[#allocation8 + $0x48] sm:$0xff] %vm5053_vm2, %v5223_v63  ;;  %v4945_v63 = vld [vmem:[#allocation7 + $0xa0] sm:$0xff] }
 0xcae   : > { %5256 = vst.msk [vmem:[#allocation8 + $0x50] sm:$0xff] %vm5053_vm2, %v5224_v16  ;;  %v4988_v36 = vpop.xlane.xlu1 %4987 }
 0xcaf   : > { %v5036_v8 = vadd.f32 %v4988_v36, %v4940_v29  ;;  %v5167_v5 = vpop.xlane.xlu0 %5166  ;;  %v5107_v36 = vld [vmem:[#allocation8 + $0xa8] sm:$0xff] }
 0xcb0   : > { %v5222_v37 = vadd.f32 %v5167_v5, %v5094_v56 }
 0xcb1   : > { %5069 = vst.msk [vmem:[#allocation7 + $0x78] sm:$0xff] %vm5053_vm2, %v5036_v8  ;;  %v5108_v8 = vld [vmem:[#allocation8 + $0xb0] sm:$0xff] }
 0xcb2   : > { %5254 = vst.msk [vmem:[#allocation8 + $0x40] sm:$0xff] %vm5053_vm2, %v5222_v37  ;;  %v4984_v28 = vpop.xlane.xlu1 %4983 }
 0xcb3   : > { %v5034_v44 = vadd.f32 %v4984_v28, %v4938_v4  ;;  %v4986_v27 = vpop.xlane.xlu0 %4985  ;;  %v4952_v28 = vld [vmem:[#allocation7 + $0xd8] sm:$0xff] }
 0xcb4   : > { %v5035_v3 = vadd.f32 %v4986_v27, %v4939_v40 }
 0xcb5   : > { %5067 = vst.msk [vmem:[#allocation7 + $0x68] sm:$0xff] %vm5053_vm2, %v5034_v44  ;;  %v5106_v44 = vld [vmem:[#allocation8 + $0xa0] sm:$0xff] }
 0xcb6   : > { %5068 = vst.msk [vmem:[#allocation7 + $0x70] sm:$0xff] %vm5053_vm2, %v5035_v3  ;;  %v5181_v41 = vpop.xlane.xlu1 %5180 }
 0xcb7   : > { %v5229_v18 = vadd.f32 %v5181_v41, %v5101_v35  ;;  %v4982_v13 = vpop.xlane.xlu0 %4981  ;;  %v4950_v41 = vld [vmem:[#allocation7 + $0xc8] sm:$0xff] }
 0xcb8   : > { %v5033_v33 = vadd.f32 %v4982_v13, %v4937_v34 }
 0xcb9   : > { %5261 = vst.msk [vmem:[#allocation8 + $0x78] sm:$0xff] %vm5053_vm2, %v5229_v18  ;;  %v4951_v18 = vld [vmem:[#allocation7 + $0xd0] sm:$0xff] }
 0xcba   : > { %5066 = vst.msk [vmem:[#allocation7 + $0x60] sm:$0xff] %vm5053_vm2, %v5033_v33  ;;  %v5177_v31 = vpop.xlane.xlu1 %5176 }
 0xcbb   : > { %v5227_v7 = vadd.f32 %v5177_v31, %v5099_v61  ;;  %v5179_v45 = vpop.xlane.xlu0 %5178  ;;  %v5113_v31 = vld [vmem:[#allocation8 + $0xd8] sm:$0xff] }
 0xcbc   : > { %v5228_v50 = vadd.f32 %v5179_v45, %v5100_v26 }
 0xcbd   : > { %5259 = vst.msk [vmem:[#allocation8 + $0x68] sm:$0xff] %vm5053_vm2, %v5227_v7  ;;  %v4949_v7 = vld [vmem:[#allocation7 + $0xc0] sm:$0xff] }
 0xcbe   : > { %5260 = vst.msk [vmem:[#allocation8 + $0x70] sm:$0xff] %vm5053_vm2, %v5228_v50  ;;  %v4996_v51 = vpop.xlane.xlu1 %4995 }
 0xcbf   : > { %v5040_v22 = vadd.f32 %v4996_v51, %v4944_v19  ;;  %v5175_v42 = vpop.xlane.xlu0 %5174  ;;  %v5111_v51 = vld [vmem:[#allocation8 + $0xc8] sm:$0xff] }
 0xcc0   : > { %v5226_v53 = vadd.f32 %v5175_v42, %v5098_v12 }
 0xcc1   : > { %5073 = vst.msk [vmem:[#allocation7 + $0x98] sm:$0xff] %vm5053_vm2, %v5040_v22  ;;  %v5112_v22 = vld [vmem:[#allocation8 + $0xd0] sm:$0xff] }
 0xcc2   : > { %5258 = vst.msk [vmem:[#allocation8 + $0x60] sm:$0xff] %vm5053_vm2, %v5226_v53  ;;  %v4992_v47 = vpop.xlane.xlu1 %4991 }
 0xcc3   : > { %v5038_v60 = vadd.f32 %v4992_v47, %v4942_v52  ;;  %v4994_v30 = vpop.xlane.xlu0 %4993  ;;  %v4956_v47 = vld [vmem:[#allocation7 + $0xf8] sm:$0xff] }
 0xcc4   : > { %v5039_v25 = vadd.f32 %v4994_v30, %v4943_v15 }
 0xcc5   : > { %5071 = vst.msk [vmem:[#allocation7 + $0x88] sm:$0xff] %vm5053_vm2, %v5038_v60  ;;  %v5110_v60 = vld [vmem:[#allocation8 + $0xc0] sm:$0xff] }
 0xcc6   : > { %5072 = vst.msk [vmem:[#allocation7 + $0x90] sm:$0xff] %vm5053_vm2, %v5039_v25  ;;  %v5189_v38 = vpop.xlane.xlu1 %5188 }
 0xcc7   : > { %v5233_v24 = vadd.f32 %v5189_v38, %v5105_v11  ;;  %v4990_v39 = vpop.xlane.xlu0 %4989  ;;  %v4954_v38 = vld [vmem:[#allocation7 + $0xe8] sm:$0xff] }
 0xcc8   : > { %v5037_v57 = vadd.f32 %v4990_v39, %v4941_v62 }
 0xcc9   : > { %5265 = vst.msk [vmem:[#allocation8 + $0x98] sm:$0xff] %vm5053_vm2, %v5233_v24  ;;  %v4955_v24 = vld [vmem:[#allocation7 + $0xf0] sm:$0xff] }
 0xcca   : > { %5070 = vst.msk [vmem:[#allocation7 + $0x80] sm:$0xff] %vm5053_vm2, %v5037_v57  ;;  %v5185_v10 = vpop.xlane.xlu1 %5184 }
 0xccb   : > { %v5231_v32 = vadd.f32 %v5185_v10, %v5103_v54  ;;  %v5187_v59 = vpop.xlane.xlu0 %5186  ;;  %v5115_v10 = vld [vmem:[#allocation8 + $0xe8] sm:$0xff] }
 0xccc   : > { %v5232_v9 = vadd.f32 %v5187_v59, %v5104_v2 }
 0xccd   : > { %5263 = vst.msk [vmem:[#allocation8 + $0x88] sm:$0xff] %vm5053_vm2, %v5231_v32  ;;  %v4953_v32 = vld [vmem:[#allocation7 + $0xe0] sm:$0xff] }
 0xcce   : > { %5264 = vst.msk [vmem:[#allocation8 + $0x90] sm:$0xff] %vm5053_vm2, %v5232_v9  ;;  %v5004_v43 = vpop.xlane.xlu1 %5003 }
 0xccf   : > { %v5044_v20 = vadd.f32 %v5004_v43, %v4948_v21  ;;  %v5183_v17 = vpop.xlane.xlu0 %5182  ;;  %v5117_v43 = vld [vmem:[#allocation8 + $0xf8] sm:$0xff] }
 0xcd0   : > { %v5230_v46 = vadd.f32 %v5183_v17, %v5102_v6 }
 0xcd1   : > { %5077 = vst.msk [vmem:[#allocation7 + $0xb8] sm:$0xff] %vm5053_vm2, %v5044_v20  ;;  %v5114_v20 = vld [vmem:[#allocation8 + $0xe0] sm:$0xff] }
 0xcd2   : > { %5262 = vst.msk [vmem:[#allocation8 + $0x80] sm:$0xff] %vm5053_vm2, %v5230_v46  ;;  %v5000_v49 = vpop.xlane.xlu1 %4999 }
 0xcd3   : > { %v5042_v48 = vadd.f32 %v5000_v49, %v4946_v58  ;;  %v5002_v23 = vpop.xlane.xlu0 %5001  ;;  %v5116_v49 = vld [vmem:[#allocation8 + $0xf0] sm:$0xff] }
 0xcd4   : > { %v5043_v0 = vadd.f32 %v5002_v23, %v4947_v1 }
 0xcd5   : > { %5075 = vst.msk [vmem:[#allocation7 + $0xa8] sm:$0xff] %vm5053_vm2, %v5042_v48 }
 0xcd6   : > { %5076 = vst.msk [vmem:[#allocation7 + $0xb0] sm:$0xff] %vm5053_vm2, %v5043_v0  ;;  %v5197_v55 = vpop.xlane.xlu1 %5196 }
 0xcd7   : > { %v5237_v16 = vadd.f32 %v5197_v55, %v5109_v14  ;;  %v4998_v29 = vpop.xlane.xlu0 %4997 }
 0xcd8   : > { %v5041_v56 = vadd.f32 %v4998_v29, %v4945_v63 }
 0xcd9   : > { %5269 = vst.msk [vmem:[#allocation8 + $0xb8] sm:$0xff] %vm5053_vm2, %v5237_v16 }
 0xcda   : > { %5074 = vst.msk [vmem:[#allocation7 + $0xa0] sm:$0xff] %vm5053_vm2, %v5041_v56  ;;  %v5193_v5 = vpop.xlane.xlu1 %5192 }
 0xcdb   : > { %v5235_v37 = vadd.f32 %v5193_v5, %v5107_v36  ;;  %v5195_v4 = vpop.xlane.xlu0 %5194 }
 0xcdc   : > { %v5236_v40 = vadd.f32 %v5195_v4, %v5108_v8 }
 0xcdd   : > { %5267 = vst.msk [vmem:[#allocation8 + $0xa8] sm:$0xff] %vm5053_vm2, %v5235_v37 }
 0xcde   : > { %5268 = vst.msk [vmem:[#allocation8 + $0xb0] sm:$0xff] %vm5053_vm2, %v5236_v40  ;;  %v5012_v27 = vpop.xlane.xlu1 %5011 }
 0xcdf   : > { %v5048_v3 = vadd.f32 %v5012_v27, %v4952_v28  ;;  %v5191_v35 = vpop.xlane.xlu0 %5190 }
 0xce0   : > { %v5234_v34 = vadd.f32 %v5191_v35, %v5106_v44 }
 0xce1   : > { %5081 = vst.msk [vmem:[#allocation7 + $0xd8] sm:$0xff] %vm5053_vm2, %v5048_v3 }
 0xce2   : > { %5266 = vst.msk [vmem:[#allocation8 + $0xa0] sm:$0xff] %vm5053_vm2, %v5234_v34  ;;  %v5008_v13 = vpop.xlane.xlu1 %5007 }
 0xce3   : > { %v5046_v33 = vadd.f32 %v5008_v13, %v4950_v41  ;;  %v5010_v61 = vpop.xlane.xlu0 %5009 }
 0xce4   : > { %v5047_v26 = vadd.f32 %v5010_v61, %v4951_v18 }
 0xce5   : > { %5079 = vst.msk [vmem:[#allocation7 + $0xc8] sm:$0xff] %vm5053_vm2, %v5046_v33 }
 0xce6   : > { %5080 = vst.msk [vmem:[#allocation7 + $0xd0] sm:$0xff] %vm5053_vm2, %v5047_v26  ;;  %v5205_v45 = vpop.xlane.xlu1 %5204 }
 0xce7   : > { %v5241_v50 = vadd.f32 %v5205_v45, %v5113_v31  ;;  %v5006_v19 = vpop.xlane.xlu0 %5005 }
 0xce8   : > { %v5045_v12 = vadd.f32 %v5006_v19, %v4949_v7 }
 0xce9   : > { %5273 = vst.msk [vmem:[#allocation8 + $0xd8] sm:$0xff] %vm5053_vm2, %v5241_v50 }
 0xcea   : > { %5078 = vst.msk [vmem:[#allocation7 + $0xc0] sm:$0xff] %vm5053_vm2, %v5045_v12  ;;  %v5201_v42 = vpop.xlane.xlu1 %5200 }
 0xceb   : > { %v5239_v53 = vadd.f32 %v5201_v42, %v5111_v51  ;;  %v5203_v52 = vpop.xlane.xlu0 %5202 }
 0xcec   : > { %v5240_v15 = vadd.f32 %v5203_v52, %v5112_v22 }
 0xced   : > { %5271 = vst.msk [vmem:[#allocation8 + $0xc8] sm:$0xff] %vm5053_vm2, %v5239_v53 }
 0xcee   : > { %5272 = vst.msk [vmem:[#allocation8 + $0xd0] sm:$0xff] %vm5053_vm2, %v5240_v15  ;;  %v5020_v30 = vpop.xlane.xlu1 %5019 }
 0xcef   : > { %v5052_v25 = vadd.f32 %v5020_v30, %v4956_v47  ;;  %v5199_v11 = vpop.xlane.xlu0 %5198 }
 0xcf0   : > { %v5238_v62 = vadd.f32 %v5199_v11, %v5110_v60 }
 0xcf1   : > { %5085 = vst.msk [vmem:[#allocation7 + $0xf8] sm:$0xff] %vm5053_vm2, %v5052_v25 }
 0xcf2   : > { %5270 = vst.msk [vmem:[#allocation8 + $0xc0] sm:$0xff] %vm5053_vm2, %v5238_v62  ;;  %v5016_v39 = vpop.xlane.xlu1 %5015 }
 0xcf3   : > { %v5050_v57 = vadd.f32 %v5016_v39, %v4954_v38  ;;  %v5018_v54 = vpop.xlane.xlu0 %5017 }
 0xcf4   : > { %v5051_v2 = vadd.f32 %v5018_v54, %v4955_v24 }
 0xcf5   : > { %5083 = vst.msk [vmem:[#allocation7 + $0xe8] sm:$0xff] %vm5053_vm2, %v5050_v57 }
 0xcf6   : > { %5084 = vst.msk [vmem:[#allocation7 + $0xf0] sm:$0xff] %vm5053_vm2, %v5051_v2  ;;  %v5209_v59 = vpop.xlane.xlu1 %5208 }
 0xcf7   : > { %v5243_v9 = vadd.f32 %v5209_v59, %v5115_v10  ;;  %v5014_v21 = vpop.xlane.xlu0 %5013 }
 0xcf8   : > { %v5049_v6 = vadd.f32 %v5014_v21, %v4953_v32 }
 0xcf9   : > { %5275 = vst.msk [vmem:[#allocation8 + $0xe8] sm:$0xff] %vm5053_vm2, %v5243_v9 }
 0xcfa   : > { %5082 = vst.msk [vmem:[#allocation7 + $0xe0] sm:$0xff] %vm5053_vm2, %v5049_v6  ;;  %v5213_v17 = vpop.xlane.xlu1 %5212 }
 0xcfb   : > { %v5245_v46 = vadd.f32 %v5213_v17, %v5117_v43  ;;  %v5207_v58 = vpop.xlane.xlu0 %5206 }
 0xcfc   : > { %v5242_v1 = vadd.f32 %v5207_v58, %v5114_v20 }
 0xcfd   : > { %5277 = vst.msk [vmem:[#allocation8 + $0xf8] sm:$0xff] %vm5053_vm2, %v5245_v46 }
 0xcfe   : > { %5274 = vst.msk [vmem:[#allocation8 + $0xe0] sm:$0xff] %vm5053_vm2, %v5242_v1 }
 0xcff   : > { %v5211_v48 = vpop.xlane.xlu0 %5210 }
 0xd00   : > { %v5244_v23 = vadd.f32 %v5211_v48, %v5116_v49 }
 0xd02   : > { %5276 = vst.msk [vmem:[#allocation8 + $0xf0] sm:$0xff] %vm5053_vm2, %v5244_v23 }
 0xd03 PF: > { %s11361_s30 = sld [smem:[#allocation27_spill]] }
 0xd09   : > { %p6740_p11 = scmp.ne.s32.totalorder %s11361_s30, 1 }
 0xd0a   : > { %v5388_v0 = vld [vmem:[#allocation7 + $0x80] sm:$0xff] (!%p6740_p11)  ;;  %v8321_v55 = vmov (!%p6740_p11), 0   ;;  %v5389_v8 = vld [vmem:[#allocation7 + $0x88] sm:$0xff] (!%p6740_p11)  ;;  %v5390_v27 = vld [vmem:[#allocation7 + $0x90] sm:$0xff] (!%p6740_p11)  ;;  %s11362_s14 = sld [smem:[#allocation26_spill]] (!%p6740_p11)  ;;  %s11363_s18 = sld [smem:[#allocation74_spill]] (!%p6740_p11) }
 0xd0b   : > { %5318 = sbr.rel (%p6740_p11) target bundleno = 3852 (0xf0c), region = 149  ;;  %v5452_v14 = vld [vmem:[#allocation8 + $0x80] sm:$0xff] (!%p6740_p11)  ;;  %7971 = vset.pattern.permute.xlu1 (!%p6740_p11), %v8321_v55  ;;  %7970 = vset.pattern.permute.xlu0 (!%p6740_p11), %v8321_v55  ;;  %v5420_v16 = vmul.f32 (!%p6740_p11), 0.00390625, %v5388_v0  ;;  %v5453_v5 = vld [vmem:[#allocation8 + $0x88] sm:$0xff] (!%p6740_p11)  ;;  %v5421_v4 = vmul.f32 (!%p6740_p11), 0.00390625, %v5389_v8  ;;  %v5454_v18 = vld [vmem:[#allocation8 + $0x90] sm:$0xff] (!%p6740_p11) }
 0xd0c   : > { %v5372_v63 = vld [vmem:[#allocation7] sm:$0xff] (!%p6740_p11)  ;;  %v5484_v29 = vmul.f32 (!%p6740_p11), 0.00390625, %v5452_v14  ;;  %v5485_v40 = vmul.f32 (!%p6740_p11), 0.00390625, %v5453_v5  ;;  %v5373_v28 = vld [vmem:[#allocation7 + $0x8] sm:$0xff] (!%p6740_p11)  ;;  %v5391_v13 = vld [vmem:[#allocation7 + $0x98] sm:$0xff] (!%p6740_p11)  ;;  %v5422_v26 = vmul.f32 (!%p6740_p11), 0.00390625, %v5390_v27 }
 0xd0d   : > { %v5404_v56 = vmul.f32 (!%p6740_p11), 0.00390625, %v5372_v63  ;;  %v5436_v36 = vld [vmem:[#allocation8] sm:$0xff] (!%p6740_p11)  ;;  %v5437_v44 = vld [vmem:[#allocation8 + $0x8] sm:$0xff] (!%p6740_p11)  ;;  %5678 = vperm.xlu0 (!%p6740_p11), %7970, %v5420_v16   ;;  %v5516_v3 = vmul.f32 (!%p6740_p11), %v5420_v16, %v5420_v16  ;;  %v5405_v34 = vmul.f32 (!%p6740_p11), 0.00390625, %v5373_v28  ;;  %v5455_v33 = vld [vmem:[#allocation8 + $0x98] sm:$0xff] (!%p6740_p11)  ;;  %v5517_v61 = vmul.f32 (!%p6740_p11), %v5421_v4, %v5421_v4  ;;  %s11365_s24 = sld [smem:[#allocation73_spill]] (!%p6740_p11) }
 0xd0e   : > { %v5468_v37 = vmul.f32 (!%p6740_p11), 0.00390625, %v5436_v36  ;;  %v5469_v41 = vmul.f32 (!%p6740_p11), 0.00390625, %v5437_v44  ;;  %v5486_v31 = vmul.f32 (!%p6740_p11), 0.00390625, %v5454_v18  ;;  %v5423_v7 = vmul.f32 (!%p6740_p11), 0.00390625, %v5391_v13  ;;  %v5374_v45 = vld [vmem:[#allocation7 + $0x10] sm:$0xff] (!%p6740_p11)  ;;  %v5375_v47 = vld [vmem:[#allocation7 + $0x18] sm:$0xff] (!%p6740_p11) }
 0xd0f   : > { %5598 = vperm.xlu1 (!%p6740_p11), %7971, %v5404_v56   ;;  %v5500_v35 = vmul.f32 (!%p6740_p11), %v5404_v56, %v5404_v56  ;;  %v5438_v50 = vld [vmem:[#allocation8 + $0x10] sm:$0xff] (!%p6740_p11)  ;;  %v5548_v19 = vsub.f32 (!%p6740_p11), %v5484_v29, %v5516_v3  ;;  %v5501_v51 = vmul.f32 (!%p6740_p11), %v5405_v34, %v5405_v34  ;;  %v5487_v22 = vmul.f32 (!%p6740_p11), 0.00390625, %v5455_v33  ;;  %v5439_v57 = vld [vmem:[#allocation8 + $0x18] sm:$0xff] (!%p6740_p11)  ;;  %v5392_v46 = vld [vmem:[#allocation7 + $0xa0] sm:$0xff] (!%p6740_p11) }
 0xd10   : > { %v5549_v42 = vsub.f32 (!%p6740_p11), %v5485_v40, %v5517_v61  ;;  %v5518_v53 = vmul.f32 (!%p6740_p11), %v5422_v26, %v5422_v26  ;;  %v5519_v52 = vmul.f32 (!%p6740_p11), %v5423_v7, %v5423_v7  ;;  %v5406_v15 = vmul.f32 (!%p6740_p11), 0.00390625, %v5374_v45  ;;  %v5393_v1 = vld [vmem:[#allocation7 + $0xa8] sm:$0xff] (!%p6740_p11)  ;;  %v5456_v0 = vld [vmem:[#allocation8 + $0xa0] sm:$0xff] (!%p6740_p11)  ;;  %s6741_s1 = sshll.u32 (!%p6740_p11), %s11362_s14, 7  ;;  %s11364_s7 = smov (!%p6740_p11), %s11363_s18 }
 0xd11   : > { %v5532_v12 = vsub.f32 (!%p6740_p11), %v5468_v37, %v5500_v35  ;;  %v5580_v60 = vmax.f32 (!%p6740_p11), %v5548_v19, 0.0  ;;  %5683 = vperm.xlu0 (!%p6740_p11), %7970, %v5421_v4   ;;  %v5533_v25 = vsub.f32 (!%p6740_p11), %v5469_v41, %v5501_v51  ;;  %v5470_v11 = vmul.f32 (!%p6740_p11), 0.00390625, %v5438_v50  ;;  %v5376_v14 = vld [vmem:[#allocation7 + $0x20] sm:$0xff] (!%p6740_p11)  ;;  %v5457_v29 = vld [vmem:[#allocation8 + $0xa8] sm:$0xff] (!%p6740_p11)  ;;  %v5394_v19 = vld [vmem:[#allocation7 + $0xb0] sm:$0xff] (!%p6740_p11)  ;;  %s5320_s19 = sshra.s32 (!%p6740_p11), %s6741_s1, 7 }
 0xd12   : > { %v5581_v62 = vmax.f32 %v5549_v42, 0.0  ;;  %v5550_v38 = vsub.f32 %v5486_v31, %v5518_v53  ;;  %v5551_v24 = vsub.f32 %v5487_v22, %v5519_v52  ;;  %v5502_v39 = vmul.f32 %v5406_v15, %v5406_v15  ;;  %v5377_v36 = vld [vmem:[#allocation7 + $0x28] sm:$0xff]  ;;  %v5440_v40 = vld [vmem:[#allocation8 + $0x20] sm:$0xff]  ;;  %v5395_v42 = vld [vmem:[#allocation7 + $0xb8] sm:$0xff]  ;;  %s6742_s21 = sshll.u32 %s5320_s19, 3 }
 0xd13   : > { %v5564_v30 = vmax.f32 %v5532_v12, 0.0  ;;  %5603 = vperm.xlu1 %7971, %v5405_v34   ;;  %v5804_v54 = vadd.f32 1e-05, %v5580_v60  ;;  %v5565_v10 = vmax.f32 %v5533_v25, 0.0  ;;  %v5407_v32 = vmul.f32 0.00390625, %v5375_v47  ;;  %v5441_v3 = vld [vmem:[#allocation8 + $0x28] sm:$0xff]  ;;  %s11366_s17 = smov %s11365_s24 }
 0xd14   : > { %v5805_v59 = vadd.f32 1e-05, %v5581_v62  ;;  %v5582_v9 = vmax.f32 %v5550_v38, 0.0  ;;  %v5583_v21 = vmax.f32 %v5551_v24, 0.0  ;;  %v5534_v6 = vsub.f32 %v5470_v11, %v5502_v39  ;;  %v5459_v47 = vld [vmem:[#allocation8 + $0xb8] sm:$0xff]  ;;  %v5378_v25 = vld [vmem:[#allocation7 + $0x30] sm:$0xff] }
 0xd15   : > { %v5788_v2 = vadd.f32 1e-05, %v5564_v30  ;;  %7996 = vrsqrt.f32 %v5804_v54  ;;  %v5789_v43 = vadd.f32 1e-05, %v5565_v10  ;;  %5688 = vperm.xlu0 %7970, %v5422_v26   ;;  %v5471_v20 = vmul.f32 0.00390625, %v5439_v57  ;;  %v5458_v30 = vld [vmem:[#allocation8 + $0xb0] sm:$0xff] }
 0xd16   : > { %v5503_v17 = vmul.f32 %v5407_v32, %v5407_v32  ;;  %v5566_v58 = vmax.f32 %v5534_v6, 0.0  ;;  %v5806_v49 = vadd.f32 1e-05, %v5582_v9  ;;  %v10879_v23 = vmul.f32 0.00390625, %v5392_v46  ;;  %v5379_v39 = vld [vmem:[#allocation7 + $0x38] sm:$0xff]  ;;  %s11001_s27 = scalar_lea.vmem [#allocation6], %s6742_s21 }
 0xd17   : > { %5693 = vperm.xlu1 %7971, %v5423_v7   ;;  %7998 = vrsqrt.f32 %v5788_v2  ;;  %v5807_v63 = vadd.f32 1e-05, %v5583_v21  ;;  %v10881_v16 = vmul.f32 0.00390625, %v5393_v1  ;;  %v5488_v8 = vmul.f32 0.00390625, %v5456_v0 }
 0xd18   : > { %8000 = vrsqrt.f32 %v5805_v59  ;;  %v5535_v48 = vsub.f32 %v5471_v20, %v5503_v17  ;;  %v5790_v56 = vadd.f32 1e-05, %v5566_v58  ;;  %v5520_v5 = vmul.f32 %v10879_v23, %v10879_v23  ;;  %v5442_v59 = vld [vmem:[#allocation8 + $0x30] sm:$0xff]  ;;  %v5443_v20 = vld [vmem:[#allocation8 + $0x38] sm:$0xff] }
 0xd19   : > { %8002 = vrsqrt.f32 %v5789_v43  ;;  %5608 = vperm.xlu0 %7970, %v5406_v15   ;;  %v10885_v37 = vmul.f32 0.00390625, %v5376_v14  ;;  %v5489_v4 = vmul.f32 0.00390625, %v5457_v29  ;;  %v5521_v44 = vmul.f32 %v10881_v16, %v10881_v16 }
 0xd1a   : > { %v5567_v55 = vmax.f32 %v5535_v48, 0.0  ;;  %8004 = vrsqrt.f32 %v5806_v49  ;;  %v10889_v27 = vmul.f32 0.00390625, %v5377_v36  ;;  %v5552_v34 = vsub.f32 %v5488_v8, %v5520_v5  ;;  %v5397_v36 = vld [vmem:[#allocation7 + $0xc8] sm:$0xff] }
 0xd1b   : > { %5613 = vperm.xlu1 %7971, %v5407_v32   ;;  %8006 = vrsqrt.f32 %v5807_v63  ;;  %v5472_v41 = vmul.f32 0.00390625, %v5440_v40  ;;  %v5504_v18 = vmul.f32 %v10885_v37, %v10885_v37  ;;  %v5553_v61 = vsub.f32 %v5489_v4, %v5521_v44  ;;  %v5396_v63 = vld [vmem:[#allocation7 + $0xc0] sm:$0xff] }
 0xd1c   : > { %v5791_v28 = vadd.f32 1e-05, %v5567_v55  ;;  %8008 = vrsqrt.f32 %v5790_v56  ;;  %v5473_v26 = vmul.f32 0.00390625, %v5441_v3  ;;  %v5505_v31 = vmul.f32 %v10889_v27, %v10889_v27  ;;  %v5460_v40 = vld [vmem:[#allocation8 + $0xc0] sm:$0xff] }
 0xd1d   : > { %v5584_v45 = vmax.f32 %v5552_v34, 0.0  ;;  %v5536_v50 = vsub.f32 %v5472_v41, %v5504_v18  ;;  %v5585_v51 = vmax.f32 %v5553_v61, 0.0  ;;  %v10895_v60 = vmul.f32 0.00390625, %v5394_v19  ;;  %v5381_v41 = vld [vmem:[#allocation7 + $0x48] sm:$0xff] }
 0xd1e   : > { %8010 = vrsqrt.f32 %v5791_v28  ;;  %v5537_v22 = vsub.f32 %v5473_v26, %v5505_v31  ;;  %v10897_v24 = vmul.f32 0.00390625, %v5395_v42  ;;  %v5490_v57 = vmul.f32 0.00390625, %v5458_v30  ;;  %v5380_v28 = vld [vmem:[#allocation7 + $0x40] sm:$0xff] }
 0xd1f   : > { %v7997_v35 = vpop.eup %7996  ;;  %v5808_v52 = vadd.f32 1e-05, %v5584_v45  ;;  %v5568_v15 = vmax.f32 %v5536_v50, 0.0  ;;  %v5809_v62 = vadd.f32 1e-05, %v5585_v51  ;;  %v5522_v10 = vmul.f32 %v10895_v60, %v10895_v60  ;;  %v5444_v26 = vld [vmem:[#allocation8 + $0x40] sm:$0xff] }
 0xd20   : > { %5934 = vperm.xlu0 %7970, %v7997_v35   ;;  %v5569_v38 = vmax.f32 %v5537_v22, 0.0  ;;  %v10901_v32 = vmul.f32 0.00390625, %v5378_v25  ;;  %v5491_v9 = vmul.f32 0.00390625, %v5459_v47  ;;  %v5523_v6 = vmul.f32 %v10897_v24, %v10897_v24  ;;  %v5445_v50 = vld [vmem:[#allocation8 + $0x48] sm:$0xff]  ;;  %v5398_v47 = vld [vmem:[#allocation7 + $0xd0] sm:$0xff] }
 0xd21   : > { %v7999_v13 = vpop.eup %7998  ;;  %8012 = vrsqrt.f32 %v5808_v52  ;;  %v5792_v2 = vadd.f32 1e-05, %v5568_v15  ;;  %v10905_v43 = vmul.f32 0.00390625, %v5379_v39  ;;  %v5554_v17 = vsub.f32 %v5490_v57, %v5522_v10 }
 0xd22   : > { %v8001_v33 = vpop.eup %8000  ;;  %8014 = vrsqrt.f32 %v5809_v62  ;;  %v5793_v21 = vadd.f32 1e-05, %v5569_v38  ;;  %v5474_v46 = vmul.f32 0.00390625, %v5442_v59  ;;  %v5506_v58 = vmul.f32 %v10901_v32, %v10901_v32  ;;  %v5399_v62 = vld [vmem:[#allocation7 + $0xd8] sm:$0xff] }
 0xd23   : > { %5939 = vperm.xlu1 %7971, %v8001_v33   ;;  %v8003_v7 = vpop.eup %8002  ;;  %8016 = vrsqrt.f32 %v5792_v2  ;;  %v5555_v1 = vsub.f32 %v5491_v9, %v5523_v6  ;;  %v5475_v49 = vmul.f32 0.00390625, %v5443_v20  ;;  %v5507_v48 = vmul.f32 %v10905_v43, %v10905_v43  ;;  %v5382_v2 = vld [vmem:[#allocation7 + $0x50] sm:$0xff]  ;;  %v5383_v6 = vld [vmem:[#allocation7 + $0x58] sm:$0xff] }
 0xd24   : > { %5854 = vperm.xlu0 %7970, %v7999_v13   ;;  %v8005_v12 = vpop.eup %8004  ;;  %8018 = vrsqrt.f32 %v5793_v21  ;;  %v5586_v0 = vmax.f32 %v5554_v17, 0.0  ;;  %v5538_v14 = vsub.f32 %v5474_v46, %v5506_v58  ;;  %v10915_v4 = vmul.f32 0.00390625, %v5396_v63 }
 0xd25   : > { %v8007_v53 = vpop.eup %8006  ;;  %v5587_v29 = vmax.f32 %v5555_v1, 0.0  ;;  %v5539_v56 = vsub.f32 %v5475_v49, %v5507_v48  ;;  %v10917_v35 = vmul.f32 0.00390625, %v5397_v36  ;;  %v5492_v34 = vmul.f32 0.00390625, %v5460_v40  ;;  %v5446_v1 = vld [vmem:[#allocation8 + $0x50] sm:$0xff]  ;;  %v5400_v40 = vld [vmem:[#allocation7 + $0xe0] sm:$0xff] }
 0xd26   : > { %v8009_v11 = vpop.eup %8008  ;;  %v5810_v8 = vadd.f32 1e-05, %v5586_v0  ;;  %v5570_v5 = vmax.f32 %v5538_v14, 0.0  ;;  %v5524_v13 = vmul.f32 %v10915_v4, %v10915_v4  ;;  %v10921_v33 = vmul.f32 0.00390625, %v5380_v28  ;;  %v5447_v14 = vld [vmem:[#allocation8 + $0x58] sm:$0xff] }
 0xd27   : > { %5859 = vperm.xlu1 %7971, %v8003_v7   ;;  %v5811_v44 = vadd.f32 1e-05, %v5587_v29  ;;  %v5571_v3 = vmax.f32 %v5539_v56, 0.0  ;;  %v5525_v7 = vmul.f32 %v10917_v35, %v10917_v35  ;;  %v10925_v45 = vmul.f32 0.00390625, %v5381_v41 }
 0xd28   : > { %5944 = vperm.xlu0 %7970, %v8005_v12   ;;  %v8011_v54 = vpop.eup %8010  ;;  %8020 = vrsqrt.f32 %v5810_v8  ;;  %v5556_v19 = vsub.f32 %v5492_v34, %v5524_v13  ;;  %v5476_v12 = vmul.f32 0.00390625, %v5444_v26  ;;  %v5508_v51 = vmul.f32 %v10921_v33, %v10921_v33 }
 0xd29   : > { %8022 = vrsqrt.f32 %v5811_v44  ;;  %v5795_v31 = vadd.f32 1e-05, %v5571_v3  ;;  %v5477_v42 = vmul.f32 0.00390625, %v5445_v50  ;;  %v10935_v57 = vmul.f32 0.00390625, %v5398_v47  ;;  %v5401_v3 = vld [vmem:[#allocation7 + $0xe8] sm:$0xff] }
 0xd2a   : > { %v5588_v52 = vmax.f32 %v5556_v19, 0.0  ;;  %v5540_v15 = vsub.f32 %v5476_v12, %v5508_v51  ;;  %v10937_v9 = vmul.f32 0.00390625, %v5399_v62  ;;  %v10941_v46 = vmul.f32 0.00390625, %v5382_v2 }
 0xd2b   : > { %5949 = vperm.xlu1 %7971, %v8007_v53   ;;  %v8013_v55 = vpop.eup %8012  ;;  %v5509_v53 = vmul.f32 %v10925_v45, %v10925_v45  ;;  %v5526_v17 = vmul.f32 %v10935_v57, %v10935_v57  ;;  %v10945_v0 = vmul.f32 0.00390625, %v5383_v6  ;;  %v5479_v36 = vmul.f32 0.00390625, %v5447_v14 }
 0xd2c   : > { %5864 = vperm.xlu0 %7970, %v8009_v11   ;;  %v5812_v38 = vadd.f32 1e-05, %v5588_v52  ;;  %v5572_v39 = vmax.f32 %v5540_v15, 0.0  ;;  %v5527_v48 = vmul.f32 %v10937_v9, %v10937_v9  ;;  %v5510_v29 = vmul.f32 %v10941_v46, %v10941_v46  ;;  %v5449_v15 = vld [vmem:[#allocation8 + $0x68] sm:$0xff] }
 0xd2d   : > { %v5541_v11 = vsub.f32 %v5477_v42, %v5509_v53  ;;  %v10955_v41 = vmul.f32 0.00390625, %v5400_v40  ;;  %v10957_v26 = vmul.f32 0.00390625, %v5401_v3  ;;  %v5481_v62 = vmul.f32 0.00390625, %v5449_v15  ;;  %v6109_v15 = vld [vmem:[%s11364_s7 + $0x8] sm:$0xff] }
 0xd2f   : > { %5869 = vperm.xlu1 %7971, %v8011_v54   ;;  %v5462_v54 = vld [vmem:[#allocation8 + $0xd0] sm:$0xff]  ;;  %v5573_v59 = vmax.f32 %v5541_v11, 0.0  ;;  %v5528_v19 = vmul.f32 %v10955_v41, %v10955_v41  ;;  %v5529_v53 = vmul.f32 %v10957_v26, %v10957_v26 }
 0xd30   : > { %5698 = vperm.xlu0 %7970, %v10879_v23   ;;  %v8015_v23 = vpop.eup %8014  ;;  %v5494_v21 = vmul.f32 0.00390625, %v5462_v54  ;;  %v5402_v54 = vld [vmem:[#allocation7 + $0xf0] sm:$0xff] }
 0xd31   : > { %v5797_v49 = vadd.f32 1e-05, %v5573_v59  ;;  %v5403_v59 = vld [vmem:[#allocation7 + $0xf8] sm:$0xff]  ;;  %v5434_v6 = vmul.f32 0.00390625, %v5402_v54  ;;  %v5332_v54 = vld [vmem:[%s11001_s27 + $0x80] sm:$0xff] }
 0xd32   : > { %v5558_v63 = vsub.f32 %v5494_v21, %v5526_v17 }
 0xd33   : > { %5703 = vperm.xlu1 %7971, %v10881_v16   ;;  %v8017_v16 = vpop.eup %8016 }
 0xd34   : > { %5618 = vperm.xlu0 %7970, %v10885_v37   ;;  %v5461_v37 = vld [vmem:[#allocation8 + $0xc8] sm:$0xff]  ;;  %v8019_v18 = vpop.eup %8018  ;;  %v5590_v8 = vmax.f32 %v5558_v63, 0.0 }
 0xd35   : > { %v5493_v61 = vmul.f32 0.00390625, %v5461_v37  ;;  %v8021_v30 = vpop.eup %8020 }
 0xd36   : > { %v5814_v37 = vadd.f32 1e-05, %v5590_v8 }
 0xd37   : > { %5623 = vperm.xlu1 %7971, %v10889_v27   ;;  %v5794_v27 = vadd.f32 1e-05, %v5570_v5  ;;  %v5557_v22 = vsub.f32 %v5493_v61, %v5525_v7  ;;  %v5385_v7 = vld [vmem:[#allocation7 + $0x68] sm:$0xff] }
 0xd38   : > { %5954 = vperm.xlu0 %7970, %v8013_v55   ;;  %v5478_v55 = vmul.f32 0.00390625, %v5446_v1  ;;  %v10965_v52 = vmul.f32 0.00390625, %v5385_v7  ;;  %v5435_v1 = vmul.f32 0.00390625, %v5403_v59  ;;  %v5356_v59 = vunpack.c.l.bf16 %v5332_v54 }
 0xd39   : > { %8024 = vrsqrt.f32 %v5794_v27  ;;  %v5589_v25 = vmax.f32 %v5557_v22, 0.0  ;;  %v5384_v27 = vld [vmem:[#allocation7 + $0x60] sm:$0xff] }
 0xd3a   : > { %8026 = vrsqrt.f32 %v5795_v31  ;;  %v5542_v5 = vsub.f32 %v5478_v55, %v5510_v29  ;;  %v10961_v12 = vmul.f32 0.00390625, %v5384_v27  ;;  %v5448_v22 = vld [vmem:[#allocation8 + $0x60] sm:$0xff] }
 0xd3b   : > { %5959 = vperm.xlu1 %7971, %v8015_v23   ;;  %v5813_v10 = vadd.f32 1e-05, %v5589_v25  ;;  %8028 = vrsqrt.f32 %v5812_v38  ;;  %v5511_v23 = vmul.f32 %v10945_v0, %v10945_v0 }
 0xd3c   : > { %5874 = vperm.xlu0 %7970, %v8017_v16   ;;  %v5574_v34 = vmax.f32 %v5542_v5, 0.0  ;;  %v5512_v25 = vmul.f32 %v10961_v12, %v10961_v12  ;;  %v5451_v5 = vld [vmem:[#allocation8 + $0x78] sm:$0xff] }
 0xd3d   : > { %8030 = vrsqrt.f32 %v5813_v10  ;;  %v5543_v44 = vsub.f32 %v5479_v36, %v5511_v23  ;;  %v5531_v23 = vmul.f32 %v5435_v1, %v5435_v1  ;;  %v5483_v3 = vmul.f32 0.00390625, %v5451_v5  ;;  %v6119_v5 = vld [vmem:[%s11364_s7 + $0x58] sm:$0xff] }
 0xd3f   : > { %5879 = vperm.xlu1 %7971, %v8019_v18   ;;  %v5464_v18 = vld [vmem:[#allocation8 + $0xe0] sm:$0xff]  ;;  %v5575_v61 = vmax.f32 %v5543_v44, 0.0 }
 0xd40   : > { %5708 = vperm.xlu0 %7970, %v10895_v60   ;;  %v8023_v60 = vpop.eup %8022  ;;  %v5496_v31 = vmul.f32 0.00390625, %v5464_v18 }
 0xd41   : > { %v5799_v42 = vadd.f32 1e-05, %v5575_v61 }
 0xd42   : > { %v5560_v47 = vsub.f32 %v5496_v31, %v5528_v19 }
 0xd43   : > { %5713 = vperm.xlu1 %7971, %v10897_v24   ;;  %v8025_v24 = vpop.eup %8024 }
 0xd44   : > { %5628 = vperm.xlu0 %7970, %v10901_v32   ;;  %v5463_v32 = vld [vmem:[#allocation8 + $0xd8] sm:$0xff]  ;;  %v8027_v20 = vpop.eup %8026  ;;  %v5592_v38 = vmax.f32 %v5560_v47, 0.0 }
 0xd45   : > { %v5495_v58 = vmul.f32 0.00390625, %v5463_v32  ;;  %v8029_v28 = vpop.eup %8028 }
 0xd46   : > { %v5816_v32 = vadd.f32 1e-05, %v5592_v38 }
 0xd47   : > { %5633 = vperm.xlu1 %7971, %v10905_v43   ;;  %v5796_v43 = vadd.f32 1e-05, %v5572_v39  ;;  %v5559_v56 = vsub.f32 %v5495_v58, %v5527_v48  ;;  %v5387_v48 = vld [vmem:[#allocation7 + $0x78] sm:$0xff] }
 0xd48   : > { %5964 = vperm.xlu0 %7970, %v8021_v30   ;;  %v5480_v30 = vmul.f32 0.00390625, %v5448_v22  ;;  %v5419_v8 = vmul.f32 0.00390625, %v5387_v48 }
 0xd49   : > { %8032 = vrsqrt.f32 %v5796_v43  ;;  %v5591_v16 = vmax.f32 %v5559_v56, 0.0  ;;  %v5386_v43 = vld [vmem:[#allocation7 + $0x70] sm:$0xff] }
 0xd4a   : > { %8034 = vrsqrt.f32 %v5797_v49  ;;  %v5544_v39 = vsub.f32 %v5480_v30, %v5512_v25  ;;  %v5467_v49 = vld [vmem:[#allocation8 + $0xf8] sm:$0xff]  ;;  %v5418_v55 = vmul.f32 0.00390625, %v5386_v43  ;;  %v5450_v56 = vld [vmem:[#allocation8 + $0x70] sm:$0xff]  ;;  %v6116_v43 = vld [vmem:[%s11364_s7 + $0x40] sm:$0xff] }
 0xd4b   : > { %5969 = vperm.xlu1 %7971, %v8023_v60   ;;  %v5815_v13 = vadd.f32 1e-05, %v5591_v16  ;;  %8036 = vrsqrt.f32 %v5814_v37  ;;  %v5513_v60 = vmul.f32 %v10965_v52, %v10965_v52  ;;  %v5499_v29 = vmul.f32 0.00390625, %v5467_v49  ;;  %v6110_v25 = vld [vmem:[%s11364_s7 + $0x10] sm:$0xff]  ;;  %v6117_v49 = vld [vmem:[%s11364_s7 + $0x48] sm:$0xff] }
 0xd4c   : > { %5884 = vperm.xlu0 %7970, %v8025_v24   ;;  %v5576_v21 = vmax.f32 %v5544_v39, 0.0  ;;  %v5514_v16 = vmul.f32 %v5418_v55, %v5418_v55  ;;  %v6112_v39 = vld [vmem:[%s11364_s7 + $0x20] sm:$0xff] }
 0xd4d   : > { %8038 = vrsqrt.f32 %v5815_v13  ;;  %v5545_v10 = vsub.f32 %v5481_v62, %v5513_v60  ;;  %v5563_v44 = vsub.f32 %v5499_v29, %v5531_v23  ;;  %v7974_v62 = vld [vmem:[%s11365_s24 + $0x4] ss:$8 sps:$4 sm:$0xff]  }
 0xd4e   : > { %v5800_v63 = vadd.f32 1e-05, %v5576_v21  ;;  %v7977_v60 = vld [vmem:[%s11366_s17 + $0x44] ss:$8 sps:$4 sm:$0xff]   ;;  %6316 = vmatprep.mubr.bf16.mxu0 %v7974_v62  ;;  %v6115_v21 = vld [vmem:[%s11364_s7 + $0x38] sm:$0xff] }
 0xd4f   : > { %5889 = vperm.xlu1 %7971, %v8027_v20   ;;  %v5466_v20 = vld [vmem:[#allocation8 + $0xf0] sm:$0xff]  ;;  %v5577_v58 = vmax.f32 %v5545_v10, 0.0  ;;  %v5595_v27 = vmax.f32 %v5563_v44, 0.0  ;;  %6348 = vmatprep.mubr.bf16.mxu1 %v7977_v60  ;;  %v5334_v62 = vld [vmem:[%s11001_s27 + $0xa0] sm:$0xff] }
 0xd50   : > { %5718 = vperm.xlu0 %7970, %v10915_v4   ;;  %v8031_v4 = vpop.eup %8030  ;;  %v6114_v10 = vld [vmem:[%s11364_s7 + $0x30] sm:$0xff] }
 0xd51   : > { %v5801_v36 = vadd.f32 1e-05, %v5577_v58  ;;  %v5819_v31 = vadd.f32 1e-05, %v5595_v27  ;;  %v5333_v58 = vld [vmem:[%s11001_s27 + $0x90] sm:$0xff] }
 0xd52   : > { %v5358_v29 = vunpack.c.l.bf16 %v5333_v58 }
 0xd53   : > { %5723 = vperm.xlu1 %7971, %v10917_v35   ;;  %v8033_v35 = vpop.eup %8032 }
 0xd54   : > { %5638 = vperm.xlu0 %7970, %v10921_v33   ;;  %v5465_v33 = vld [vmem:[#allocation8 + $0xe8] sm:$0xff]  ;;  %v8035_v50 = vpop.eup %8034 }
 0xd55   : > { %v5497_v51 = vmul.f32 0.00390625, %v5465_v33  ;;  %v8037_v2 = vpop.eup %8036 }
 0xd57   : > { %5643 = vperm.xlu1 %7971, %v10925_v45   ;;  %v5798_v45 = vadd.f32 1e-05, %v5574_v34  ;;  %v5561_v11 = vsub.f32 %v5497_v51, %v5529_v53 }
 0xd58   : > { %5974 = vperm.xlu0 %7970, %v8029_v28   ;;  %v5482_v28 = vmul.f32 0.00390625, %v5450_v56  ;;  %v5325_v56 = vld [vmem:[%s11001_s27 + $0x10] sm:$0xff] }
 0xd59   : > { %8040 = vrsqrt.f32 %v5798_v45  ;;  %v5593_v24 = vmax.f32 %v5561_v11, 0.0  ;;  %v6111_v11 = vld [vmem:[%s11364_s7 + $0x18] sm:$0xff] }
 0xd5a   : > { %8042 = vrsqrt.f32 %v5799_v42  ;;  %v5546_v34 = vsub.f32 %v5482_v28, %v5514_v16  ;;  %v5359_v28 = vunpack.c.h.bf16 %v5333_v58 }
 0xd5b   : > { %5979 = vperm.xlu1 %7971, %v8031_v4   ;;  %8044 = vrsqrt.f32 %v5816_v32  ;;  %v5515_v4 = vmul.f32 %v5419_v8, %v5419_v8 }
 0xd5c   : > { %5894 = vperm.xlu0 %7970, %v8033_v35   ;;  %v5578_v33 = vmax.f32 %v5546_v34, 0.0 }
 0xd5d   : > { %v5547_v35 = vsub.f32 %v5483_v3, %v5515_v4  ;;  %v5342_v3 = vunpack.c.l.bf16 %v5325_v56 }
 0xd5f   : > { %5899 = vperm.xlu1 %7971, %v8035_v50   ;;  %v5579_v7 = vmax.f32 %v5547_v35, 0.0  ;;  %v6120_v35 = vld [vmem:[%s11364_s7 + $0x60] sm:$0xff] }
 0xd60   : > { %5728 = vperm.xlu0 %7970, %v10935_v57   ;;  %v8039_v57 = vpop.eup %8038 }
 0xd61   : > { %v5803_v45 = vadd.f32 1e-05, %v5579_v7 }
 0xd63   : > { %5733 = vperm.xlu1 %7971, %v10937_v9   ;;  %v8041_v17 = vpop.eup %8040  ;;  %v5817_v9 = vadd.f32 1e-05, %v5593_v24  ;;  %v6113_v24 = vld [vmem:[%s11364_s7 + $0x28] sm:$0xff] }
 0xd64   : > { %5648 = vperm.xlu0 %7970, %v10941_v46   ;;  %v5498_v46 = vmul.f32 0.00390625, %v5466_v20  ;;  %v8043_v14 = vpop.eup %8042 }
 0xd65   : > { %8046 = vrsqrt.f32 %v5817_v9  ;;  %v8045_v18 = vpop.eup %8044 }
 0xd66   : > { %8048 = vrsqrt.f32 %v5800_v63 }
 0xd67   : > { %5653 = vperm.xlu1 %7971, %v10945_v0   ;;  %v5530_v0 = vmul.f32 %v5434_v6, %v5434_v6  ;;  %8050 = vrsqrt.f32 %v5801_v36 }
 0xd68   : > { %5984 = vperm.xlu0 %7970, %v8037_v2  }
 0xd69   : > { %v5562_v40 = vsub.f32 %v5498_v46, %v5530_v0  ;;  %v6118_v0 = vld [vmem:[%s11364_s7 + $0x50] sm:$0xff] }
 0xd6b   : > { %5989 = vperm.xlu1 %7971, %v8039_v57   ;;  %v5594_v37 = vmax.f32 %v5562_v40, 0.0  ;;  %v5324_v57 = vld [vmem:[%s11001_s27] sm:$0xff] }
 0xd6c   : > { %5904 = vperm.xlu0 %7970, %v8041_v17   ;;  %v5340_v9 = vunpack.c.l.bf16 %v5324_v57  ;;  %v5341_v48 = vunpack.c.h.bf16 %v5324_v57 }
 0xd6d   : > { %v5818_v61 = vadd.f32 1e-05, %v5594_v37 }
 0xd6f   : > { %5909 = vperm.xlu1 %7971, %v8043_v14   ;;  %v8047_v13 = vpop.eup %8046  ;;  %8052 = vrsqrt.f32 %v5818_v61  ;;  %v6121_v61 = vld [vmem:[%s11364_s7 + $0x68] sm:$0xff] }
 0xd70   : > { %5738 = vperm.xlu0 %7970, %v10955_v41   ;;  %v8049_v41 = vpop.eup %8048  ;;  %8054 = vrsqrt.f32 %v5819_v31 }
 0xd71   : > { %v8051_v50 = vpop.eup %8050 }
 0xd73   : > { %5743 = vperm.xlu1 %7971, %v10957_v26   ;;  %v5802_v26 = vadd.f32 1e-05, %v5578_v33 }
 0xd74   : > { %5658 = vperm.xlu0 %7970, %v10961_v12  }
 0xd75   : > { %8056 = vrsqrt.f32 %v5802_v26 }
 0xd76   : > { %8058 = vrsqrt.f32 %v5803_v45 }
 0xd77   : > { %5663 = vperm.xlu1 %7971, %v10965_v52   ;;  %v6108_v52 = vld [vmem:[%s11363_s18] sm:$0xff] }
 0xd78   : > { %5994 = vperm.xlu0 %7970, %v8045_v18  }
 0xd79   : > { %v8053_v19 = vpop.eup %8052 }
 0xd7a   : > { %v8055_v12 = vpop.eup %8054 }
 0xd7b   : > { %5999 = vperm.xlu1 %7971, %v8047_v13  }
 0xd7c   : > { %5914 = vperm.xlu0 %7970, %v8049_v41   ;;  %v5343_v41 = vunpack.c.h.bf16 %v5325_v56 }
 0xd7f   : > { %5919 = vperm.xlu1 %7971, %v8051_v50   ;;  %v8057_v51 = vpop.eup %8056 }
 0xd80   : > { %5748 = vperm.xlu0 %7970, %v5434_v6   ;;  %v8059_v22 = vpop.eup %8058  ;;  %v5357_v6 = vunpack.c.h.bf16 %v5332_v54 }
 0xd83   : > { %5753 = vperm.xlu1 %7971, %v5435_v1  }
 0xd84   : > { %5668 = vperm.xlu0 %7970, %v5418_v55  }
 0xd87   : > { %5673 = vperm.xlu1 %7971, %v5419_v8  }
 0xd88   : > { %6004 = vperm.xlu0 %7970, %v8053_v19  }
 0xd8b   : > { %6009 = vperm.xlu1 %7971, %v8055_v12  }
 0xd8c   : > { %v5679_v42 = vpop.permute.xlu0 %5678  ;;  %5924 = vperm.xlu0 %7970, %v8057_v51   ;;  %v6122_v51 = vld [vmem:[%s11364_s7 + $0x70] sm:$0xff] }
 0xd8d   : > { %v5772_v17 = vsub.f32 %v5356_v59, %v5679_v42  ;;  %v6123_v42 = vld [vmem:[%s11364_s7 + $0x78] sm:$0xff]  ;;  %v5361_v59 = vunpack.c.h.bf16 %v5334_v62 }
 0xd8e   : > { %v5599_v53 = vpop.permute.xlu1 %5598 }
 0xd8f   : > { %5929 = vperm.xlu1 %7971, %v8059_v22   ;;  %v5756_v55 = vsub.f32 %v5340_v9, %v5599_v53 }
 0xd90   : > { %v5684_v47 = vpop.permute.xlu0 %5683  ;;  %6126 = vperm.xlu0 %7970, %v6108_v52  }
 0xd91   : > { %v5773_v46 = vsub.f32 %v5357_v6, %v5684_v47 }
 0xd92   : > { %v5604_v30 = vpop.permute.xlu1 %5603 }
 0xd93   : > { %6131 = vperm.xlu1 %7971, %v6109_v15   ;;  %v5757_v40 = vsub.f32 %v5341_v48, %v5604_v30 }
 0xd94   : > { %6136 = vperm.xlu0 %7970, %v6110_v25   ;;  %v5689_v38 = vpop.permute.xlu0 %5688 }
 0xd95   : > { %v5774_v37 = vsub.f32 %v5358_v29, %v5689_v38 }
 0xd96   : > { %v5694_v2 = vpop.permute.xlu1 %5693 }
 0xd97   : > { %6141 = vperm.xlu1 %7971, %v6111_v11   ;;  %v5775_v33 = vsub.f32 %v5359_v28, %v5694_v2  ;;  %v5360_v2 = vunpack.c.l.bf16 %v5334_v62 }
 0xd98   : > { %6146 = vperm.xlu0 %7970, %v6112_v39   ;;  %v5609_v32 = vpop.permute.xlu0 %5608 }
 0xd99   : > { %v5758_v26 = vsub.f32 %v5342_v3, %v5609_v32 }
 0xd9a   : > { %v5614_v20 = vpop.permute.xlu1 %5613 }
 0xd9b   : > { %6151 = vperm.xlu1 %7971, %v6113_v24   ;;  %v5759_v53 = vsub.f32 %v5343_v41, %v5614_v20  ;;  %v5326_v24 = vld [vmem:[%s11001_s27 + $0x20] sm:$0xff] }
 0xd9c   : > { %6156 = vperm.xlu0 %7970, %v6114_v10  }
 0xd9f   : > { %6161 = vperm.xlu1 %7971, %v6115_v21   ;;  %v5935_v1 = vpop.permute.xlu0 %5934  ;;  %v5344_v21 = vunpack.c.l.bf16 %v5326_v24 }
 0xda0   : > { %v6028_v14 = vmul.f32 %v5935_v1, %v5772_v17  ;;  %6166 = vperm.xlu0 %7970, %v6116_v43   ;;  %v5345_v43 = vunpack.c.h.bf16 %v5326_v24 }
 0xda2   : > { %v5940_v63 = vpop.permute.xlu1 %5939  ;;  %v6060_v36 = vmax.f32 %v6028_v14, 0.0 }
 0xda3   : > { %v6029_v23 = vmul.f32 %v5940_v63, %v5773_v46  ;;  %6171 = vperm.xlu1 %7971, %v6117_v49   ;;  %v5855_v8 = vpop.permute.xlu0 %5854 }
 0xda4   : > { %v6012_v44 = vmul.f32 %v5855_v8, %v5756_v55  ;;  %6176 = vperm.xlu0 %7970, %v6118_v0  }
 0xda5   : > { %v6061_v16 = vmax.f32 %v6029_v23, 0.0 }
 0xda6   : > { %v5860_v4 = vpop.permute.xlu1 %5859  ;;  %v6044_v18 = vmax.f32 %v6012_v44, 0.0 }
 0xda7   : > { %v6013_v34 = vmul.f32 %v5860_v4, %v5757_v40  ;;  %6181 = vperm.xlu1 %7971, %v6119_v5   ;;  %v6084_v27 = vpack.c.bf16 %v6061_v16, %v6060_v36  ;;  %v5945_v13 = vpop.permute.xlu0 %5944  ;;  %v5335_v36 = vld [vmem:[%s11001_s27 + $0xb0] sm:$0xff] }
 0xda8   : > { %v6030_v7 = vmul.f32 %v5945_v13, %v5774_v37  ;;  %6186 = vperm.xlu0 %7970, %v6120_v35   ;;  %v5362_v28 = vunpack.c.l.bf16 %v5335_v36  ;;  %v5327_v16 = vld [vmem:[%s11001_s27 + $0x30] sm:$0xff]  ;;  %v5363_v3 = vunpack.c.h.bf16 %v5335_v36 }
 0xda9   : > { %v6045_v31 = vmax.f32 %v6013_v34, 0.0  ;;  %7029 = vmatprep.subr.bf16.mxu0 %v6084_v27  ;;  %7429 = vmatprep.subr.bf16.mxu1 %v6084_v27  ;;  %v5346_v34 = vunpack.c.l.bf16 %v5327_v16  ;;  %v5347_v35 = vunpack.c.h.bf16 %v5327_v16 }
 0xdaa   : > { %v5950_v50 = vpop.permute.xlu1 %5949  ;;  %v6062_v19 = vmax.f32 %v6030_v7, 0.0 }
 0xdab   : > { %v6031_v45 = vmul.f32 %v5950_v50, %v5775_v33  ;;  %6191 = vperm.xlu1 %7971, %v6121_v61   ;;  %v6076_v12 = vpack.c.bf16 %v6045_v31, %v6044_v18  ;;  %v5865_v22 = vpop.permute.xlu0 %5864 }
 0xdac   : > { %v6014_v15 = vmul.f32 %v5865_v22, %v5758_v26  ;;  %6196 = vperm.xlu0 %7970, %v6122_v51  }
 0xdad   : > { %v6063_v52 = vmax.f32 %v6031_v45, 0.0  ;;  %7030 = vmatpush3.bf16.msra.mxu0 %v6076_v12  ;;  %7437 = vmatpush3.bf16.msra.mxu1 %v6076_v12 }
 0xdae   : > { %v5870_v47 = vpop.permute.xlu1 %5869  ;;  %v6046_v11 = vmax.f32 %v6014_v15, 0.0 }
 0xdaf   : > { %v6085_v30 = vpack.c.bf16 %v6063_v52, %v6062_v19  ;;  %v6015_v25 = vmul.f32 %v5870_v47, %v5759_v53  ;;  %6201 = vperm.xlu1 %7971, %v6123_v42   ;;  %v5699_v60 = vpop.permute.xlu0 %5698  ;;  %v5336_v42 = vld [vmem:[%s11001_s27 + $0xc0] sm:$0xff] }
 0xdb0   : > { %v5776_v32 = vsub.f32 %v5360_v2, %v5699_v60  ;;  %v5365_v62 = vunpack.c.h.bf16 %v5336_v42 }
 0xdb1   : > { %v6047_v38 = vmax.f32 %v6015_v25, 0.0  ;;  %7031 = vmatprep.subr.bf16.mxu0 %v6085_v30  ;;  %7430 = vmatprep.subr.bf16.mxu1 %v6085_v30  ;;  %v5364_v30 = vunpack.c.l.bf16 %v5336_v42  ;;  %v5328_v25 = vld [vmem:[%s11001_s27 + $0x40] sm:$0xff] }
 0xdb2   : > { %v5704_v39 = vpop.permute.xlu1 %5703  ;;  %v5349_v24 = vunpack.c.h.bf16 %v5328_v25 }
 0xdb3   : > { %v6077_v54 = vpack.c.bf16 %v6047_v38, %v6046_v11  ;;  %v5619_v10 = vpop.permute.xlu0 %5618  ;;  %v5777_v20 = vsub.f32 %v5361_v59, %v5704_v39  ;;  %v5348_v39 = vunpack.c.l.bf16 %v5328_v25 }
 0xdb4   : > { %v5760_v58 = vsub.f32 %v5344_v21, %v5619_v10 }
 0xdb5   : > { %7032 = vmatpush3.bf16.msra.mxu0 %v6077_v54  ;;  %7438 = vmatpush3.bf16.msra.mxu1 %v6077_v54 }
 0xdb6   : > { %v5624_v57 = vpop.permute.xlu1 %5623 }
 0xdb7   : > { %v5955_v6 = vpop.permute.xlu0 %5954  ;;  %v5761_v48 = vsub.f32 %v5345_v43, %v5624_v57 }
 0xdb8   : > { %v6032_v17 = vmul.f32 %v5955_v6, %v5776_v32 }
 0xdba   : > { %v5960_v9 = vpop.permute.xlu1 %5959  ;;  %v6064_v49 = vmax.f32 %v6032_v17, 0.0 }
 0xdbb   : > { %v6033_v1 = vmul.f32 %v5960_v9, %v5777_v20  ;;  %v5875_v46 = vpop.permute.xlu0 %5874 }
 0xdbc   : > { %v6016_v63 = vmul.f32 %v5875_v46, %v5760_v58  ;;  %v5337_v46 = vld [vmem:[%s11001_s27 + $0xd0] sm:$0xff] }
 0xdbd   : > { %v6065_v14 = vmax.f32 %v6033_v1, 0.0  ;;  %v5367_v36 = vunpack.c.h.bf16 %v5337_v46 }
 0xdbe   : > { %v5880_v0 = vpop.permute.xlu1 %5879  ;;  %v6048_v56 = vmax.f32 %v6016_v63, 0.0 }
 0xdbf   : > { %v6086_v55 = vpack.c.bf16 %v6065_v14, %v6064_v49  ;;  %v6017_v29 = vmul.f32 %v5880_v0, %v5761_v48  ;;  %v5709_v23 = vpop.permute.xlu0 %5708 }
 0xdc0   : > { %v5778_v37 = vsub.f32 %v5362_v28, %v5709_v23 }
 0xdc1   : > { %v6049_v8 = vmax.f32 %v6017_v29, 0.0  ;;  %7033 = vmatprep.subr.bf16.mxu0 %v6086_v55  ;;  %7431 = vmatprep.subr.bf16.mxu1 %v6086_v55  ;;  %v5366_v55 = vunpack.c.l.bf16 %v5337_v46  ;;  %v5329_v29 = vld [vmem:[%s11001_s27 + $0x50] sm:$0xff] }
 0xdc2   : > { %v5714_v5 = vpop.permute.xlu1 %5713  ;;  %v5351_v16 = vunpack.c.h.bf16 %v5329_v29 }
 0xdc3   : > { %v6078_v40 = vpack.c.bf16 %v6049_v8, %v6048_v56  ;;  %v5629_v44 = vpop.permute.xlu0 %5628  ;;  %v5779_v27 = vsub.f32 %v5363_v3, %v5714_v5  ;;  %v5350_v5 = vunpack.c.l.bf16 %v5329_v29 }
 0xdc4   : > { %v5762_v33 = vsub.f32 %v5346_v34, %v5629_v44 }
 0xdc5   : > { %7034 = vmatpush3.bf16.msra.mxu0 %v6078_v40  ;;  %7439 = vmatpush3.bf16.msra.mxu1 %v6078_v40 }
 0xdc6   : > { %v5634_v4 = vpop.permute.xlu1 %5633 }
 0xdc7   : > { %v5965_v18 = vpop.permute.xlu0 %5964  ;;  %v5763_v50 = vsub.f32 %v5347_v35, %v5634_v4 }
 0xdc8   : > { %v6034_v13 = vmul.f32 %v5965_v18, %v5778_v37 }
 0xdca   : > { %v5970_v61 = vpop.permute.xlu1 %5969  ;;  %v6066_v31 = vmax.f32 %v6034_v13, 0.0 }
 0xdcb   : > { %v6035_v41 = vmul.f32 %v5970_v61, %v5779_v27  ;;  %v5885_v7 = vpop.permute.xlu0 %5884 }
 0xdcc   : > { %v6018_v45 = vmul.f32 %v5885_v7, %v5762_v33  ;;  %v5338_v7 = vld [vmem:[%s11001_s27 + $0xe0] sm:$0xff] }
 0xdcd   : > { %v6067_v26 = vmax.f32 %v6035_v41, 0.0  ;;  %v5369_v42 = vunpack.c.h.bf16 %v5338_v7 }
 0xdce   : > { %v5890_v19 = vpop.permute.xlu1 %5889  ;;  %v6050_v22 = vmax.f32 %v6018_v45, 0.0 }
 0xdcf   : > { %v6087_v12 = vpack.c.bf16 %v6067_v26, %v6066_v31  ;;  %v6019_v51 = vmul.f32 %v5890_v19, %v5763_v50  ;;  %v5719_v53 = vpop.permute.xlu0 %5718 }
 0xdd0   : > { %v5780_v38 = vsub.f32 %v5364_v30, %v5719_v53 }
 0xdd1   : > { %v6051_v52 = vmax.f32 %v6019_v51, 0.0  ;;  %7035 = vmatprep.subr.bf16.mxu0 %v6087_v12  ;;  %7432 = vmatprep.subr.bf16.mxu1 %v6087_v12  ;;  %v5368_v12 = vunpack.c.l.bf16 %v5338_v7  ;;  %v5330_v51 = vld [vmem:[%s11001_s27 + $0x60] sm:$0xff] }
 0xdd2   : > { %v5724_v15 = vpop.permute.xlu1 %5723  ;;  %v5353_v25 = vunpack.c.h.bf16 %v5330_v51  ;;  %v7984_v7 = vld [vmem:[%s11366_s17 + $0x24] ss:$8 sps:$4 sm:$0xff]  }
 0xdd3   : > { %v6079_v47 = vpack.c.bf16 %v6051_v52, %v6050_v22  ;;  %v5639_v11 = vpop.permute.xlu0 %5638  ;;  %v5781_v2 = vsub.f32 %v5365_v62, %v5724_v15  ;;  %v5352_v15 = vunpack.c.l.bf16 %v5330_v51  ;;  %v7994_v51 = vld [vmem:[%s11366_s17 + $0x30] ss:$8 sps:$4 sm:$0xff]  }
 0xdd4   : > { %v5764_v57 = vsub.f32 %v5348_v39, %v5639_v11 }
 0xdd5   : > { %7036 = vmatpush3.bf16.msra.mxu0 %v6079_v47  ;;  %7440 = vmatpush3.bf16.msra.mxu1 %v6079_v47 }
 0xdd6   : > { %v5644_v60 = vpop.permute.xlu1 %5643 }
 0xdd7   : > { %v5975_v54 = vpop.permute.xlu0 %5974  ;;  %v5765_v20 = vsub.f32 %v5349_v24, %v5644_v60 }
 0xdd8   : > { %v6036_v10 = vmul.f32 %v5975_v54, %v5780_v38 }
 0xdda   : > { %v5980_v59 = vpop.permute.xlu1 %5979  ;;  %v6068_v21 = vmax.f32 %v6036_v10, 0.0 }
 0xddb   : > { %v6037_v32 = vmul.f32 %v5980_v59, %v5781_v2  ;;  %v5895_v6 = vpop.permute.xlu0 %5894 }
 0xddc   : > { %v6020_v17 = vmul.f32 %v5895_v6, %v5764_v57  ;;  %v5339_v6 = vld [vmem:[%s11001_s27 + $0xf0] sm:$0xff] }
 0xddd   : > { %v6069_v43 = vmax.f32 %v6037_v32, 0.0  ;;  %v5371_v46 = vunpack.c.h.bf16 %v5339_v6 }
 0xdde   : > { %v5900_v9 = vpop.permute.xlu1 %5899  ;;  %v6052_v49 = vmax.f32 %v6020_v17, 0.0 }
 0xddf   : > { %v6088_v58 = vpack.c.bf16 %v6069_v43, %v6068_v21  ;;  %v6021_v1 = vmul.f32 %v5900_v9, %v5765_v20  ;;  %v5729_v48 = vpop.permute.xlu0 %5728 }
 0xde0   : > { %v5782_v8 = vsub.f32 %v5366_v55, %v5729_v48 }
 0xde1   : > { %v6053_v14 = vmax.f32 %v6021_v1, 0.0  ;;  %7037 = vmatprep.subr.bf16.mxu0 %v6088_v58  ;;  %7433 = vmatprep.subr.bf16.mxu1 %v6088_v58  ;;  %v5370_v58 = vunpack.c.l.bf16 %v5339_v6  ;;  %v5331_v1 = vld [vmem:[%s11001_s27 + $0x70] sm:$0xff] }
 0xde2   : > { %v5734_v63 = vpop.permute.xlu1 %5733  ;;  %v5355_v29 = vunpack.c.h.bf16 %v5331_v1 }
 0xde3   : > { %v6080_v0 = vpack.c.bf16 %v6053_v14, %v6052_v49  ;;  %v5649_v56 = vpop.permute.xlu0 %5648  ;;  %v5783_v28 = vsub.f32 %v5367_v36, %v5734_v63  ;;  %v5354_v63 = vunpack.c.l.bf16 %v5331_v1 }
 0xde4   : > { %v5766_v4 = vsub.f32 %v5350_v5, %v5649_v56 }
 0xde5   : > { %7038 = vmatpush3.bf16.msra.mxu0 %v6080_v0  ;;  %7441 = vmatpush3.bf16.msra.mxu1 %v6080_v0 }
 0xde6   : > { %v5654_v23 = vpop.permute.xlu1 %5653 }
 0xde7   : > { %v5985_v40 = vpop.permute.xlu0 %5984  ;;  %v5767_v27 = vsub.f32 %v5351_v16, %v5654_v23 }
 0xde8   : > { %v6038_v44 = vmul.f32 %v5985_v40, %v5782_v8 }
 0xdea   : > { %v5990_v3 = vpop.permute.xlu1 %5989  ;;  %v6070_v34 = vmax.f32 %v6038_v44, 0.0 }
 0xdeb   : > { %v6039_v37 = vmul.f32 %v5990_v3, %v5783_v28  ;;  %v5905_v18 = vpop.permute.xlu0 %5904 }
 0xdec   : > { %v6022_v13 = vmul.f32 %v5905_v18, %v5766_v4 }
 0xded   : > { %v6071_v35 = vmax.f32 %v6039_v37, 0.0 }
 0xdee   : > { %v5910_v61 = vpop.permute.xlu1 %5909  ;;  %v6054_v31 = vmax.f32 %v6022_v13, 0.0  ;;  %v7975_v13 = vld [vmem:[%s11366_s17 + $0x40] ss:$8 sps:$4 sm:$0xff]  }
 0xdef   : > { %v6089_v33 = vpack.c.bf16 %v6071_v35, %v6070_v34  ;;  %v6023_v41 = vmul.f32 %v5910_v61, %v5767_v27  ;;  %v5739_v50 = vpop.permute.xlu0 %5738  ;;  %v7972_v35 = vld [vmem:[%s11366_s17] ss:$8 sps:$4 sm:$0xff]   ;;  %v7978_v61 = vld [vmem:[%s11366_s17 + $0x14] ss:$8 sps:$4 sm:$0xff]  }
 0xdf0   : > { %v5784_v52 = vsub.f32 %v5368_v12, %v5739_v50  ;;  %v7986_v50 = vld [vmem:[%s11366_s17 + $0x64] ss:$8 sps:$4 sm:$0xff]   ;;  %v7992_v12 = vld [vmem:[%s11366_s17 + $0x74] ss:$8 sps:$4 sm:$0xff]  }
 0xdf1   : > { %v6055_v26 = vmax.f32 %v6023_v41, 0.0  ;;  %7039 = vmatprep.subr.bf16.mxu0 %v6089_v33  ;;  %7434 = vmatprep.subr.bf16.mxu1 %v6089_v33  ;;  %v7980_v33 = vld [vmem:[%s11366_s17 + $0x54] ss:$8 sps:$4 sm:$0xff]   ;;  %v7982_v41 = vld [vmem:[%s11366_s17 + $0x10] ss:$8 sps:$4 sm:$0xff]  }
 0xdf2   : > { %v5744_v45 = vpop.permute.xlu1 %5743 }
 0xdf3   : > { %v6081_v19 = vpack.c.bf16 %v6055_v26, %v6054_v31  ;;  %v5659_v22 = vpop.permute.xlu0 %5658  ;;  %v5785_v30 = vsub.f32 %v5369_v42, %v5744_v45  ;;  %v7983_v31 = vld [vmem:[%s11366_s17 + $0x50] ss:$8 sps:$4 sm:$0xff]   ;;  %v7988_v26 = vld [vmem:[%s11366_s17 + $0x20] ss:$8 sps:$4 sm:$0xff]  }
 0xdf4   : > { %v5768_v60 = vsub.f32 %v5352_v15, %v5659_v22  ;;  %v7989_v45 = vld [vmem:[%s11366_s17 + $0x60] ss:$8 sps:$4 sm:$0xff]   ;;  %v7995_v22 = vld [vmem:[%s11366_s17 + $0x70] ss:$8 sps:$4 sm:$0xff]  }
 0xdf5   : > { %7040 = vmatpush3.bf16.msra.mxu0 %v6081_v19  ;;  %7442 = vmatpush3.bf16.msra.mxu1 %v6081_v19  ;;  %v7990_v19 = vld [vmem:[%s11366_s17 + $0x34] ss:$8 sps:$4 sm:$0xff]  }
 0xdf6   : > { %v5664_v53 = vpop.permute.xlu1 %5663 }
 0xdf7   : > { %v5995_v47 = vpop.permute.xlu0 %5994  ;;  %v5769_v2 = vsub.f32 %v5353_v25, %v5664_v53 }
 0xdf8   : > { %v6040_v11 = vmul.f32 %v5995_v47, %v5784_v52 }
 0xdfa   : > { %v6000_v62 = vpop.permute.xlu1 %5999  ;;  %v6072_v39 = vmax.f32 %v6040_v11, 0.0 }
 0xdfb   : > { %v6041_v38 = vmul.f32 %v6000_v62, %v5785_v30  ;;  %v5915_v54 = vpop.permute.xlu0 %5914 }
 0xdfc   : > { %v6024_v10 = vmul.f32 %v5915_v54, %v5768_v60 }
 0xdfd   : > { %v6073_v24 = vmax.f32 %v6041_v38, 0.0 }
 0xdfe   : > { %v5920_v59 = vpop.permute.xlu1 %5919  ;;  %v6056_v21 = vmax.f32 %v6024_v10, 0.0 }
 0xdff   : > { %v6090_v57 = vpack.c.bf16 %v6073_v24, %v6072_v39  ;;  %v6025_v32 = vmul.f32 %v5920_v59, %v5769_v2  ;;  %v5749_v20 = vpop.permute.xlu0 %5748 }
 0xe00   : > { %v5786_v14 = vsub.f32 %v5370_v58, %v5749_v20 }
 0xe01   : > { %v6057_v43 = vmax.f32 %v6025_v32, 0.0  ;;  %7041 = vmatprep.subr.bf16.mxu0 %v6090_v57  ;;  %7435 = vmatprep.subr.bf16.mxu1 %v6090_v57 }
 0xe02   : > { %v5754_v17 = vpop.permute.xlu1 %5753 }
 0xe03   : > { %v6082_v9 = vpack.c.bf16 %v6057_v43, %v6056_v21  ;;  %v5669_v49 = vpop.permute.xlu0 %5668  ;;  %v5787_v55 = vsub.f32 %v5371_v46, %v5754_v17 }
 0xe04   : > { %v5770_v23 = vsub.f32 %v5354_v63, %v5669_v49 }
 0xe05   : > { %7042 = vmatpush3.bf16.msra.mxu0 %v6082_v9  ;;  %7443 = vmatpush3.bf16.msra.mxu1 %v6082_v9 }
 0xe06   : > { %v5674_v48 = vpop.permute.xlu1 %5673 }
 0xe07   : > { %v6005_v0 = vpop.permute.xlu0 %6004  ;;  %v5771_v28 = vsub.f32 %v5355_v29, %v5674_v48 }
 0xe08   : > { %v6042_v56 = vmul.f32 %v6005_v0, %v5786_v14 }
 0xe0a   : > { %v6010_v36 = vpop.permute.xlu1 %6009  ;;  %v6074_v5 = vmax.f32 %v6042_v56, 0.0 }
 0xe0b   : > { %v6043_v8 = vmul.f32 %v6010_v36, %v5787_v55  ;;  %v5925_v40 = vpop.permute.xlu0 %5924 }
 0xe0c   : > { %v6026_v44 = vmul.f32 %v5925_v40, %v5770_v23 }
 0xe0d   : > { %v6075_v16 = vmax.f32 %v6043_v8, 0.0 }
 0xe0e   : > { %v5930_v3 = vpop.permute.xlu1 %5929  ;;  %v6058_v34 = vmax.f32 %v6026_v44, 0.0 }
 0xe0f   : > { %v6091_v4 = vpack.c.bf16 %v6075_v16, %v6074_v5  ;;  %v6027_v37 = vmul.f32 %v5930_v3, %v5771_v28  ;;  %v6127_v42 = vpop.permute.xlu0 %6126 }
 0xe11   : > { %v6059_v18 = vmax.f32 %v6027_v37, 0.0  ;;  %7043 = vmatprep.subr.bf16.mxu0 %v6091_v4  ;;  %7436 = vmatprep.subr.bf16.mxu1 %v6091_v4 }
 0xe12   : > { %v6132_v53 = vpop.permute.xlu1 %6131 }
 0xe13   : > { %v6083_v27 = vpack.c.bf16 %v6059_v18, %v6058_v34  ;;  %v6137_v52 = vpop.permute.xlu0 %6136 }
 0xe15   : > { %7044 = vmatpush3.bf16.msra.mxu0 %v6083_v27  ;;  %7444 = vmatpush3.bf16.msra.mxu1 %v6083_v27 }
 0xe16   : > { %v6142_v15 = vpop.permute.xlu1 %6141 }
 0xe17   : > { %v6147_v47 = vpop.permute.xlu0 %6146 }
 0xe18   : > { %6317 = vmatmul.mubr.bf16.vlgmr.msra.gmra.mrb[0].mxu0 %v7972_v35  ;;  %6349 = vmatmul.mubr.bf16.vlgmr.msra.gmra.mrb[0].mxu1 %v7975_v13 }
 0xe19   : > { %6324 = vmatprep.mubr.bf16.mxu0 %v7978_v61  ;;  %6356 = vmatprep.mubr.bf16.mxu1 %v7980_v33 }
 0xe1a   : > { %v11094_v30 = vpop.permute.xlu1 %6151 }
 0xe1b   : > { %v11096_v25 = vpop.permute.xlu0 %6156 }
 0xe1e   : > { %v11098_v11 = vpop.permute.xlu1 %6161 }
 0xe1f   : > { %v6167_v62 = vpop.permute.xlu0 %6166 }
 0xe20   : > { %6325 = vmatmul.mubr.bf16.gmra.mrb[4].mxu0 %v7982_v41  ;;  %6357 = vmatmul.mubr.bf16.gmra.mrb[4].mxu1 %v7983_v31 }
 0xe21   : > { %6332 = vmatprep.mubr.bf16.mxu0 %v7984_v7  ;;  %6364 = vmatprep.mubr.bf16.mxu1 %v7986_v50 }
 0xe22   : > { %v6172_v17 = vpop.permute.xlu1 %6171 }
 0xe23   : > { %v6177_v1 = vpop.permute.xlu0 %6176 }
 0xe26   : > { %v6182_v28 = vpop.permute.xlu1 %6181 }
 0xe27   : > { %v6187_v3 = vpop.permute.xlu0 %6186 }
 0xe28   : > { %6333 = vmatmul.mubr.bf16.gmra.mrb[8].mxu0 %v7988_v26  ;;  %6365 = vmatmul.mubr.bf16.gmra.mrb[8].mxu1 %v7989_v45 }
 0xe29   : > { %6340 = vmatprep.mubr.bf16.mxu0 %v7990_v19  ;;  %6372 = vmatprep.mubr.bf16.mxu1 %v7992_v12 }
 0xe2a   : > { %v6192_v45 = vpop.permute.xlu1 %6191 }
 0xe30   : > { %6341 = vmatmul.mubr.bf16.gmra.mrb[12].mxu0 %v7994_v51  ;;  %6373 = vmatmul.mubr.bf16.gmra.mrb[12].mxu1 %v7995_v22  ;;  %v6197_v51 = vpop.permute.xlu0 %6196 }
 0xeeb   : > { %v7045_v60 = vpop.f32.mrb[0].mxu0  ;;  %v7069_v38 = vpop.f32.mrb[0].mxu1 }
 0xeec   : > { %v7046_v39 = vpop.f32.mrb[1].mxu0  ;;  %v7070_v54 = vpop.f32.mrb[1].mxu1 }
 0xeed   : > { %v7047_v2 = vadd.f32 %v7046_v39, %v7045_v60  ;;  %v7071_v24 = vadd.f32 %v7070_v54, %v7069_v38  ;;  %v7048_v10 = vpop.f32.mrb[2].mxu0  ;;  %v7072_v59 = vpop.f32.mrb[2].mxu1 }
 0xeee   : > { %v7049_v57 = vpop.f32.mrb[3].mxu0  ;;  %v7073_v32 = vpop.f32.mrb[3].mxu1 }
 0xeef   : > { %v6319_v21 = vadd.f32 %v7047_v2, %v6127_v42  ;;  %v6351_v6 = vadd.f32 %v7071_v24, %v6167_v62  ;;  %v7050_v20 = vadd.f32 %v7049_v57, %v7048_v10  ;;  %v7074_v43 = vadd.f32 %v7073_v32, %v7072_v59  ;;  %v6202_v10 = vpop.permute.xlu1 %6201 }
 0xef1   : > { %6381 = vst [vmem:[%s8689_s5] sm:$0xff] %v6319_v21  ;;  %6389 = vst [vmem:[%s8689_s5 + $0x40] sm:$0xff] %v6351_v6  ;;  %v6322_v9 = vadd.f32 %v7050_v20, %v6132_v53  ;;  %v6354_v58 = vadd.f32 %v7074_v43, %v6172_v17 }
 0xef3   : > { %6382 = vst [vmem:[%s8689_s5 + $0x8] sm:$0xff] %v6322_v9  ;;  %6390 = vst [vmem:[%s8689_s5 + $0x48] sm:$0xff] %v6354_v58  ;;  %v7051_v49 = vpop.f32.mrb[4].mxu0  ;;  %v7075_v46 = vpop.f32.mrb[4].mxu1 }
 0xef4   : > { %v7052_v48 = vpop.f32.mrb[5].mxu0  ;;  %v7076_v14 = vpop.f32.mrb[5].mxu1 }
 0xef5   : > { %v7053_v63 = vadd.f32 %v7052_v48, %v7051_v49  ;;  %v7077_v0 = vadd.f32 %v7076_v14, %v7075_v46  ;;  %v7054_v55 = vpop.f32.mrb[6].mxu0  ;;  %v7078_v29 = vpop.f32.mrb[6].mxu1 }
 0xef6   : > { %v7055_v56 = vpop.f32.mrb[7].mxu0  ;;  %v7079_v36 = vpop.f32.mrb[7].mxu1 }
 0xef7   : > { %v6327_v23 = vadd.f32 %v7053_v63, %v6137_v52  ;;  %v6359_v8 = vadd.f32 %v7077_v0, %v6177_v1  ;;  %v7056_v5 = vadd.f32 %v7055_v56, %v7054_v55  ;;  %v7080_v40 = vadd.f32 %v7079_v36, %v7078_v29 }
 0xef9   : > { %6383 = vst [vmem:[%s8689_s5 + $0x10] sm:$0xff] %v6327_v23  ;;  %6391 = vst [vmem:[%s8689_s5 + $0x50] sm:$0xff] %v6359_v8  ;;  %v6330_v16 = vadd.f32 %v7056_v5, %v6142_v15  ;;  %v6362_v44 = vadd.f32 %v7080_v40, %v6182_v28 }
 0xefb   : > { %6384 = vst [vmem:[%s8689_s5 + $0x18] sm:$0xff] %v6330_v16  ;;  %6392 = vst [vmem:[%s8689_s5 + $0x58] sm:$0xff] %v6362_v44  ;;  %v7057_v4 = vpop.f32.mrb[8].mxu0  ;;  %v7081_v37 = vpop.f32.mrb[8].mxu1 }
 0xefc   : > { %v7058_v34 = vpop.f32.mrb[9].mxu0  ;;  %v7082_v18 = vpop.f32.mrb[9].mxu1 }
 0xefd   : > { %v7059_v27 = vadd.f32 %v7058_v34, %v7057_v4  ;;  %v7083_v35 = vadd.f32 %v7082_v18, %v7081_v37  ;;  %v7060_v13 = vpop.f32.mrb[10].mxu0  ;;  %v7084_v61 = vpop.f32.mrb[10].mxu1 }
 0xefe   : > { %v7061_v33 = vpop.f32.mrb[11].mxu0  ;;  %v7085_v41 = vpop.f32.mrb[11].mxu1 }
 0xeff   : > { %v6335_v31 = vadd.f32 %v7059_v27, %v6147_v47  ;;  %v6367_v7 = vadd.f32 %v7083_v35, %v6187_v3  ;;  %v7062_v50 = vadd.f32 %v7061_v33, %v7060_v13  ;;  %v7086_v26 = vadd.f32 %v7085_v41, %v7084_v61 }
 0xf01   : > { %6385 = vst [vmem:[%s8689_s5 + $0x20] sm:$0xff] %v6335_v31  ;;  %6393 = vst [vmem:[%s8689_s5 + $0x60] sm:$0xff] %v6367_v7  ;;  %v6338_v19 = vadd.f32 %v7062_v50, %v11094_v30  ;;  %v6370_v12 = vadd.f32 %v7086_v26, %v6192_v45 }
 0xf03   : > { %6386 = vst [vmem:[%s8689_s5 + $0x28] sm:$0xff] %v6338_v19  ;;  %6394 = vst [vmem:[%s8689_s5 + $0x68] sm:$0xff] %v6370_v12  ;;  %v7063_v22 = vpop.f32.mrb[12].mxu0  ;;  %v7087_v42 = vpop.f32.mrb[12].mxu1 }
 0xf04   : > { %v7064_v53 = vpop.f32.mrb[13].mxu0  ;;  %v7088_v52 = vpop.f32.mrb[13].mxu1 }
 0xf05   : > { %v7065_v15 = vadd.f32 %v7064_v53, %v7063_v22  ;;  %v7089_v47 = vadd.f32 %v7088_v52, %v7087_v42  ;;  %v7066_v62 = vpop.f32.mrb[14].mxu0  ;;  %v7090_v60 = vpop.f32.mrb[14].mxu1 }
 0xf06   : > { %v7067_v38 = vpop.f32.mrb[15].mxu0  ;;  %v7091_v39 = vpop.f32.mrb[15].mxu1 }
 0xf07   : > { %v6343_v30 = vadd.f32 %v7065_v15, %v11096_v25  ;;  %v6375_v54 = vadd.f32 %v7089_v47, %v6197_v51  ;;  %v7068_v2 = vadd.f32 %v7067_v38, %v7066_v62  ;;  %v7092_v24 = vadd.f32 %v7091_v39, %v7090_v60 }
 0xf09   : > { %6387 = vst [vmem:[%s8689_s5 + $0x30] sm:$0xff] %v6343_v30  ;;  %6395 = vst [vmem:[%s8689_s5 + $0x70] sm:$0xff] %v6375_v54  ;;  %v6346_v59 = vadd.f32 %v7068_v2, %v11098_v11  ;;  %v6378_v57 = vadd.f32 %v7092_v24, %v6202_v10 }
 0xf0b   : > { %6388 = vst [vmem:[%s8689_s5 + $0x38] sm:$0xff] %v6346_v59  ;;  %6396 = vst [vmem:[%s8689_s5 + $0x78] sm:$0xff] %v6378_v57 }
 0xf0c PF: > { %s11367_s20 = sld [smem:[#allocation27_spill]]  ;;  %s11368_s25 = sld [smem:[#allocation26_spill]] }
 0xf0d   : > { %s11369_s16 = sld [smem:[#allocation28_spill]]  ;;  %s11370_s26 = sld [smem:[#allocation24_spill]] }
 0xf0e   : > { %s11371_s30 = sld [smem:[#allocation34_spill]]  ;;  %s6413_s1 = sshll.u32 %s8689_s5, 4  ;;  %s11123_s1 = int_to_ptr.vmem [resolvable:$true] %s6413_s1 }
 0xf0f   : > { %s11372_s19 = sld [smem:[#allocation75_spill]]  ;;  %s8172_s6 = scalar_lea.vmem %s11123_s1, 2048 }
 0xf10   : > { %p8173_p12 = scmp.ne.s32.totalorder %s11123_s1, %s8172_s6  ;;  %s8322_s5 = smov [#allocation18]  }
 0xf12   : > { %s6405_s21 = smul.u32 %s11368_s25, %s11367_s20  ;;  %s8176_s20 = sshll.u32 %s8322_s5, 4  ;;  %s8177_s20 = int_to_ptr.vmem [resolvable:$false] %s8176_s20 }
 0xf13   : > { %s6760_s14 = sshll.u32 %s11369_s16, 5  ;;  %s11374_s3 = sand.u32 1, %s11370_s26  }
 0xf14   : > { %s6410_s24 = sadd.s32 %s6760_s14, %s6405_s21  ;;  %s11132_s4 = scalar_lea.sflag [#allocation12], %s11374_s3 }
 0xf15   : > { %s6761_s23 = sshll.u32 %s6410_s24, 7  ;;  %s11373_s0 = smov %s11372_s19 }
 0xf16   : > { %s11128_s2 = scalar_lea.hbm %s11372_s19, %s6761_s23  ;;  %p11375_p13 = scmp.ne.s32.totalorder %s11371_s30, 0 }
 0xf17   : > { %s8178_s25 = scalar_lea.vmem %s8177_s20, 4096  ;;  %p8179_p4 = scmp.lt.s32.totalorder %s11123_s1, %s8177_s20 }
 0xf18   : > { %p8174_p0 = pnand %p8173_p12, %p11375_p13  ;;  %p8180_p8 = scmp.lt.s32.totalorder %s8178_s25, %s8172_s6 }
 0xf1a   : > { %p8175_p5 = pneg %p8174_p0  ;;  %p8181_p6 = por %p8180_p8, %p8179_p4 }
 0xf1c   : > { %p8182_p10 = pnand %p8181_p6, %p8175_p5 }
 0xf1e   : > { %8185 = shalt.err (!%p8182_p10)
}
 0xf1f   : > { %s8186_s3 = scalar_lea.hbm %s11128_s2, 2048  ;;  %s8190_s21 = scalar_lea.hbm %s11373_s0, 8192 }
 0xf20   : > { %p8187_p1 = scmp.ne.s32.totalorder %s11128_s2, %s8186_s3  ;;  %p8191_p7 = scmp.lt.u32.totalorder %s11128_s2, %s11373_s0 }
 0xf21   : > { %p8192_p9 = scmp.lt.u32.totalorder %s8190_s21, %s8186_s3  ;;  %p8194_p12 = scmp.lt.u32.totalorder %s8186_s3, %s11128_s2 }
 0xf22   : > { %p8188_p2 = pnand %p8187_p1, %p11375_p13 }
 0xf23   : > { %p8193_p11 = por %p8192_p9, %p8191_p7 }
 0xf24   : > { %p8189_p3 = pneg %p8188_p2 }
 0xf25   : > { %p8195_p0 = por %p8194_p12, %p8193_p11 }
 0xf27   : > { %p8196_p5 = pnand %p8195_p0, %p8189_p3 }
 0xf29   : > { %8199 = shalt.err (!%p8196_p5)
}
 0xf2a   : > { %s8323_s6 = smov 128   ;;  %s8324_s23 = smov 256  }
 0xf2b   : > { %s8325_s18 = smov 8  }
 0xf2c   : > { %7461 = dma.vmem_to_hbm [thread:$0]  (%p11375_p13), %s11123_s1, 2048, %s11128_s2, %s11132_s4, %s8323_s6, %s8324_s23, %s8325_s18  }
 0xf2d PF: > { %s11376_s27 = sld [smem:[#allocation23_spill]]  ;;  %s11377_s19 = sld [smem:[#allocation37_spill]] }
 0xf2e   : > { %p7488_p4 = scmp.ge.s32.totalorder %s8310_s29, 2 }
 0xf33   : > { %s6428_s5 = sand.u32 1, %s11376_s27   ;;  %p11378_p8 = scmp.ne.s32.totalorder %s11377_s19, 0 }
 0xf34   : > { %s6429_s20 = scalar_lea.sflag [#allocation12], %s6428_s5 }
 0xf35   : > { %p7477_p6 = pnand %p7488_p4, %p11378_p8 }
 0xf37   : > { %8261 = dma.done.wait (!%p7477_p6), %s6429_s20, 2048  }
 0xf38   : > { %8263 = vsyncadd (!%p7477_p6), %s6429_s20, 4294965248  ;;  %s31_s29 = sadd.s32 1, %s8310_s29   ;;  %s11379_s18 = sld [smem:[#allocation24_spill]] }
 0xf39   : > { %p28_p10 = scmp.ge.s32.totalorder %s31_s29, 10   ;;  %s11380_s19 = sld [smem:[#allocation25_spill]] }
 0xf3a   : > { %s11381_s20 = sld [smem:[#allocation36_spill]]  ;;  %s11382_s30 = sld [smem:[#allocation35_spill]] }
 0xf3b   : > { %s11383_s23 = sld [smem:[#allocation29_spill]]  ;;  %s11384_s24 = sld [smem:[#allocation30_spill]] }
 0xf3c   : > { %s11385_s26 = sld [smem:[#allocation31_spill]]  ;;  %s11386_s27 = sld [smem:[#allocation32_spill]] }
 0xf3d   : > { %s11387_s2 = sld [smem:[#allocation33_spill]]  ;;  %s11388_s21 = smov %s8282_s22 }
 0xf3e   : > { %s11390_s25 = smov %s8306_s28  ;;  %30 = sbr.rel (!%p28_p10) target bundleno = 26 (0x1a), region = 209 }
 0xf40   : > { %s11389_s22 = smov %s11382_s30 }
 0xf43   : > { %s11391_s28 = smov %s11387_s2 }
 0xf45   :  { %6434 = vsyncpa [#allocation11], 1 }
 0xf46   :  { %6436 = vsyncpa [#allocation11 + $0x1], 1 }
 0xf47   :  { %6437 = vsyncpa [#allocation14], 1 }
 0xf48   :  { %6438 = vsyncpa [#allocation17], 1 }
 0xf49   :  { %6439 = vsyncpa [#allocation12], 1 }
 0xf4a   :  { %6441 = vsyncpa [#allocation12 + $0x1], 1 }

</bundles_post_ra>
